<compile_context>
chip_gen: v6e
topology: v6e:2x2x1
jax: 0.10.0
libtpu: 0.0.40
codegen_flags: <defaults>
</compile_context>

<pallas_src>
import functools

import jax
import jax.numpy as jnp
from jax import lax
from jax.experimental import pallas as pl
from jax.experimental.pallas import tpu as pltpu

NEG_SLOPE = 0.01  # nn.LeakyReLU() default


def relu(x):
    return jnp.maximum(x, 0.0)


def leaky_relu(x):
    return jnp.where(x >= 0, x, NEG_SLOPE * x)


def softplus(x):
    # torch.nn.Softplus(beta=1, threshold=20)
    return jnp.where(x > 20.0, x, jnp.log1p(jnp.exp(jnp.minimum(x, 20.0))))


# ---------------------------------------------------------------------------
# Shared math (pure jnp) used inside the Pallas kernel (on VMEM values) and by
# the plain-JAX reference -- identical numerics in both paths (the only kernel-
# only difference is the approximate reciprocal in the softmax denominator).
# ---------------------------------------------------------------------------
def _init_marking(g0, B, Lp1, K):
    """initial_marking split into (front, time) halves; row 0 front = relu(G[0])."""
    row0 = lax.broadcasted_iota(jnp.int32, (B, Lp1, 1), 1) == 0
    m_front0 = jnp.where(row0, g0[None, :, :], 0.0)            # (B, Lp1, K)
    m_time0 = jnp.zeros((B, Lp1, 4), jnp.float32)              # (B, Lp1, 4)
    return m_front0, m_time0


def _step_update(carry, act_i, time_i, step, stab, pcW1s, pcb1, pcW2, pcb2,
                 *, T, K, approx_recip):
    """One iteration of marking_update, vectorized over the batch.

    carry   : (m_front (B,Lp1,K) f32, m_time (B,Lp1,4) f32)
    act_i   : (B, 1) int32  (0 = padding, T+1 = unseen  ->  no-op)
    time_i  : (B, 4) f32
    stab    : (5T, 8K) bf16 gather table; column blocks (K lanes each, 2 vregs total):
              [relu(C) | relu(C)@pcW1[K:2K] | relu(G[1:]) | te_bias | Wt[:,4..7]]
              row block 0 = plain one-hot rows; row blocks 1..4 hold Wt[:,0..3] in the
              te_bias column block only (picked up by the time_i-scaled one-hots).
    pcW1s   : (2K, K) bf16 = [pcW1[:K]; pcW1[2K:]]    pcW2 : (K, K) bf16
    pcb1/pcb2 : (1, K) f32
    """
    m_front, m_time = carry
    B, Lp1, _ = m_front.shape
    bf = jnp.bfloat16

    valid = jnp.logical_and(act_i != 0, act_i != T + 1)        # (B, 1)
    t_idx = jnp.clip(act_i - 1, 0, T - 1)                      # PlaceConsumeLayer: seq - 1

    oh = (t_idx == lax.broadcasted_iota(jnp.int32, (B, T), 1)).astype(jnp.float32)
    # scaled one-hot LHS folds the 4 time_i broadcast MACs into the gather matmul
    lhs = jnp.concatenate(
        [oh, oh * time_i[:, 0:1], oh * time_i[:, 1:2],
         oh * time_i[:, 2:3], oh * time_i[:, 3:4]], axis=1)     # (B, 5T)
    gath = jnp.dot(lhs.astype(bf), stab,
                   preferred_element_type=jnp.float32)          # (B, 8K)

    c_emb = gath[:, 0 * K:1 * K]            # relu(C)[t_idx]                       (B, K)
    cproj = gath[:, 1 * K:2 * K]            # relu(C)[t_idx] @ pcW1[K:2K]          (B, K)
    g_emb = gath[:, 2 * K:3 * K]            # relu(G[act])  (only used when valid) (B, K)

    # TransitionTimeEmbedding: te_bias = bt[t] + sum_i time_i[i] * Wt[t, i]  (from gather);
    # the per-row marking-time half stays as 4 MACs on one 128-lane-aligned vreg group.
    te = gath[:, 3 * K:4 * K][:, None, :]
    for ii in range(4):
        te = te + m_time[:, :, ii:ii + 1] * gath[:, (4 + ii) * K:(5 + ii) * K][:, None, :]
    te = leaky_relu(te)                                         # (B, Lp1, K)

    # place_condition MLP: one (B*Lp1, 2K) x (2K, K) dot; the c_emb contribution is the
    # pre-folded cproj block (PyTorch concat order [m_front | c_emb | te]).
    x = jnp.concatenate([m_front, te], axis=2).reshape(B * Lp1, 2 * K)
    h = jnp.dot(x.astype(bf), pcW1s, preferred_element_type=jnp.float32).reshape(B, Lp1, K)
    h = leaky_relu(h + cproj[:, None, :] + pcb1)
    ew = (jnp.dot(h.reshape(B * Lp1, K).astype(bf), pcW2,
                  preferred_element_type=jnp.float32) + pcb2).reshape(B, Lp1, K)

    # mask all-zero place-embedding rows (exact PyTorch semantics), softmax over trace dim.
    mask_zero = jnp.logical_and(jnp.max(jnp.abs(m_front), axis=2) == 0.0,
                                jnp.max(jnp.abs(m_time), axis=2) == 0.0)   # (B, Lp1)
    ew = jnp.where(mask_zero[:, :, None], -1e9, ew)
    ew = ew - jnp.max(ew, axis=1, keepdims=True)
    e = jnp.exp(ew)
    denom = jnp.sum(e, axis=1, keepdims=True)
    if approx_recip:
        weights = e * pl.reciprocal(denom, approx=True)         # EUP slot (kernel only)
    else:
        weights = e / denom                                     # exact (reference path)

    consumed = weights * c_emb[:, None, :]                      # (B, Lp1, K)
    valid_b = valid[:, :, None]                                 # (B, 1, 1)
    new_front = jnp.where(valid_b, relu(m_front - consumed), m_front)

    # marking[valid, step+1] = cat(relu(G[act]), time_i)
    write = jnp.logical_and(
        valid_b, lax.broadcasted_iota(jnp.int32, (1, Lp1, 1), 1) == step + 1)
    new_front = jnp.where(write, g_emb[:, None, :], new_front)
    new_time = jnp.where(write, time_i[:, None, :], m_time)
    return new_front, new_time


def _judge(m_front, m_time, jWf, jWt, jb, sel, fireb, tb2v, *, T, K, beta):
    """TransitionJudgeLayer.forward: cond/time branches stacked over T, then a single
    block-diagonal selector matmul for fire_judge + time Linear2."""
    B, Lp1, _ = m_front.shape
    bf = jnp.bfloat16
    C2 = 2 * K * T

    mf_flat = m_front.reshape(B * Lp1, K)
    mt_flat = m_time.reshape(B * Lp1, 4)
    mask = jnp.logical_and(jnp.max(jnp.abs(m_front), axis=2) == 0.0,
                           jnp.max(jnp.abs(m_time), axis=2) == 0.0).reshape(B * Lp1, 1)

    # one lane-dense matmul covering condition_layers AND time_layers first Linear for all T
    h = leaky_relu(jnp.dot(mf_flat.astype(bf), jWf, preferred_element_type=jnp.float32)
                   + jnp.dot(mt_flat.astype(bf), jWt, preferred_element_type=jnp.float32)
                   + jb)                                        # (B*Lp1, 2*C2)

    # masked_fill applies to the condition half only (before the trace-sum)
    cond_cols = lax.broadcasted_iota(jnp.int32, (1, 2 * C2), 1) < C2
    h = jnp.where(jnp.logical_and(mask, cond_cols), 0.0, h)

    # fused block-diagonal selector: fire_judge over the cond half, time Linear2 over the
    # time half, one MXU pass -> (B*Lp1, 2T)
    out = jnp.dot(h.astype(bf), sel, preferred_element_type=jnp.float32)

    logits = jnp.sum(out[:, :T].reshape(B, Lp1, T), axis=1) + fireb        # (B, T)
    r = jnp.maximum(1.0 / (1.0 + jnp.exp(-logits)), 1e-5)      # sigmoid + clamp(min=1e-5)

    tmax = jnp.max(softplus(out[:, T:] + tb2v).reshape(B, Lp1, T), axis=1)  # (B, T)
    return r * tmax - beta * jnp.exp(r)


# ---------------------------------------------------------------------------
# Fused Pallas kernel (one batch tile per grid step)
# ---------------------------------------------------------------------------
def _fused_kernel(act_ref, time_ref, g0_ref, stab_ref, pcW1s_ref, pcb1_ref, pcW2_ref,
                  pcb2_ref, jWf_ref, jWt_ref, jb_ref, sel_ref, fireb_ref, tb2_ref,
                  scores_ref, *, T, K, beta):
    Bt = act_ref.shape[0]
    L = act_ref.shape[2]
    Lp1 = L + 1

    acts = act_ref[...]                    # (Bt, 1, L) int32
    times = time_ref[...]                  # (Bt, 4, L) f32
    stab = stab_ref[...]
    pcW1s, pcb1 = pcW1s_ref[...], pcb1_ref[...]
    pcW2, pcb2 = pcW2_ref[...], pcb2_ref[...]

    carry = _init_marking(g0_ref[...], Bt, Lp1, K)
    # static Python loop: L is tiny; static step indices make the per-step input slices and
    # the row-write mask compile-time constants.
    for i in range(L):
        carry = _step_update(carry, acts[:, 0, i:i + 1], times[:, :, i], i,
                             stab, pcW1s, pcb1, pcW2, pcb2,
                             T=T, K=K, approx_recip=True)

    m_front, m_time = carry
    scores = _judge(m_front, m_time, jWf_ref[...], jWt_ref[...], jb_ref[...],
                    sel_ref[...], fireb_ref[...], tb2_ref[...], T=T, K=K, beta=beta)
    scores_ref[...] = scores.reshape(Bt, 1, T)


# ---------------------------------------------------------------------------
# Wrapper: pre-stack weight tables (host/XLA side, once), call the fused kernel.
# ---------------------------------------------------------------------------
def _prepare(batch_data, params, *, T, K):
    bf = jnp.bfloat16
    acts = batch_data[:, 0:1, :].astype(jnp.int32)                 # (B, 1, L)
    times = batch_data[:, 1:, :].astype(jnp.float32)               # (B, 4, L)

    G, C, Wt, bt = params["G"], params["C"], params["Wt"], params["bt"]
    pcW1 = params["pcW1"]                                          # (3K, K)
    g0relu = relu(G[0])[None, :]                                   # (1, K) f32

    # gather table: 8 column blocks of K (= 2x128 lanes), 5 row blocks of T.
    Crelu = relu(C)                                                # (T, K)
    Grelu = relu(G[1:T + 1])                                       # (T, K)
    cproj = jnp.dot(Crelu, pcW1[K:2 * K])                          # (T, K)  pre-folded
    zero = jnp.zeros((T, K), jnp.float32)
    row0 = jnp.concatenate(
        [Crelu, cproj, Grelu, bt, Wt[:, 4], Wt[:, 5], Wt[:, 6], Wt[:, 7]], axis=1)
    rows_ti = [jnp.concatenate([zero, zero, zero, Wt[:, ii], zero, zero, zero, zero],
                               axis=1) for ii in range(4)]
    step_tab = jnp.concatenate([row0] + rows_ti, axis=0).astype(bf)   # (5T, 8K)

    pcW1s = jnp.concatenate([pcW1[:K], pcW1[2 * K:]], axis=0).astype(bf)  # (2K, K)
    pcW2 = params["pcW2"].astype(bf)                               # (K, K)
    pcb1, pcb2 = params["pcb1"], params["pcb2"]                    # (1, K) f32

    C2 = 2 * K * T
    condW_s = jnp.transpose(params["condW"], (1, 0, 2)).reshape(K + 4, C2)
    tW1_s = jnp.transpose(params["tW1"], (1, 0, 2)).reshape(K + 4, C2)
    jWf = jnp.concatenate([condW_s[:K], tW1_s[:K]], axis=1).astype(bf)   # (K, 2*C2)
    jWt = jnp.concatenate([condW_s[K:], tW1_s[K:]], axis=1).astype(bf)   # (4, 2*C2)
    jb = jnp.concatenate([params["condb"].reshape(1, C2),
                          params["tb1"].reshape(1, C2)], axis=1)         # (1, 2*C2) f32

    # single block-diagonal selector [fire_judge | time Linear2] -> (2*C2, 2T)
    eyeT = jnp.eye(T, dtype=jnp.float32)
    fire_vec = params["fireW"][:, 0]                               # (2K,)
    fsel = (eyeT[:, None, :] * fire_vec[None, :, None]).reshape(C2, T)
    t_vec = params["tW2"][:, :, 0]                                 # (T, 2K)
    tsel = (eyeT[:, None, :] * t_vec[:, :, None]).reshape(C2, T)
    zCT = jnp.zeros((C2, T), jnp.float32)
    sel = jnp.concatenate(
        [jnp.concatenate([fsel, zCT], axis=1),
         jnp.concatenate([zCT, tsel], axis=1)], axis=0).astype(bf)       # (2*C2, 2T)

    fireb = params["fireb"]                                        # (1, 1) f32
    tb2v = params["tb2"][:, 0][None, :]                            # (1, T) f32

    return (acts, times, g0relu, step_tab, pcW1s, pcb1, pcW2, pcb2,
            jWf, jWt, jb, sel, fireb, tb2v)


def forward(batch_data, params, *, T, K, beta, batch_tile=None):
    """TransitionPlaceEmbeddingModel.forward(batch_data) -> scores (B, T)."""
    B, _, L = batch_data.shape
    ins = _prepare(batch_data, params, T=T, K=K)

    Bt = B if batch_tile is None else batch_tile
    assert B % Bt == 0, "batch_tile must divide the batch"

    def batched(shape):
        return pl.BlockSpec(shape, lambda b: (b, 0, 0))

    def whole(arr):
        nd = arr.ndim
        return pl.BlockSpec(arr.shape, lambda b: (0,) * nd)

    in_specs = [batched((Bt, 1, L)), batched((Bt, 4, L))] + [whole(a) for a in ins[2:]]
    out_specs = pl.BlockSpec((Bt, 1, T), lambda b: (b, 0, 0))

    out = pl.pallas_call(
        functools.partial(_fused_kernel, T=T, K=K, beta=beta),
        grid=(B // Bt,),
        out_shape=jax.ShapeDtypeStruct((B, 1, T), jnp.float32),
        in_specs=in_specs,
        out_specs=out_specs,
        compiler_params=pltpu.CompilerParams(
            dimension_semantics=("parallel",)),   # shard batch tiles across TCs (v7x)
    )(*ins)
    return out[:, 0, :]


def reference_forward(batch_data, params, *, T, K, beta):
    """Pure-JAX (XLA) reference with identical math (exact reciprocal), for validation."""
    (acts, times, g0, stab, pcW1s, pcb1, pcW2, pcb2,
     jWf, jWt, jb, sel, fireb, tb2v) = _prepare(batch_data, params, T=T, K=K)
    B, _, L = acts.shape
    carry = _init_marking(g0, B, L + 1, K)
    for i in range(L):
        carry = _step_update(carry, acts[:, 0, i:i + 1], times[:, :, i], i,
                             stab, pcW1s, pcb1, pcW2, pcb2,
                             T=T, K=K, approx_recip=False)
    m_front, m_time = carry
    return _judge(m_front, m_time, jWf, jWt, jb, sel, fireb, tb2v, T=T, K=K, beta=beta)


# ---------------------------------------------------------------------------
# Deterministic synthetic parameters
# ---------------------------------------------------------------------------
def init_params(key, T, K):
    ks = jax.random.split(key, 16)

    def unif(k, shape, fan_in):
        b = float(1.0 / (fan_in ** 0.5))
        return jax.random.uniform(k, shape, jnp.float32, -b, b)

    return dict(
        # embeddings
        G=jax.random.normal(ks[0], (T + 1, K), jnp.float32),          # nn.Embedding(T+1, K)
        C=jax.random.normal(ks[1], (T, K), jnp.float32),              # nn.Embedding(T, K)
        # TransitionTimeEmbedding
        Wt=jax.random.normal(ks[2], (T, 8, K), jnp.float32),          # time_emb_weights
        bt=jnp.zeros((T, K), jnp.float32),                            # time_emb_bias
        # PlaceConsumeLayer.place_condition: Linear(3K,K) -> LeakyReLU -> Linear(K,K)
        pcW1=unif(ks[3], (3 * K, K), 3 * K), pcb1=unif(ks[4], (1, K), 3 * K),
        pcW2=unif(ks[5], (K, K), K),         pcb2=unif(ks[6], (1, K), K),
        # TransitionJudgeLayer
        condW=unif(ks[7], (T, K + 4, 2 * K), K + 4), condb=unif(ks[8], (T, 2 * K), K + 4),
        fireW=unif(ks[9], (2 * K, 1), 2 * K),        fireb=unif(ks[10], (1, 1), 2 * K),
        tW1=unif(ks[11], (T, K + 4, 2 * K), K + 4),  tb1=unif(ks[12], (T, 2 * K), K + 4),
        tW2=unif(ks[13], (T, 2 * K, 1), 2 * K),      tb2=unif(ks[14], (T, 1), 2 * K),
    )


if __name__ == "__main__":
    T = 6      # transition_num
    K = 32     # dimension
    L = 7      # max_trace_len  (L+1 = 8 keeps sublane collapses tile-aligned)
    B = 4
    beta = 0.1
    # TODO(synk): dropout probability is unused at inference (identity).

    key = jax.random.PRNGKey(0)
    k_act, k_time, k_param = jax.random.split(key, 3)

    activity = jax.random.randint(k_act, (B, L), 0, T + 2)            # ids in [0, T+1]
    time_feats = jax.random.normal(k_time, (B, 4, L), dtype=jnp.float32)
    batch_data = jnp.concatenate(
        [activity.astype(jnp.float32)[:, None, :], time_feats], axis=1)  # (B, 5, L)

    params = init_params(k_param, T, K)

    scores = forward(batch_data, params, T=T, K=K, beta=beta, batch_tile=2)
    scores = jax.block_until_ready(scores)

    ref = reference_forward(batch_data, params, T=T, K=K, beta=beta)
    assert scores.shape == (B, T)
    assert bool(jnp.all(jnp.isfinite(scores)))
    assert jnp.allclose(scores, ref, atol=2e-2, rtol=2e-2), (scores, ref)
    print("KERNEL_OK")
</pallas_src>

<mosaic_0001>
module attributes {stable_mosaic.version = 11 : i64} {
  func.func @_fused_kernel(%arg0: i32, %arg1: memref<2x1x7xi32, #tpu.memory_space<vmem>>, %arg2: memref<2x4x7xf32, #tpu.memory_space<vmem>>, %arg3: memref<1x32xf32, #tpu.memory_space<vmem>>, %arg4: memref<30x256xbf16, #tpu.memory_space<vmem>>, %arg5: memref<64x32xbf16, #tpu.memory_space<vmem>>, %arg6: memref<1x32xf32, #tpu.memory_space<vmem>>, %arg7: memref<32x32xbf16, #tpu.memory_space<vmem>>, %arg8: memref<1x32xf32, #tpu.memory_space<vmem>>, %arg9: memref<32x768xbf16, #tpu.memory_space<vmem>>, %arg10: memref<4x768xbf16, #tpu.memory_space<vmem>>, %arg11: memref<1x768xf32, #tpu.memory_space<vmem>>, %arg12: memref<768x12xbf16, #tpu.memory_space<vmem>>, %arg13: memref<1x1xf32, #tpu.memory_space<vmem>>, %arg14: memref<1x6xf32, #tpu.memory_space<vmem>>, %arg15: memref<2x1x6xf32, #tpu.memory_space<vmem>>) attributes {dimension_semantics = [#tpu.dimension_semantics<parallel>], iteration_bounds = array<i64: 2>, scalar_prefetch = 0 : i64, scratch_operands = 0 : i64, tpu.core_type = #tpu.core_type<tc>, window_params = [{transform_indices = @transform_0, window_bounds = array<i64: 2, 1, 7>}, {transform_indices = @transform_1, window_bounds = array<i64: 2, 4, 7>}, {pipeline_mode = #tpu.pipeline_mode<synchronous>, transform_indices = @transform_2, window_bounds = array<i64: 1, 32>}, {pipeline_mode = #tpu.pipeline_mode<synchronous>, transform_indices = @transform_3, window_bounds = array<i64: 30, 256>}, {pipeline_mode = #tpu.pipeline_mode<synchronous>, transform_indices = @transform_4, window_bounds = array<i64: 64, 32>}, {pipeline_mode = #tpu.pipeline_mode<synchronous>, transform_indices = @transform_5, window_bounds = array<i64: 1, 32>}, {pipeline_mode = #tpu.pipeline_mode<synchronous>, transform_indices = @transform_6, window_bounds = array<i64: 32, 32>}, {pipeline_mode = #tpu.pipeline_mode<synchronous>, transform_indices = @transform_7, window_bounds = array<i64: 1, 32>}, {pipeline_mode = #tpu.pipeline_mode<synchronous>, transform_indices = @transform_8, window_bounds = array<i64: 32, 768>}, {pipeline_mode = #tpu.pipeline_mode<synchronous>, transform_indices = @transform_9, window_bounds = array<i64: 4, 768>}, {pipeline_mode = #tpu.pipeline_mode<synchronous>, transform_indices = @transform_10, window_bounds = array<i64: 1, 768>}, {pipeline_mode = #tpu.pipeline_mode<synchronous>, transform_indices = @transform_11, window_bounds = array<i64: 768, 12>}, {pipeline_mode = #tpu.pipeline_mode<synchronous>, transform_indices = @transform_12, window_bounds = array<i64: 1, 1>}, {pipeline_mode = #tpu.pipeline_mode<synchronous>, transform_indices = @transform_13, window_bounds = array<i64: 1, 6>}, {transform_indices = @transform_14, window_bounds = array<i64: 2, 1, 6>}]} {
    %c0 = arith.constant 0 : index
    %c0_0 = arith.constant 0 : index
    %c0_1 = arith.constant 0 : index
    %0 = vector.load %arg1[%c0, %c0_0, %c0_1] : memref<2x1x7xi32, #tpu.memory_space<vmem>>, vector<2x1x7xi32>
    %c0_2 = arith.constant 0 : index
    %c0_3 = arith.constant 0 : index
    %c0_4 = arith.constant 0 : index
    %1 = vector.load %arg2[%c0_2, %c0_3, %c0_4] : memref<2x4x7xf32, #tpu.memory_space<vmem>>, vector<2x4x7xf32>
    %c0_5 = arith.constant 0 : index
    %c0_6 = arith.constant 0 : index
    %2 = vector.load %arg4[%c0_5, %c0_6] : memref<30x256xbf16, #tpu.memory_space<vmem>>, vector<30x256xbf16>
    %c0_7 = arith.constant 0 : index
    %c0_8 = arith.constant 0 : index
    %3 = vector.load %arg5[%c0_7, %c0_8] : memref<64x32xbf16, #tpu.memory_space<vmem>>, vector<64x32xbf16>
    %c0_9 = arith.constant 0 : index
    %c0_10 = arith.constant 0 : index
    %4 = vector.load %arg6[%c0_9, %c0_10] : memref<1x32xf32, #tpu.memory_space<vmem>>, vector<1x32xf32>
    %c0_11 = arith.constant 0 : index
    %c0_12 = arith.constant 0 : index
    %5 = vector.load %arg7[%c0_11, %c0_12] : memref<32x32xbf16, #tpu.memory_space<vmem>>, vector<32x32xbf16>
    %c0_13 = arith.constant 0 : index
    %c0_14 = arith.constant 0 : index
    %6 = vector.load %arg8[%c0_13, %c0_14] : memref<1x32xf32, #tpu.memory_space<vmem>>, vector<1x32xf32>
    %c0_15 = arith.constant 0 : index
    %c0_16 = arith.constant 0 : index
    %7 = vector.load %arg3[%c0_15, %c0_16] : memref<1x32xf32, #tpu.memory_space<vmem>>, vector<1x32xf32>
    %8 = tpu.iota {dimensions = array<i32: 1>} : vector<2x8x1xi32>
    %c0_i32 = arith.constant 0 : i32
    %9 = vector.broadcast %c0_i32 : i32 to vector<2x8x1xi32>
    %10 = arith.cmpi eq, %8, %9 : vector<2x8x1xi32>
    %11 = vector.shape_cast %7 : vector<1x32xf32> to vector<1x1x32xf32>
    %cst = arith.constant 0.000000e+00 : f32
    %12 = vector.shape_cast %10 : vector<2x8x1xi1> to vector<2x8x1xi1>
    %13 = vector.broadcast %12 : vector<2x8x1xi1> to vector<2x8x32xi1>
    %14 = vector.shape_cast %11 : vector<1x1x32xf32> to vector<1x1x32xf32>
    %15 = vector.broadcast %14 : vector<1x1x32xf32> to vector<2x8x32xf32>
    %16 = vector.broadcast %cst : f32 to vector<2x8x32xf32>
    %17 = arith.select %13, %15, %16 : vector<2x8x32xi1>, vector<2x8x32xf32>
    %cst_17 = arith.constant 0.000000e+00 : f32
    %18 = vector.broadcast %cst_17 : f32 to vector<2x8x4xf32>
    %19 = vector.extract_strided_slice %0 {offsets = [0, 0, 0], sizes = [2, 1, 1], strides = [1, 1, 1]} : vector<2x1x7xi32> to vector<2x1x1xi32>
    %20 = vector.shape_cast %19 : vector<2x1x1xi32> to vector<2x1xi32>
    %21 = vector.extract_strided_slice %1 {offsets = [0, 0, 0], sizes = [2, 4, 1], strides = [1, 1, 1]} : vector<2x4x7xf32> to vector<2x4x1xf32>
    %22 = vector.shape_cast %21 : vector<2x4x1xf32> to vector<2x4xf32>
    %c0_i32_18 = arith.constant 0 : i32
    %23 = vector.broadcast %c0_i32_18 : i32 to vector<2x1xi32>
    %24 = arith.cmpi ne, %20, %23 : vector<2x1xi32>
    %c7_i32 = arith.constant 7 : i32
    %25 = vector.broadcast %c7_i32 : i32 to vector<2x1xi32>
    %26 = arith.cmpi ne, %20, %25 : vector<2x1xi32>
    %27 = arith.andi %24, %26 : vector<2x1xi1>
    %c1_i32 = arith.constant 1 : i32
    %28 = vector.broadcast %c1_i32 : i32 to vector<2x1xi32>
    %29 = arith.subi %20, %28 : vector<2x1xi32>
    %c0_i32_19 = arith.constant 0 : i32
    %c5_i32 = arith.constant 5 : i32
    %30 = vector.broadcast %c0_i32_19 : i32 to vector<2x1xi32>
    %31 = arith.maxsi %30, %29 : vector<2x1xi32>
    %32 = vector.broadcast %c5_i32 : i32 to vector<2x1xi32>
    %33 = arith.minsi %32, %31 : vector<2x1xi32>
    %34 = tpu.iota {dimensions = array<i32: 1>} : vector<2x6xi32>
    %35 = vector.broadcast %33 : vector<2x1xi32> to vector<2x6xi32>
    %36 = arith.cmpi eq, %35, %34 : vector<2x6xi32>
    %37 = arith.extui %36 : vector<2x6xi1> to vector<2x6xi32>
    %38 = arith.sitofp %37 : vector<2x6xi32> to vector<2x6xf32>
    %39 = vector.extract_strided_slice %22 {offsets = [0, 0], sizes = [2, 1], strides = [1, 1]} : vector<2x4xf32> to vector<2x1xf32>
    %40 = vector.broadcast %39 : vector<2x1xf32> to vector<2x6xf32>
    %41 = arith.mulf %38, %40 : vector<2x6xf32>
    %42 = vector.extract_strided_slice %22 {offsets = [0, 1], sizes = [2, 1], strides = [1, 1]} : vector<2x4xf32> to vector<2x1xf32>
    %43 = vector.broadcast %42 : vector<2x1xf32> to vector<2x6xf32>
    %44 = arith.mulf %38, %43 : vector<2x6xf32>
    %45 = vector.extract_strided_slice %22 {offsets = [0, 2], sizes = [2, 1], strides = [1, 1]} : vector<2x4xf32> to vector<2x1xf32>
    %46 = vector.broadcast %45 : vector<2x1xf32> to vector<2x6xf32>
    %47 = arith.mulf %38, %46 : vector<2x6xf32>
    %48 = vector.extract_strided_slice %22 {offsets = [0, 3], sizes = [2, 1], strides = [1, 1]} : vector<2x4xf32> to vector<2x1xf32>
    %49 = vector.broadcast %48 : vector<2x1xf32> to vector<2x6xf32>
    %50 = arith.mulf %38, %49 : vector<2x6xf32>
    %51 = tpu.concatenate %38, %41, %44, %47, %50 in 1 : vector<2x6xf32>, vector<2x6xf32>, vector<2x6xf32>, vector<2x6xf32>, vector<2x6xf32> -> vector<2x30xf32>
    %52 = arith.truncf %51 : vector<2x30xf32> to vector<2x30xbf16>
    %cst_20 = arith.constant dense<0.000000e+00> : vector<2x256xf32>
    %53 = tpu.matmul %52, %2, %cst_20 {dimension_numbers = #tpu.dot_dimension_numbers<[1], [0], [0], [1], [0, 0, 1, 1], [], []>} : vector<2x30xbf16>, vector<30x256xbf16>, vector<2x256xf32> -> vector<2x256xf32>
    %54 = vector.extract_strided_slice %53 {offsets = [0, 0], sizes = [2, 32], strides = [1, 1]} : vector<2x256xf32> to vector<2x32xf32>
    %55 = vector.extract_strided_slice %53 {offsets = [0, 32], sizes = [2, 32], strides = [1, 1]} : vector<2x256xf32> to vector<2x32xf32>
    %56 = vector.extract_strided_slice %53 {offsets = [0, 64], sizes = [2, 32], strides = [1, 1]} : vector<2x256xf32> to vector<2x32xf32>
    %57 = vector.extract_strided_slice %53 {offsets = [0, 96], sizes = [2, 32], strides = [1, 1]} : vector<2x256xf32> to vector<2x32xf32>
    %58 = vector.shape_cast %57 : vector<2x32xf32> to vector<2x1x32xf32>
    %59 = vector.extract_strided_slice %18 {offsets = [0, 0, 0], sizes = [2, 8, 1], strides = [1, 1, 1]} : vector<2x8x4xf32> to vector<2x8x1xf32>
    %60 = vector.extract_strided_slice %53 {offsets = [0, 128], sizes = [2, 32], strides = [1, 1]} : vector<2x256xf32> to vector<2x32xf32>
    %61 = vector.shape_cast %60 : vector<2x32xf32> to vector<2x1x32xf32>
    %62 = vector.broadcast %59 : vector<2x8x1xf32> to vector<2x8x32xf32>
    %63 = vector.broadcast %61 : vector<2x1x32xf32> to vector<2x8x32xf32>
    %64 = arith.mulf %62, %63 : vector<2x8x32xf32>
    %65 = vector.broadcast %58 : vector<2x1x32xf32> to vector<2x8x32xf32>
    %66 = arith.addf %65, %64 : vector<2x8x32xf32>
    %67 = vector.extract_strided_slice %18 {offsets = [0, 0, 1], sizes = [2, 8, 1], strides = [1, 1, 1]} : vector<2x8x4xf32> to vector<2x8x1xf32>
    %68 = vector.extract_strided_slice %53 {offsets = [0, 160], sizes = [2, 32], strides = [1, 1]} : vector<2x256xf32> to vector<2x32xf32>
    %69 = vector.shape_cast %68 : vector<2x32xf32> to vector<2x1x32xf32>
    %70 = vector.broadcast %67 : vector<2x8x1xf32> to vector<2x8x32xf32>
    %71 = vector.broadcast %69 : vector<2x1x32xf32> to vector<2x8x32xf32>
    %72 = arith.mulf %70, %71 : vector<2x8x32xf32>
    %73 = arith.addf %66, %72 : vector<2x8x32xf32>
    %74 = vector.extract_strided_slice %18 {offsets = [0, 0, 2], sizes = [2, 8, 1], strides = [1, 1, 1]} : vector<2x8x4xf32> to vector<2x8x1xf32>
    %75 = vector.extract_strided_slice %53 {offsets = [0, 192], sizes = [2, 32], strides = [1, 1]} : vector<2x256xf32> to vector<2x32xf32>
    %76 = vector.shape_cast %75 : vector<2x32xf32> to vector<2x1x32xf32>
    %77 = vector.broadcast %74 : vector<2x8x1xf32> to vector<2x8x32xf32>
    %78 = vector.broadcast %76 : vector<2x1x32xf32> to vector<2x8x32xf32>
    %79 = arith.mulf %77, %78 : vector<2x8x32xf32>
    %80 = arith.addf %73, %79 : vector<2x8x32xf32>
    %81 = vector.extract_strided_slice %18 {offsets = [0, 0, 3], sizes = [2, 8, 1], strides = [1, 1, 1]} : vector<2x8x4xf32> to vector<2x8x1xf32>
    %82 = vector.extract_strided_slice %53 {offsets = [0, 224], sizes = [2, 32], strides = [1, 1]} : vector<2x256xf32> to vector<2x32xf32>
    %83 = vector.shape_cast %82 : vector<2x32xf32> to vector<2x1x32xf32>
    %84 = vector.broadcast %81 : vector<2x8x1xf32> to vector<2x8x32xf32>
    %85 = vector.broadcast %83 : vector<2x1x32xf32> to vector<2x8x32xf32>
    %86 = arith.mulf %84, %85 : vector<2x8x32xf32>
    %87 = arith.addf %80, %86 : vector<2x8x32xf32>
    %cst_21 = arith.constant 0.000000e+00 : f32
    %88 = vector.broadcast %cst_21 : f32 to vector<2x8x32xf32>
    %89 = arith.cmpf oge, %87, %88 : vector<2x8x32xf32>
    %cst_22 = arith.constant 0.00999999977 : f32
    %90 = vector.broadcast %cst_22 : f32 to vector<2x8x32xf32>
    %91 = arith.mulf %90, %87 : vector<2x8x32xf32>
    %92 = arith.select %89, %87, %91 : vector<2x8x32xi1>, vector<2x8x32xf32>
    %93 = tpu.concatenate %17, %92 in 2 : vector<2x8x32xf32>, vector<2x8x32xf32> -> vector<2x8x64xf32>
    %94 = vector.shape_cast %93 : vector<2x8x64xf32> to vector<16x64xf32>
    %95 = arith.truncf %94 : vector<16x64xf32> to vector<16x64xbf16>
    %cst_23 = arith.constant dense<0.000000e+00> : vector<16x32xf32>
    %96 = tpu.matmul %95, %3, %cst_23 {dimension_numbers = #tpu.dot_dimension_numbers<[1], [0], [0], [1], [0, 0, 1, 1], [], []>} : vector<16x64xbf16>, vector<64x32xbf16>, vector<16x32xf32> -> vector<16x32xf32>
    %97 = vector.shape_cast %96 : vector<16x32xf32> to vector<2x8x32xf32>
    %98 = vector.shape_cast %55 : vector<2x32xf32> to vector<2x1x32xf32>
    %99 = vector.broadcast %98 : vector<2x1x32xf32> to vector<2x8x32xf32>
    %100 = arith.addf %97, %99 : vector<2x8x32xf32>
    %101 = vector.shape_cast %4 : vector<1x32xf32> to vector<1x1x32xf32>
    %102 = vector.broadcast %101 : vector<1x1x32xf32> to vector<2x8x32xf32>
    %103 = arith.addf %100, %102 : vector<2x8x32xf32>
    %cst_24 = arith.constant 0.000000e+00 : f32
    %104 = vector.broadcast %cst_24 : f32 to vector<2x8x32xf32>
    %105 = arith.cmpf oge, %103, %104 : vector<2x8x32xf32>
    %cst_25 = arith.constant 0.00999999977 : f32
    %106 = vector.broadcast %cst_25 : f32 to vector<2x8x32xf32>
    %107 = arith.mulf %106, %103 : vector<2x8x32xf32>
    %108 = arith.select %105, %103, %107 : vector<2x8x32xi1>, vector<2x8x32xf32>
    %109 = vector.shape_cast %108 : vector<2x8x32xf32> to vector<16x32xf32>
    %110 = arith.truncf %109 : vector<16x32xf32> to vector<16x32xbf16>
    %cst_26 = arith.constant dense<0.000000e+00> : vector<16x32xf32>
    %111 = tpu.matmul %110, %5, %cst_26 {dimension_numbers = #tpu.dot_dimension_numbers<[1], [0], [0], [1], [0, 0, 1, 1], [], []>} : vector<16x32xbf16>, vector<32x32xbf16>, vector<16x32xf32> -> vector<16x32xf32>
    %112 = vector.broadcast %6 : vector<1x32xf32> to vector<16x32xf32>
    %113 = arith.addf %111, %112 : vector<16x32xf32>
    %114 = vector.shape_cast %113 : vector<16x32xf32> to vector<2x8x32xf32>
    %115 = math.absf %17 : vector<2x8x32xf32>
    %cst_27 = arith.constant dense<0xFF800000> : vector<2x8xf32>
    %116 = vector.multi_reduction <maximumf>, %115, %cst_27 [2] : vector<2x8x32xf32> to vector<2x8xf32>
    %cst_28 = arith.constant 0.000000e+00 : f32
    %117 = vector.broadcast %cst_28 : f32 to vector<2x8xf32>
    %118 = arith.cmpf oeq, %116, %117 : vector<2x8xf32>
    %119 = math.absf %18 : vector<2x8x4xf32>
    %cst_29 = arith.constant dense<0xFF800000> : vector<2x8xf32>
    %120 = vector.multi_reduction <maximumf>, %119, %cst_29 [2] : vector<2x8x4xf32> to vector<2x8xf32>
    %cst_30 = arith.constant 0.000000e+00 : f32
    %121 = vector.broadcast %cst_30 : f32 to vector<2x8xf32>
    %122 = arith.cmpf oeq, %120, %121 : vector<2x8xf32>
    %123 = arith.andi %118, %122 : vector<2x8xi1>
    %124 = vector.shape_cast %123 : vector<2x8xi1> to vector<2x8x1xi1>
    %cst_31 = arith.constant -1.000000e+09 : f32
    %125 = vector.shape_cast %124 : vector<2x8x1xi1> to vector<2x8x1xi1>
    %126 = vector.broadcast %125 : vector<2x8x1xi1> to vector<2x8x32xi1>
    %127 = vector.broadcast %cst_31 : f32 to vector<2x8x32xf32>
    %128 = arith.select %126, %127, %114 : vector<2x8x32xi1>, vector<2x8x32xf32>
    %cst_32 = arith.constant dense<0xFF800000> : vector<2x32xf32>
    %129 = vector.multi_reduction <maximumf>, %128, %cst_32 [1] : vector<2x8x32xf32> to vector<2x32xf32>
    %130 = vector.shape_cast %129 : vector<2x32xf32> to vector<2x1x32xf32>
    %131 = vector.broadcast %130 : vector<2x1x32xf32> to vector<2x8x32xf32>
    %132 = arith.subf %128, %131 : vector<2x8x32xf32>
    %133 = math.exp %132 : vector<2x8x32xf32>
    %cst_33 = arith.constant dense<0.000000e+00> : vector<2x32xf32>
    %134 = vector.multi_reduction <add>, %133, %cst_33 [1] : vector<2x8x32xf32> to vector<2x32xf32>
    %135 = vector.shape_cast %134 : vector<2x32xf32> to vector<2x1x32xf32>
    %136 = tpu.reciprocal %135 {approx = true} : vector<2x1x32xf32> -> vector<2x1x32xf32>
    %137 = vector.broadcast %136 : vector<2x1x32xf32> to vector<2x8x32xf32>
    %138 = arith.mulf %133, %137 : vector<2x8x32xf32>
    %139 = vector.shape_cast %54 : vector<2x32xf32> to vector<2x1x32xf32>
    %140 = vector.broadcast %139 : vector<2x1x32xf32> to vector<2x8x32xf32>
    %141 = arith.mulf %138, %140 : vector<2x8x32xf32>
    %142 = vector.shape_cast %27 : vector<2x1xi1> to vector<2x1x1xi1>
    %143 = arith.subf %17, %141 : vector<2x8x32xf32>
    %cst_34 = arith.constant 0.000000e+00 : f32
    %144 = vector.broadcast %cst_34 : f32 to vector<2x8x32xf32>
    %145 = arith.maximumf %143, %144 : vector<2x8x32xf32>
    %146 = vector.shape_cast %142 : vector<2x1x1xi1> to vector<2x1x1xi1>
    %147 = vector.broadcast %146 : vector<2x1x1xi1> to vector<2x8x32xi1>
    %148 = arith.select %147, %145, %17 : vector<2x8x32xi1>, vector<2x8x32xf32>
    %149 = tpu.iota {dimensions = array<i32: 1>} : vector<1x8x1xi32>
    %c1_i32_35 = arith.constant 1 : i32
    %150 = vector.broadcast %c1_i32_35 : i32 to vector<1x8x1xi32>
    %151 = arith.cmpi eq, %149, %150 : vector<1x8x1xi32>
    %152 = vector.broadcast %142 : vector<2x1x1xi1> to vector<2x8x1xi1>
    %153 = vector.broadcast %151 : vector<1x8x1xi1> to vector<2x8x1xi1>
    %154 = arith.andi %152, %153 : vector<2x8x1xi1>
    %155 = vector.shape_cast %56 : vector<2x32xf32> to vector<2x1x32xf32>
    %156 = vector.shape_cast %154 : vector<2x8x1xi1> to vector<2x8x1xi1>
    %157 = vector.broadcast %156 : vector<2x8x1xi1> to vector<2x8x32xi1>
    %158 = vector.shape_cast %155 : vector<2x1x32xf32> to vector<2x1x32xf32>
    %159 = vector.broadcast %158 : vector<2x1x32xf32> to vector<2x8x32xf32>
    %160 = arith.select %157, %159, %148 : vector<2x8x32xi1>, vector<2x8x32xf32>
    %161 = vector.shape_cast %22 : vector<2x4xf32> to vector<2x1x4xf32>
    %162 = vector.shape_cast %154 : vector<2x8x1xi1> to vector<2x8x1xi1>
    %163 = vector.broadcast %162 : vector<2x8x1xi1> to vector<2x8x4xi1>
    %164 = vector.shape_cast %161 : vector<2x1x4xf32> to vector<2x1x4xf32>
    %165 = vector.broadcast %164 : vector<2x1x4xf32> to vector<2x8x4xf32>
    %166 = arith.select %163, %165, %18 : vector<2x8x4xi1>, vector<2x8x4xf32>
    %167 = vector.extract_strided_slice %0 {offsets = [0, 0, 1], sizes = [2, 1, 1], strides = [1, 1, 1]} : vector<2x1x7xi32> to vector<2x1x1xi32>
    %168 = vector.shape_cast %167 : vector<2x1x1xi32> to vector<2x1xi32>
    %169 = vector.extract_strided_slice %1 {offsets = [0, 0, 1], sizes = [2, 4, 1], strides = [1, 1, 1]} : vector<2x4x7xf32> to vector<2x4x1xf32>
    %170 = vector.shape_cast %169 : vector<2x4x1xf32> to vector<2x4xf32>
    %c0_i32_36 = arith.constant 0 : i32
    %171 = vector.broadcast %c0_i32_36 : i32 to vector<2x1xi32>
    %172 = arith.cmpi ne, %168, %171 : vector<2x1xi32>
    %c7_i32_37 = arith.constant 7 : i32
    %173 = vector.broadcast %c7_i32_37 : i32 to vector<2x1xi32>
    %174 = arith.cmpi ne, %168, %173 : vector<2x1xi32>
    %175 = arith.andi %172, %174 : vector<2x1xi1>
    %c1_i32_38 = arith.constant 1 : i32
    %176 = vector.broadcast %c1_i32_38 : i32 to vector<2x1xi32>
    %177 = arith.subi %168, %176 : vector<2x1xi32>
    %c0_i32_39 = arith.constant 0 : i32
    %c5_i32_40 = arith.constant 5 : i32
    %178 = vector.broadcast %c0_i32_39 : i32 to vector<2x1xi32>
    %179 = arith.maxsi %178, %177 : vector<2x1xi32>
    %180 = vector.broadcast %c5_i32_40 : i32 to vector<2x1xi32>
    %181 = arith.minsi %180, %179 : vector<2x1xi32>
    %182 = tpu.iota {dimensions = array<i32: 1>} : vector<2x6xi32>
    %183 = vector.broadcast %181 : vector<2x1xi32> to vector<2x6xi32>
    %184 = arith.cmpi eq, %183, %182 : vector<2x6xi32>
    %185 = arith.extui %184 : vector<2x6xi1> to vector<2x6xi32>
    %186 = arith.sitofp %185 : vector<2x6xi32> to vector<2x6xf32>
    %187 = vector.extract_strided_slice %170 {offsets = [0, 0], sizes = [2, 1], strides = [1, 1]} : vector<2x4xf32> to vector<2x1xf32>
    %188 = vector.broadcast %187 : vector<2x1xf32> to vector<2x6xf32>
    %189 = arith.mulf %186, %188 : vector<2x6xf32>
    %190 = vector.extract_strided_slice %170 {offsets = [0, 1], sizes = [2, 1], strides = [1, 1]} : vector<2x4xf32> to vector<2x1xf32>
    %191 = vector.broadcast %190 : vector<2x1xf32> to vector<2x6xf32>
    %192 = arith.mulf %186, %191 : vector<2x6xf32>
    %193 = vector.extract_strided_slice %170 {offsets = [0, 2], sizes = [2, 1], strides = [1, 1]} : vector<2x4xf32> to vector<2x1xf32>
    %194 = vector.broadcast %193 : vector<2x1xf32> to vector<2x6xf32>
    %195 = arith.mulf %186, %194 : vector<2x6xf32>
    %196 = vector.extract_strided_slice %170 {offsets = [0, 3], sizes = [2, 1], strides = [1, 1]} : vector<2x4xf32> to vector<2x1xf32>
    %197 = vector.broadcast %196 : vector<2x1xf32> to vector<2x6xf32>
    %198 = arith.mulf %186, %197 : vector<2x6xf32>
    %199 = tpu.concatenate %186, %189, %192, %195, %198 in 1 : vector<2x6xf32>, vector<2x6xf32>, vector<2x6xf32>, vector<2x6xf32>, vector<2x6xf32> -> vector<2x30xf32>
    %200 = arith.truncf %199 : vector<2x30xf32> to vector<2x30xbf16>
    %cst_41 = arith.constant dense<0.000000e+00> : vector<2x256xf32>
    %201 = tpu.matmul %200, %2, %cst_41 {dimension_numbers = #tpu.dot_dimension_numbers<[1], [0], [0], [1], [0, 0, 1, 1], [], []>} : vector<2x30xbf16>, vector<30x256xbf16>, vector<2x256xf32> -> vector<2x256xf32>
    %202 = vector.extract_strided_slice %201 {offsets = [0, 0], sizes = [2, 32], strides = [1, 1]} : vector<2x256xf32> to vector<2x32xf32>
    %203 = vector.extract_strided_slice %201 {offsets = [0, 32], sizes = [2, 32], strides = [1, 1]} : vector<2x256xf32> to vector<2x32xf32>
    %204 = vector.extract_strided_slice %201 {offsets = [0, 64], sizes = [2, 32], strides = [1, 1]} : vector<2x256xf32> to vector<2x32xf32>
    %205 = vector.extract_strided_slice %201 {offsets = [0, 96], sizes = [2, 32], strides = [1, 1]} : vector<2x256xf32> to vector<2x32xf32>
    %206 = vector.shape_cast %205 : vector<2x32xf32> to vector<2x1x32xf32>
    %207 = vector.extract_strided_slice %166 {offsets = [0, 0, 0], sizes = [2, 8, 1], strides = [1, 1, 1]} : vector<2x8x4xf32> to vector<2x8x1xf32>
    %208 = vector.extract_strided_slice %201 {offsets = [0, 128], sizes = [2, 32], strides = [1, 1]} : vector<2x256xf32> to vector<2x32xf32>
    %209 = vector.shape_cast %208 : vector<2x32xf32> to vector<2x1x32xf32>
    %210 = vector.broadcast %207 : vector<2x8x1xf32> to vector<2x8x32xf32>
    %211 = vector.broadcast %209 : vector<2x1x32xf32> to vector<2x8x32xf32>
    %212 = arith.mulf %210, %211 : vector<2x8x32xf32>
    %213 = vector.broadcast %206 : vector<2x1x32xf32> to vector<2x8x32xf32>
    %214 = arith.addf %213, %212 : vector<2x8x32xf32>
    %215 = vector.extract_strided_slice %166 {offsets = [0, 0, 1], sizes = [2, 8, 1], strides = [1, 1, 1]} : vector<2x8x4xf32> to vector<2x8x1xf32>
    %216 = vector.extract_strided_slice %201 {offsets = [0, 160], sizes = [2, 32], strides = [1, 1]} : vector<2x256xf32> to vector<2x32xf32>
    %217 = vector.shape_cast %216 : vector<2x32xf32> to vector<2x1x32xf32>
    %218 = vector.broadcast %215 : vector<2x8x1xf32> to vector<2x8x32xf32>
    %219 = vector.broadcast %217 : vector<2x1x32xf32> to vector<2x8x32xf32>
    %220 = arith.mulf %218, %219 : vector<2x8x32xf32>
    %221 = arith.addf %214, %220 : vector<2x8x32xf32>
    %222 = vector.extract_strided_slice %166 {offsets = [0, 0, 2], sizes = [2, 8, 1], strides = [1, 1, 1]} : vector<2x8x4xf32> to vector<2x8x1xf32>
    %223 = vector.extract_strided_slice %201 {offsets = [0, 192], sizes = [2, 32], strides = [1, 1]} : vector<2x256xf32> to vector<2x32xf32>
    %224 = vector.shape_cast %223 : vector<2x32xf32> to vector<2x1x32xf32>
    %225 = vector.broadcast %222 : vector<2x8x1xf32> to vector<2x8x32xf32>
    %226 = vector.broadcast %224 : vector<2x1x32xf32> to vector<2x8x32xf32>
    %227 = arith.mulf %225, %226 : vector<2x8x32xf32>
    %228 = arith.addf %221, %227 : vector<2x8x32xf32>
    %229 = vector.extract_strided_slice %166 {offsets = [0, 0, 3], sizes = [2, 8, 1], strides = [1, 1, 1]} : vector<2x8x4xf32> to vector<2x8x1xf32>
    %230 = vector.extract_strided_slice %201 {offsets = [0, 224], sizes = [2, 32], strides = [1, 1]} : vector<2x256xf32> to vector<2x32xf32>
    %231 = vector.shape_cast %230 : vector<2x32xf32> to vector<2x1x32xf32>
    %232 = vector.broadcast %229 : vector<2x8x1xf32> to vector<2x8x32xf32>
    %233 = vector.broadcast %231 : vector<2x1x32xf32> to vector<2x8x32xf32>
    %234 = arith.mulf %232, %233 : vector<2x8x32xf32>
    %235 = arith.addf %228, %234 : vector<2x8x32xf32>
    %cst_42 = arith.constant 0.000000e+00 : f32
    %236 = vector.broadcast %cst_42 : f32 to vector<2x8x32xf32>
    %237 = arith.cmpf oge, %235, %236 : vector<2x8x32xf32>
    %cst_43 = arith.constant 0.00999999977 : f32
    %238 = vector.broadcast %cst_43 : f32 to vector<2x8x32xf32>
    %239 = arith.mulf %238, %235 : vector<2x8x32xf32>
    %240 = arith.select %237, %235, %239 : vector<2x8x32xi1>, vector<2x8x32xf32>
    %241 = tpu.concatenate %160, %240 in 2 : vector<2x8x32xf32>, vector<2x8x32xf32> -> vector<2x8x64xf32>
    %242 = vector.shape_cast %241 : vector<2x8x64xf32> to vector<16x64xf32>
    %243 = arith.truncf %242 : vector<16x64xf32> to vector<16x64xbf16>
    %cst_44 = arith.constant dense<0.000000e+00> : vector<16x32xf32>
    %244 = tpu.matmul %243, %3, %cst_44 {dimension_numbers = #tpu.dot_dimension_numbers<[1], [0], [0], [1], [0, 0, 1, 1], [], []>} : vector<16x64xbf16>, vector<64x32xbf16>, vector<16x32xf32> -> vector<16x32xf32>
    %245 = vector.shape_cast %244 : vector<16x32xf32> to vector<2x8x32xf32>
    %246 = vector.shape_cast %203 : vector<2x32xf32> to vector<2x1x32xf32>
    %247 = vector.broadcast %246 : vector<2x1x32xf32> to vector<2x8x32xf32>
    %248 = arith.addf %245, %247 : vector<2x8x32xf32>
    %249 = vector.shape_cast %4 : vector<1x32xf32> to vector<1x1x32xf32>
    %250 = vector.broadcast %249 : vector<1x1x32xf32> to vector<2x8x32xf32>
    %251 = arith.addf %248, %250 : vector<2x8x32xf32>
    %cst_45 = arith.constant 0.000000e+00 : f32
    %252 = vector.broadcast %cst_45 : f32 to vector<2x8x32xf32>
    %253 = arith.cmpf oge, %251, %252 : vector<2x8x32xf32>
    %cst_46 = arith.constant 0.00999999977 : f32
    %254 = vector.broadcast %cst_46 : f32 to vector<2x8x32xf32>
    %255 = arith.mulf %254, %251 : vector<2x8x32xf32>
    %256 = arith.select %253, %251, %255 : vector<2x8x32xi1>, vector<2x8x32xf32>
    %257 = vector.shape_cast %256 : vector<2x8x32xf32> to vector<16x32xf32>
    %258 = arith.truncf %257 : vector<16x32xf32> to vector<16x32xbf16>
    %cst_47 = arith.constant dense<0.000000e+00> : vector<16x32xf32>
    %259 = tpu.matmul %258, %5, %cst_47 {dimension_numbers = #tpu.dot_dimension_numbers<[1], [0], [0], [1], [0, 0, 1, 1], [], []>} : vector<16x32xbf16>, vector<32x32xbf16>, vector<16x32xf32> -> vector<16x32xf32>
    %260 = vector.broadcast %6 : vector<1x32xf32> to vector<16x32xf32>
    %261 = arith.addf %259, %260 : vector<16x32xf32>
    %262 = vector.shape_cast %261 : vector<16x32xf32> to vector<2x8x32xf32>
    %263 = math.absf %160 : vector<2x8x32xf32>
    %cst_48 = arith.constant dense<0xFF800000> : vector<2x8xf32>
    %264 = vector.multi_reduction <maximumf>, %263, %cst_48 [2] : vector<2x8x32xf32> to vector<2x8xf32>
    %cst_49 = arith.constant 0.000000e+00 : f32
    %265 = vector.broadcast %cst_49 : f32 to vector<2x8xf32>
    %266 = arith.cmpf oeq, %264, %265 : vector<2x8xf32>
    %267 = math.absf %166 : vector<2x8x4xf32>
    %cst_50 = arith.constant dense<0xFF800000> : vector<2x8xf32>
    %268 = vector.multi_reduction <maximumf>, %267, %cst_50 [2] : vector<2x8x4xf32> to vector<2x8xf32>
    %cst_51 = arith.constant 0.000000e+00 : f32
    %269 = vector.broadcast %cst_51 : f32 to vector<2x8xf32>
    %270 = arith.cmpf oeq, %268, %269 : vector<2x8xf32>
    %271 = arith.andi %266, %270 : vector<2x8xi1>
    %272 = vector.shape_cast %271 : vector<2x8xi1> to vector<2x8x1xi1>
    %cst_52 = arith.constant -1.000000e+09 : f32
    %273 = vector.shape_cast %272 : vector<2x8x1xi1> to vector<2x8x1xi1>
    %274 = vector.broadcast %273 : vector<2x8x1xi1> to vector<2x8x32xi1>
    %275 = vector.broadcast %cst_52 : f32 to vector<2x8x32xf32>
    %276 = arith.select %274, %275, %262 : vector<2x8x32xi1>, vector<2x8x32xf32>
    %cst_53 = arith.constant dense<0xFF800000> : vector<2x32xf32>
    %277 = vector.multi_reduction <maximumf>, %276, %cst_53 [1] : vector<2x8x32xf32> to vector<2x32xf32>
    %278 = vector.shape_cast %277 : vector<2x32xf32> to vector<2x1x32xf32>
    %279 = vector.broadcast %278 : vector<2x1x32xf32> to vector<2x8x32xf32>
    %280 = arith.subf %276, %279 : vector<2x8x32xf32>
    %281 = math.exp %280 : vector<2x8x32xf32>
    %cst_54 = arith.constant dense<0.000000e+00> : vector<2x32xf32>
    %282 = vector.multi_reduction <add>, %281, %cst_54 [1] : vector<2x8x32xf32> to vector<2x32xf32>
    %283 = vector.shape_cast %282 : vector<2x32xf32> to vector<2x1x32xf32>
    %284 = tpu.reciprocal %283 {approx = true} : vector<2x1x32xf32> -> vector<2x1x32xf32>
    %285 = vector.broadcast %284 : vector<2x1x32xf32> to vector<2x8x32xf32>
    %286 = arith.mulf %281, %285 : vector<2x8x32xf32>
    %287 = vector.shape_cast %202 : vector<2x32xf32> to vector<2x1x32xf32>
    %288 = vector.broadcast %287 : vector<2x1x32xf32> to vector<2x8x32xf32>
    %289 = arith.mulf %286, %288 : vector<2x8x32xf32>
    %290 = vector.shape_cast %175 : vector<2x1xi1> to vector<2x1x1xi1>
    %291 = arith.subf %160, %289 : vector<2x8x32xf32>
    %cst_55 = arith.constant 0.000000e+00 : f32
    %292 = vector.broadcast %cst_55 : f32 to vector<2x8x32xf32>
    %293 = arith.maximumf %291, %292 : vector<2x8x32xf32>
    %294 = vector.shape_cast %290 : vector<2x1x1xi1> to vector<2x1x1xi1>
    %295 = vector.broadcast %294 : vector<2x1x1xi1> to vector<2x8x32xi1>
    %296 = arith.select %295, %293, %160 : vector<2x8x32xi1>, vector<2x8x32xf32>
    %297 = tpu.iota {dimensions = array<i32: 1>} : vector<1x8x1xi32>
    %c2_i32 = arith.constant 2 : i32
    %298 = vector.broadcast %c2_i32 : i32 to vector<1x8x1xi32>
    %299 = arith.cmpi eq, %297, %298 : vector<1x8x1xi32>
    %300 = vector.broadcast %290 : vector<2x1x1xi1> to vector<2x8x1xi1>
    %301 = vector.broadcast %299 : vector<1x8x1xi1> to vector<2x8x1xi1>
    %302 = arith.andi %300, %301 : vector<2x8x1xi1>
    %303 = vector.shape_cast %204 : vector<2x32xf32> to vector<2x1x32xf32>
    %304 = vector.shape_cast %302 : vector<2x8x1xi1> to vector<2x8x1xi1>
    %305 = vector.broadcast %304 : vector<2x8x1xi1> to vector<2x8x32xi1>
    %306 = vector.shape_cast %303 : vector<2x1x32xf32> to vector<2x1x32xf32>
    %307 = vector.broadcast %306 : vector<2x1x32xf32> to vector<2x8x32xf32>
    %308 = arith.select %305, %307, %296 : vector<2x8x32xi1>, vector<2x8x32xf32>
    %309 = vector.shape_cast %170 : vector<2x4xf32> to vector<2x1x4xf32>
    %310 = vector.shape_cast %302 : vector<2x8x1xi1> to vector<2x8x1xi1>
    %311 = vector.broadcast %310 : vector<2x8x1xi1> to vector<2x8x4xi1>
    %312 = vector.shape_cast %309 : vector<2x1x4xf32> to vector<2x1x4xf32>
    %313 = vector.broadcast %312 : vector<2x1x4xf32> to vector<2x8x4xf32>
    %314 = arith.select %311, %313, %166 : vector<2x8x4xi1>, vector<2x8x4xf32>
    %315 = vector.extract_strided_slice %0 {offsets = [0, 0, 2], sizes = [2, 1, 1], strides = [1, 1, 1]} : vector<2x1x7xi32> to vector<2x1x1xi32>
    %316 = vector.shape_cast %315 : vector<2x1x1xi32> to vector<2x1xi32>
    %317 = vector.extract_strided_slice %1 {offsets = [0, 0, 2], sizes = [2, 4, 1], strides = [1, 1, 1]} : vector<2x4x7xf32> to vector<2x4x1xf32>
    %318 = vector.shape_cast %317 : vector<2x4x1xf32> to vector<2x4xf32>
    %c0_i32_56 = arith.constant 0 : i32
    %319 = vector.broadcast %c0_i32_56 : i32 to vector<2x1xi32>
    %320 = arith.cmpi ne, %316, %319 : vector<2x1xi32>
    %c7_i32_57 = arith.constant 7 : i32
    %321 = vector.broadcast %c7_i32_57 : i32 to vector<2x1xi32>
    %322 = arith.cmpi ne, %316, %321 : vector<2x1xi32>
    %323 = arith.andi %320, %322 : vector<2x1xi1>
    %c1_i32_58 = arith.constant 1 : i32
    %324 = vector.broadcast %c1_i32_58 : i32 to vector<2x1xi32>
    %325 = arith.subi %316, %324 : vector<2x1xi32>
    %c0_i32_59 = arith.constant 0 : i32
    %c5_i32_60 = arith.constant 5 : i32
    %326 = vector.broadcast %c0_i32_59 : i32 to vector<2x1xi32>
    %327 = arith.maxsi %326, %325 : vector<2x1xi32>
    %328 = vector.broadcast %c5_i32_60 : i32 to vector<2x1xi32>
    %329 = arith.minsi %328, %327 : vector<2x1xi32>
    %330 = tpu.iota {dimensions = array<i32: 1>} : vector<2x6xi32>
    %331 = vector.broadcast %329 : vector<2x1xi32> to vector<2x6xi32>
    %332 = arith.cmpi eq, %331, %330 : vector<2x6xi32>
    %333 = arith.extui %332 : vector<2x6xi1> to vector<2x6xi32>
    %334 = arith.sitofp %333 : vector<2x6xi32> to vector<2x6xf32>
    %335 = vector.extract_strided_slice %318 {offsets = [0, 0], sizes = [2, 1], strides = [1, 1]} : vector<2x4xf32> to vector<2x1xf32>
    %336 = vector.broadcast %335 : vector<2x1xf32> to vector<2x6xf32>
    %337 = arith.mulf %334, %336 : vector<2x6xf32>
    %338 = vector.extract_strided_slice %318 {offsets = [0, 1], sizes = [2, 1], strides = [1, 1]} : vector<2x4xf32> to vector<2x1xf32>
    %339 = vector.broadcast %338 : vector<2x1xf32> to vector<2x6xf32>
    %340 = arith.mulf %334, %339 : vector<2x6xf32>
    %341 = vector.extract_strided_slice %318 {offsets = [0, 2], sizes = [2, 1], strides = [1, 1]} : vector<2x4xf32> to vector<2x1xf32>
    %342 = vector.broadcast %341 : vector<2x1xf32> to vector<2x6xf32>
    %343 = arith.mulf %334, %342 : vector<2x6xf32>
    %344 = vector.extract_strided_slice %318 {offsets = [0, 3], sizes = [2, 1], strides = [1, 1]} : vector<2x4xf32> to vector<2x1xf32>
    %345 = vector.broadcast %344 : vector<2x1xf32> to vector<2x6xf32>
    %346 = arith.mulf %334, %345 : vector<2x6xf32>
    %347 = tpu.concatenate %334, %337, %340, %343, %346 in 1 : vector<2x6xf32>, vector<2x6xf32>, vector<2x6xf32>, vector<2x6xf32>, vector<2x6xf32> -> vector<2x30xf32>
    %348 = arith.truncf %347 : vector<2x30xf32> to vector<2x30xbf16>
    %cst_61 = arith.constant dense<0.000000e+00> : vector<2x256xf32>
    %349 = tpu.matmul %348, %2, %cst_61 {dimension_numbers = #tpu.dot_dimension_numbers<[1], [0], [0], [1], [0, 0, 1, 1], [], []>} : vector<2x30xbf16>, vector<30x256xbf16>, vector<2x256xf32> -> vector<2x256xf32>
    %350 = vector.extract_strided_slice %349 {offsets = [0, 0], sizes = [2, 32], strides = [1, 1]} : vector<2x256xf32> to vector<2x32xf32>
    %351 = vector.extract_strided_slice %349 {offsets = [0, 32], sizes = [2, 32], strides = [1, 1]} : vector<2x256xf32> to vector<2x32xf32>
    %352 = vector.extract_strided_slice %349 {offsets = [0, 64], sizes = [2, 32], strides = [1, 1]} : vector<2x256xf32> to vector<2x32xf32>
    %353 = vector.extract_strided_slice %349 {offsets = [0, 96], sizes = [2, 32], strides = [1, 1]} : vector<2x256xf32> to vector<2x32xf32>
    %354 = vector.shape_cast %353 : vector<2x32xf32> to vector<2x1x32xf32>
    %355 = vector.extract_strided_slice %314 {offsets = [0, 0, 0], sizes = [2, 8, 1], strides = [1, 1, 1]} : vector<2x8x4xf32> to vector<2x8x1xf32>
    %356 = vector.extract_strided_slice %349 {offsets = [0, 128], sizes = [2, 32], strides = [1, 1]} : vector<2x256xf32> to vector<2x32xf32>
    %357 = vector.shape_cast %356 : vector<2x32xf32> to vector<2x1x32xf32>
    %358 = vector.broadcast %355 : vector<2x8x1xf32> to vector<2x8x32xf32>
    %359 = vector.broadcast %357 : vector<2x1x32xf32> to vector<2x8x32xf32>
    %360 = arith.mulf %358, %359 : vector<2x8x32xf32>
    %361 = vector.broadcast %354 : vector<2x1x32xf32> to vector<2x8x32xf32>
    %362 = arith.addf %361, %360 : vector<2x8x32xf32>
    %363 = vector.extract_strided_slice %314 {offsets = [0, 0, 1], sizes = [2, 8, 1], strides = [1, 1, 1]} : vector<2x8x4xf32> to vector<2x8x1xf32>
    %364 = vector.extract_strided_slice %349 {offsets = [0, 160], sizes = [2, 32], strides = [1, 1]} : vector<2x256xf32> to vector<2x32xf32>
    %365 = vector.shape_cast %364 : vector<2x32xf32> to vector<2x1x32xf32>
    %366 = vector.broadcast %363 : vector<2x8x1xf32> to vector<2x8x32xf32>
    %367 = vector.broadcast %365 : vector<2x1x32xf32> to vector<2x8x32xf32>
    %368 = arith.mulf %366, %367 : vector<2x8x32xf32>
    %369 = arith.addf %362, %368 : vector<2x8x32xf32>
    %370 = vector.extract_strided_slice %314 {offsets = [0, 0, 2], sizes = [2, 8, 1], strides = [1, 1, 1]} : vector<2x8x4xf32> to vector<2x8x1xf32>
    %371 = vector.extract_strided_slice %349 {offsets = [0, 192], sizes = [2, 32], strides = [1, 1]} : vector<2x256xf32> to vector<2x32xf32>
    %372 = vector.shape_cast %371 : vector<2x32xf32> to vector<2x1x32xf32>
    %373 = vector.broadcast %370 : vector<2x8x1xf32> to vector<2x8x32xf32>
    %374 = vector.broadcast %372 : vector<2x1x32xf32> to vector<2x8x32xf32>
    %375 = arith.mulf %373, %374 : vector<2x8x32xf32>
    %376 = arith.addf %369, %375 : vector<2x8x32xf32>
    %377 = vector.extract_strided_slice %314 {offsets = [0, 0, 3], sizes = [2, 8, 1], strides = [1, 1, 1]} : vector<2x8x4xf32> to vector<2x8x1xf32>
    %378 = vector.extract_strided_slice %349 {offsets = [0, 224], sizes = [2, 32], strides = [1, 1]} : vector<2x256xf32> to vector<2x32xf32>
    %379 = vector.shape_cast %378 : vector<2x32xf32> to vector<2x1x32xf32>
    %380 = vector.broadcast %377 : vector<2x8x1xf32> to vector<2x8x32xf32>
    %381 = vector.broadcast %379 : vector<2x1x32xf32> to vector<2x8x32xf32>
    %382 = arith.mulf %380, %381 : vector<2x8x32xf32>
    %383 = arith.addf %376, %382 : vector<2x8x32xf32>
    %cst_62 = arith.constant 0.000000e+00 : f32
    %384 = vector.broadcast %cst_62 : f32 to vector<2x8x32xf32>
    %385 = arith.cmpf oge, %383, %384 : vector<2x8x32xf32>
    %cst_63 = arith.constant 0.00999999977 : f32
    %386 = vector.broadcast %cst_63 : f32 to vector<2x8x32xf32>
    %387 = arith.mulf %386, %383 : vector<2x8x32xf32>
    %388 = arith.select %385, %383, %387 : vector<2x8x32xi1>, vector<2x8x32xf32>
    %389 = tpu.concatenate %308, %388 in 2 : vector<2x8x32xf32>, vector<2x8x32xf32> -> vector<2x8x64xf32>
    %390 = vector.shape_cast %389 : vector<2x8x64xf32> to vector<16x64xf32>
    %391 = arith.truncf %390 : vector<16x64xf32> to vector<16x64xbf16>
    %cst_64 = arith.constant dense<0.000000e+00> : vector<16x32xf32>
    %392 = tpu.matmul %391, %3, %cst_64 {dimension_numbers = #tpu.dot_dimension_numbers<[1], [0], [0], [1], [0, 0, 1, 1], [], []>} : vector<16x64xbf16>, vector<64x32xbf16>, vector<16x32xf32> -> vector<16x32xf32>
    %393 = vector.shape_cast %392 : vector<16x32xf32> to vector<2x8x32xf32>
    %394 = vector.shape_cast %351 : vector<2x32xf32> to vector<2x1x32xf32>
    %395 = vector.broadcast %394 : vector<2x1x32xf32> to vector<2x8x32xf32>
    %396 = arith.addf %393, %395 : vector<2x8x32xf32>
    %397 = vector.shape_cast %4 : vector<1x32xf32> to vector<1x1x32xf32>
    %398 = vector.broadcast %397 : vector<1x1x32xf32> to vector<2x8x32xf32>
    %399 = arith.addf %396, %398 : vector<2x8x32xf32>
    %cst_65 = arith.constant 0.000000e+00 : f32
    %400 = vector.broadcast %cst_65 : f32 to vector<2x8x32xf32>
    %401 = arith.cmpf oge, %399, %400 : vector<2x8x32xf32>
    %cst_66 = arith.constant 0.00999999977 : f32
    %402 = vector.broadcast %cst_66 : f32 to vector<2x8x32xf32>
    %403 = arith.mulf %402, %399 : vector<2x8x32xf32>
    %404 = arith.select %401, %399, %403 : vector<2x8x32xi1>, vector<2x8x32xf32>
    %405 = vector.shape_cast %404 : vector<2x8x32xf32> to vector<16x32xf32>
    %406 = arith.truncf %405 : vector<16x32xf32> to vector<16x32xbf16>
    %cst_67 = arith.constant dense<0.000000e+00> : vector<16x32xf32>
    %407 = tpu.matmul %406, %5, %cst_67 {dimension_numbers = #tpu.dot_dimension_numbers<[1], [0], [0], [1], [0, 0, 1, 1], [], []>} : vector<16x32xbf16>, vector<32x32xbf16>, vector<16x32xf32> -> vector<16x32xf32>
    %408 = vector.broadcast %6 : vector<1x32xf32> to vector<16x32xf32>
    %409 = arith.addf %407, %408 : vector<16x32xf32>
    %410 = vector.shape_cast %409 : vector<16x32xf32> to vector<2x8x32xf32>
    %411 = math.absf %308 : vector<2x8x32xf32>
    %cst_68 = arith.constant dense<0xFF800000> : vector<2x8xf32>
    %412 = vector.multi_reduction <maximumf>, %411, %cst_68 [2] : vector<2x8x32xf32> to vector<2x8xf32>
    %cst_69 = arith.constant 0.000000e+00 : f32
    %413 = vector.broadcast %cst_69 : f32 to vector<2x8xf32>
    %414 = arith.cmpf oeq, %412, %413 : vector<2x8xf32>
    %415 = math.absf %314 : vector<2x8x4xf32>
    %cst_70 = arith.constant dense<0xFF800000> : vector<2x8xf32>
    %416 = vector.multi_reduction <maximumf>, %415, %cst_70 [2] : vector<2x8x4xf32> to vector<2x8xf32>
    %cst_71 = arith.constant 0.000000e+00 : f32
    %417 = vector.broadcast %cst_71 : f32 to vector<2x8xf32>
    %418 = arith.cmpf oeq, %416, %417 : vector<2x8xf32>
    %419 = arith.andi %414, %418 : vector<2x8xi1>
    %420 = vector.shape_cast %419 : vector<2x8xi1> to vector<2x8x1xi1>
    %cst_72 = arith.constant -1.000000e+09 : f32
    %421 = vector.shape_cast %420 : vector<2x8x1xi1> to vector<2x8x1xi1>
    %422 = vector.broadcast %421 : vector<2x8x1xi1> to vector<2x8x32xi1>
    %423 = vector.broadcast %cst_72 : f32 to vector<2x8x32xf32>
    %424 = arith.select %422, %423, %410 : vector<2x8x32xi1>, vector<2x8x32xf32>
    %cst_73 = arith.constant dense<0xFF800000> : vector<2x32xf32>
    %425 = vector.multi_reduction <maximumf>, %424, %cst_73 [1] : vector<2x8x32xf32> to vector<2x32xf32>
    %426 = vector.shape_cast %425 : vector<2x32xf32> to vector<2x1x32xf32>
    %427 = vector.broadcast %426 : vector<2x1x32xf32> to vector<2x8x32xf32>
    %428 = arith.subf %424, %427 : vector<2x8x32xf32>
    %429 = math.exp %428 : vector<2x8x32xf32>
    %cst_74 = arith.constant dense<0.000000e+00> : vector<2x32xf32>
    %430 = vector.multi_reduction <add>, %429, %cst_74 [1] : vector<2x8x32xf32> to vector<2x32xf32>
    %431 = vector.shape_cast %430 : vector<2x32xf32> to vector<2x1x32xf32>
    %432 = tpu.reciprocal %431 {approx = true} : vector<2x1x32xf32> -> vector<2x1x32xf32>
    %433 = vector.broadcast %432 : vector<2x1x32xf32> to vector<2x8x32xf32>
    %434 = arith.mulf %429, %433 : vector<2x8x32xf32>
    %435 = vector.shape_cast %350 : vector<2x32xf32> to vector<2x1x32xf32>
    %436 = vector.broadcast %435 : vector<2x1x32xf32> to vector<2x8x32xf32>
    %437 = arith.mulf %434, %436 : vector<2x8x32xf32>
    %438 = vector.shape_cast %323 : vector<2x1xi1> to vector<2x1x1xi1>
    %439 = arith.subf %308, %437 : vector<2x8x32xf32>
    %cst_75 = arith.constant 0.000000e+00 : f32
    %440 = vector.broadcast %cst_75 : f32 to vector<2x8x32xf32>
    %441 = arith.maximumf %439, %440 : vector<2x8x32xf32>
    %442 = vector.shape_cast %438 : vector<2x1x1xi1> to vector<2x1x1xi1>
    %443 = vector.broadcast %442 : vector<2x1x1xi1> to vector<2x8x32xi1>
    %444 = arith.select %443, %441, %308 : vector<2x8x32xi1>, vector<2x8x32xf32>
    %445 = tpu.iota {dimensions = array<i32: 1>} : vector<1x8x1xi32>
    %c3_i32 = arith.constant 3 : i32
    %446 = vector.broadcast %c3_i32 : i32 to vector<1x8x1xi32>
    %447 = arith.cmpi eq, %445, %446 : vector<1x8x1xi32>
    %448 = vector.broadcast %438 : vector<2x1x1xi1> to vector<2x8x1xi1>
    %449 = vector.broadcast %447 : vector<1x8x1xi1> to vector<2x8x1xi1>
    %450 = arith.andi %448, %449 : vector<2x8x1xi1>
    %451 = vector.shape_cast %352 : vector<2x32xf32> to vector<2x1x32xf32>
    %452 = vector.shape_cast %450 : vector<2x8x1xi1> to vector<2x8x1xi1>
    %453 = vector.broadcast %452 : vector<2x8x1xi1> to vector<2x8x32xi1>
    %454 = vector.shape_cast %451 : vector<2x1x32xf32> to vector<2x1x32xf32>
    %455 = vector.broadcast %454 : vector<2x1x32xf32> to vector<2x8x32xf32>
    %456 = arith.select %453, %455, %444 : vector<2x8x32xi1>, vector<2x8x32xf32>
    %457 = vector.shape_cast %318 : vector<2x4xf32> to vector<2x1x4xf32>
    %458 = vector.shape_cast %450 : vector<2x8x1xi1> to vector<2x8x1xi1>
    %459 = vector.broadcast %458 : vector<2x8x1xi1> to vector<2x8x4xi1>
    %460 = vector.shape_cast %457 : vector<2x1x4xf32> to vector<2x1x4xf32>
    %461 = vector.broadcast %460 : vector<2x1x4xf32> to vector<2x8x4xf32>
    %462 = arith.select %459, %461, %314 : vector<2x8x4xi1>, vector<2x8x4xf32>
    %463 = vector.extract_strided_slice %0 {offsets = [0, 0, 3], sizes = [2, 1, 1], strides = [1, 1, 1]} : vector<2x1x7xi32> to vector<2x1x1xi32>
    %464 = vector.shape_cast %463 : vector<2x1x1xi32> to vector<2x1xi32>
    %465 = vector.extract_strided_slice %1 {offsets = [0, 0, 3], sizes = [2, 4, 1], strides = [1, 1, 1]} : vector<2x4x7xf32> to vector<2x4x1xf32>
    %466 = vector.shape_cast %465 : vector<2x4x1xf32> to vector<2x4xf32>
    %c0_i32_76 = arith.constant 0 : i32
    %467 = vector.broadcast %c0_i32_76 : i32 to vector<2x1xi32>
    %468 = arith.cmpi ne, %464, %467 : vector<2x1xi32>
    %c7_i32_77 = arith.constant 7 : i32
    %469 = vector.broadcast %c7_i32_77 : i32 to vector<2x1xi32>
    %470 = arith.cmpi ne, %464, %469 : vector<2x1xi32>
    %471 = arith.andi %468, %470 : vector<2x1xi1>
    %c1_i32_78 = arith.constant 1 : i32
    %472 = vector.broadcast %c1_i32_78 : i32 to vector<2x1xi32>
    %473 = arith.subi %464, %472 : vector<2x1xi32>
    %c0_i32_79 = arith.constant 0 : i32
    %c5_i32_80 = arith.constant 5 : i32
    %474 = vector.broadcast %c0_i32_79 : i32 to vector<2x1xi32>
    %475 = arith.maxsi %474, %473 : vector<2x1xi32>
    %476 = vector.broadcast %c5_i32_80 : i32 to vector<2x1xi32>
    %477 = arith.minsi %476, %475 : vector<2x1xi32>
    %478 = tpu.iota {dimensions = array<i32: 1>} : vector<2x6xi32>
    %479 = vector.broadcast %477 : vector<2x1xi32> to vector<2x6xi32>
    %480 = arith.cmpi eq, %479, %478 : vector<2x6xi32>
    %481 = arith.extui %480 : vector<2x6xi1> to vector<2x6xi32>
    %482 = arith.sitofp %481 : vector<2x6xi32> to vector<2x6xf32>
    %483 = vector.extract_strided_slice %466 {offsets = [0, 0], sizes = [2, 1], strides = [1, 1]} : vector<2x4xf32> to vector<2x1xf32>
    %484 = vector.broadcast %483 : vector<2x1xf32> to vector<2x6xf32>
    %485 = arith.mulf %482, %484 : vector<2x6xf32>
    %486 = vector.extract_strided_slice %466 {offsets = [0, 1], sizes = [2, 1], strides = [1, 1]} : vector<2x4xf32> to vector<2x1xf32>
    %487 = vector.broadcast %486 : vector<2x1xf32> to vector<2x6xf32>
    %488 = arith.mulf %482, %487 : vector<2x6xf32>
    %489 = vector.extract_strided_slice %466 {offsets = [0, 2], sizes = [2, 1], strides = [1, 1]} : vector<2x4xf32> to vector<2x1xf32>
    %490 = vector.broadcast %489 : vector<2x1xf32> to vector<2x6xf32>
    %491 = arith.mulf %482, %490 : vector<2x6xf32>
    %492 = vector.extract_strided_slice %466 {offsets = [0, 3], sizes = [2, 1], strides = [1, 1]} : vector<2x4xf32> to vector<2x1xf32>
    %493 = vector.broadcast %492 : vector<2x1xf32> to vector<2x6xf32>
    %494 = arith.mulf %482, %493 : vector<2x6xf32>
    %495 = tpu.concatenate %482, %485, %488, %491, %494 in 1 : vector<2x6xf32>, vector<2x6xf32>, vector<2x6xf32>, vector<2x6xf32>, vector<2x6xf32> -> vector<2x30xf32>
    %496 = arith.truncf %495 : vector<2x30xf32> to vector<2x30xbf16>
    %cst_81 = arith.constant dense<0.000000e+00> : vector<2x256xf32>
    %497 = tpu.matmul %496, %2, %cst_81 {dimension_numbers = #tpu.dot_dimension_numbers<[1], [0], [0], [1], [0, 0, 1, 1], [], []>} : vector<2x30xbf16>, vector<30x256xbf16>, vector<2x256xf32> -> vector<2x256xf32>
    %498 = vector.extract_strided_slice %497 {offsets = [0, 0], sizes = [2, 32], strides = [1, 1]} : vector<2x256xf32> to vector<2x32xf32>
    %499 = vector.extract_strided_slice %497 {offsets = [0, 32], sizes = [2, 32], strides = [1, 1]} : vector<2x256xf32> to vector<2x32xf32>
    %500 = vector.extract_strided_slice %497 {offsets = [0, 64], sizes = [2, 32], strides = [1, 1]} : vector<2x256xf32> to vector<2x32xf32>
    %501 = vector.extract_strided_slice %497 {offsets = [0, 96], sizes = [2, 32], strides = [1, 1]} : vector<2x256xf32> to vector<2x32xf32>
    %502 = vector.shape_cast %501 : vector<2x32xf32> to vector<2x1x32xf32>
    %503 = vector.extract_strided_slice %462 {offsets = [0, 0, 0], sizes = [2, 8, 1], strides = [1, 1, 1]} : vector<2x8x4xf32> to vector<2x8x1xf32>
    %504 = vector.extract_strided_slice %497 {offsets = [0, 128], sizes = [2, 32], strides = [1, 1]} : vector<2x256xf32> to vector<2x32xf32>
    %505 = vector.shape_cast %504 : vector<2x32xf32> to vector<2x1x32xf32>
    %506 = vector.broadcast %503 : vector<2x8x1xf32> to vector<2x8x32xf32>
    %507 = vector.broadcast %505 : vector<2x1x32xf32> to vector<2x8x32xf32>
    %508 = arith.mulf %506, %507 : vector<2x8x32xf32>
    %509 = vector.broadcast %502 : vector<2x1x32xf32> to vector<2x8x32xf32>
    %510 = arith.addf %509, %508 : vector<2x8x32xf32>
    %511 = vector.extract_strided_slice %462 {offsets = [0, 0, 1], sizes = [2, 8, 1], strides = [1, 1, 1]} : vector<2x8x4xf32> to vector<2x8x1xf32>
    %512 = vector.extract_strided_slice %497 {offsets = [0, 160], sizes = [2, 32], strides = [1, 1]} : vector<2x256xf32> to vector<2x32xf32>
    %513 = vector.shape_cast %512 : vector<2x32xf32> to vector<2x1x32xf32>
    %514 = vector.broadcast %511 : vector<2x8x1xf32> to vector<2x8x32xf32>
    %515 = vector.broadcast %513 : vector<2x1x32xf32> to vector<2x8x32xf32>
    %516 = arith.mulf %514, %515 : vector<2x8x32xf32>
    %517 = arith.addf %510, %516 : vector<2x8x32xf32>
    %518 = vector.extract_strided_slice %462 {offsets = [0, 0, 2], sizes = [2, 8, 1], strides = [1, 1, 1]} : vector<2x8x4xf32> to vector<2x8x1xf32>
    %519 = vector.extract_strided_slice %497 {offsets = [0, 192], sizes = [2, 32], strides = [1, 1]} : vector<2x256xf32> to vector<2x32xf32>
    %520 = vector.shape_cast %519 : vector<2x32xf32> to vector<2x1x32xf32>
    %521 = vector.broadcast %518 : vector<2x8x1xf32> to vector<2x8x32xf32>
    %522 = vector.broadcast %520 : vector<2x1x32xf32> to vector<2x8x32xf32>
    %523 = arith.mulf %521, %522 : vector<2x8x32xf32>
    %524 = arith.addf %517, %523 : vector<2x8x32xf32>
    %525 = vector.extract_strided_slice %462 {offsets = [0, 0, 3], sizes = [2, 8, 1], strides = [1, 1, 1]} : vector<2x8x4xf32> to vector<2x8x1xf32>
    %526 = vector.extract_strided_slice %497 {offsets = [0, 224], sizes = [2, 32], strides = [1, 1]} : vector<2x256xf32> to vector<2x32xf32>
    %527 = vector.shape_cast %526 : vector<2x32xf32> to vector<2x1x32xf32>
    %528 = vector.broadcast %525 : vector<2x8x1xf32> to vector<2x8x32xf32>
    %529 = vector.broadcast %527 : vector<2x1x32xf32> to vector<2x8x32xf32>
    %530 = arith.mulf %528, %529 : vector<2x8x32xf32>
    %531 = arith.addf %524, %530 : vector<2x8x32xf32>
    %cst_82 = arith.constant 0.000000e+00 : f32
    %532 = vector.broadcast %cst_82 : f32 to vector<2x8x32xf32>
    %533 = arith.cmpf oge, %531, %532 : vector<2x8x32xf32>
    %cst_83 = arith.constant 0.00999999977 : f32
    %534 = vector.broadcast %cst_83 : f32 to vector<2x8x32xf32>
    %535 = arith.mulf %534, %531 : vector<2x8x32xf32>
    %536 = arith.select %533, %531, %535 : vector<2x8x32xi1>, vector<2x8x32xf32>
    %537 = tpu.concatenate %456, %536 in 2 : vector<2x8x32xf32>, vector<2x8x32xf32> -> vector<2x8x64xf32>
    %538 = vector.shape_cast %537 : vector<2x8x64xf32> to vector<16x64xf32>
    %539 = arith.truncf %538 : vector<16x64xf32> to vector<16x64xbf16>
    %cst_84 = arith.constant dense<0.000000e+00> : vector<16x32xf32>
    %540 = tpu.matmul %539, %3, %cst_84 {dimension_numbers = #tpu.dot_dimension_numbers<[1], [0], [0], [1], [0, 0, 1, 1], [], []>} : vector<16x64xbf16>, vector<64x32xbf16>, vector<16x32xf32> -> vector<16x32xf32>
    %541 = vector.shape_cast %540 : vector<16x32xf32> to vector<2x8x32xf32>
    %542 = vector.shape_cast %499 : vector<2x32xf32> to vector<2x1x32xf32>
    %543 = vector.broadcast %542 : vector<2x1x32xf32> to vector<2x8x32xf32>
    %544 = arith.addf %541, %543 : vector<2x8x32xf32>
    %545 = vector.shape_cast %4 : vector<1x32xf32> to vector<1x1x32xf32>
    %546 = vector.broadcast %545 : vector<1x1x32xf32> to vector<2x8x32xf32>
    %547 = arith.addf %544, %546 : vector<2x8x32xf32>
    %cst_85 = arith.constant 0.000000e+00 : f32
    %548 = vector.broadcast %cst_85 : f32 to vector<2x8x32xf32>
    %549 = arith.cmpf oge, %547, %548 : vector<2x8x32xf32>
    %cst_86 = arith.constant 0.00999999977 : f32
    %550 = vector.broadcast %cst_86 : f32 to vector<2x8x32xf32>
    %551 = arith.mulf %550, %547 : vector<2x8x32xf32>
    %552 = arith.select %549, %547, %551 : vector<2x8x32xi1>, vector<2x8x32xf32>
    %553 = vector.shape_cast %552 : vector<2x8x32xf32> to vector<16x32xf32>
    %554 = arith.truncf %553 : vector<16x32xf32> to vector<16x32xbf16>
    %cst_87 = arith.constant dense<0.000000e+00> : vector<16x32xf32>
    %555 = tpu.matmul %554, %5, %cst_87 {dimension_numbers = #tpu.dot_dimension_numbers<[1], [0], [0], [1], [0, 0, 1, 1], [], []>} : vector<16x32xbf16>, vector<32x32xbf16>, vector<16x32xf32> -> vector<16x32xf32>
    %556 = vector.broadcast %6 : vector<1x32xf32> to vector<16x32xf32>
    %557 = arith.addf %555, %556 : vector<16x32xf32>
    %558 = vector.shape_cast %557 : vector<16x32xf32> to vector<2x8x32xf32>
    %559 = math.absf %456 : vector<2x8x32xf32>
    %cst_88 = arith.constant dense<0xFF800000> : vector<2x8xf32>
    %560 = vector.multi_reduction <maximumf>, %559, %cst_88 [2] : vector<2x8x32xf32> to vector<2x8xf32>
    %cst_89 = arith.constant 0.000000e+00 : f32
    %561 = vector.broadcast %cst_89 : f32 to vector<2x8xf32>
    %562 = arith.cmpf oeq, %560, %561 : vector<2x8xf32>
    %563 = math.absf %462 : vector<2x8x4xf32>
    %cst_90 = arith.constant dense<0xFF800000> : vector<2x8xf32>
    %564 = vector.multi_reduction <maximumf>, %563, %cst_90 [2] : vector<2x8x4xf32> to vector<2x8xf32>
    %cst_91 = arith.constant 0.000000e+00 : f32
    %565 = vector.broadcast %cst_91 : f32 to vector<2x8xf32>
    %566 = arith.cmpf oeq, %564, %565 : vector<2x8xf32>
    %567 = arith.andi %562, %566 : vector<2x8xi1>
    %568 = vector.shape_cast %567 : vector<2x8xi1> to vector<2x8x1xi1>
    %cst_92 = arith.constant -1.000000e+09 : f32
    %569 = vector.shape_cast %568 : vector<2x8x1xi1> to vector<2x8x1xi1>
    %570 = vector.broadcast %569 : vector<2x8x1xi1> to vector<2x8x32xi1>
    %571 = vector.broadcast %cst_92 : f32 to vector<2x8x32xf32>
    %572 = arith.select %570, %571, %558 : vector<2x8x32xi1>, vector<2x8x32xf32>
    %cst_93 = arith.constant dense<0xFF800000> : vector<2x32xf32>
    %573 = vector.multi_reduction <maximumf>, %572, %cst_93 [1] : vector<2x8x32xf32> to vector<2x32xf32>
    %574 = vector.shape_cast %573 : vector<2x32xf32> to vector<2x1x32xf32>
    %575 = vector.broadcast %574 : vector<2x1x32xf32> to vector<2x8x32xf32>
    %576 = arith.subf %572, %575 : vector<2x8x32xf32>
    %577 = math.exp %576 : vector<2x8x32xf32>
    %cst_94 = arith.constant dense<0.000000e+00> : vector<2x32xf32>
    %578 = vector.multi_reduction <add>, %577, %cst_94 [1] : vector<2x8x32xf32> to vector<2x32xf32>
    %579 = vector.shape_cast %578 : vector<2x32xf32> to vector<2x1x32xf32>
    %580 = tpu.reciprocal %579 {approx = true} : vector<2x1x32xf32> -> vector<2x1x32xf32>
    %581 = vector.broadcast %580 : vector<2x1x32xf32> to vector<2x8x32xf32>
    %582 = arith.mulf %577, %581 : vector<2x8x32xf32>
    %583 = vector.shape_cast %498 : vector<2x32xf32> to vector<2x1x32xf32>
    %584 = vector.broadcast %583 : vector<2x1x32xf32> to vector<2x8x32xf32>
    %585 = arith.mulf %582, %584 : vector<2x8x32xf32>
    %586 = vector.shape_cast %471 : vector<2x1xi1> to vector<2x1x1xi1>
    %587 = arith.subf %456, %585 : vector<2x8x32xf32>
    %cst_95 = arith.constant 0.000000e+00 : f32
    %588 = vector.broadcast %cst_95 : f32 to vector<2x8x32xf32>
    %589 = arith.maximumf %587, %588 : vector<2x8x32xf32>
    %590 = vector.shape_cast %586 : vector<2x1x1xi1> to vector<2x1x1xi1>
    %591 = vector.broadcast %590 : vector<2x1x1xi1> to vector<2x8x32xi1>
    %592 = arith.select %591, %589, %456 : vector<2x8x32xi1>, vector<2x8x32xf32>
    %593 = tpu.iota {dimensions = array<i32: 1>} : vector<1x8x1xi32>
    %c4_i32 = arith.constant 4 : i32
    %594 = vector.broadcast %c4_i32 : i32 to vector<1x8x1xi32>
    %595 = arith.cmpi eq, %593, %594 : vector<1x8x1xi32>
    %596 = vector.broadcast %586 : vector<2x1x1xi1> to vector<2x8x1xi1>
    %597 = vector.broadcast %595 : vector<1x8x1xi1> to vector<2x8x1xi1>
    %598 = arith.andi %596, %597 : vector<2x8x1xi1>
    %599 = vector.shape_cast %500 : vector<2x32xf32> to vector<2x1x32xf32>
    %600 = vector.shape_cast %598 : vector<2x8x1xi1> to vector<2x8x1xi1>
    %601 = vector.broadcast %600 : vector<2x8x1xi1> to vector<2x8x32xi1>
    %602 = vector.shape_cast %599 : vector<2x1x32xf32> to vector<2x1x32xf32>
    %603 = vector.broadcast %602 : vector<2x1x32xf32> to vector<2x8x32xf32>
    %604 = arith.select %601, %603, %592 : vector<2x8x32xi1>, vector<2x8x32xf32>
    %605 = vector.shape_cast %466 : vector<2x4xf32> to vector<2x1x4xf32>
    %606 = vector.shape_cast %598 : vector<2x8x1xi1> to vector<2x8x1xi1>
    %607 = vector.broadcast %606 : vector<2x8x1xi1> to vector<2x8x4xi1>
    %608 = vector.shape_cast %605 : vector<2x1x4xf32> to vector<2x1x4xf32>
    %609 = vector.broadcast %608 : vector<2x1x4xf32> to vector<2x8x4xf32>
    %610 = arith.select %607, %609, %462 : vector<2x8x4xi1>, vector<2x8x4xf32>
    %611 = vector.extract_strided_slice %0 {offsets = [0, 0, 4], sizes = [2, 1, 1], strides = [1, 1, 1]} : vector<2x1x7xi32> to vector<2x1x1xi32>
    %612 = vector.shape_cast %611 : vector<2x1x1xi32> to vector<2x1xi32>
    %613 = vector.extract_strided_slice %1 {offsets = [0, 0, 4], sizes = [2, 4, 1], strides = [1, 1, 1]} : vector<2x4x7xf32> to vector<2x4x1xf32>
    %614 = vector.shape_cast %613 : vector<2x4x1xf32> to vector<2x4xf32>
    %c0_i32_96 = arith.constant 0 : i32
    %615 = vector.broadcast %c0_i32_96 : i32 to vector<2x1xi32>
    %616 = arith.cmpi ne, %612, %615 : vector<2x1xi32>
    %c7_i32_97 = arith.constant 7 : i32
    %617 = vector.broadcast %c7_i32_97 : i32 to vector<2x1xi32>
    %618 = arith.cmpi ne, %612, %617 : vector<2x1xi32>
    %619 = arith.andi %616, %618 : vector<2x1xi1>
    %c1_i32_98 = arith.constant 1 : i32
    %620 = vector.broadcast %c1_i32_98 : i32 to vector<2x1xi32>
    %621 = arith.subi %612, %620 : vector<2x1xi32>
    %c0_i32_99 = arith.constant 0 : i32
    %c5_i32_100 = arith.constant 5 : i32
    %622 = vector.broadcast %c0_i32_99 : i32 to vector<2x1xi32>
    %623 = arith.maxsi %622, %621 : vector<2x1xi32>
    %624 = vector.broadcast %c5_i32_100 : i32 to vector<2x1xi32>
    %625 = arith.minsi %624, %623 : vector<2x1xi32>
    %626 = tpu.iota {dimensions = array<i32: 1>} : vector<2x6xi32>
    %627 = vector.broadcast %625 : vector<2x1xi32> to vector<2x6xi32>
    %628 = arith.cmpi eq, %627, %626 : vector<2x6xi32>
    %629 = arith.extui %628 : vector<2x6xi1> to vector<2x6xi32>
    %630 = arith.sitofp %629 : vector<2x6xi32> to vector<2x6xf32>
    %631 = vector.extract_strided_slice %614 {offsets = [0, 0], sizes = [2, 1], strides = [1, 1]} : vector<2x4xf32> to vector<2x1xf32>
    %632 = vector.broadcast %631 : vector<2x1xf32> to vector<2x6xf32>
    %633 = arith.mulf %630, %632 : vector<2x6xf32>
    %634 = vector.extract_strided_slice %614 {offsets = [0, 1], sizes = [2, 1], strides = [1, 1]} : vector<2x4xf32> to vector<2x1xf32>
    %635 = vector.broadcast %634 : vector<2x1xf32> to vector<2x6xf32>
    %636 = arith.mulf %630, %635 : vector<2x6xf32>
    %637 = vector.extract_strided_slice %614 {offsets = [0, 2], sizes = [2, 1], strides = [1, 1]} : vector<2x4xf32> to vector<2x1xf32>
    %638 = vector.broadcast %637 : vector<2x1xf32> to vector<2x6xf32>
    %639 = arith.mulf %630, %638 : vector<2x6xf32>
    %640 = vector.extract_strided_slice %614 {offsets = [0, 3], sizes = [2, 1], strides = [1, 1]} : vector<2x4xf32> to vector<2x1xf32>
    %641 = vector.broadcast %640 : vector<2x1xf32> to vector<2x6xf32>
    %642 = arith.mulf %630, %641 : vector<2x6xf32>
    %643 = tpu.concatenate %630, %633, %636, %639, %642 in 1 : vector<2x6xf32>, vector<2x6xf32>, vector<2x6xf32>, vector<2x6xf32>, vector<2x6xf32> -> vector<2x30xf32>
    %644 = arith.truncf %643 : vector<2x30xf32> to vector<2x30xbf16>
    %cst_101 = arith.constant dense<0.000000e+00> : vector<2x256xf32>
    %645 = tpu.matmul %644, %2, %cst_101 {dimension_numbers = #tpu.dot_dimension_numbers<[1], [0], [0], [1], [0, 0, 1, 1], [], []>} : vector<2x30xbf16>, vector<30x256xbf16>, vector<2x256xf32> -> vector<2x256xf32>
    %646 = vector.extract_strided_slice %645 {offsets = [0, 0], sizes = [2, 32], strides = [1, 1]} : vector<2x256xf32> to vector<2x32xf32>
    %647 = vector.extract_strided_slice %645 {offsets = [0, 32], sizes = [2, 32], strides = [1, 1]} : vector<2x256xf32> to vector<2x32xf32>
    %648 = vector.extract_strided_slice %645 {offsets = [0, 64], sizes = [2, 32], strides = [1, 1]} : vector<2x256xf32> to vector<2x32xf32>
    %649 = vector.extract_strided_slice %645 {offsets = [0, 96], sizes = [2, 32], strides = [1, 1]} : vector<2x256xf32> to vector<2x32xf32>
    %650 = vector.shape_cast %649 : vector<2x32xf32> to vector<2x1x32xf32>
    %651 = vector.extract_strided_slice %610 {offsets = [0, 0, 0], sizes = [2, 8, 1], strides = [1, 1, 1]} : vector<2x8x4xf32> to vector<2x8x1xf32>
    %652 = vector.extract_strided_slice %645 {offsets = [0, 128], sizes = [2, 32], strides = [1, 1]} : vector<2x256xf32> to vector<2x32xf32>
    %653 = vector.shape_cast %652 : vector<2x32xf32> to vector<2x1x32xf32>
    %654 = vector.broadcast %651 : vector<2x8x1xf32> to vector<2x8x32xf32>
    %655 = vector.broadcast %653 : vector<2x1x32xf32> to vector<2x8x32xf32>
    %656 = arith.mulf %654, %655 : vector<2x8x32xf32>
    %657 = vector.broadcast %650 : vector<2x1x32xf32> to vector<2x8x32xf32>
    %658 = arith.addf %657, %656 : vector<2x8x32xf32>
    %659 = vector.extract_strided_slice %610 {offsets = [0, 0, 1], sizes = [2, 8, 1], strides = [1, 1, 1]} : vector<2x8x4xf32> to vector<2x8x1xf32>
    %660 = vector.extract_strided_slice %645 {offsets = [0, 160], sizes = [2, 32], strides = [1, 1]} : vector<2x256xf32> to vector<2x32xf32>
    %661 = vector.shape_cast %660 : vector<2x32xf32> to vector<2x1x32xf32>
    %662 = vector.broadcast %659 : vector<2x8x1xf32> to vector<2x8x32xf32>
    %663 = vector.broadcast %661 : vector<2x1x32xf32> to vector<2x8x32xf32>
    %664 = arith.mulf %662, %663 : vector<2x8x32xf32>
    %665 = arith.addf %658, %664 : vector<2x8x32xf32>
    %666 = vector.extract_strided_slice %610 {offsets = [0, 0, 2], sizes = [2, 8, 1], strides = [1, 1, 1]} : vector<2x8x4xf32> to vector<2x8x1xf32>
    %667 = vector.extract_strided_slice %645 {offsets = [0, 192], sizes = [2, 32], strides = [1, 1]} : vector<2x256xf32> to vector<2x32xf32>
    %668 = vector.shape_cast %667 : vector<2x32xf32> to vector<2x1x32xf32>
    %669 = vector.broadcast %666 : vector<2x8x1xf32> to vector<2x8x32xf32>
    %670 = vector.broadcast %668 : vector<2x1x32xf32> to vector<2x8x32xf32>
    %671 = arith.mulf %669, %670 : vector<2x8x32xf32>
    %672 = arith.addf %665, %671 : vector<2x8x32xf32>
    %673 = vector.extract_strided_slice %610 {offsets = [0, 0, 3], sizes = [2, 8, 1], strides = [1, 1, 1]} : vector<2x8x4xf32> to vector<2x8x1xf32>
    %674 = vector.extract_strided_slice %645 {offsets = [0, 224], sizes = [2, 32], strides = [1, 1]} : vector<2x256xf32> to vector<2x32xf32>
    %675 = vector.shape_cast %674 : vector<2x32xf32> to vector<2x1x32xf32>
    %676 = vector.broadcast %673 : vector<2x8x1xf32> to vector<2x8x32xf32>
    %677 = vector.broadcast %675 : vector<2x1x32xf32> to vector<2x8x32xf32>
    %678 = arith.mulf %676, %677 : vector<2x8x32xf32>
    %679 = arith.addf %672, %678 : vector<2x8x32xf32>
    %cst_102 = arith.constant 0.000000e+00 : f32
    %680 = vector.broadcast %cst_102 : f32 to vector<2x8x32xf32>
    %681 = arith.cmpf oge, %679, %680 : vector<2x8x32xf32>
    %cst_103 = arith.constant 0.00999999977 : f32
    %682 = vector.broadcast %cst_103 : f32 to vector<2x8x32xf32>
    %683 = arith.mulf %682, %679 : vector<2x8x32xf32>
    %684 = arith.select %681, %679, %683 : vector<2x8x32xi1>, vector<2x8x32xf32>
    %685 = tpu.concatenate %604, %684 in 2 : vector<2x8x32xf32>, vector<2x8x32xf32> -> vector<2x8x64xf32>
    %686 = vector.shape_cast %685 : vector<2x8x64xf32> to vector<16x64xf32>
    %687 = arith.truncf %686 : vector<16x64xf32> to vector<16x64xbf16>
    %cst_104 = arith.constant dense<0.000000e+00> : vector<16x32xf32>
    %688 = tpu.matmul %687, %3, %cst_104 {dimension_numbers = #tpu.dot_dimension_numbers<[1], [0], [0], [1], [0, 0, 1, 1], [], []>} : vector<16x64xbf16>, vector<64x32xbf16>, vector<16x32xf32> -> vector<16x32xf32>
    %689 = vector.shape_cast %688 : vector<16x32xf32> to vector<2x8x32xf32>
    %690 = vector.shape_cast %647 : vector<2x32xf32> to vector<2x1x32xf32>
    %691 = vector.broadcast %690 : vector<2x1x32xf32> to vector<2x8x32xf32>
    %692 = arith.addf %689, %691 : vector<2x8x32xf32>
    %693 = vector.shape_cast %4 : vector<1x32xf32> to vector<1x1x32xf32>
    %694 = vector.broadcast %693 : vector<1x1x32xf32> to vector<2x8x32xf32>
    %695 = arith.addf %692, %694 : vector<2x8x32xf32>
    %cst_105 = arith.constant 0.000000e+00 : f32
    %696 = vector.broadcast %cst_105 : f32 to vector<2x8x32xf32>
    %697 = arith.cmpf oge, %695, %696 : vector<2x8x32xf32>
    %cst_106 = arith.constant 0.00999999977 : f32
    %698 = vector.broadcast %cst_106 : f32 to vector<2x8x32xf32>
    %699 = arith.mulf %698, %695 : vector<2x8x32xf32>
    %700 = arith.select %697, %695, %699 : vector<2x8x32xi1>, vector<2x8x32xf32>
    %701 = vector.shape_cast %700 : vector<2x8x32xf32> to vector<16x32xf32>
    %702 = arith.truncf %701 : vector<16x32xf32> to vector<16x32xbf16>
    %cst_107 = arith.constant dense<0.000000e+00> : vector<16x32xf32>
    %703 = tpu.matmul %702, %5, %cst_107 {dimension_numbers = #tpu.dot_dimension_numbers<[1], [0], [0], [1], [0, 0, 1, 1], [], []>} : vector<16x32xbf16>, vector<32x32xbf16>, vector<16x32xf32> -> vector<16x32xf32>
    %704 = vector.broadcast %6 : vector<1x32xf32> to vector<16x32xf32>
    %705 = arith.addf %703, %704 : vector<16x32xf32>
    %706 = vector.shape_cast %705 : vector<16x32xf32> to vector<2x8x32xf32>
    %707 = math.absf %604 : vector<2x8x32xf32>
    %cst_108 = arith.constant dense<0xFF800000> : vector<2x8xf32>
    %708 = vector.multi_reduction <maximumf>, %707, %cst_108 [2] : vector<2x8x32xf32> to vector<2x8xf32>
    %cst_109 = arith.constant 0.000000e+00 : f32
    %709 = vector.broadcast %cst_109 : f32 to vector<2x8xf32>
    %710 = arith.cmpf oeq, %708, %709 : vector<2x8xf32>
    %711 = math.absf %610 : vector<2x8x4xf32>
    %cst_110 = arith.constant dense<0xFF800000> : vector<2x8xf32>
    %712 = vector.multi_reduction <maximumf>, %711, %cst_110 [2] : vector<2x8x4xf32> to vector<2x8xf32>
    %cst_111 = arith.constant 0.000000e+00 : f32
    %713 = vector.broadcast %cst_111 : f32 to vector<2x8xf32>
    %714 = arith.cmpf oeq, %712, %713 : vector<2x8xf32>
    %715 = arith.andi %710, %714 : vector<2x8xi1>
    %716 = vector.shape_cast %715 : vector<2x8xi1> to vector<2x8x1xi1>
    %cst_112 = arith.constant -1.000000e+09 : f32
    %717 = vector.shape_cast %716 : vector<2x8x1xi1> to vector<2x8x1xi1>
    %718 = vector.broadcast %717 : vector<2x8x1xi1> to vector<2x8x32xi1>
    %719 = vector.broadcast %cst_112 : f32 to vector<2x8x32xf32>
    %720 = arith.select %718, %719, %706 : vector<2x8x32xi1>, vector<2x8x32xf32>
    %cst_113 = arith.constant dense<0xFF800000> : vector<2x32xf32>
    %721 = vector.multi_reduction <maximumf>, %720, %cst_113 [1] : vector<2x8x32xf32> to vector<2x32xf32>
    %722 = vector.shape_cast %721 : vector<2x32xf32> to vector<2x1x32xf32>
    %723 = vector.broadcast %722 : vector<2x1x32xf32> to vector<2x8x32xf32>
    %724 = arith.subf %720, %723 : vector<2x8x32xf32>
    %725 = math.exp %724 : vector<2x8x32xf32>
    %cst_114 = arith.constant dense<0.000000e+00> : vector<2x32xf32>
    %726 = vector.multi_reduction <add>, %725, %cst_114 [1] : vector<2x8x32xf32> to vector<2x32xf32>
    %727 = vector.shape_cast %726 : vector<2x32xf32> to vector<2x1x32xf32>
    %728 = tpu.reciprocal %727 {approx = true} : vector<2x1x32xf32> -> vector<2x1x32xf32>
    %729 = vector.broadcast %728 : vector<2x1x32xf32> to vector<2x8x32xf32>
    %730 = arith.mulf %725, %729 : vector<2x8x32xf32>
    %731 = vector.shape_cast %646 : vector<2x32xf32> to vector<2x1x32xf32>
    %732 = vector.broadcast %731 : vector<2x1x32xf32> to vector<2x8x32xf32>
    %733 = arith.mulf %730, %732 : vector<2x8x32xf32>
    %734 = vector.shape_cast %619 : vector<2x1xi1> to vector<2x1x1xi1>
    %735 = arith.subf %604, %733 : vector<2x8x32xf32>
    %cst_115 = arith.constant 0.000000e+00 : f32
    %736 = vector.broadcast %cst_115 : f32 to vector<2x8x32xf32>
    %737 = arith.maximumf %735, %736 : vector<2x8x32xf32>
    %738 = vector.shape_cast %734 : vector<2x1x1xi1> to vector<2x1x1xi1>
    %739 = vector.broadcast %738 : vector<2x1x1xi1> to vector<2x8x32xi1>
    %740 = arith.select %739, %737, %604 : vector<2x8x32xi1>, vector<2x8x32xf32>
    %741 = tpu.iota {dimensions = array<i32: 1>} : vector<1x8x1xi32>
    %c5_i32_116 = arith.constant 5 : i32
    %742 = vector.broadcast %c5_i32_116 : i32 to vector<1x8x1xi32>
    %743 = arith.cmpi eq, %741, %742 : vector<1x8x1xi32>
    %744 = vector.broadcast %734 : vector<2x1x1xi1> to vector<2x8x1xi1>
    %745 = vector.broadcast %743 : vector<1x8x1xi1> to vector<2x8x1xi1>
    %746 = arith.andi %744, %745 : vector<2x8x1xi1>
    %747 = vector.shape_cast %648 : vector<2x32xf32> to vector<2x1x32xf32>
    %748 = vector.shape_cast %746 : vector<2x8x1xi1> to vector<2x8x1xi1>
    %749 = vector.broadcast %748 : vector<2x8x1xi1> to vector<2x8x32xi1>
    %750 = vector.shape_cast %747 : vector<2x1x32xf32> to vector<2x1x32xf32>
    %751 = vector.broadcast %750 : vector<2x1x32xf32> to vector<2x8x32xf32>
    %752 = arith.select %749, %751, %740 : vector<2x8x32xi1>, vector<2x8x32xf32>
    %753 = vector.shape_cast %614 : vector<2x4xf32> to vector<2x1x4xf32>
    %754 = vector.shape_cast %746 : vector<2x8x1xi1> to vector<2x8x1xi1>
    %755 = vector.broadcast %754 : vector<2x8x1xi1> to vector<2x8x4xi1>
    %756 = vector.shape_cast %753 : vector<2x1x4xf32> to vector<2x1x4xf32>
    %757 = vector.broadcast %756 : vector<2x1x4xf32> to vector<2x8x4xf32>
    %758 = arith.select %755, %757, %610 : vector<2x8x4xi1>, vector<2x8x4xf32>
    %759 = vector.extract_strided_slice %0 {offsets = [0, 0, 5], sizes = [2, 1, 1], strides = [1, 1, 1]} : vector<2x1x7xi32> to vector<2x1x1xi32>
    %760 = vector.shape_cast %759 : vector<2x1x1xi32> to vector<2x1xi32>
    %761 = vector.extract_strided_slice %1 {offsets = [0, 0, 5], sizes = [2, 4, 1], strides = [1, 1, 1]} : vector<2x4x7xf32> to vector<2x4x1xf32>
    %762 = vector.shape_cast %761 : vector<2x4x1xf32> to vector<2x4xf32>
    %c0_i32_117 = arith.constant 0 : i32
    %763 = vector.broadcast %c0_i32_117 : i32 to vector<2x1xi32>
    %764 = arith.cmpi ne, %760, %763 : vector<2x1xi32>
    %c7_i32_118 = arith.constant 7 : i32
    %765 = vector.broadcast %c7_i32_118 : i32 to vector<2x1xi32>
    %766 = arith.cmpi ne, %760, %765 : vector<2x1xi32>
    %767 = arith.andi %764, %766 : vector<2x1xi1>
    %c1_i32_119 = arith.constant 1 : i32
    %768 = vector.broadcast %c1_i32_119 : i32 to vector<2x1xi32>
    %769 = arith.subi %760, %768 : vector<2x1xi32>
    %c0_i32_120 = arith.constant 0 : i32
    %c5_i32_121 = arith.constant 5 : i32
    %770 = vector.broadcast %c0_i32_120 : i32 to vector<2x1xi32>
    %771 = arith.maxsi %770, %769 : vector<2x1xi32>
    %772 = vector.broadcast %c5_i32_121 : i32 to vector<2x1xi32>
    %773 = arith.minsi %772, %771 : vector<2x1xi32>
    %774 = tpu.iota {dimensions = array<i32: 1>} : vector<2x6xi32>
    %775 = vector.broadcast %773 : vector<2x1xi32> to vector<2x6xi32>
    %776 = arith.cmpi eq, %775, %774 : vector<2x6xi32>
    %777 = arith.extui %776 : vector<2x6xi1> to vector<2x6xi32>
    %778 = arith.sitofp %777 : vector<2x6xi32> to vector<2x6xf32>
    %779 = vector.extract_strided_slice %762 {offsets = [0, 0], sizes = [2, 1], strides = [1, 1]} : vector<2x4xf32> to vector<2x1xf32>
    %780 = vector.broadcast %779 : vector<2x1xf32> to vector<2x6xf32>
    %781 = arith.mulf %778, %780 : vector<2x6xf32>
    %782 = vector.extract_strided_slice %762 {offsets = [0, 1], sizes = [2, 1], strides = [1, 1]} : vector<2x4xf32> to vector<2x1xf32>
    %783 = vector.broadcast %782 : vector<2x1xf32> to vector<2x6xf32>
    %784 = arith.mulf %778, %783 : vector<2x6xf32>
    %785 = vector.extract_strided_slice %762 {offsets = [0, 2], sizes = [2, 1], strides = [1, 1]} : vector<2x4xf32> to vector<2x1xf32>
    %786 = vector.broadcast %785 : vector<2x1xf32> to vector<2x6xf32>
    %787 = arith.mulf %778, %786 : vector<2x6xf32>
    %788 = vector.extract_strided_slice %762 {offsets = [0, 3], sizes = [2, 1], strides = [1, 1]} : vector<2x4xf32> to vector<2x1xf32>
    %789 = vector.broadcast %788 : vector<2x1xf32> to vector<2x6xf32>
    %790 = arith.mulf %778, %789 : vector<2x6xf32>
    %791 = tpu.concatenate %778, %781, %784, %787, %790 in 1 : vector<2x6xf32>, vector<2x6xf32>, vector<2x6xf32>, vector<2x6xf32>, vector<2x6xf32> -> vector<2x30xf32>
    %792 = arith.truncf %791 : vector<2x30xf32> to vector<2x30xbf16>
    %cst_122 = arith.constant dense<0.000000e+00> : vector<2x256xf32>
    %793 = tpu.matmul %792, %2, %cst_122 {dimension_numbers = #tpu.dot_dimension_numbers<[1], [0], [0], [1], [0, 0, 1, 1], [], []>} : vector<2x30xbf16>, vector<30x256xbf16>, vector<2x256xf32> -> vector<2x256xf32>
    %794 = vector.extract_strided_slice %793 {offsets = [0, 0], sizes = [2, 32], strides = [1, 1]} : vector<2x256xf32> to vector<2x32xf32>
    %795 = vector.extract_strided_slice %793 {offsets = [0, 32], sizes = [2, 32], strides = [1, 1]} : vector<2x256xf32> to vector<2x32xf32>
    %796 = vector.extract_strided_slice %793 {offsets = [0, 64], sizes = [2, 32], strides = [1, 1]} : vector<2x256xf32> to vector<2x32xf32>
    %797 = vector.extract_strided_slice %793 {offsets = [0, 96], sizes = [2, 32], strides = [1, 1]} : vector<2x256xf32> to vector<2x32xf32>
    %798 = vector.shape_cast %797 : vector<2x32xf32> to vector<2x1x32xf32>
    %799 = vector.extract_strided_slice %758 {offsets = [0, 0, 0], sizes = [2, 8, 1], strides = [1, 1, 1]} : vector<2x8x4xf32> to vector<2x8x1xf32>
    %800 = vector.extract_strided_slice %793 {offsets = [0, 128], sizes = [2, 32], strides = [1, 1]} : vector<2x256xf32> to vector<2x32xf32>
    %801 = vector.shape_cast %800 : vector<2x32xf32> to vector<2x1x32xf32>
    %802 = vector.broadcast %799 : vector<2x8x1xf32> to vector<2x8x32xf32>
    %803 = vector.broadcast %801 : vector<2x1x32xf32> to vector<2x8x32xf32>
    %804 = arith.mulf %802, %803 : vector<2x8x32xf32>
    %805 = vector.broadcast %798 : vector<2x1x32xf32> to vector<2x8x32xf32>
    %806 = arith.addf %805, %804 : vector<2x8x32xf32>
    %807 = vector.extract_strided_slice %758 {offsets = [0, 0, 1], sizes = [2, 8, 1], strides = [1, 1, 1]} : vector<2x8x4xf32> to vector<2x8x1xf32>
    %808 = vector.extract_strided_slice %793 {offsets = [0, 160], sizes = [2, 32], strides = [1, 1]} : vector<2x256xf32> to vector<2x32xf32>
    %809 = vector.shape_cast %808 : vector<2x32xf32> to vector<2x1x32xf32>
    %810 = vector.broadcast %807 : vector<2x8x1xf32> to vector<2x8x32xf32>
    %811 = vector.broadcast %809 : vector<2x1x32xf32> to vector<2x8x32xf32>
    %812 = arith.mulf %810, %811 : vector<2x8x32xf32>
    %813 = arith.addf %806, %812 : vector<2x8x32xf32>
    %814 = vector.extract_strided_slice %758 {offsets = [0, 0, 2], sizes = [2, 8, 1], strides = [1, 1, 1]} : vector<2x8x4xf32> to vector<2x8x1xf32>
    %815 = vector.extract_strided_slice %793 {offsets = [0, 192], sizes = [2, 32], strides = [1, 1]} : vector<2x256xf32> to vector<2x32xf32>
    %816 = vector.shape_cast %815 : vector<2x32xf32> to vector<2x1x32xf32>
    %817 = vector.broadcast %814 : vector<2x8x1xf32> to vector<2x8x32xf32>
    %818 = vector.broadcast %816 : vector<2x1x32xf32> to vector<2x8x32xf32>
    %819 = arith.mulf %817, %818 : vector<2x8x32xf32>
    %820 = arith.addf %813, %819 : vector<2x8x32xf32>
    %821 = vector.extract_strided_slice %758 {offsets = [0, 0, 3], sizes = [2, 8, 1], strides = [1, 1, 1]} : vector<2x8x4xf32> to vector<2x8x1xf32>
    %822 = vector.extract_strided_slice %793 {offsets = [0, 224], sizes = [2, 32], strides = [1, 1]} : vector<2x256xf32> to vector<2x32xf32>
    %823 = vector.shape_cast %822 : vector<2x32xf32> to vector<2x1x32xf32>
    %824 = vector.broadcast %821 : vector<2x8x1xf32> to vector<2x8x32xf32>
    %825 = vector.broadcast %823 : vector<2x1x32xf32> to vector<2x8x32xf32>
    %826 = arith.mulf %824, %825 : vector<2x8x32xf32>
    %827 = arith.addf %820, %826 : vector<2x8x32xf32>
    %cst_123 = arith.constant 0.000000e+00 : f32
    %828 = vector.broadcast %cst_123 : f32 to vector<2x8x32xf32>
    %829 = arith.cmpf oge, %827, %828 : vector<2x8x32xf32>
    %cst_124 = arith.constant 0.00999999977 : f32
    %830 = vector.broadcast %cst_124 : f32 to vector<2x8x32xf32>
    %831 = arith.mulf %830, %827 : vector<2x8x32xf32>
    %832 = arith.select %829, %827, %831 : vector<2x8x32xi1>, vector<2x8x32xf32>
    %833 = tpu.concatenate %752, %832 in 2 : vector<2x8x32xf32>, vector<2x8x32xf32> -> vector<2x8x64xf32>
    %834 = vector.shape_cast %833 : vector<2x8x64xf32> to vector<16x64xf32>
    %835 = arith.truncf %834 : vector<16x64xf32> to vector<16x64xbf16>
    %cst_125 = arith.constant dense<0.000000e+00> : vector<16x32xf32>
    %836 = tpu.matmul %835, %3, %cst_125 {dimension_numbers = #tpu.dot_dimension_numbers<[1], [0], [0], [1], [0, 0, 1, 1], [], []>} : vector<16x64xbf16>, vector<64x32xbf16>, vector<16x32xf32> -> vector<16x32xf32>
    %837 = vector.shape_cast %836 : vector<16x32xf32> to vector<2x8x32xf32>
    %838 = vector.shape_cast %795 : vector<2x32xf32> to vector<2x1x32xf32>
    %839 = vector.broadcast %838 : vector<2x1x32xf32> to vector<2x8x32xf32>
    %840 = arith.addf %837, %839 : vector<2x8x32xf32>
    %841 = vector.shape_cast %4 : vector<1x32xf32> to vector<1x1x32xf32>
    %842 = vector.broadcast %841 : vector<1x1x32xf32> to vector<2x8x32xf32>
    %843 = arith.addf %840, %842 : vector<2x8x32xf32>
    %cst_126 = arith.constant 0.000000e+00 : f32
    %844 = vector.broadcast %cst_126 : f32 to vector<2x8x32xf32>
    %845 = arith.cmpf oge, %843, %844 : vector<2x8x32xf32>
    %cst_127 = arith.constant 0.00999999977 : f32
    %846 = vector.broadcast %cst_127 : f32 to vector<2x8x32xf32>
    %847 = arith.mulf %846, %843 : vector<2x8x32xf32>
    %848 = arith.select %845, %843, %847 : vector<2x8x32xi1>, vector<2x8x32xf32>
    %849 = vector.shape_cast %848 : vector<2x8x32xf32> to vector<16x32xf32>
    %850 = arith.truncf %849 : vector<16x32xf32> to vector<16x32xbf16>
    %cst_128 = arith.constant dense<0.000000e+00> : vector<16x32xf32>
    %851 = tpu.matmul %850, %5, %cst_128 {dimension_numbers = #tpu.dot_dimension_numbers<[1], [0], [0], [1], [0, 0, 1, 1], [], []>} : vector<16x32xbf16>, vector<32x32xbf16>, vector<16x32xf32> -> vector<16x32xf32>
    %852 = vector.broadcast %6 : vector<1x32xf32> to vector<16x32xf32>
    %853 = arith.addf %851, %852 : vector<16x32xf32>
    %854 = vector.shape_cast %853 : vector<16x32xf32> to vector<2x8x32xf32>
    %855 = math.absf %752 : vector<2x8x32xf32>
    %cst_129 = arith.constant dense<0xFF800000> : vector<2x8xf32>
    %856 = vector.multi_reduction <maximumf>, %855, %cst_129 [2] : vector<2x8x32xf32> to vector<2x8xf32>
    %cst_130 = arith.constant 0.000000e+00 : f32
    %857 = vector.broadcast %cst_130 : f32 to vector<2x8xf32>
    %858 = arith.cmpf oeq, %856, %857 : vector<2x8xf32>
    %859 = math.absf %758 : vector<2x8x4xf32>
    %cst_131 = arith.constant dense<0xFF800000> : vector<2x8xf32>
    %860 = vector.multi_reduction <maximumf>, %859, %cst_131 [2] : vector<2x8x4xf32> to vector<2x8xf32>
    %cst_132 = arith.constant 0.000000e+00 : f32
    %861 = vector.broadcast %cst_132 : f32 to vector<2x8xf32>
    %862 = arith.cmpf oeq, %860, %861 : vector<2x8xf32>
    %863 = arith.andi %858, %862 : vector<2x8xi1>
    %864 = vector.shape_cast %863 : vector<2x8xi1> to vector<2x8x1xi1>
    %cst_133 = arith.constant -1.000000e+09 : f32
    %865 = vector.shape_cast %864 : vector<2x8x1xi1> to vector<2x8x1xi1>
    %866 = vector.broadcast %865 : vector<2x8x1xi1> to vector<2x8x32xi1>
    %867 = vector.broadcast %cst_133 : f32 to vector<2x8x32xf32>
    %868 = arith.select %866, %867, %854 : vector<2x8x32xi1>, vector<2x8x32xf32>
    %cst_134 = arith.constant dense<0xFF800000> : vector<2x32xf32>
    %869 = vector.multi_reduction <maximumf>, %868, %cst_134 [1] : vector<2x8x32xf32> to vector<2x32xf32>
    %870 = vector.shape_cast %869 : vector<2x32xf32> to vector<2x1x32xf32>
    %871 = vector.broadcast %870 : vector<2x1x32xf32> to vector<2x8x32xf32>
    %872 = arith.subf %868, %871 : vector<2x8x32xf32>
    %873 = math.exp %872 : vector<2x8x32xf32>
    %cst_135 = arith.constant dense<0.000000e+00> : vector<2x32xf32>
    %874 = vector.multi_reduction <add>, %873, %cst_135 [1] : vector<2x8x32xf32> to vector<2x32xf32>
    %875 = vector.shape_cast %874 : vector<2x32xf32> to vector<2x1x32xf32>
    %876 = tpu.reciprocal %875 {approx = true} : vector<2x1x32xf32> -> vector<2x1x32xf32>
    %877 = vector.broadcast %876 : vector<2x1x32xf32> to vector<2x8x32xf32>
    %878 = arith.mulf %873, %877 : vector<2x8x32xf32>
    %879 = vector.shape_cast %794 : vector<2x32xf32> to vector<2x1x32xf32>
    %880 = vector.broadcast %879 : vector<2x1x32xf32> to vector<2x8x32xf32>
    %881 = arith.mulf %878, %880 : vector<2x8x32xf32>
    %882 = vector.shape_cast %767 : vector<2x1xi1> to vector<2x1x1xi1>
    %883 = arith.subf %752, %881 : vector<2x8x32xf32>
    %cst_136 = arith.constant 0.000000e+00 : f32
    %884 = vector.broadcast %cst_136 : f32 to vector<2x8x32xf32>
    %885 = arith.maximumf %883, %884 : vector<2x8x32xf32>
    %886 = vector.shape_cast %882 : vector<2x1x1xi1> to vector<2x1x1xi1>
    %887 = vector.broadcast %886 : vector<2x1x1xi1> to vector<2x8x32xi1>
    %888 = arith.select %887, %885, %752 : vector<2x8x32xi1>, vector<2x8x32xf32>
    %889 = tpu.iota {dimensions = array<i32: 1>} : vector<1x8x1xi32>
    %c6_i32 = arith.constant 6 : i32
    %890 = vector.broadcast %c6_i32 : i32 to vector<1x8x1xi32>
    %891 = arith.cmpi eq, %889, %890 : vector<1x8x1xi32>
    %892 = vector.broadcast %882 : vector<2x1x1xi1> to vector<2x8x1xi1>
    %893 = vector.broadcast %891 : vector<1x8x1xi1> to vector<2x8x1xi1>
    %894 = arith.andi %892, %893 : vector<2x8x1xi1>
    %895 = vector.shape_cast %796 : vector<2x32xf32> to vector<2x1x32xf32>
    %896 = vector.shape_cast %894 : vector<2x8x1xi1> to vector<2x8x1xi1>
    %897 = vector.broadcast %896 : vector<2x8x1xi1> to vector<2x8x32xi1>
    %898 = vector.shape_cast %895 : vector<2x1x32xf32> to vector<2x1x32xf32>
    %899 = vector.broadcast %898 : vector<2x1x32xf32> to vector<2x8x32xf32>
    %900 = arith.select %897, %899, %888 : vector<2x8x32xi1>, vector<2x8x32xf32>
    %901 = vector.shape_cast %762 : vector<2x4xf32> to vector<2x1x4xf32>
    %902 = vector.shape_cast %894 : vector<2x8x1xi1> to vector<2x8x1xi1>
    %903 = vector.broadcast %902 : vector<2x8x1xi1> to vector<2x8x4xi1>
    %904 = vector.shape_cast %901 : vector<2x1x4xf32> to vector<2x1x4xf32>
    %905 = vector.broadcast %904 : vector<2x1x4xf32> to vector<2x8x4xf32>
    %906 = arith.select %903, %905, %758 : vector<2x8x4xi1>, vector<2x8x4xf32>
    %907 = vector.extract_strided_slice %0 {offsets = [0, 0, 6], sizes = [2, 1, 1], strides = [1, 1, 1]} : vector<2x1x7xi32> to vector<2x1x1xi32>
    %908 = vector.shape_cast %907 : vector<2x1x1xi32> to vector<2x1xi32>
    %909 = vector.extract_strided_slice %1 {offsets = [0, 0, 6], sizes = [2, 4, 1], strides = [1, 1, 1]} : vector<2x4x7xf32> to vector<2x4x1xf32>
    %910 = vector.shape_cast %909 : vector<2x4x1xf32> to vector<2x4xf32>
    %c0_i32_137 = arith.constant 0 : i32
    %911 = vector.broadcast %c0_i32_137 : i32 to vector<2x1xi32>
    %912 = arith.cmpi ne, %908, %911 : vector<2x1xi32>
    %c7_i32_138 = arith.constant 7 : i32
    %913 = vector.broadcast %c7_i32_138 : i32 to vector<2x1xi32>
    %914 = arith.cmpi ne, %908, %913 : vector<2x1xi32>
    %915 = arith.andi %912, %914 : vector<2x1xi1>
    %c1_i32_139 = arith.constant 1 : i32
    %916 = vector.broadcast %c1_i32_139 : i32 to vector<2x1xi32>
    %917 = arith.subi %908, %916 : vector<2x1xi32>
    %c0_i32_140 = arith.constant 0 : i32
    %c5_i32_141 = arith.constant 5 : i32
    %918 = vector.broadcast %c0_i32_140 : i32 to vector<2x1xi32>
    %919 = arith.maxsi %918, %917 : vector<2x1xi32>
    %920 = vector.broadcast %c5_i32_141 : i32 to vector<2x1xi32>
    %921 = arith.minsi %920, %919 : vector<2x1xi32>
    %922 = tpu.iota {dimensions = array<i32: 1>} : vector<2x6xi32>
    %923 = vector.broadcast %921 : vector<2x1xi32> to vector<2x6xi32>
    %924 = arith.cmpi eq, %923, %922 : vector<2x6xi32>
    %925 = arith.extui %924 : vector<2x6xi1> to vector<2x6xi32>
    %926 = arith.sitofp %925 : vector<2x6xi32> to vector<2x6xf32>
    %927 = vector.extract_strided_slice %910 {offsets = [0, 0], sizes = [2, 1], strides = [1, 1]} : vector<2x4xf32> to vector<2x1xf32>
    %928 = vector.broadcast %927 : vector<2x1xf32> to vector<2x6xf32>
    %929 = arith.mulf %926, %928 : vector<2x6xf32>
    %930 = vector.extract_strided_slice %910 {offsets = [0, 1], sizes = [2, 1], strides = [1, 1]} : vector<2x4xf32> to vector<2x1xf32>
    %931 = vector.broadcast %930 : vector<2x1xf32> to vector<2x6xf32>
    %932 = arith.mulf %926, %931 : vector<2x6xf32>
    %933 = vector.extract_strided_slice %910 {offsets = [0, 2], sizes = [2, 1], strides = [1, 1]} : vector<2x4xf32> to vector<2x1xf32>
    %934 = vector.broadcast %933 : vector<2x1xf32> to vector<2x6xf32>
    %935 = arith.mulf %926, %934 : vector<2x6xf32>
    %936 = vector.extract_strided_slice %910 {offsets = [0, 3], sizes = [2, 1], strides = [1, 1]} : vector<2x4xf32> to vector<2x1xf32>
    %937 = vector.broadcast %936 : vector<2x1xf32> to vector<2x6xf32>
    %938 = arith.mulf %926, %937 : vector<2x6xf32>
    %939 = tpu.concatenate %926, %929, %932, %935, %938 in 1 : vector<2x6xf32>, vector<2x6xf32>, vector<2x6xf32>, vector<2x6xf32>, vector<2x6xf32> -> vector<2x30xf32>
    %940 = arith.truncf %939 : vector<2x30xf32> to vector<2x30xbf16>
    %cst_142 = arith.constant dense<0.000000e+00> : vector<2x256xf32>
    %941 = tpu.matmul %940, %2, %cst_142 {dimension_numbers = #tpu.dot_dimension_numbers<[1], [0], [0], [1], [0, 0, 1, 1], [], []>} : vector<2x30xbf16>, vector<30x256xbf16>, vector<2x256xf32> -> vector<2x256xf32>
    %942 = vector.extract_strided_slice %941 {offsets = [0, 0], sizes = [2, 32], strides = [1, 1]} : vector<2x256xf32> to vector<2x32xf32>
    %943 = vector.extract_strided_slice %941 {offsets = [0, 32], sizes = [2, 32], strides = [1, 1]} : vector<2x256xf32> to vector<2x32xf32>
    %944 = vector.extract_strided_slice %941 {offsets = [0, 64], sizes = [2, 32], strides = [1, 1]} : vector<2x256xf32> to vector<2x32xf32>
    %945 = vector.extract_strided_slice %941 {offsets = [0, 96], sizes = [2, 32], strides = [1, 1]} : vector<2x256xf32> to vector<2x32xf32>
    %946 = vector.shape_cast %945 : vector<2x32xf32> to vector<2x1x32xf32>
    %947 = vector.extract_strided_slice %906 {offsets = [0, 0, 0], sizes = [2, 8, 1], strides = [1, 1, 1]} : vector<2x8x4xf32> to vector<2x8x1xf32>
    %948 = vector.extract_strided_slice %941 {offsets = [0, 128], sizes = [2, 32], strides = [1, 1]} : vector<2x256xf32> to vector<2x32xf32>
    %949 = vector.shape_cast %948 : vector<2x32xf32> to vector<2x1x32xf32>
    %950 = vector.broadcast %947 : vector<2x8x1xf32> to vector<2x8x32xf32>
    %951 = vector.broadcast %949 : vector<2x1x32xf32> to vector<2x8x32xf32>
    %952 = arith.mulf %950, %951 : vector<2x8x32xf32>
    %953 = vector.broadcast %946 : vector<2x1x32xf32> to vector<2x8x32xf32>
    %954 = arith.addf %953, %952 : vector<2x8x32xf32>
    %955 = vector.extract_strided_slice %906 {offsets = [0, 0, 1], sizes = [2, 8, 1], strides = [1, 1, 1]} : vector<2x8x4xf32> to vector<2x8x1xf32>
    %956 = vector.extract_strided_slice %941 {offsets = [0, 160], sizes = [2, 32], strides = [1, 1]} : vector<2x256xf32> to vector<2x32xf32>
    %957 = vector.shape_cast %956 : vector<2x32xf32> to vector<2x1x32xf32>
    %958 = vector.broadcast %955 : vector<2x8x1xf32> to vector<2x8x32xf32>
    %959 = vector.broadcast %957 : vector<2x1x32xf32> to vector<2x8x32xf32>
    %960 = arith.mulf %958, %959 : vector<2x8x32xf32>
    %961 = arith.addf %954, %960 : vector<2x8x32xf32>
    %962 = vector.extract_strided_slice %906 {offsets = [0, 0, 2], sizes = [2, 8, 1], strides = [1, 1, 1]} : vector<2x8x4xf32> to vector<2x8x1xf32>
    %963 = vector.extract_strided_slice %941 {offsets = [0, 192], sizes = [2, 32], strides = [1, 1]} : vector<2x256xf32> to vector<2x32xf32>
    %964 = vector.shape_cast %963 : vector<2x32xf32> to vector<2x1x32xf32>
    %965 = vector.broadcast %962 : vector<2x8x1xf32> to vector<2x8x32xf32>
    %966 = vector.broadcast %964 : vector<2x1x32xf32> to vector<2x8x32xf32>
    %967 = arith.mulf %965, %966 : vector<2x8x32xf32>
    %968 = arith.addf %961, %967 : vector<2x8x32xf32>
    %969 = vector.extract_strided_slice %906 {offsets = [0, 0, 3], sizes = [2, 8, 1], strides = [1, 1, 1]} : vector<2x8x4xf32> to vector<2x8x1xf32>
    %970 = vector.extract_strided_slice %941 {offsets = [0, 224], sizes = [2, 32], strides = [1, 1]} : vector<2x256xf32> to vector<2x32xf32>
    %971 = vector.shape_cast %970 : vector<2x32xf32> to vector<2x1x32xf32>
    %972 = vector.broadcast %969 : vector<2x8x1xf32> to vector<2x8x32xf32>
    %973 = vector.broadcast %971 : vector<2x1x32xf32> to vector<2x8x32xf32>
    %974 = arith.mulf %972, %973 : vector<2x8x32xf32>
    %975 = arith.addf %968, %974 : vector<2x8x32xf32>
    %cst_143 = arith.constant 0.000000e+00 : f32
    %976 = vector.broadcast %cst_143 : f32 to vector<2x8x32xf32>
    %977 = arith.cmpf oge, %975, %976 : vector<2x8x32xf32>
    %cst_144 = arith.constant 0.00999999977 : f32
    %978 = vector.broadcast %cst_144 : f32 to vector<2x8x32xf32>
    %979 = arith.mulf %978, %975 : vector<2x8x32xf32>
    %980 = arith.select %977, %975, %979 : vector<2x8x32xi1>, vector<2x8x32xf32>
    %981 = tpu.concatenate %900, %980 in 2 : vector<2x8x32xf32>, vector<2x8x32xf32> -> vector<2x8x64xf32>
    %982 = vector.shape_cast %981 : vector<2x8x64xf32> to vector<16x64xf32>
    %983 = arith.truncf %982 : vector<16x64xf32> to vector<16x64xbf16>
    %cst_145 = arith.constant dense<0.000000e+00> : vector<16x32xf32>
    %984 = tpu.matmul %983, %3, %cst_145 {dimension_numbers = #tpu.dot_dimension_numbers<[1], [0], [0], [1], [0, 0, 1, 1], [], []>} : vector<16x64xbf16>, vector<64x32xbf16>, vector<16x32xf32> -> vector<16x32xf32>
    %985 = vector.shape_cast %984 : vector<16x32xf32> to vector<2x8x32xf32>
    %986 = vector.shape_cast %943 : vector<2x32xf32> to vector<2x1x32xf32>
    %987 = vector.broadcast %986 : vector<2x1x32xf32> to vector<2x8x32xf32>
    %988 = arith.addf %985, %987 : vector<2x8x32xf32>
    %989 = vector.shape_cast %4 : vector<1x32xf32> to vector<1x1x32xf32>
    %990 = vector.broadcast %989 : vector<1x1x32xf32> to vector<2x8x32xf32>
    %991 = arith.addf %988, %990 : vector<2x8x32xf32>
    %cst_146 = arith.constant 0.000000e+00 : f32
    %992 = vector.broadcast %cst_146 : f32 to vector<2x8x32xf32>
    %993 = arith.cmpf oge, %991, %992 : vector<2x8x32xf32>
    %cst_147 = arith.constant 0.00999999977 : f32
    %994 = vector.broadcast %cst_147 : f32 to vector<2x8x32xf32>
    %995 = arith.mulf %994, %991 : vector<2x8x32xf32>
    %996 = arith.select %993, %991, %995 : vector<2x8x32xi1>, vector<2x8x32xf32>
    %997 = vector.shape_cast %996 : vector<2x8x32xf32> to vector<16x32xf32>
    %998 = arith.truncf %997 : vector<16x32xf32> to vector<16x32xbf16>
    %cst_148 = arith.constant dense<0.000000e+00> : vector<16x32xf32>
    %999 = tpu.matmul %998, %5, %cst_148 {dimension_numbers = #tpu.dot_dimension_numbers<[1], [0], [0], [1], [0, 0, 1, 1], [], []>} : vector<16x32xbf16>, vector<32x32xbf16>, vector<16x32xf32> -> vector<16x32xf32>
    %1000 = vector.broadcast %6 : vector<1x32xf32> to vector<16x32xf32>
    %1001 = arith.addf %999, %1000 : vector<16x32xf32>
    %1002 = vector.shape_cast %1001 : vector<16x32xf32> to vector<2x8x32xf32>
    %1003 = math.absf %900 : vector<2x8x32xf32>
    %cst_149 = arith.constant dense<0xFF800000> : vector<2x8xf32>
    %1004 = vector.multi_reduction <maximumf>, %1003, %cst_149 [2] : vector<2x8x32xf32> to vector<2x8xf32>
    %cst_150 = arith.constant 0.000000e+00 : f32
    %1005 = vector.broadcast %cst_150 : f32 to vector<2x8xf32>
    %1006 = arith.cmpf oeq, %1004, %1005 : vector<2x8xf32>
    %1007 = math.absf %906 : vector<2x8x4xf32>
    %cst_151 = arith.constant dense<0xFF800000> : vector<2x8xf32>
    %1008 = vector.multi_reduction <maximumf>, %1007, %cst_151 [2] : vector<2x8x4xf32> to vector<2x8xf32>
    %cst_152 = arith.constant 0.000000e+00 : f32
    %1009 = vector.broadcast %cst_152 : f32 to vector<2x8xf32>
    %1010 = arith.cmpf oeq, %1008, %1009 : vector<2x8xf32>
    %1011 = arith.andi %1006, %1010 : vector<2x8xi1>
    %1012 = vector.shape_cast %1011 : vector<2x8xi1> to vector<2x8x1xi1>
    %cst_153 = arith.constant -1.000000e+09 : f32
    %1013 = vector.shape_cast %1012 : vector<2x8x1xi1> to vector<2x8x1xi1>
    %1014 = vector.broadcast %1013 : vector<2x8x1xi1> to vector<2x8x32xi1>
    %1015 = vector.broadcast %cst_153 : f32 to vector<2x8x32xf32>
    %1016 = arith.select %1014, %1015, %1002 : vector<2x8x32xi1>, vector<2x8x32xf32>
    %cst_154 = arith.constant dense<0xFF800000> : vector<2x32xf32>
    %1017 = vector.multi_reduction <maximumf>, %1016, %cst_154 [1] : vector<2x8x32xf32> to vector<2x32xf32>
    %1018 = vector.shape_cast %1017 : vector<2x32xf32> to vector<2x1x32xf32>
    %1019 = vector.broadcast %1018 : vector<2x1x32xf32> to vector<2x8x32xf32>
    %1020 = arith.subf %1016, %1019 : vector<2x8x32xf32>
    %1021 = math.exp %1020 : vector<2x8x32xf32>
    %cst_155 = arith.constant dense<0.000000e+00> : vector<2x32xf32>
    %1022 = vector.multi_reduction <add>, %1021, %cst_155 [1] : vector<2x8x32xf32> to vector<2x32xf32>
    %1023 = vector.shape_cast %1022 : vector<2x32xf32> to vector<2x1x32xf32>
    %1024 = tpu.reciprocal %1023 {approx = true} : vector<2x1x32xf32> -> vector<2x1x32xf32>
    %1025 = vector.broadcast %1024 : vector<2x1x32xf32> to vector<2x8x32xf32>
    %1026 = arith.mulf %1021, %1025 : vector<2x8x32xf32>
    %1027 = vector.shape_cast %942 : vector<2x32xf32> to vector<2x1x32xf32>
    %1028 = vector.broadcast %1027 : vector<2x1x32xf32> to vector<2x8x32xf32>
    %1029 = arith.mulf %1026, %1028 : vector<2x8x32xf32>
    %1030 = vector.shape_cast %915 : vector<2x1xi1> to vector<2x1x1xi1>
    %1031 = arith.subf %900, %1029 : vector<2x8x32xf32>
    %cst_156 = arith.constant 0.000000e+00 : f32
    %1032 = vector.broadcast %cst_156 : f32 to vector<2x8x32xf32>
    %1033 = arith.maximumf %1031, %1032 : vector<2x8x32xf32>
    %1034 = vector.shape_cast %1030 : vector<2x1x1xi1> to vector<2x1x1xi1>
    %1035 = vector.broadcast %1034 : vector<2x1x1xi1> to vector<2x8x32xi1>
    %1036 = arith.select %1035, %1033, %900 : vector<2x8x32xi1>, vector<2x8x32xf32>
    %1037 = tpu.iota {dimensions = array<i32: 1>} : vector<1x8x1xi32>
    %c7_i32_157 = arith.constant 7 : i32
    %1038 = vector.broadcast %c7_i32_157 : i32 to vector<1x8x1xi32>
    %1039 = arith.cmpi eq, %1037, %1038 : vector<1x8x1xi32>
    %1040 = vector.broadcast %1030 : vector<2x1x1xi1> to vector<2x8x1xi1>
    %1041 = vector.broadcast %1039 : vector<1x8x1xi1> to vector<2x8x1xi1>
    %1042 = arith.andi %1040, %1041 : vector<2x8x1xi1>
    %1043 = vector.shape_cast %944 : vector<2x32xf32> to vector<2x1x32xf32>
    %1044 = vector.shape_cast %1042 : vector<2x8x1xi1> to vector<2x8x1xi1>
    %1045 = vector.broadcast %1044 : vector<2x8x1xi1> to vector<2x8x32xi1>
    %1046 = vector.shape_cast %1043 : vector<2x1x32xf32> to vector<2x1x32xf32>
    %1047 = vector.broadcast %1046 : vector<2x1x32xf32> to vector<2x8x32xf32>
    %1048 = arith.select %1045, %1047, %1036 : vector<2x8x32xi1>, vector<2x8x32xf32>
    %1049 = vector.shape_cast %910 : vector<2x4xf32> to vector<2x1x4xf32>
    %1050 = vector.shape_cast %1042 : vector<2x8x1xi1> to vector<2x8x1xi1>
    %1051 = vector.broadcast %1050 : vector<2x8x1xi1> to vector<2x8x4xi1>
    %1052 = vector.shape_cast %1049 : vector<2x1x4xf32> to vector<2x1x4xf32>
    %1053 = vector.broadcast %1052 : vector<2x1x4xf32> to vector<2x8x4xf32>
    %1054 = arith.select %1051, %1053, %906 : vector<2x8x4xi1>, vector<2x8x4xf32>
    %c0_158 = arith.constant 0 : index
    %c0_159 = arith.constant 0 : index
    %1055 = vector.load %arg9[%c0_158, %c0_159] : memref<32x768xbf16, #tpu.memory_space<vmem>>, vector<32x768xbf16>
    %c0_160 = arith.constant 0 : index
    %c0_161 = arith.constant 0 : index
    %1056 = vector.load %arg10[%c0_160, %c0_161] : memref<4x768xbf16, #tpu.memory_space<vmem>>, vector<4x768xbf16>
    %c0_162 = arith.constant 0 : index
    %c0_163 = arith.constant 0 : index
    %1057 = vector.load %arg11[%c0_162, %c0_163] : memref<1x768xf32, #tpu.memory_space<vmem>>, vector<1x768xf32>
    %c0_164 = arith.constant 0 : index
    %c0_165 = arith.constant 0 : index
    %1058 = vector.load %arg12[%c0_164, %c0_165] : memref<768x12xbf16, #tpu.memory_space<vmem>>, vector<768x12xbf16>
    %c0_166 = arith.constant 0 : index
    %c0_167 = arith.constant 0 : index
    %1059 = vector.load %arg13[%c0_166, %c0_167] : memref<1x1xf32, #tpu.memory_space<vmem>>, vector<1x1xf32>
    %c0_168 = arith.constant 0 : index
    %c0_169 = arith.constant 0 : index
    %1060 = vector.load %arg14[%c0_168, %c0_169] : memref<1x6xf32, #tpu.memory_space<vmem>>, vector<1x6xf32>
    %1061 = vector.shape_cast %1048 : vector<2x8x32xf32> to vector<16x32xf32>
    %1062 = vector.shape_cast %1054 : vector<2x8x4xf32> to vector<16x4xf32>
    %1063 = math.absf %1048 : vector<2x8x32xf32>
    %cst_170 = arith.constant dense<0xFF800000> : vector<2x8xf32>
    %1064 = vector.multi_reduction <maximumf>, %1063, %cst_170 [2] : vector<2x8x32xf32> to vector<2x8xf32>
    %cst_171 = arith.constant 0.000000e+00 : f32
    %1065 = vector.broadcast %cst_171 : f32 to vector<2x8xf32>
    %1066 = arith.cmpf oeq, %1064, %1065 : vector<2x8xf32>
    %1067 = math.absf %1054 : vector<2x8x4xf32>
    %cst_172 = arith.constant dense<0xFF800000> : vector<2x8xf32>
    %1068 = vector.multi_reduction <maximumf>, %1067, %cst_172 [2] : vector<2x8x4xf32> to vector<2x8xf32>
    %cst_173 = arith.constant 0.000000e+00 : f32
    %1069 = vector.broadcast %cst_173 : f32 to vector<2x8xf32>
    %1070 = arith.cmpf oeq, %1068, %1069 : vector<2x8xf32>
    %1071 = arith.andi %1066, %1070 : vector<2x8xi1>
    %1072 = vector.shape_cast %1071 : vector<2x8xi1> to vector<16x1xi1>
    %1073 = arith.truncf %1061 : vector<16x32xf32> to vector<16x32xbf16>
    %cst_174 = arith.constant dense<0.000000e+00> : vector<16x768xf32>
    %1074 = tpu.matmul %1073, %1055, %cst_174 {dimension_numbers = #tpu.dot_dimension_numbers<[1], [0], [0], [1], [0, 0, 1, 1], [], []>} : vector<16x32xbf16>, vector<32x768xbf16>, vector<16x768xf32> -> vector<16x768xf32>
    %1075 = arith.truncf %1062 : vector<16x4xf32> to vector<16x4xbf16>
    %cst_175 = arith.constant dense<0.000000e+00> : vector<16x768xf32>
    %1076 = tpu.matmul %1075, %1056, %cst_175 {dimension_numbers = #tpu.dot_dimension_numbers<[1], [0], [0], [1], [0, 0, 1, 1], [], []>} : vector<16x4xbf16>, vector<4x768xbf16>, vector<16x768xf32> -> vector<16x768xf32>
    %1077 = arith.addf %1074, %1076 : vector<16x768xf32>
    %1078 = vector.broadcast %1057 : vector<1x768xf32> to vector<16x768xf32>
    %1079 = arith.addf %1077, %1078 : vector<16x768xf32>
    %cst_176 = arith.constant 0.000000e+00 : f32
    %1080 = vector.broadcast %cst_176 : f32 to vector<16x768xf32>
    %1081 = arith.cmpf oge, %1079, %1080 : vector<16x768xf32>
    %cst_177 = arith.constant 0.00999999977 : f32
    %1082 = vector.broadcast %cst_177 : f32 to vector<16x768xf32>
    %1083 = arith.mulf %1082, %1079 : vector<16x768xf32>
    %1084 = arith.select %1081, %1079, %1083 : vector<16x768xi1>, vector<16x768xf32>
    %1085 = tpu.iota {dimensions = array<i32: 1>} : vector<1x768xi32>
    %c384_i32 = arith.constant 384 : i32
    %1086 = vector.broadcast %c384_i32 : i32 to vector<1x768xi32>
    %1087 = arith.cmpi slt, %1085, %1086 : vector<1x768xi32>
    %1088 = vector.broadcast %1072 : vector<16x1xi1> to vector<16x768xi1>
    %1089 = vector.broadcast %1087 : vector<1x768xi1> to vector<16x768xi1>
    %1090 = arith.andi %1088, %1089 : vector<16x768xi1>
    %cst_178 = arith.constant 0.000000e+00 : f32
    %1091 = vector.broadcast %cst_178 : f32 to vector<16x768xf32>
    %1092 = arith.select %1090, %1091, %1084 : vector<16x768xi1>, vector<16x768xf32>
    %1093 = arith.truncf %1092 : vector<16x768xf32> to vector<16x768xbf16>
    %cst_179 = arith.constant dense<0.000000e+00> : vector<16x12xf32>
    %1094 = tpu.matmul %1093, %1058, %cst_179 {dimension_numbers = #tpu.dot_dimension_numbers<[1], [0], [0], [1], [0, 0, 1, 1], [], []>} : vector<16x768xbf16>, vector<768x12xbf16>, vector<16x12xf32> -> vector<16x12xf32>
    %1095 = vector.extract_strided_slice %1094 {offsets = [0, 0], sizes = [16, 6], strides = [1, 1]} : vector<16x12xf32> to vector<16x6xf32>
    %1096 = vector.shape_cast %1095 : vector<16x6xf32> to vector<2x8x6xf32>
    %cst_180 = arith.constant dense<0.000000e+00> : vector<2x6xf32>
    %1097 = vector.multi_reduction <add>, %1096, %cst_180 [1] : vector<2x8x6xf32> to vector<2x6xf32>
    %1098 = vector.broadcast %1059 : vector<1x1xf32> to vector<2x6xf32>
    %1099 = arith.addf %1097, %1098 : vector<2x6xf32>
    %cst_181 = arith.constant 0.000000e+00 : f32
    %1100 = vector.broadcast %cst_181 : f32 to vector<2x6xf32>
    %1101 = arith.subf %1100, %1099 : vector<2x6xf32>
    %1102 = math.exp %1101 : vector<2x6xf32>
    %cst_182 = arith.constant 1.000000e+00 : f32
    %1103 = vector.broadcast %cst_182 : f32 to vector<2x6xf32>
    %1104 = arith.addf %1103, %1102 : vector<2x6xf32>
    %cst_183 = arith.constant 1.000000e+00 : f32
    %1105 = vector.broadcast %cst_183 : f32 to vector<2x6xf32>
    %1106 = arith.divf %1105, %1104 : vector<2x6xf32>
    %cst_184 = arith.constant 9.99999974E-6 : f32
    %1107 = vector.broadcast %cst_184 : f32 to vector<2x6xf32>
    %1108 = arith.maximumf %1106, %1107 : vector<2x6xf32>
    %1109 = vector.extract_strided_slice %1094 {offsets = [0, 6], sizes = [16, 6], strides = [1, 1]} : vector<16x12xf32> to vector<16x6xf32>
    %1110 = vector.broadcast %1060 : vector<1x6xf32> to vector<16x6xf32>
    %1111 = arith.addf %1109, %1110 : vector<16x6xf32>
    %cst_185 = arith.constant 2.000000e+01 : f32
    %1112 = vector.broadcast %cst_185 : f32 to vector<16x6xf32>
    %1113 = arith.cmpf ogt, %1111, %1112 : vector<16x6xf32>
    %cst_186 = arith.constant 2.000000e+01 : f32
    %1114 = vector.broadcast %cst_186 : f32 to vector<16x6xf32>
    %1115 = arith.minimumf %1111, %1114 : vector<16x6xf32>
    %1116 = math.exp %1115 : vector<16x6xf32>
    %1117 = math.log1p %1116 : vector<16x6xf32>
    %1118 = arith.select %1113, %1111, %1117 : vector<16x6xi1>, vector<16x6xf32>
    %1119 = vector.shape_cast %1118 : vector<16x6xf32> to vector<2x8x6xf32>
    %cst_187 = arith.constant dense<0xFF800000> : vector<2x6xf32>
    %1120 = vector.multi_reduction <maximumf>, %1119, %cst_187 [1] : vector<2x8x6xf32> to vector<2x6xf32>
    %1121 = arith.mulf %1108, %1120 : vector<2x6xf32>
    %1122 = math.exp %1108 : vector<2x6xf32>
    %cst_188 = arith.constant 1.000000e-01 : f32
    %1123 = vector.broadcast %cst_188 : f32 to vector<2x6xf32>
    %1124 = arith.mulf %1123, %1122 : vector<2x6xf32>
    %1125 = arith.subf %1121, %1124 : vector<2x6xf32>
    %1126 = vector.shape_cast %1125 : vector<2x6xf32> to vector<2x1x6xf32>
    %c0_189 = arith.constant 0 : index
    %c0_190 = arith.constant 0 : index
    %c0_191 = arith.constant 0 : index
    %1127 = vector.load %arg15[%c0_189, %c0_190, %c0_191] : memref<2x1x6xf32, #tpu.memory_space<vmem>>, vector<2x1x6xf32>
    tpu.vector_store %arg15[%c0_189, %c0_190, %c0_191], %1126 {strides = array<i32>} : memref<2x1x6xf32, #tpu.memory_space<vmem>>, vector<2x1x6xf32>,
    return
  }
  func.func @transform_0(%arg0: i32) -> (i32, i32, i32) {
    %c0_i32 = arith.constant 0 : i32
    %c0_i32_0 = arith.constant 0 : i32
    %c0_i32_1 = arith.constant 0 : i32
    return %arg0, %c0_i32, %c0_i32_0 : i32, i32, i32
  }
  func.func @transform_1(%arg0: i32) -> (i32, i32, i32) {
    %c0_i32 = arith.constant 0 : i32
    %c0_i32_0 = arith.constant 0 : i32
    %c0_i32_1 = arith.constant 0 : i32
    return %arg0, %c0_i32, %c0_i32_0 : i32, i32, i32
  }
  func.func @transform_2(%arg0: i32) -> (i32, i32) {
    %c0_i32 = arith.constant 0 : i32
    %c0_i32_0 = arith.constant 0 : i32
    %c0_i32_1 = arith.constant 0 : i32
    return %c0_i32, %c0_i32_0 : i32, i32
  }
  func.func @transform_3(%arg0: i32) -> (i32, i32) {
    %c0_i32 = arith.constant 0 : i32
    %c0_i32_0 = arith.constant 0 : i32
    %c0_i32_1 = arith.constant 0 : i32
    return %c0_i32, %c0_i32_0 : i32, i32
  }
  func.func @transform_4(%arg0: i32) -> (i32, i32) {
    %c0_i32 = arith.constant 0 : i32
    %c0_i32_0 = arith.constant 0 : i32
    %c0_i32_1 = arith.constant 0 : i32
    return %c0_i32, %c0_i32_0 : i32, i32
  }
  func.func @transform_5(%arg0: i32) -> (i32, i32) {
    %c0_i32 = arith.constant 0 : i32
    %c0_i32_0 = arith.constant 0 : i32
    %c0_i32_1 = arith.constant 0 : i32
    return %c0_i32, %c0_i32_0 : i32, i32
  }
  func.func @transform_6(%arg0: i32) -> (i32, i32) {
    %c0_i32 = arith.constant 0 : i32
    %c0_i32_0 = arith.constant 0 : i32
    %c0_i32_1 = arith.constant 0 : i32
    return %c0_i32, %c0_i32_0 : i32, i32
  }
  func.func @transform_7(%arg0: i32) -> (i32, i32) {
    %c0_i32 = arith.constant 0 : i32
    %c0_i32_0 = arith.constant 0 : i32
    %c0_i32_1 = arith.constant 0 : i32
    return %c0_i32, %c0_i32_0 : i32, i32
  }
  func.func @transform_8(%arg0: i32) -> (i32, i32) {
    %c0_i32 = arith.constant 0 : i32
    %c0_i32_0 = arith.constant 0 : i32
    %c0_i32_1 = arith.constant 0 : i32
    return %c0_i32, %c0_i32_0 : i32, i32
  }
  func.func @transform_9(%arg0: i32) -> (i32, i32) {
    %c0_i32 = arith.constant 0 : i32
    %c0_i32_0 = arith.constant 0 : i32
    %c0_i32_1 = arith.constant 0 : i32
    return %c0_i32, %c0_i32_0 : i32, i32
  }
  func.func @transform_10(%arg0: i32) -> (i32, i32) {
    %c0_i32 = arith.constant 0 : i32
    %c0_i32_0 = arith.constant 0 : i32
    %c0_i32_1 = arith.constant 0 : i32
    return %c0_i32, %c0_i32_0 : i32, i32
  }
  func.func @transform_11(%arg0: i32) -> (i32, i32) {
    %c0_i32 = arith.constant 0 : i32
    %c0_i32_0 = arith.constant 0 : i32
    %c0_i32_1 = arith.constant 0 : i32
    return %c0_i32, %c0_i32_0 : i32, i32
  }
  func.func @transform_12(%arg0: i32) -> (i32, i32) {
    %c0_i32 = arith.constant 0 : i32
    %c0_i32_0 = arith.constant 0 : i32
    %c0_i32_1 = arith.constant 0 : i32
    return %c0_i32, %c0_i32_0 : i32, i32
  }
  func.func @transform_13(%arg0: i32) -> (i32, i32) {
    %c0_i32 = arith.constant 0 : i32
    %c0_i32_0 = arith.constant 0 : i32
    %c0_i32_1 = arith.constant 0 : i32
    return %c0_i32, %c0_i32_0 : i32, i32
  }
  func.func @transform_14(%arg0: i32) -> (i32, i32, i32) {
    %c0_i32 = arith.constant 0 : i32
    %c0_i32_0 = arith.constant 0 : i32
    %c0_i32_1 = arith.constant 0 : i32
    return %arg0, %c0_i32, %c0_i32_0 : i32, i32, i32
  }
}

</mosaic_0001>

<bundles_post_ra>
// kernel: tpu_custom_call.1
= control target key start
LH: loop header
LB: loop body
LE: loop exit
PB: predicated region body
PF: predicated region fallthrough
CT: control target
= control target key end

     0   :  { %s10993_s0 = inlined_call_operand.vmem [shape: s32[4,1,7], index: 0, kind: input, shape index: {}]   ;;  %s10994_s1 = inlined_call_operand.vmem [shape: f32[4,4,7], index: 1, kind: input, shape index: {}]   ;;  %s10995_s2 = inlined_call_operand.vmem [shape: f32[1,32], index: 2, kind: input, shape index: {}]   ;;  %s10996_s3 = inlined_call_operand.vmem [shape: bf16[30,256], index: 3, kind: input, shape index: {}]   ;;  %s10997_s4 = inlined_call_operand.vmem [shape: bf16[64,32], index: 4, kind: input, shape index: {}]   ;;  %s10998_s5 = inlined_call_operand.vmem [shape: f32[1,32], index: 5, kind: input, shape index: {}]   ;;  %s10999_s6 = inlined_call_operand.vmem [shape: bf16[32,32], index: 6, kind: input, shape index: {}]   ;;  %s11000_s7 = inlined_call_operand.vmem [shape: f32[1,32], index: 7, kind: input, shape index: {}]   ;;  %s11001_s8 = inlined_call_operand.vmem [shape: bf16[32,768], index: 8, kind: input, shape index: {}]   ;;  %s11002_s9 = inlined_call_operand.vmem [shape: bf16[4,768], index: 9, kind: input, shape index: {}]   ;;  %s11003_s10 = inlined_call_operand.vmem [shape: f32[1,768], index: 10, kind: input, shape index: {}]   ;;  %s11004_s11 = inlined_call_operand.vmem [shape: bf16[768,12], index: 11, kind: input, shape index: {}]   ;;  %s11005_s12 = inlined_call_operand.<no memory space> [shape: f32[1,1], index: 12, kind: input, shape index: {}]   ;;  %s11006_s13 = inlined_call_operand.vmem [shape: f32[1,6], index: 13, kind: input, shape index: {}]   ;;  %s11007_s14 = inlined_call_operand.hbm [shape: f32[4,1,6], index: 14, kind: output, shape index: {}]  }
   0x1   :  { %11058 = sst [smem:[#allocation12_spill]] %s10993_s0  ;;  %v19_v0 = vstv %s11005_s12 }
   0x2   :  { %11059 = sst [smem:[#allocation13_spill]] %s10994_s1  ;;  %20 = vst [vmem:[#allocation2] sm:$0x1] %v19_v0 }
   0x3   :  { %11060 = sst [smem:[#allocation14_spill]] %s10995_s2 }
   0x4   :  { %21 = vsyncpa [#allocation4], 0 }
   0x5   :  { %23 = vsyncpa [#allocation4 + $0x1], 0  ;;  %s8737_s15 = smov 0   ;;  %s8739_s16 = smov 0  }
   0x6   :  { %s8741_s17 = smov 0   ;;  %s8743_s18 = smov 0  }
   0x7 LB: > { %s8758_s12 = sadd.s32 4294967295, %s8635_s18   ;;  %s7757_s19 = sadd.s32 4294967294, %s8635_s18   ;;  %s8635_s18 = sphi %s8743_s18, %s11156_s18   ;;  %s8631_s17 = sphi %s8741_s17, %s11155_s17   ;;  %s8627_s16 = sphi %s8739_s16, %s11154_s16   ;;  %s8623_s15 = sphi %s8737_s15, %s11153_s15  }
   0x8   : > { %s8762_s20 = sadd.s32 1, %s8635_s18   ;;  %s340_s21 = sadd.s32 1, %s8631_s17 }
   0x9   : > { %s337_s22 = ssub.s32 %s8635_s18, %s8762_s20  ;;  %p350_p0 = scmp.ne.s32.totalorder %s8631_s17, %s8627_s16 }
   0xa   : > { %p338_p1 = scmp.eq.s32.totalorder %s337_s22, 0  ;;  %p351_p2 = scmp.eq.s32.totalorder %s8758_s12, 1 }
   0xb   : > { %p356_p3 = scmp.ne.s32.totalorder %s8627_s16, %s8623_s15  ;;  %p357_p4 = scmp.eq.s32.totalorder %s7757_s19, 1 }
   0xc   : > { %s8773_s23 = scalar_select %p338_p1, %s8631_s17, %s340_s21  }
   0xd   : > { %p8775_p5 = por %p351_p2, %p350_p0  ;;  %p8779_p6 = por %p357_p4, %p356_p3 }
   0xe   : > { %11061 = sst [smem:[#allocation6_spill]] %s8773_s23  ;;  %p7760_p7 = scmp.ge.s32.totalorder %s8635_s18, 1 }
   0xf   : > { %p428_p8 = scmp.lt.s32.totalorder %s8635_s18, 3 }
  0x11   : > { %p429_p9 = pnand %p7760_p7, %p428_p8 }
  0x13   : > { %432 = sbr.rel (%p429_p9) target bundleno = 6403 (0x1903), region = 76 }
  0x18   : > { %s7762_s26 = sshll.u32 %s8758_s12, 1  ;;  %v514_v1 = vlaneseq  ;;  %v11027_v2 = vmov 0   ;;  %v8638_v3 = vmov 1966171168   ;;  %s11067_s0 = sld [smem:[#allocation12_spill]]  ;;  %vm11018_vm4 = vcmask 1041409  }
  0x19   : > { %8246 = vset.pattern.permute.xlu1 %v11027_v2  ;;  %8245 = vset.pattern.permute.xlu0 %v11027_v2  ;;  %p479_p10 = scmp.lt.s32.totalorder %s7762_s26, 3  ;;  %v559_v4 = vunpack.c.l.s4 %v8638_v3  ;;  %s11068_s1 = sld [smem:[#allocation13_spill]]  ;;  %vm11034_vm6 = vcmask 1046528   ;;  %vm1585_vm8 = vcmask 48128   ;;  %vm11038_vm9 = vcmask 97280  }
  0x1a   : > { %v8789_v5 = vshrl.u32 %v514_v1, 7  ;;  %1655 = vmatprep.mubr.bf16.mxu1 %v11027_v2  ;;  %2394 = vmatprep.mubr.bf16.mxu0 %v11027_v2  ;;  %s11012_s28 = smov 12   ;;  %s11016_s29 = smov 6   ;;  %vm11037_vm10 = vcmask 146432   ;;  %vm11036_vm11 = vcmask 195584   ;;  %vm11035_vm12 = vcmask 244736  }
  0x1b   : > { %s11158_s26 = smov (!%p479_p10, %s7762_s26), 3  ;;  %v560_v6 = vunpack.c.0.s8 %v559_v4  ;;  %s11008_s19 = smov 24   ;;  %vm8648_vm13 = vmmov 0  }
  0x1c   : > { %v8794_v7 = vsub.s32 0, %v8789_v5  ;;  %v8797_v8 = vsub.s32 1, %v8789_v5  ;;  %v8800_v9 = vsub.s32 2, %v8789_v5  ;;  %v8803_v10 = vsub.s32 3, %v8789_v5  ;;  %s7764_s27 = sshll.u32 %s11158_s26, 2  ;;  %s11010_s21 = smov 18  }
  0x1d   : > { %v8816_v11 = vsub.s32 %v560_v6, %v8789_v5  ;;  %s11069_s2 = sld [smem:[#allocation14_spill]] }
  0x1e   : > { %11064 = vst [vmem:[#allocation7_spill] sm:$0xff] %v8797_v8  ;;  %11065 = vst [vmem:[#allocation8_spill] sm:$0xff] %v8800_v9  ;;  %s8808_s30 = scalar_lea.vmem %s11067_s0, %s11158_s26  ;;  %s11021_s26 = smov 96  }
  0x1f   : > { %11066 = vst [vmem:[#allocation9_spill] sm:$0xff] %v8803_v10  ;;  %s8813_s22 = scalar_lea.vmem %s11068_s1, %s7764_s27  ;;  %v492_v12 = vld [vmem:[%s8808_s30 + $0x1] sm:$0x1]  ;;  %s11019_s27 = smov 64  }
  0x20   : > { %v493_v13 = vld [vmem:[%s8813_s22] sm:$0xf]  ;;  %v494_v14 = vld [vmem:[%s8813_s22 + $0x4] sm:$0xf]  ;;  %v8821_v15 = vadd.s32 4294967295, %v492_v12  ;;  %s11076_s0 = smov 32  }
  0x21   : > { %v815_v16 = vrot.slane %v493_v13, %v8797_v8  ;;  %v589_v17 = vrot.slane %v493_v13, %v8794_v7  ;;  %v819_v18 = vrot.slane %v494_v14, %v8797_v8  ;;  %v593_v19 = vrot.slane %v494_v14, %v8794_v7 }
  0x22   : > { %v8828_v20 = vrot.slane %v494_v14, %v8800_v9  ;;  %v8831_v21 = vrot.slane %v493_v13, %v8800_v9  ;;  %v8834_v22 = vrot.slane %v494_v14, %v8803_v10  ;;  %v8837_v23 = vrot.slane %v493_v13, %v8803_v10 }
  0x23   : > { %v822_v24 = vcombine.high %v815_v16, %v815_v16  ;;  %v829_v25 = vrot.slane %v815_v16, %v8816_v11  ;;  %v596_v26 = vcombine.high %v589_v17, %v589_v17  ;;  %v603_v27 = vrot.slane %v589_v17, %v8816_v11 }
  0x24   : > { %v869_v28 = vcombine.high %v819_v18, %v819_v18  ;;  %v876_v29 = vrot.slane %v819_v18, %v8816_v11  ;;  %v643_v30 = vcombine.high %v593_v19, %v593_v19  ;;  %v650_v31 = vrot.slane %v593_v19, %v8816_v11 }
  0x25   : > { %v836_v32 = vrot.slane %v822_v24, %v8816_v11  ;;  %v837_v33 = vcombine.high %v829_v25, %v829_v25  ;;  %v845_v34 = vrot.slane %v829_v25, %v8816_v11  ;;  %v610_v35 = vrot.slane %v596_v26, %v8816_v11 }
  0x26   : > { %v611_v36 = vcombine.high %v603_v27, %v603_v27  ;;  %v619_v37 = vrot.slane %v603_v27, %v8816_v11  ;;  %v883_v38 = vrot.slane %v869_v28, %v8816_v11  ;;  %v884_v39 = vcombine.high %v876_v29, %v876_v29 }
  0x27   : > { %v838_v40 = vcombine.high %v836_v32, %v836_v32  ;;  %v852_v41 = vrot.slane %v836_v32, %v8816_v11  ;;  %v859_v42 = vrot.slane %v837_v33, %v8816_v11  ;;  %v612_v43 = vcombine.high %v610_v35, %v610_v35 }
  0x28   : > { %v626_v44 = vrot.slane %v610_v35, %v8816_v11  ;;  %v633_v45 = vrot.slane %v611_v36, %v8816_v11  ;;  %v885_v46 = vcombine.high %v883_v38, %v883_v38  ;;  %v892_v47 = vrot.slane %v876_v29, %v8816_v11 }
  0x29   : > { %v866_v48 = vrot.slane %v838_v40, %v8816_v11  ;;  %v916_v49 = vcombine.low %v845_v34, %v859_v42  ;;  %v7772_v50 = vcombine.high %v845_v34, %v859_v42  ;;  %v640_v51 = vrot.slane %v612_v43, %v8816_v11 }
  0x2a   : > { %v690_v52 = vcombine.low %v619_v37, %v633_v45  ;;  %v7770_v53 = vcombine.high %v619_v37, %v633_v45  ;;  %v899_v54 = vrot.slane %v883_v38, %v8816_v11  ;;  %v906_v55 = vrot.slane %v884_v39, %v8816_v11 }
  0x2b   : > { %v918_v56 = vcombine.low %v852_v41, %v866_v48  ;;  %v925_v57 = vrot.slane %v916_v49, %v8816_v11  ;;  %v932_v58 = vrot.slane %v7772_v50, %v8816_v11  ;;  %v692_v59 = vcombine.low %v626_v44, %v640_v51 }
  0x2c   : > { %v699_v60 = vrot.slane %v690_v52, %v8816_v11  ;;  %v706_v61 = vrot.slane %v7770_v53, %v8816_v11  ;;  %v913_v62 = vrot.slane %v885_v46, %v8816_v11  ;;  %v956_v63 = vcombine.low %v892_v47, %v906_v55 }
  0x2d   : > { %v939_v0 = vrot.slane %v918_v56, %v8816_v11  ;;  %v940_v3 = vcombine.low %v925_v57, %v932_v58  ;;  %v713_v4 = vrot.slane %v692_v59, %v8816_v11  ;;  %v7773_v6 = vcombine.high %v892_v47, %v906_v55 }
  0x2e   : > { %v714_v12 = vcombine.low %v699_v60, %v706_v61  ;;  %v958_v13 = vcombine.low %v899_v54, %v913_v62  ;;  %v965_v14 = vrot.slane %v956_v63, %v8816_v11  ;;  %v657_v16 = vrot.slane %v643_v30, %v8816_v11 }
  0x2f   : > { %v947_v17 = vrot.slane %v940_v3, %v8816_v11  ;;  %v954_v18 = vrot.slane %v939_v0, %v8816_v11  ;;  %v728_v19 = vrot.slane %v713_v4, %v8816_v11  ;;  %v972_v24 = vrot.slane %v7773_v6, %v8816_v11 }
  0x30   : > { %v721_v25 = vrot.slane %v714_v12, %v8816_v11  ;;  %v979_v26 = vrot.slane %v958_v13, %v8816_v11  ;;  %v658_v27 = vcombine.high %v650_v31, %v650_v31  ;;  %v659_v28 = vcombine.high %v657_v16, %v657_v16 }
  0x31   : > { %v8872_v29 = vcombine.low %v947_v17, %v954_v18  ;;  %v980_v32 = vcombine.low %v965_v14, %v972_v24  ;;  %v666_v33 = vrot.slane %v650_v31, %v8816_v11  ;;  %v673_v30 = vrot.slane %v657_v16, %v8816_v11 }
  0x32   : > { %v8876_v34 = vcombine.low %v721_v25, %v728_v19  ;;  %v994_v35 = vrot.slane %v979_v26, %v8816_v11  ;;  %v680_v36 = vrot.slane %v658_v27, %v8816_v11  ;;  %v687_v37 = vrot.slane %v659_v28, %v8816_v11 }
  0x33   : > { %997 = vperm.xlu1 %8246, %v8872_v29   ;;  %v987_v38 = vrot.slane %v980_v32, %v8816_v11  ;;  %v1094_v39 = vcombine.high %v8828_v20, %v8828_v20  ;;  %v1101_v31 = vrot.slane %v8828_v20, %v8816_v11  ;;  %v1047_v40 = vcombine.high %v8831_v21, %v8831_v21 }
  0x34   : > { %771 = vperm.xlu0 %8245, %v8876_v34   ;;  %v730_v41 = vcombine.low %v666_v33, %v680_v36  ;;  %v7771_v42 = vcombine.high %v666_v33, %v680_v36  ;;  %v732_v43 = vcombine.low %v673_v30, %v687_v37  ;;  %v1054_v44 = vrot.slane %v8831_v21, %v8816_v11 }
  0x35   : > { %v8892_v45 = vcombine.low %v987_v38, %v994_v35  ;;  %v1108_v46 = vrot.slane %v1094_v39, %v8816_v11  ;;  %v1109_v47 = vcombine.high %v1101_v31, %v1101_v31  ;;  %v1117_v48 = vrot.slane %v1101_v31, %v8816_v11 }
  0x36   : > { %v739_v20 = vrot.slane %v730_v41, %v8816_v11  ;;  %v746_v49 = vrot.slane %v7771_v42, %v8816_v11  ;;  %v753_v50 = vrot.slane %v732_v43, %v8816_v11  ;;  %v1061_v51 = vrot.slane %v1047_v40, %v8816_v11 }
  0x37   : > { %1000 = vperm.xlu1 %8246, %v8892_v45   ;;  %v1110_v52 = vcombine.high %v1108_v46, %v1108_v46  ;;  %v1124_v21 = vrot.slane %v1108_v46, %v8816_v11  ;;  %v1131_v53 = vrot.slane %v1109_v47, %v8816_v11  ;;  %v1062_v54 = vcombine.high %v1054_v44, %v1054_v44 }
  0x38   : > { %v754_v55 = vcombine.low %v739_v20, %v746_v49  ;;  %v768_v56 = vrot.slane %v753_v50, %v8816_v11  ;;  %v1063_v57 = vcombine.high %v1061_v51, %v1061_v51  ;;  %v1070_v58 = vrot.slane %v1054_v44, %v8816_v11  ;;  %v8940_v20 = vld [vmem:[%s8808_s30] sm:$0x1] }
  0x39   : > { %v1138_v59 = vrot.slane %v1110_v52, %v8816_v11  ;;  %v1181_v60 = vcombine.low %v1117_v48, %v1131_v53  ;;  %v7775_v61 = vcombine.high %v1117_v48, %v1131_v53  ;;  %v1077_v62 = vrot.slane %v1061_v51, %v8816_v11 }
  0x3a   : > { %v761_v63 = vrot.slane %v754_v55, %v8816_v11  ;;  %v1084_v0 = vrot.slane %v1062_v54, %v8816_v11  ;;  %v1091_v3 = vrot.slane %v1063_v57, %v8816_v11  ;;  %v1319_v4 = vcombine.high %v8834_v22, %v8834_v22 }
  0x3b   : > { %v1183_v6 = vcombine.low %v1124_v21, %v1138_v59  ;;  %v1190_v12 = vrot.slane %v1181_v60, %v8816_v11  ;;  %v1197_v13 = vrot.slane %v7775_v61, %v8816_v11  ;;  %v1326_v14 = vrot.slane %v8834_v22, %v8816_v11 }
  0x3c   : > { %v8916_v16 = vcombine.low %v761_v63, %v768_v56  ;;  %v1141_v17 = vcombine.low %v1070_v58, %v1084_v0  ;;  %v7774_v18 = vcombine.high %v1070_v58, %v1084_v0  ;;  %v1143_v19 = vcombine.low %v1077_v62, %v1091_v3 }
  0x3d   : > { %v1204_v24 = vrot.slane %v1183_v6, %v8816_v11  ;;  %v1205_v25 = vcombine.low %v1190_v12, %v1197_v13  ;;  %v1333_v26 = vrot.slane %v1319_v4, %v8816_v11  ;;  %v1334_v27 = vcombine.high %v1326_v14, %v1326_v14 }
  0x3e   : > { %774 = vperm.xlu0 %8245, %v8916_v16   ;;  %v1150_v28 = vrot.slane %v1141_v17, %v8816_v11  ;;  %v1157_v32 = vrot.slane %v7774_v18, %v8816_v11  ;;  %v1164_v33 = vrot.slane %v1143_v19, %v8816_v11  ;;  %v1342_v22 = vrot.slane %v1326_v14, %v8816_v11 }
  0x3f   : > { %v1212_v30 = vrot.slane %v1205_v25, %v8816_v11  ;;  %v1219_v35 = vrot.slane %v1204_v24, %v8816_v11  ;;  %v1335_v36 = vcombine.high %v1333_v26, %v1333_v26  ;;  %v1349_v37 = vrot.slane %v1333_v26, %v8816_v11 }
  0x40   : > { %v1165_v38 = vcombine.low %v1150_v28, %v1157_v32  ;;  %v1179_v39 = vrot.slane %v1164_v33, %v8816_v11  ;;  %v1356_v31 = vrot.slane %v1334_v27, %v8816_v11  ;;  %v1272_v40 = vcombine.high %v8837_v23, %v8837_v23 }
  0x41   : > { %v8932_v41 = vcombine.low %v1212_v30, %v1219_v35  ;;  %v1363_v42 = vrot.slane %v1335_v36, %v8816_v11  ;;  %v1279_v43 = vrot.slane %v8837_v23, %v8816_v11  ;;  %vm536_vm0 = vcmp.gt.s32.totalorder %v8821_v15, 0 }
  0x42   : > { %v1172_v44 = vrot.slane %v1165_v38, %v8816_v11  ;;  %v1406_v46 = vcombine.low %v1342_v22, %v1356_v31  ;;  %v7777_v47 = vcombine.high %v1342_v22, %v1356_v31  ;;  %v1286_v48 = vrot.slane %v1272_v40, %v8816_v11 }
  0x43   : > { %1225 = vperm.xlu1 %8246, %v8932_v41   ;;  %v1408_v49 = vcombine.low %v1349_v37, %v1363_v42  ;;  %v1287_v50 = vcombine.high %v1279_v43, %v1279_v43  ;;  %v1295_v51 = vrot.slane %v1279_v43, %v8816_v11  ;;  %v537_v59 = vsel %vm536_vm0, %v8821_v15, 0 }
  0x44   : > { %v8945_v52 = vcombine.low %v1172_v44, %v1179_v39  ;;  %v1415_v23 = vrot.slane %v1406_v46, %v8816_v11  ;;  %v1422_v21 = vrot.slane %v7777_v47, %v8816_v11  ;;  %v1288_v53 = vcombine.high %v1286_v48, %v1286_v48 }
  0x45   : > { %v1429_v54 = vrot.slane %v1408_v49, %v8816_v11  ;;  %v1302_v55 = vrot.slane %v1286_v48, %v8816_v11  ;;  %v1309_v56 = vrot.slane %v1287_v50, %v8816_v11  ;;  %v7766_v63 = vadd.s32 4294967295, %v8940_v20 }
  0x46   : > { %1222 = vperm.xlu0 %8245, %v8945_v52   ;;  %v1430_v57 = vcombine.low %v1415_v23, %v1422_v21  ;;  %v1316_v58 = vrot.slane %v1288_v53, %v8816_v11  ;;  %vm540_vm2 = vcmp.lt.s32.totalorder %v537_v59, 5  ;;  %v543_v32 = vand.u32 127, %v514_v1 }
  0x47   : > { %v1444_v60 = vrot.slane %v1429_v54, %v8816_v11  ;;  %v1366_v61 = vcombine.low %v1295_v51, %v1309_v56  ;;  %v7776_v62 = vcombine.high %v1295_v51, %v1309_v56  ;;  %vm534_vm1 = vcmp.gt.s32.totalorder %v7766_v63, 0 }
  0x48   : > { %v1437_v0 = vrot.slane %v1430_v57, %v8816_v11  ;;  %v1368_v3 = vcombine.low %v1302_v55, %v1316_v58  ;;  %v535_v17 = vsel %vm534_vm1, %v7766_v63, 0  ;;  %v8966_v19 = vsel %vm540_vm2, %v537_v59, 5 }
  0x49   : > { %v1375_v4 = vrot.slane %v1366_v61, %v8816_v11  ;;  %v1382_v6 = vrot.slane %v7776_v62, %v8816_v11  ;;  %vm538_vm3 = vcmp.lt.s32.totalorder %v535_v17, 5  ;;  %v8977_v22 = vsub.s32 %v543_v32, %v8789_v5 }
  0x4a   : > { %v8960_v12 = vcombine.low %v1437_v0, %v1444_v60  ;;  %v1389_v13 = vrot.slane %v1368_v3, %v8816_v11  ;;  %v8972_v25 = vsel %vm538_vm3, %v535_v17, 5  ;;  %v564_v31 = vrot.slane %v543_v32, %v8816_v11  ;;  %v9008_v0 = vld [vmem:[%s10996_s3 + $0x14] ss:$8 sps:$4 sm:$0x7f]  }
  0x4b   : > { %v1390_v15 = vcombine.low %v1375_v4, %v1382_v6  ;;  %v11029_v61 = vmov 0.0   ;;  %7782 = vmatprep.subr.msk.bf16.mxu1 %vm11034_vm6, %v9008_v0  ;;  %7796 = vmatprep.subr.msk.bf16.mxu0 %vm11034_vm6, %v9008_v0  ;;  %vm516_vm0 = vcmp.eq.s32.totalorder %v8789_v5, 0  ;;  %vm1774_vm1 = vcmask 261120  }
  0x4c   : > { %1450 = vperm.xlu1 %8246, %v8960_v12   ;;  %v1404_v14 = vrot.slane %v1389_v13, %v8816_v11  ;;  %v565_v46 = vcombine.high %v564_v31, %v564_v31  ;;  %v9003_v63 = vrot.slane %v564_v31, %v8816_v11  ;;  %vm1802_vm2 = vcmask 523264  }
  0x4d   : > { %v1397_v18 = vrot.slane %v1390_v15, %v8816_v11 }
  0x4e   : > { %v8993_v51 = vrot.slane %v565_v46, %v8816_v11 }
  0x4f   : > { %v8968_v24 = vcombine.low %v1397_v18, %v1404_v14  ;;  %v8387_v14 = vld [vmem:[%s10996_s3 + $0x10] ss:$8 sps:$4 sm:$0x7f]  }
  0x50   : > { %552 = vperm.xlu1 %8246, %v8966_v19  }
  0x51   : > { %1447 = vperm.xlu0 %8245, %v8968_v24  }
  0x55   : > { %545 = vperm.xlu0 %8245, %v8972_v25  }
  0xae   : > { %v998_v26 = vpop.permute.xlu1 %997 }
  0xaf   : > { %v772_v27 = vpop.permute.xlu0 %771  ;;  %v1005_v40 = vrot.slane %v998_v26, %v8977_v22 }
  0xb0   : > { %v779_v1 = vrot.slane %v772_v27, %v8977_v22 }
  0xb2   : > { %v1001_v28 = vpop.permute.xlu1 %1000 }
  0xb3   : > { %v1009_v35 = vrot.slane %v1001_v28, %v8977_v22 }
  0xb5   : > { %v1010_v42 = vsel %vm11018_vm4, %v1009_v35, %v1005_v40 }
  0xb6   : > { %v1017_v48 = vrot.slane %v1010_v42, %v8816_v11 }
  0xb8   : > { %v1018_v53 = vcombine.high %v1017_v48, %v1017_v48  ;;  %v1025_v59 = vrot.slane %v1017_v48, %v8816_v11 }
  0xb9   : > { %v775_v33 = vpop.permute.xlu0 %774 }
  0xba   : > { %v783_v36 = vrot.slane %v775_v33, %v8977_v22  ;;  %v1032_v3 = vrot.slane %v1018_v53, %v8816_v11  ;;  %v9024_v33 = vsel %vm11034_vm6, %v8387_v14, 0 }
  0xbb   : > { %1636 = vmatpush1.bf16.msra.mxu1 %v9024_v33  ;;  %2375 = vmatpush1.bf16.msra.mxu0 %v9024_v33 }
  0xbc   : > { %v785_v43 = vsel %vm11018_vm4, %v783_v36, %v779_v1  ;;  %v8388_v36 = vld [vmem:[%s10996_s3 + $0x4] ss:$8 sps:$4 sm:$0xff]  }
  0xbd   : > { %v792_v49 = vrot.slane %v785_v43, %v8816_v11  ;;  %1637 = vmatprep.subr.bf16.mxu1 %v8388_v36  ;;  %2376 = vmatprep.subr.bf16.mxu0 %v8388_v36 }
  0xbe   : > { %v1226_v30 = vpop.permute.xlu1 %1225 }
  0xbf   : > { %v1234_v38 = vrot.slane %v1226_v30, %v8977_v22  ;;  %v793_v54 = vcombine.high %v792_v49, %v792_v49  ;;  %v800_v4 = vrot.slane %v792_v49, %v8816_v11 }
  0xc1   : > { %v1223_v37 = vpop.permute.xlu0 %1222  ;;  %v807_v6 = vrot.slane %v793_v54, %v8816_v11 }
  0xc2   : > { %v1230_v39 = vrot.slane %v1223_v37, %v8977_v22 }
  0xc4   : > { %v1235_v44 = vsel %vm11018_vm4, %v1234_v38, %v1230_v39  ;;  %v8390_v39 = vld [vmem:[%s10996_s3] ss:$8 sps:$4 sm:$0xff]  }
  0xc5   : > { %v1242_v50 = vrot.slane %v1235_v44, %v8816_v11  ;;  %1638 = vmatpush1.bf16.msra.mxu1 %v8390_v39  ;;  %2377 = vmatpush1.bf16.msra.mxu0 %v8390_v39 }
  0xc6   : > { %8045 = vmatprep.subr.bf16.mxu1 %v11029_v61  ;;  %8077 = vmatprep.subr.bf16.mxu0 %v11029_v61 }
  0xc7   : > { %v1451_v47 = vpop.permute.xlu1 %1450  ;;  %v1243_v57 = vcombine.high %v1242_v50, %v1242_v50  ;;  %v1250_v17 = vrot.slane %v1242_v50, %v8816_v11 }
  0xc8   : > { %v1459_v23 = vrot.slane %v1451_v47, %v8977_v22 }
  0xc9   : > { %v1257_v18 = vrot.slane %v1243_v57, %v8816_v11 }
  0xcb   : > { %v553_v21 = vpop.permute.xlu1 %552 }
  0xcc   : > { %v1448_v55 = vpop.permute.xlu0 %1447  ;;  %v557_v56 = vrot.slane %v553_v21, %v8794_v7 }
  0xcd   : > { %v1455_v58 = vrot.slane %v1448_v55, %v8977_v22 }
  0xce   : > { %vm581_vm5 = vcmp.eq.s32.totalorder %v557_v56, %v8993_v51 }
  0xcf   : > { %v1460_v60 = vsel %vm11018_vm4, %v1459_v23, %v1455_v58  ;;  %v7769_v62 = vsel %vm581_vm5, 1.0, %v11029_v61 }
  0xd0   : > { %v1467_v13 = vrot.slane %v1460_v60, %v8816_v11  ;;  %v546_v15 = vpop.permute.xlu0 %545  ;;  %v1036_v32 = vmul.f32 %v7769_v62, %v1032_v3  ;;  %v811_v30 = vmul.f32 %v7769_v62, %v807_v6  ;;  %v1261_v35 = vmul.f32 %v7769_v62, %v1257_v18 }
  0xd1   : > { %v550_v26 = vrot.slane %v546_v15, %v8794_v7  ;;  %v11031_v18 = vmov 1  }
  0xd2   : > { %v1468_v27 = vcombine.high %v1467_v13, %v1467_v13  ;;  %v1475_v28 = vrot.slane %v1467_v13, %v8816_v11  ;;  %8252 = vset.pattern.permute.xlu1 %v11031_v18  ;;  %8253 = vset.pattern.permute.xlu0 %v11031_v18 }
  0xd3   : > { %vm580_vm7 = vcmp.eq.s32.totalorder %v550_v26, %v9003_v63 }
  0xd4   : > { %v1482_v37 = vrot.slane %v1468_v27, %v8816_v11  ;;  %v7768_v38 = vsel %vm580_vm7, 1.0, %v11029_v61 }
  0xd5   : > { %v1035_v31 = vmul.f32 %v7768_v38, %v1025_v59  ;;  %v810_v40 = vmul.f32 %v7768_v38, %v800_v4  ;;  %v1485_v1 = vmul.f32 %v7768_v38, %v1475_v28  ;;  %v1260_v42 = vmul.f32 %v7768_v38, %v1250_v17 }
  0xd6   : > { %v1486_v43 = vmul.f32 %v7769_v62, %v1482_v37  ;;  %v1489_v44 = vcombine.low %v7768_v38, %v7769_v62 }
  0xd7   : > { %v1527_v46 = vcombine.low %v1035_v31, %v1036_v32  ;;  %v1507_v47 = vcombine.low %v810_v40, %v811_v30  ;;  %v1547_v48 = vcombine.low %v1260_v42, %v1261_v35 }
  0xd8   : > { %v1567_v49 = vcombine.low %v1485_v1, %v1486_v43  ;;  %v1496_v58 = vrot.slane %v1489_v44, %v8816_v11  ;;  %v9083_v44 = vld [vmem:[%s10997_s4 + $0x18] sm:$0xff]  }
  0xd9   : > { %v1534_v50 = vrot.slane %v1527_v46, %v8816_v11  ;;  %v1514_v23 = vrot.slane %v1507_v47, %v8816_v11  ;;  %v1554_v55 = vrot.slane %v1547_v48, %v8816_v11  ;;  %v9090_v46 = vld [vmem:[%s10997_s4 + $0x10] sm:$0xff]   ;;  %v9102_v48 = vld [vmem:[%s10997_s4 + $0x8] sm:$0xff]  }
  0xda   : > { %v1574_v54 = vrot.slane %v1567_v49, %v8816_v11  ;;  %v1503_v59 = vrot.slane %v1496_v58, %v8816_v11 }
  0xdb   : > { %v1541_v21 = vrot.slane %v1534_v50, %v8816_v11  ;;  %v1521_v53 = vrot.slane %v1514_v23, %v8816_v11  ;;  %v1561_v57 = vrot.slane %v1554_v55, %v8816_v11 }
  0xdc   : > { %v1581_v56 = vrot.slane %v1574_v54, %v8816_v11 }
  0xdd   : > { %1542 = vrot.lane.b32.xlu1 %v1541_v21, %s11012_s28  ;;  %1522 = vrot.lane.b32.xlu0 %v1521_v53, %s11016_s29  ;;  %s11071_s29 = smov 12   ;;  %s11073_s28 = smov 24  }
  0xe1   : > { %1582 = vrot.lane.b32.xlu1 %v1581_v56, %s11008_s19  ;;  %1562 = vrot.lane.b32.xlu0 %v1561_v57, %s11010_s21  ;;  %s11014_s19 = smov 32   ;;  %s11075_s21 = smov 64  }
 0x14f   : > { %v1543_v60 = vpop.permute.xlu1 %1542  ;;  %v1523_v62 = vpop.permute.xlu0 %1522 }
 0x150   : > { %v1586_v3 = vsel %vm1585_vm8, %v1503_v59, %v1523_v62  ;;  %v9117_v59 = vld [vmem:[%s10997_s4] sm:$0xff]  }
 0x151   : > { %v1588_v6 = vsel %vm11038_vm9, %v1586_v3, %v1543_v60 }
 0x153   : > { %v1583_v4 = vpop.permute.xlu1 %1582  ;;  %v1563_v13 = vpop.permute.xlu0 %1562 }
 0x154   : > { %v1590_v15 = vsel %vm11037_vm10, %v1588_v6, %v1563_v13 }
 0x155   : > { %v1592_v14 = vsel %vm11036_vm11, %v1590_v15, %v1583_v4 }
 0x156   : > { %v1593_v17 = vpack.c.bf16 %v1592_v14, %v1592_v14 }
 0x158   : > { %7783 = vmatmul.mubr.msk.bf16.vlgmr.msra.gmra.mxu1 %vm11035_vm12, %v1593_v17 }
 0x159   : > { %8046 = vmatpush3.bf16.msra.mxu1 %v9083_v44  ;;  %8053 = vmatprep.mubr.msk.bf16.mxu1 %vm8648_vm13, %v11029_v61 }
 0x15a   : > { %8047 = vmatprep.subr.bf16.mxu1 %v11029_v61 }
 0x15d   : > { %8048 = vmatpush3.bf16.msra.mxu1 %v9090_v46 }
 0x15e   : > { %8049 = vmatprep.subr.bf16.mxu1 %v11029_v61 }
 0x161   : > { %8050 = vmatpush3.bf16.msra.mxu1 %v9102_v48 }
 0x162   : > { %8051 = vmatprep.subr.bf16.mxu1 %v11029_v61 }
 0x165   : > { %8052 = vmatpush3.bf16.msra.mxu1 %v9117_v59 }
 0x166   : > { %8057 = vmatprep.subr.bf16.mxu1 %v11029_v61 }
 0x218   : > { %v1657_v26 = vpop.f32.mrf.mxu1 }
 0x219   : > { %v1671_v1 = vrot.slane %v1657_v26, %v8816_v11 }
 0x21a   : > { %v1659_v27 = vpop.f32.mrf.mxu1 }
 0x21b   : > { %v1694_v28 = vrot.slane %v1659_v27, %v8816_v11  ;;  %v1672_v42 = vcombine.high %v1671_v1, %v1671_v1  ;;  %v1679_v49 = vrot.slane %v1671_v1, %v8816_v11 }
 0x21c   : > { %v1661_v32 = vpop.f32.mrf.mxu1 }
 0x21d   : > { %v1695_v30 = vcombine.high %v1694_v28, %v1694_v28  ;;  %v1702_v35 = vrot.slane %v1694_v28, %v8816_v11  ;;  %v1686_v43 = vrot.slane %v1672_v42, %v8816_v11  ;;  %v9110_v21 = vrot.slane %v1679_v49, %v8794_v7 }
 0x21e   : > { %v1662_v36 = vpop.f32.mrf.mxu1 }
 0x21f   : > { %v1709_v37 = vrot.slane %v1695_v30, %v8816_v11  ;;  %v1713_v38 = vrot.slane %v1702_v35, %v8794_v7  ;;  %v9093_v47 = vrot.slane %v1686_v43, %v8794_v7  ;;  %v7765_v30 = vld [vmem:[%s11069_s2] ss:$0 sm:$0xff]  ;;  %s8655_s2 = smov 122  }
 0x220   : > { %v9135_v36 = vsel %vm516_vm0, %v7765_v30, 0.0  ;;  %v8540_v30 = vld [vmem:[%s8808_s30 + $0x1] sm:$0x1]  ;;  %s11070_s30 = smov 6  }
 0x221   : > { %v1717_v39 = vrot.slane %v1709_v37, %v8794_v7  ;;  %v1720_v31 = vmul.f32 0.0, %v1713_v38  ;;  %vm527_vm5 = vcmp.ne.s32.totalorder %v8540_v30, 0  ;;  %vm529_vm7 = vcmp.ne.s32.totalorder %v8540_v30, 7 }
 0x223   : > { %v1721_v40 = vmul.f32 0.0, %v1717_v39  ;;  %1734 = vrot.lane.b32.xlu0 %v1720_v31, %s11021_s26 }
 0x225   : > { %1736 = vrot.lane.b32.xlu1 %v1721_v40, %s11021_s26 }
 0x227   : > { %1742 = vrot.lane.b32.xlu0 %v1720_v31, %s11019_s27 }
 0x229   : > { %1744 = vrot.lane.b32.xlu1 %v1721_v40, %s11019_s27 }
 0x22b   : > { %1750 = vrot.lane.b32.xlu0 %v1720_v31, %s11014_s19 }
 0x22d   : > { %1752 = vrot.lane.b32.xlu1 %v1721_v40, %s11014_s19  ;;  %s11072_s19 = smov 18  }
 0x231   : > { %2093 = vperm.xlu1 %8252, %v8876_v34  }
 0x235   : > { %2134 = vperm.xlu1 %8252, %v8872_v29  }
 0x239   : > { %2137 = vperm.xlu1 %8252, %v8892_v45  }
 0x23d   : > { %2178 = vperm.xlu1 %8252, %v8932_v41  }
 0x241   : > { %2219 = vperm.xlu1 %8252, %v8960_v12  }
 0x245   : > { %2080 = vperm.xlu1 %8252, %v8966_v19  }
 0x249   : > { %1849 = vrot.lane.b32.xlu1 %v9093_v47, %s11021_s26 }
 0x24a   : > { %8255 = vset.pattern.permute.xlu1 %v11027_v2 }
 0x295   : > { %v1735_v50 = vpop.permute.xlu0 %1734 }
 0x296   : > { %v1740_v54 = vadd.f32 %v1735_v50, %v9110_v21 }
 0x297   : > { %v1737_v23 = vpop.permute.xlu1 %1736 }
 0x298   : > { %v1741_v56 = vadd.f32 %v1737_v23, %v9093_v47 }
 0x299   : > { %v1743_v53 = vpop.permute.xlu0 %1742 }
 0x29a   : > { %v1748_v57 = vadd.f32 %v1743_v53, %v1740_v54 }
 0x29b   : > { %v1745_v55 = vpop.permute.xlu1 %1744 }
 0x29c   : > { %v1749_v60 = vadd.f32 %v1745_v55, %v1741_v56 }
 0x29d   : > { %v1751_v58 = vpop.permute.xlu0 %1750 }
 0x29e   : > { %v1756_v62 = vadd.f32 %v1751_v58, %v1748_v57 }
 0x29f   : > { %v1753_v3 = vpop.permute.xlu1 %1752 }
 0x2a0   : > { %v1758_v4 = vadd.f32 %v1756_v62, %v1720_v31  ;;  %v1757_v6 = vadd.f32 %v1753_v3, %v1749_v60 }
 0x2a2   : > { %v1762_v13 = vmul.f32 0.01, %v1758_v4  ;;  %v1759_v15 = vadd.f32 %v1757_v6, %v1721_v40  ;;  %vm1760_vm14 = vcmp.ge.f32.partialorder %v1758_v4, 0.0 }
 0x2a4   : > { %v1763_v14 = vmul.f32 0.01, %v1759_v15  ;;  %vm1761_vm15 = vcmp.ge.f32.partialorder %v1759_v15, 0.0  ;;  %v1764_v17 = vsel %vm1760_vm14, %v1758_v4, %v1762_v13  ;;  %vm526_vm14 = vcmp.ne.s32.totalorder %v8940_v20, 0 }
 0x2a6   : > { %v1765_v26 = vsel %vm1761_vm15, %v1759_v15, %v1763_v14  ;;  %vm528_vm15 = vcmp.ne.s32.totalorder %v8940_v20, 7 }
 0x2a7   : > { %v8247_v27 = vpack.i.bf16 %v1765_v26, %v1764_v17 }
 0x2a9   : > { %8248 = vrot.lane.b32.xlu0 %v8247_v27, %s11019_s27  ;;  %s11074_s27 = smov 96  }
 0x2ac   : > { %v2094_v28 = vpop.permute.xlu1 %2093 }
 0x2ad   : > { %2096 = vperm.xlu0 %8253, %v8916_v16   ;;  %v2101_v23 = vrot.slane %v2094_v28, %v8977_v22 }
 0x2b0   : > { %v2135_v32 = vpop.permute.xlu1 %2134 }
 0x2b1   : > { %2175 = vperm.xlu0 %8253, %v8945_v52   ;;  %v2142_v43 = vrot.slane %v2135_v32, %v8977_v22 }
 0x2b4   : > { %v2138_v35 = vpop.permute.xlu1 %2137 }
 0x2b5   : > { %2216 = vperm.xlu0 %8253, %v8968_v24   ;;  %v2146_v49 = vrot.slane %v2138_v35, %v8977_v22 }
 0x2b7   : > { %v2147_v53 = vsel %vm11018_vm4, %v2146_v49, %v2142_v43 }
 0x2b8   : > { %v2179_v42 = vpop.permute.xlu1 %2178  ;;  %v2154_v56 = vrot.slane %v2147_v53, %v8816_v11 }
 0x2b9   : > { %2073 = vperm.xlu0 %8253, %v8972_v25   ;;  %v2187_v57 = vrot.slane %v2179_v42, %v8977_v22 }
 0x2ba   : > { %v2155_v13 = vcombine.high %v2154_v56, %v2154_v56  ;;  %v2162_v42 = vrot.slane %v2154_v56, %v8816_v11 }
 0x2bc   : > { %v2220_v50 = vpop.permute.xlu1 %2219  ;;  %v2169_v35 = vrot.slane %v2155_v13, %v8816_v11 }
 0x2bd   : > { %1847 = vrot.lane.b32.xlu0 %v9110_v21, %s11021_s26  ;;  %v2228_v15 = vrot.slane %v2220_v50, %v8977_v22 }
 0x2be   : > { %8254 = vset.pattern.permute.xlu0 %v11027_v2 }
 0x2c0   : > { %v2081_v60 = vpop.permute.xlu1 %2080 }
 0x2c1   : > { %v2085_v4 = vrot.slane %v2081_v60, %v8794_v7 }
 0x2c3   : > { %vm2087_vm3 = vcmp.eq.s32.totalorder %v2085_v4, %v8993_v51 }
 0x31b   : > { %v8249_v37 = vpop.permute.xlu0 %8248 }
 0x31c   : > { %v8251_v38 = vunpack.i.h.bf16 %v8249_v37  ;;  %v8250_v39 = vunpack.i.l.bf16 %v8249_v37 }
 0x31e   : > { %v1776_v31 = vsel %vm1774_vm1, %v9135_v36, %v8251_v38  ;;  %v1775_v40 = vsel %vm1774_vm1, %v9135_v36, %v8250_v39  ;;  %v9165_v39 = vsel %vm2087_vm3, 1.0, %v11029_v61  ;;  %vm530_vm3 = vmand %vm526_vm14, %vm528_vm15 }
 0x31f   : > { %v1777_v1 = vpack.c.bf16 %v1776_v31, %v1775_v40 }
 0x321   : > { %8054 = vmatmul.mubr.msk.bf16.vlgmr.msra.gmra.mxu1 %vm1802_vm2, %v1777_v1 }
 0x322   : > { %8061 = vmatprep.mubr.msk.bf16.mxu1 %vm8648_vm13, %v11029_v61 }
 0x328   : > { %v2097_v54 = vpop.permute.xlu0 %2096 }
 0x329   : > { %v2105_v55 = vrot.slane %v2097_v54, %v8977_v22 }
 0x32b   : > { %v2106_v58 = vsel %vm11018_vm4, %v2105_v55, %v2101_v23  ;;  %v2173_v55 = vmul.f32 %v9165_v39, %v2169_v35 }
 0x32c   : > { %v2113_v62 = vrot.slane %v2106_v58, %v8816_v11  ;;  %v2176_v3 = vpop.permute.xlu0 %2175 }
 0x32d   : > { %v2183_v6 = vrot.slane %v2176_v3, %v8977_v22 }
 0x32e   : > { %v2114_v14 = vcombine.high %v2113_v62, %v2113_v62  ;;  %v2121_v43 = vrot.slane %v2113_v62, %v8816_v11 }
 0x32f   : > { %v2188_v17 = vsel %vm11018_vm4, %v2187_v57, %v2183_v6 }
 0x330   : > { %v2195_v26 = vrot.slane %v2188_v17, %v8816_v11  ;;  %v2217_v27 = vpop.permute.xlu0 %2216  ;;  %v2128_v37 = vrot.slane %v2114_v14, %v8816_v11  ;;  %v1987_v14 = vsel %vm530_vm3, 1, %v11027_v2 }
 0x331   : > { %v2224_v28 = vrot.slane %v2217_v27, %v8977_v22  ;;  %v9192_v30 = vrot.slane %v1987_v14, %v8794_v7 }
 0x332   : > { %v2196_v32 = vcombine.high %v2195_v26, %v2195_v26  ;;  %v2203_v49 = vrot.slane %v2195_v26, %v8816_v11  ;;  %v2132_v54 = vmul.f32 %v9165_v39, %v2128_v37 }
 0x333   : > { %v2229_v38 = vsel %vm11018_vm4, %v2228_v15, %v2224_v28  ;;  %vm531_vm4 = vmand %vm527_vm5, %vm529_vm7  ;;  %vm2008_vm5 = vcmp.eq.s32.totalorder %v9192_v30, 1 }
 0x334   : > { %v2210_v31 = vrot.slane %v2196_v32, %v8816_v11  ;;  %v2236_v40 = vrot.slane %v2229_v38, %v8816_v11  ;;  %v2074_v1 = vpop.permute.xlu0 %2073  ;;  %v1988_v26 = vsel %vm531_vm4, 1, %v11027_v2  ;;  %vm2007_vm4 = vcmp.eq.s32.totalorder %v8789_v5, 1 }
 0x335   : > { %v2078_v50 = vrot.slane %v2074_v1, %v8794_v7  ;;  %vm2012_vm14 = vmand %vm2008_vm5, %vm2007_vm4 }
 0x336   : > { %v2237_v23 = vcombine.high %v2236_v40, %v2236_v40  ;;  %v2244_v53 = vrot.slane %v2236_v40, %v8816_v11  ;;  %v2214_v56 = vmul.f32 %v9165_v39, %v2210_v31  ;;  %v9197_v31 = vrot.slane %v1988_v26, %v8794_v7 }
 0x337   : > { %vm2086_vm0 = vcmp.eq.s32.totalorder %v2078_v50, %v9003_v63 }
 0x338   : > { %v2251_v57 = vrot.slane %v2237_v23, %v8816_v11  ;;  %v7794_v58 = vsel %vm2086_vm0, 1.0, %v11029_v61  ;;  %vm2009_vm7 = vcmp.eq.s32.totalorder %v9197_v31, 1  ;;  %v9225_v23 = vld [vmem:[%s10999_s6 + $0x8] sm:$0xff]  }
 0x339   : > { %v2131_v60 = vmul.f32 %v7794_v58, %v2121_v43  ;;  %v2172_v62 = vmul.f32 %v7794_v58, %v2162_v42  ;;  %v2213_v3 = vmul.f32 %v7794_v58, %v2203_v49  ;;  %v2254_v20 = vmul.f32 %v7794_v58, %v2244_v53  ;;  %vm2013_vm15 = vmand %vm2009_vm7, %vm2007_vm4  ;;  %v9213_v42 = vld [vmem:[%s8813_s22 + $0x4] sm:$0xf]  ;;  %v9217_v43 = vld [vmem:[%s8813_s22] sm:$0xf]  ;;  %8058 = vmatpush3.bf16.msra.mxu1 %v9225_v23 }
 0x33a   : > { %v2255_v4 = vmul.f32 %v9165_v39, %v2251_v57  ;;  %v2014_v49 = vsel %vm2012_vm14, 1, %v11027_v2  ;;  %v2015_v50 = vsel %vm2013_vm15, 1, %v11027_v2  ;;  %v1932_v53 = vand.u32 2147483647, %v9135_v36  ;;  %8059 = vmatprep.subr.bf16.mxu1 %v11029_v61 }
 0x33b   : > { %v2276_v6 = vcombine.low %v2131_v60, %v2132_v54  ;;  %v2296_v13 = vcombine.low %v2172_v62, %v2173_v55  ;;  %v2316_v15 = vcombine.low %v2213_v3, %v2214_v56  ;;  %v9233_v54 = vld [vmem:[%s10999_s6] sm:$0xff]   ;;  %v11025_v56 = vmov 2   ;;  %v1850_v62 = vpop.permute.xlu1 %1849  ;;  %v1848_v3 = vpop.permute.xlu0 %1847 }
 0x33c   : > { %v2336_v17 = vcombine.low %v2254_v20, %v2255_v4  ;;  %v1933_v55 = vsel %vm1774_vm1, %v1932_v53, -inf  ;;  %v2258_v57 = vcombine.low %v7794_v58, %v9165_v39 }
 0x33d   : > { %v2283_v27 = vrot.slane %v2276_v6, %v8816_v11  ;;  %v2303_v28 = vrot.slane %v2296_v13, %v8816_v11  ;;  %v2323_v32 = vrot.slane %v2316_v15, %v8816_v11  ;;  %8060 = vmatpush3.bf16.msra.mxu1 %v9233_v54 }
 0x33e   : > { %v2343_v35 = vrot.slane %v2336_v17, %v8816_v11  ;;  %8065 = vmatprep.subr.bf16.mxu1 %v11029_v61  ;;  %v2265_v60 = vrot.slane %v2258_v57, %v8816_v11 }
 0x33f   : > { %v2290_v37 = vrot.slane %v2283_v27, %v8816_v11  ;;  %v2310_v38 = vrot.slane %v2303_v28, %v8816_v11  ;;  %v2330_v40 = vrot.slane %v2323_v32, %v8816_v11 }
 0x340   : > { %v2350_v1 = vrot.slane %v2343_v35, %v8816_v11  ;;  %v2272_v20 = vrot.slane %v2265_v60, %v8816_v11 }
 0x341   : > { %2291 = vrot.lane.b32.xlu0 %v2290_v37, %s11070_s30  ;;  %2311 = vrot.lane.b32.xlu1 %v2310_v38, %s11071_s29 }
 0x345   : > { %2331 = vrot.lane.b32.xlu0 %v2330_v40, %s11072_s19  ;;  %2351 = vrot.lane.b32.xlu1 %v2350_v1, %s11073_s28  ;;  %v9281_v1 = vld [vmem:[%s10998_s5] ss:$0 sm:$0xff] }
 0x349   : > { %2040 = vperm.xlu1 %8255, %v9213_v42   ;;  %2037 = vperm.xlu0 %8254, %v9217_v43  }
 0x34d   : > { %2017 = vperm.xlu1 %8255, %v2014_v49   ;;  %2020 = vperm.xlu0 %8254, %v2015_v50  }
 0x371   : > { %1934 = vmax.xlane.f32.xlu1 %v1933_v55 }
 0x382   : > { %2001 = vperm.xlu1 %8255, %v9197_v31  }
 0x386   : > { %8270 = vset.pattern.permute.xlu1 %v11025_v56 }
 0x3b3   : > { %v2292_v4 = vpop.permute.xlu0 %2291  ;;  %v2312_v6 = vpop.permute.xlu1 %2311 }
 0x3b4   : > { %v2354_v13 = vsel %vm1585_vm8, %v2272_v20, %v2292_v4 }
 0x3b5   : > { %v2355_v15 = vsel %vm11038_vm9, %v2354_v13, %v2312_v6 }
 0x3b7   : > { %v2332_v14 = vpop.permute.xlu0 %2331  ;;  %v2352_v17 = vpop.permute.xlu1 %2351 }
 0x3b8   : > { %v2356_v26 = vsel %vm11037_vm10, %v2355_v15, %v2332_v14  ;;  %v11023_v15 = vmov 3  }
 0x3b9   : > { %v2357_v27 = vsel %vm11036_vm11, %v2356_v26, %v2352_v17 }
 0x3ba   : > { %v2358_v28 = vpack.c.bf16 %v2357_v27, %v2357_v27 }
 0x3bc   : > { %7797 = vmatmul.mubr.msk.bf16.vlgmr.msra.gmra.mxu0 %vm11035_vm12, %v2358_v28 }
 0x3bd   : > { %8078 = vmatpush3.bf16.msra.mxu0 %v9225_v23  ;;  %8081 = vmatprep.mubr.msk.bf16.mxu0 %vm8648_vm13, %v11029_v61 }
 0x3be   : > { %8079 = vmatprep.subr.bf16.mxu0 %v11029_v61 }
 0x3c1   : > { %8080 = vmatpush3.bf16.msra.mxu0 %v9233_v54 }
 0x3c2   : > { %7802 = vmatprep.subr.msk.bf16.mxu0 %vm11034_vm6, %v9008_v0 }
 0x3c4   : > { %v2041_v39 = vpop.permute.xlu1 %2040  ;;  %v2038_v58 = vpop.permute.xlu0 %2037 }
 0x3c5   : > { %v2045_v32 = vrot.slane %v2038_v58, %v8977_v22  ;;  %v2049_v35 = vrot.slane %v2041_v39, %v8977_v22 }
 0x3c8   : > { %v9257_v37 = vpop.permute.xlu1 %2017  ;;  %v9259_v38 = vpop.permute.xlu0 %2020 }
 0x3c9   : > { %vm2022_vm0 = vcmp.eq.s32.totalorder %v9257_v37, 1  ;;  %vm2023_vm3 = vcmp.eq.s32.totalorder %v9259_v38, 1 }
 0x3ca   : > { %v9265_v40 = vsel %vm2022_vm0, %v2045_v32, 0.0  ;;  %v9270_v0 = vsel %vm2023_vm3, %v2049_v35, 0.0 }
 0x3cb   : > { %2451 = vperm.xlu0 %8254, %v9265_v40  }
 0x3cf   : > { %2456 = vperm.xlu0 %8254, %v9270_v0  }
 0x3d3   : > { %8256 = vset.pattern.permute.xlu0 %v11031_v18 }
 0x3d4   : > { %2492 = vperm.xlu0 %8256, %v9265_v40  }
 0x3d8   : > { %2496 = vperm.xlu0 %8256, %v9270_v0  }
 0x3dc   : > { %8257 = vset.pattern.permute.xlu0 %v11025_v56 }
 0x3dd   : > { %2512 = vperm.xlu0 %8257, %v9265_v40  }
 0x3e1   : > { %v1840_v49 = vpop.f32.mrf.mxu1  ;;  %2516 = vperm.xlu0 %8257, %v9270_v0  }
 0x3e2   : > { %v1853_v50 = vadd.f32 %v1848_v3, %v1840_v49 }
 0x3e3   : > { %v8055_v53 = vpop.f32.mrf.mxu1 }
 0x3e4   : > { %v1861_v55 = vadd.f32 %v9281_v1, %v1853_v50 }
 0x3e5   : > { %v1843_v57 = vpop.f32.mrf.mxu1  ;;  %8258 = vset.pattern.permute.xlu0 %v11027_v2 }
 0x3e6   : > { %v1854_v60 = vadd.f32 %v1850_v62, %v1843_v57  ;;  %1998 = vperm.xlu0 %8258, %v9192_v30   ;;  %v1865_v4 = vmul.f32 0.01, %v1861_v55  ;;  %vm1863_vm4 = vcmp.ge.f32.partialorder %v1861_v55, 0.0 }
 0x3e7   : > { %v8056_v20 = vpop.f32.mrf.mxu1 }
 0x3e8   : > { %v1862_v6 = vadd.f32 %v9281_v1, %v1854_v60  ;;  %v1867_v3 = vsel %vm1863_vm4, %v1861_v55, %v1865_v4 }
 0x3ea   : > { %vm1864_vm14 = vcmp.ge.f32.partialorder %v1862_v6, 0.0  ;;  %v1866_v13 = vmul.f32 0.01, %v1862_v6  ;;  %8259 = vset.pattern.permute.xlu0 %v11023_v15 }
 0x3eb   : > { %2532 = vperm.xlu0 %8259, %v9265_v40  }
 0x3ec   : > { %v1868_v14 = vsel %vm1864_vm14, %v1862_v6, %v1866_v13 }
 0x3ed   : > { %v1869_v17 = vpack.c.bf16 %v1868_v14, %v1867_v3 }
 0x3ef   : > { %8062 = vmatmul.mubr.msk.bf16.vlgmr.msra.gmra.mxu1 %vm1774_vm1, %v1869_v17  ;;  %2536 = vperm.xlu0 %8259, %v9270_v0  }
 0x3f0   : > { %8066 = vmatpush3.bf16.msra.mxu1 %v9083_v44  ;;  %8073 = vmatprep.mubr.msk.bf16.mxu1 %vm8648_vm13, %v11029_v61 }
 0x3f1   : > { %8067 = vmatprep.subr.bf16.mxu1 %v11029_v61 }
 0x3f3   : > { %8271 = vset.pattern.permute.xlu0 %v11025_v56 }
 0x3f4   : > { %8068 = vmatpush3.bf16.msra.mxu1 %v9090_v46 }
 0x3f5   : > { %8069 = vmatprep.subr.bf16.mxu1 %v11029_v61 }
 0x3f8   : > { %8070 = vmatpush3.bf16.msra.mxu1 %v9102_v48 }
 0x3f9   : > { %8071 = vmatprep.subr.bf16.mxu1 %v11029_v61 }
 0x3fc   : > { %8072 = vmatpush3.bf16.msra.mxu1 %v9117_v59 }
 0x3fd   : > { %8085 = vmatprep.subr.bf16.mxu1 %v11029_v61 }
 0x446   : > { %v2452_v62 = vpop.permute.xlu0 %2451 }
 0x44a   : > { %v2457_v26 = vpop.permute.xlu0 %2456 }
 0x44f   : > { %v2493_v27 = vpop.permute.xlu0 %2492 }
 0x453   : > { %v2497_v50 = vpop.permute.xlu0 %2496 }
 0x458   : > { %v2513_v6 = vpop.permute.xlu0 %2512 }
 0x45c   : > { %v2517_v17 = vpop.permute.xlu0 %2516 }
 0x47c   : > { %v9303_v28 = vpop.f32.mrf.mxu0 }
 0x47e   : > { %v2398_v39 = vpop.f32.mrf.mxu0 }
 0x47f   : > { %v2433_v58 = vrot.slane %v2398_v39, %v8816_v11 }
 0x480   : > { %v2400_v32 = vpop.f32.mrf.mxu0 }
 0x481   : > { %v2434_v35 = vcombine.high %v2433_v58, %v2433_v58  ;;  %v2441_v49 = vrot.slane %v2433_v58, %v8816_v11 }
 0x482   : > { %v2401_v53 = vpop.f32.mrf.mxu0 }
 0x483   : > { %v2448_v55 = vrot.slane %v2434_v35, %v8816_v11  ;;  %v9309_v57 = vrot.slane %v2441_v49, %v8794_v7 }
 0x485   : > { %v9312_v60 = vrot.slane %v2448_v55, %v8794_v7  ;;  %v2469_v20 = vmul.f32 %v9309_v57, %v2452_v62  ;;  %v2499_v13 = vmul.f32 %v2493_v27, %v9309_v57  ;;  %v2519_v14 = vmul.f32 %v2513_v6, %v9309_v57  ;;  %v1935_v27 = vpop.xlane.xlu1 %1934 }
 0x486   : > { %vm1936_vm15 = vcmp.eq.f32.partialorder %v1935_v27, 0.0 }
 0x487   : > { %2483 = vrot.lane.b32.xlu1 %v2469_v20, %s11074_s27  ;;  %v2470_v4 = vmul.f32 %v9312_v60, %v2457_v26  ;;  %v2500_v3 = vmul.f32 %v2497_v50, %v9312_v60  ;;  %v2520_v62 = vmul.f32 %v2517_v17, %v9312_v60  ;;  %v9329_v26 = vld [vmem:[%s11000_s7] ss:$0 sm:$0xff] }
 0x489   : > { %2485 = vrot.lane.b32.xlu0 %v2470_v4, %s11074_s27 }
 0x48b   : > { %2503 = vrot.lane.b32.xlu1 %v2499_v13, %s11075_s21 }
 0x48d   : > { %2505 = vrot.lane.b32.xlu0 %v2500_v3, %s11075_s21 }
 0x48f   : > { %2523 = vrot.lane.b32.xlu1 %v2519_v14, %s11076_s0 }
 0x491   : > { %2525 = vrot.lane.b32.xlu0 %v2520_v62, %s11076_s0 }
 0x4af   : > { %v1925_v39 = vpop.f32.mrf.mxu1 }
 0x4b0   : > { %v1926_v58 = vadd.f32 %v9329_v26, %v1925_v39 }
 0x4b1   : > { %v8063_v32 = vpop.f32.mrf.mxu1 }
 0x4b2   : > { %v1941_v35 = vsel %vm1936_vm15, -1e+09, %v1926_v58 }
 0x4b3   : > { %v1943_v49 = vsel %vm1774_vm1, %v1941_v35, -inf  ;;  %v1928_v50 = vpop.f32.mrf.mxu1 }
 0x4b4   : > { %v1944_v53 = vrot.slane %v1943_v49, 4  ;;  %v1929_v55 = vadd.f32 %v9329_v26, %v1928_v50 }
 0x4b5   : > { %v8064_v20 = vpop.f32.mrf.mxu1 }
 0x4b6   : > { %v1945_v4 = vmax.f32 %v1943_v49, %v1944_v53  ;;  %v1942_v6 = vsel %vm1936_vm15, -1e+09, %v1929_v55 }
 0x4b7   : > { %v1950_v13 = vsel %vm1774_vm1, %v1942_v6, -inf }
 0x4b8   : > { %v1946_v3 = vrot.slane %v1945_v4, 2  ;;  %v1951_v14 = vrot.slane %v1950_v13, 4 }
 0x4ba   : > { %v1947_v17 = vmax.f32 %v1945_v4, %v1946_v3  ;;  %v1952_v62 = vmax.f32 %v1950_v13, %v1951_v14 }
 0x4bc   : > { %v1948_v27 = vrot.slane %v1947_v17, 1  ;;  %v1953_v15 = vrot.slane %v1952_v62, 2 }
 0x4be   : > { %v1949_v39 = vmax.f32 %v1947_v17, %v1948_v27  ;;  %v1954_v32 = vmax.f32 %v1952_v62, %v1953_v15 }
 0x4c0   : > { %v1957_v58 = vsub.f32 %v1941_v35, %v1949_v39  ;;  %v1955_v56 = vrot.slane %v1954_v32, 1 }
 0x4c2   : > { %v1959_v2 = vmul.f32 1.442695, %v1957_v58  ;;  %v1956_v61 = vmax.f32 %v1954_v32, %v1955_v56 }
 0x4c4   : > { %8464 = vpow2.f32 %v1959_v2  ;;  %v1958_v18 = vsub.f32 %v1942_v6, %v1956_v61 }
 0x4c6   : > { %v1961_v50 = vmul.f32 1.442695, %v1958_v18  ;;  %v1999_v18 = vpop.permute.xlu0 %1998 }
 0x4c7   : > { %vm2003_vm4 = vcmp.eq.s32.totalorder %v1999_v18, 1 }
 0x4c8   : > { %8466 = vpow2.f32 %v1961_v50 }
 0x4ca   : > { %v2533_v58 = vpop.permute.xlu0 %2532 }
 0x4d1   : > { %v8465_v49 = vpop.eup %8464 }
 0x4d2   : > { %v1963_v53 = vsel %vm1774_vm1, %v8465_v49, 0.0 }
 0x4d3   : > { %v1964_v55 = vrot.slane %v1963_v53, 4 }
 0x4d5   : > { %v8467_v20 = vpop.eup %8466  ;;  %v1965_v9 = vadd.f32 %v1964_v55, %v1963_v53 }
 0x4d6   : > { %v1970_v4 = vsel %vm1774_vm1, %v8467_v20, 0.0 }
 0x4d7   : > { %v1966_v13 = vrot.slane %v1965_v9, 2  ;;  %v1971_v3 = vrot.slane %v1970_v4, 4 }
 0x4d9   : > { %v1967_v14 = vadd.f32 %v1966_v13, %v1965_v9  ;;  %v1972_v15 = vadd.f32 %v1971_v3, %v1970_v4  ;;  %v2410_v9 = vrot.slane %v9303_v28, %v8816_v11  ;;  %v2002_v13 = vpop.permute.xlu1 %2001 }
 0x4da   : > { %vm2004_vm14 = vcmp.eq.s32.totalorder %v2002_v13, 1 }
 0x4db   : > { %v1968_v35 = vrot.slane %v1967_v14, 1  ;;  %v1973_v17 = vrot.slane %v1972_v15, 2 }
 0x4dd   : > { %v1969_v62 = vadd.f32 %v1968_v35, %v1967_v14  ;;  %v1974_v56 = vadd.f32 %v1973_v17, %v1972_v15  ;;  %v2537_v15 = vpop.permute.xlu0 %2536 }
 0x4df   : > { %8468 = vrcp.f32 %v1969_v62  ;;  %v1975_v2 = vrot.slane %v1974_v56, 1 }
 0x4e1   : > { %v1976_v61 = vadd.f32 %v1975_v2, %v1974_v56 }
 0x4e3   : > { %8470 = vrcp.f32 %v1976_v61 }
 0x4ec   : > { %v8469_v6 = vpop.eup %8468 }
 0x4ed   : > { %v1979_v27 = vmul.f32 %v8469_v6, %v8465_v49  ;;  %v2411_v49 = vcombine.high %v2410_v9, %v2410_v9 }
 0x4ef   : > { %v1981_v39 = vmul.f32 %v1979_v27, %v9110_v21  ;;  %v2425_v62 = vrot.slane %v2411_v49, %v8816_v11 }
 0x4f0   : > { %v8471_v32 = vpop.eup %8470 }
 0x4f1   : > { %v1983_v50 = vsub.f32 %v9135_v36, %v1981_v39  ;;  %v1980_v53 = vmul.f32 %v8471_v32, %v8467_v20  ;;  %v2418_v20 = vrot.slane %v2410_v9, %v8816_v11  ;;  %v9353_v18 = vrot.slane %v2425_v62, %v8794_v7 }
 0x4f3   : > { %v1985_v55 = vmax.f32 %v1983_v50, 0.0  ;;  %v1982_v4 = vmul.f32 %v1980_v53, %v9093_v47  ;;  %v9350_v2 = vrot.slane %v2418_v20, %v8794_v7 }
 0x4f5   : > { %v2005_v3 = vsel %vm2003_vm4, %v1985_v55, %v9135_v36  ;;  %v1984_v14 = vsub.f32 %v9135_v36, %v1982_v4  ;;  %v2540_v4 = vmul.f32 %v2537_v15, %v9312_v60 }
 0x4f6   : > { %2026 = vrot.lane.b32.xlu1 %v2005_v3, %s11075_s21 }
 0x4f7   : > { %v1986_v35 = vmax.f32 %v1984_v14, 0.0 }
 0x4f9   : > { %v2484_v17 = vpop.permute.xlu1 %2483  ;;  %v2006_v28 = vsel %vm2004_vm14, %v1986_v35, %v9135_v36  ;;  %v2539_v36 = vmul.f32 %v2533_v58, %v9309_v57  ;;  %v11077_v57 = vmov 1  }
 0x4fa   : > { %2028 = vrot.lane.b32.xlu0 %v2006_v28, %s11075_s21  ;;  %v2489_v6 = vadd.f32 %v2484_v17, %v9350_v2 }
 0x4fb   : > { %v2486_v56 = vpop.permute.xlu0 %2485 }
 0x4fc   : > { %v2490_v39 = vadd.f32 %v2486_v56, %v9353_v18 }
 0x4fd   : > { %v2504_v61 = vpop.permute.xlu1 %2503 }
 0x4fe   : > { %v2509_v32 = vadd.f32 %v2504_v61, %v2489_v6 }
 0x4ff   : > { %v2506_v27 = vpop.permute.xlu0 %2505 }
 0x500   : > { %v2510_v53 = vadd.f32 %v2506_v27, %v2490_v39 }
 0x501   : > { %v2524_v50 = vpop.permute.xlu1 %2523 }
 0x502   : > { %v2529_v9 = vadd.f32 %v2524_v50, %v2509_v32 }
 0x503   : > { %v2526_v55 = vpop.permute.xlu0 %2525 }
 0x504   : > { %v2541_v13 = vadd.f32 %v2539_v36, %v2529_v9  ;;  %v2530_v3 = vadd.f32 %v2526_v55, %v2510_v53  ;;  %v11078_v36 = vmov 0.0  }
 0x506   : > { %v2545_v14 = vmul.f32 0.01, %v2541_v13  ;;  %v2542_v49 = vadd.f32 %v2540_v4, %v2530_v3  ;;  %vm2543_vm15 = vcmp.ge.f32.partialorder %v2541_v13, 0.0 }
 0x508   : > { %v2546_v35 = vmul.f32 0.01, %v2542_v49  ;;  %vm2544_vm4 = vcmp.ge.f32.partialorder %v2542_v49, 0.0  ;;  %v2547_v20 = vsel %vm2543_vm15, %v2541_v13, %v2545_v14 }
 0x50a   : > { %v2548_v17 = vsel %vm2544_vm4, %v2542_v49, %v2546_v35 }
 0x50b   : > { %v8265_v28 = vpack.i.bf16 %v2548_v17, %v2547_v20 }
 0x50d   : > { %8266 = vrot.lane.b32.xlu0 %v8265_v28, %s11075_s21 }
 0x511   : > { %2836 = vperm.xlu0 %8271, %v8916_v16  }
 0x515   : > { %2915 = vperm.xlu0 %8271, %v8945_v52  }
 0x519   : > { %2956 = vperm.xlu0 %8271, %v8968_v24  }
 0x51d   : > { %2813 = vperm.xlu0 %8271, %v8972_v25  }
 0x521   : > { %2612 = vrot.lane.b32.xlu0 %v9350_v2, %s11074_s27 }
 0x522   : > { %8272 = vset.pattern.permute.xlu0 %v11077_v57 }
 0x568   : > { %v2027_v60 = vpop.permute.xlu1 %2026 }
 0x569   : > { %v9370_v15 = vsel %vm2022_vm0, %v9110_v21, %v2027_v60  ;;  %vm11079_vm0 = vcmask 1041409  }
 0x56a   : > { %vm11081_vm14 = vmmov %vm11079_vm0 }
 0x56b   : > { %vm11082_vm4 = vmmov %vm11079_vm0 }
 0x56c   : > { %v2029_v58 = vpop.permute.xlu0 %2028 }
 0x56d   : > { %v9375_v62 = vsel %vm2023_vm3, %v9093_v47, %v2029_v58  ;;  %vm11080_vm3 = vmmov %vm11079_vm0 }
 0x56e   : > { %v8260_v56 = vpack.i.bf16 %v9375_v62, %v9370_v15 }
 0x570   : > { %8261 = vrot.lane.b32.xlu1 %v8260_v56, %s11075_s21 }
 0x574   : > { %2833 = vperm.xlu1 %8270, %v8876_v34  }
 0x578   : > { %2874 = vperm.xlu1 %8270, %v8872_v29  }
 0x57c   : > { %2877 = vperm.xlu1 %8270, %v8892_v45  }
 0x57f   : > { %v8267_v47 = vpop.permute.xlu0 %8266 }
 0x580   : > { %2918 = vperm.xlu1 %8270, %v8932_v41   ;;  %v8269_v37 = vunpack.i.h.bf16 %v8267_v47  ;;  %v8268_v38 = vunpack.i.l.bf16 %v8267_v47 }
 0x584   : > { %2959 = vperm.xlu1 %8270, %v8960_v12  }
 0x588   : > { %2820 = vperm.xlu1 %8270, %v8966_v19  }
 0x58c   : > { %2614 = vrot.lane.b32.xlu1 %v9353_v18, %s11074_s27  ;;  %v2837_v50 = vpop.permute.xlu0 %2836 }
 0x58d   : > { %8273 = vset.pattern.permute.xlu1 %v11077_v57  ;;  %v2845_v4 = vrot.slane %v2837_v50, %v8977_v22 }
 0x590   : > { %v2916_v53 = vpop.permute.xlu0 %2915 }
 0x594   : > { %v2957_v13 = vpop.permute.xlu0 %2956 }
 0x595   : > { %v2964_v56 = vrot.slane %v2957_v13, %v8977_v22 }
 0x598   : > { %v2814_v20 = vpop.permute.xlu0 %2813 }
 0x599   : > { %v2818_v28 = vrot.slane %v2814_v20, %v8794_v7 }
 0x59b   : > { %vm2826_vm15 = vcmp.eq.s32.totalorder %v2818_v28, %v9003_v63 }
 0x5e2   : > { %v8262_v21 = vpop.permute.xlu1 %8261 }
 0x5e3   : > { %v8264_v61 = vunpack.i.h.bf16 %v8262_v21  ;;  %v8263_v6 = vunpack.i.l.bf16 %v8262_v21 }
 0x5e5   : > { %v2566_v27 = vsel %vm1774_vm1, %v8264_v61, %v8269_v37  ;;  %v2565_v39 = vsel %vm1774_vm1, %v8263_v6, %v8268_v38 }
 0x5e6   : > { %v2567_v32 = vpack.c.bf16 %v2566_v27, %v2565_v39 }
 0x5e8   : > { %8074 = vmatmul.mubr.msk.bf16.vlgmr.msra.gmra.mxu1 %vm1802_vm2, %v2567_v32 }
 0x5e9   : > { %8086 = vmatpush3.bf16.msra.mxu1 %v9083_v44  ;;  %8093 = vmatprep.mubr.msk.bf16.mxu1 %vm8648_vm13, %v11078_v36 }
 0x5ea   : > { %8087 = vmatprep.subr.bf16.mxu1 %v11078_v36 }
 0x5ed   : > { %8088 = vmatpush3.bf16.msra.mxu1 %v9090_v46 }
 0x5ee   : > { %8089 = vmatprep.subr.bf16.mxu1 %v11078_v36 }
 0x5ef   : > { %v2834_v9 = vpop.permute.xlu1 %2833 }
 0x5f0   : > { %v2841_v44 = vrot.slane %v2834_v9, %v8977_v22  ;;  %v9423_v9 = vsel %vm2826_vm15, 1.0, %v11078_v36  ;;  %vm2765_vm15 = vcmp.eq.s32.totalorder %v8789_v5, 2 }
 0x5f1   : > { %8090 = vmatpush3.bf16.msra.mxu1 %v9102_v48  ;;  %v2923_v48 = vrot.slane %v2916_v53, %v8977_v22 }
 0x5f2   : > { %8091 = vmatprep.subr.bf16.mxu1 %v11078_v36  ;;  %v2846_v49 = vsel %vm11079_vm0, %v2845_v4, %v2841_v44 }
 0x5f3   : > { %v2875_v55 = vpop.permute.xlu1 %2874  ;;  %v2853_v60 = vrot.slane %v2846_v49, %v8816_v11 }
 0x5f4   : > { %v2882_v3 = vrot.slane %v2875_v55, %v8977_v22 }
 0x5f5   : > { %8092 = vmatpush3.bf16.msra.mxu1 %v9117_v59  ;;  %v2854_v38 = vcombine.high %v2853_v60, %v2853_v60  ;;  %v2861_v39 = vrot.slane %v2853_v60, %v8816_v11 }
 0x5f6   : > { %8105 = vmatprep.subr.bf16.mxu1 %v11078_v36 }
 0x5f7   : > { %v2878_v46 = vpop.permute.xlu1 %2877  ;;  %v2868_v13 = vrot.slane %v2854_v38, %v8816_v11 }
 0x5f8   : > { %v2886_v14 = vrot.slane %v2878_v46, %v8977_v22 }
 0x5fa   : > { %v2887_v35 = vsel %vm11080_vm3, %v2886_v14, %v2882_v3  ;;  %vm2686_vm3 = vcmask 31744  }
 0x5fb   : > { %v2919_v17 = vpop.permute.xlu1 %2918  ;;  %v2894_v59 = vrot.slane %v2887_v35, %v8816_v11  ;;  %v2871_v35 = vmul.f32 %v9423_v9, %v2861_v39 }
 0x5fc   : > { %v2927_v58 = vrot.slane %v2919_v17, %v8977_v22 }
 0x5fd   : > { %v2895_v61 = vcombine.high %v2894_v59, %v2894_v59  ;;  %v2902_v32 = vrot.slane %v2894_v59, %v8816_v11 }
 0x5fe   : > { %v2928_v47 = vsel %vm11081_vm14, %v2927_v58, %v2923_v48  ;;  %vm2675_vm14 = vcmask 785920  }
 0x5ff   : > { %v2935_v21 = vrot.slane %v2928_v47, %v8816_v11  ;;  %v2960_v37 = vpop.permute.xlu1 %2959  ;;  %v2909_v44 = vrot.slane %v2895_v61, %v8816_v11  ;;  %v2912_v48 = vmul.f32 %v9423_v9, %v2902_v32 }
 0x600   : > { %v2968_v6 = vrot.slane %v2960_v37, %v8977_v22 }
 0x601   : > { %v2936_v27 = vcombine.high %v2935_v21, %v2935_v21  ;;  %v2943_v50 = vrot.slane %v2935_v21, %v8816_v11 }
 0x602   : > { %v2969_v53 = vsel %vm11082_vm4, %v2968_v6, %v2964_v56  ;;  %vm2768_vm4 = vmand %vm2008_vm5, %vm2765_vm15 }
 0x603   : > { %v2976_v55 = vrot.slane %v2969_v53, %v8816_v11  ;;  %v2821_v4 = vpop.permute.xlu1 %2820  ;;  %v2950_v3 = vrot.slane %v2936_v27, %v8816_v11  ;;  %v2953_v20 = vmul.f32 %v9423_v9, %v2943_v50 }
 0x604   : > { %v2825_v46 = vrot.slane %v2821_v4, %v8794_v7 }
 0x605   : > { %v2977_v14 = vcombine.high %v2976_v55, %v2976_v55  ;;  %v2984_v49 = vrot.slane %v2976_v55, %v8816_v11 }
 0x606   : > { %vm2827_vm0 = vcmp.eq.s32.totalorder %v2825_v46, %v8993_v51  ;;  %v2674_v46 = vand.u32 2147483647, %v9375_v62 }
 0x607   : > { %v2991_v17 = vrot.slane %v2977_v14, %v8816_v11  ;;  %v7801_v28 = vsel %vm2827_vm0, 1.0, %v11078_v36  ;;  %v2994_v60 = vmul.f32 %v9423_v9, %v2984_v49  ;;  %v2685_v49 = vand.u32 2147483647, %v9270_v0  ;;  %vm2769_vm0 = vmand %vm2009_vm7, %vm2765_vm15 }
 0x608   : > { %v2913_v59 = vmul.f32 %v7801_v28, %v2909_v44  ;;  %v2872_v58 = vmul.f32 %v7801_v28, %v2868_v13  ;;  %v2954_v56 = vmul.f32 %v7801_v28, %v2950_v3  ;;  %v2998_v47 = vcombine.low %v9423_v9, %v7801_v28 }
 0x609   : > { %v2995_v21 = vmul.f32 %v7801_v28, %v2991_v17  ;;  %v2684_v13 = vand.u32 2147483647, %v9265_v40  ;;  %v2673_v44 = vand.u32 2147483647, %v9370_v15  ;;  %v2613_v28 = vpop.permute.xlu0 %2612 }
 0x60a   : > { %v3036_v37 = vcombine.low %v2912_v48, %v2913_v59  ;;  %v3016_v38 = vcombine.low %v2871_v35, %v2872_v58  ;;  %v3056_v61 = vcombine.low %v2953_v20, %v2954_v56  ;;  %v2679_v48 = vsel %vm2675_vm14, %v2674_v46, -inf }
 0x60b   : > { %v3076_v6 = vcombine.low %v2994_v60, %v2995_v21  ;;  %v2687_v3 = vsel %vm2686_vm3, %v2684_v13, -inf  ;;  %v2676_v14 = vsel %vm2675_vm14, %v2673_v44, -inf  ;;  %v11083_v35 = vmov 0   ;;  %v2615_v21 = vpop.permute.xlu1 %2614 }
 0x60c   : > { %v3043_v27 = vrot.slane %v3036_v37, %v8816_v11  ;;  %v3023_v39 = vrot.slane %v3016_v38, %v8816_v11  ;;  %v3063_v32 = vrot.slane %v3056_v61, %v8816_v11  ;;  %v2770_v20 = vsel %vm2768_vm4, 1, %v11083_v35 }
 0x60d   : > { %v3083_v50 = vrot.slane %v3076_v6, %v8816_v11  ;;  %v2771_v17 = vsel %vm2769_vm0, 1, %v11083_v35  ;;  %v3005_v37 = vrot.slane %v2998_v47, %v8816_v11 }
 0x60e   : > { %v3050_v53 = vrot.slane %v3043_v27, %v8816_v11  ;;  %v3030_v55 = vrot.slane %v3023_v39, %v8816_v11  ;;  %v3070_v4 = vrot.slane %v3063_v32, %v8816_v11 }
 0x60f   : > { %v3090_v9 = vrot.slane %v3083_v50, %v8816_v11  ;;  %v3012_v32 = vrot.slane %v3005_v37, %v8816_v11 }
 0x610   : > { %3051 = vrot.lane.b32.xlu1 %v3050_v53, %s11071_s29  ;;  %3031 = vrot.lane.b32.xlu0 %v3030_v55, %s11070_s30 }
 0x614   : > { %3091 = vrot.lane.b32.xlu1 %v3090_v9, %s11073_s28  ;;  %3071 = vrot.lane.b32.xlu0 %v3070_v4, %s11072_s19 }
 0x618   : > { %2783 = vperm.xlu0 %8272, %v9217_v43   ;;  %v2690_v43 = vsel %vm2686_vm3, %v2685_v49, -inf  ;;  %v9490_v49 = vld [vmem:[%s10996_s3] ss:$8 sps:$4 sm:$0xff]  }
 0x637   : > { %2688 = vmax.xlane.f32.xlu0 %v2687_v3 }
 0x638   : > { %2677 = vmax.xlane.f32.xlu1 %v2676_v14 }
 0x63b   : > { %2680 = vmax.xlane.f32.xlu0 %v2679_v48 }
 0x63c   : > { %2691 = vmax.xlane.f32.xlu1 %v2690_v43 }
 0x64d   : > { %2786 = vperm.xlu1 %8273, %v9213_v42  }
 0x651   : > { %2773 = vperm.xlu0 %8272, %v2770_v20   ;;  %2776 = vperm.xlu1 %8273, %v2771_v17  }
 0x655   : > { %8274 = vset.pattern.permute.xlu1 %v11083_v35  ;;  %8275 = vset.pattern.permute.xlu0 %v11083_v35 }
 0x682   : > { %v3032_v38 = vpop.permute.xlu0 %3031  ;;  %v3052_v50 = vpop.permute.xlu1 %3051 }
 0x683   : > { %v3094_v55 = vsel %vm1585_vm8, %v3012_v32, %v3032_v38  ;;  %v11084_v38 = vmov 2  }
 0x684   : > { %v3095_v47 = vsel %vm11038_vm9, %v3094_v55, %v3052_v50 }
 0x686   : > { %v3072_v9 = vpop.permute.xlu0 %3071  ;;  %v3092_v46 = vpop.permute.xlu1 %3091 }
 0x687   : > { %v3096_v3 = vsel %vm11037_vm10, %v3095_v47, %v3072_v9 }
 0x688   : > { %v3097_v14 = vsel %vm11036_vm11, %v3096_v3, %v3092_v46 }
 0x689   : > { %v3098_v48 = vpack.c.bf16 %v3097_v14, %v3097_v14 }
 0x693   : > { %v2784_v43 = vpop.permute.xlu0 %2783 }
 0x6a8   : > { %v2605_v60 = vpop.f32.mrf.mxu1 }
 0x6a9   : > { %v2618_v59 = vadd.f32 %v2613_v28, %v2605_v60  ;;  %v9503_v28 = vld [vmem:[%s10996_s3 + $0x14] ss:$8 sps:$4 sm:$0x7f]  }
 0x6aa   : > { %v8075_v58 = vpop.f32.mrf.mxu1 }
 0x6ab   : > { %v2620_v56 = vadd.f32 %v9281_v1, %v2618_v59  ;;  %v2791_v58 = vrot.slane %v2784_v43, %v8977_v22 }
 0x6ac   : > { %v2608_v42 = vpop.f32.mrf.mxu1 }
 0x6ad   : > { %v2619_v61 = vadd.f32 %v2615_v21, %v2608_v42  ;;  %v2624_v27 = vmul.f32 0.01, %v2620_v56  ;;  %vm2622_vm15 = vcmp.ge.f32.partialorder %v2620_v56, 0.0 }
 0x6ae   : > { %v8076_v6 = vpop.f32.mrf.mxu1 }
 0x6af   : > { %v2621_v39 = vadd.f32 %v9281_v1, %v2619_v61  ;;  %v2626_v4 = vsel %vm2622_vm15, %v2620_v56, %v2624_v27  ;;  %v9483_v1 = vld [vmem:[%s10996_s3 + $0x4] ss:$8 sps:$4 sm:$0xff]  }
 0x6b1   : > { %vm2623_vm4 = vcmp.ge.f32.partialorder %v2621_v39, 0.0  ;;  %v2625_v53 = vmul.f32 0.01, %v2621_v39 }
 0x6b3   : > { %v2627_v13 = vsel %vm2623_vm4, %v2621_v39, %v2625_v53 }
 0x6b4   : > { %v2628_v44 = vpack.c.bf16 %v2627_v13, %v2626_v4 }
 0x6b6   : > { %8082 = vmatmul.mubr.msk.bf16.vlgmr.msra.gmra.mxu0 %vm1774_vm1, %v2628_v44 }
 0x6b7   : > { %3115 = vmatpush1.bf16.msra.mxu0 %v9024_v33  ;;  %3134 = vmatprep.mubr.bf16.mxu0 %v11083_v35 }
 0x6b8   : > { %3116 = vmatprep.subr.bf16.mxu0 %v9483_v1 }
 0x6bb   : > { %3117 = vmatpush1.bf16.msra.mxu0 %v9490_v49 }
 0x6bc   : > { %8097 = vmatprep.subr.bf16.mxu0 %v11078_v36 }
 0x6be   : > { %7803 = vmatmul.mubr.msk.bf16.vlgmr.msra.gmra.mxu0 %vm11035_vm12, %v3098_v48 }
 0x6bf   : > { %8098 = vmatpush3.bf16.msra.mxu0 %v9225_v23  ;;  %8101 = vmatprep.mubr.msk.bf16.mxu0 %vm8648_vm13, %v11078_v36 }
 0x6c0   : > { %8099 = vmatprep.subr.bf16.mxu0 %v11078_v36  ;;  %v2689_v17 = vpop.xlane.xlu0 %2688 }
 0x6c1   : > { %v2678_v20 = vpop.xlane.xlu1 %2677  ;;  %vm2693_vm4 = vcmp.eq.f32.partialorder %v2689_v17, 0.0 }
 0x6c3   : > { %8100 = vmatpush3.bf16.msra.mxu0 %v9233_v54 }
 0x6c4   : > { %7808 = vmatprep.subr.msk.bf16.mxu0 %vm11034_vm6, %v9503_v28  ;;  %v2681_v59 = vpop.xlane.xlu0 %2680  ;;  %vm2682_vm6 = vcmp.eq.f32.partialorder %v2678_v20, 0.0 }
 0x6c5   : > { %v2692_v60 = vpop.xlane.xlu1 %2691  ;;  %vm2695_vm12 = vmand %vm2682_vm6, %vm2693_vm4  ;;  %vm2683_vm11 = vcmp.eq.f32.partialorder %v2681_v59, 0.0 }
 0x6c6   : > { %vm2694_vm10 = vcmp.eq.f32.partialorder %v2692_v60, 0.0 }
 0x6c7   : > { %vm2696_vm9 = vmand %vm2683_vm11, %vm2694_vm10 }
 0x6c9   : > { %v2787_v23 = vpop.permute.xlu1 %2786 }
 0x6ca   : > { %v2795_v56 = vrot.slane %v2787_v23, %v8977_v22 }
 0x6cc   : > { %v9509_v21 = vpop.permute.xlu0 %2773 }
 0x6cd   : > { %vm2778_vm0 = vcmp.eq.s32.totalorder %v9509_v21, 1  ;;  %v9512_v54 = vpop.permute.xlu1 %2776 }
 0x6ce   : > { %v9517_v37 = vsel %vm2778_vm0, %v2791_v58, %v9265_v40  ;;  %vm2779_vm15 = vcmp.eq.s32.totalorder %v9512_v54, 1  ;;  %v11085_v40 = vmov 3  }
 0x6cf   : > { %v9523_v42 = vsel %vm2779_vm15, %v2795_v56, %v9270_v0  ;;  %3191 = vperm.xlu1 %8274, %v9517_v37  }
 0x6d0   : > { %3196 = vperm.xlu0 %8275, %v9523_v42  }
 0x6d3   : > { %8276 = vset.pattern.permute.xlu1 %v11077_v57 }
 0x6d4   : > { %3232 = vperm.xlu1 %8276, %v9517_v37   ;;  %8277 = vset.pattern.permute.xlu0 %v11084_v38 }
 0x6d5   : > { %3252 = vperm.xlu0 %8277, %v9517_v37  }
 0x6d8   : > { %3236 = vperm.xlu1 %8276, %v9523_v42  }
 0x6d9   : > { %8280 = vset.pattern.permute.xlu0 %v11077_v57 }
 0x6da   : > { %2756 = vperm.xlu0 %8280, %v9192_v30  }
 0x6dc   : > { %8278 = vset.pattern.permute.xlu1 %v11084_v38 }
 0x6dd   : > { %3256 = vperm.xlu1 %8278, %v9523_v42  }
 0x6de   : > { %8281 = vset.pattern.permute.xlu0 %v11085_v40 }
 0x6df   : > { %3276 = vperm.xlu0 %8281, %v9523_v42  }
 0x6e1   : > { %8279 = vset.pattern.permute.xlu1 %v11085_v40 }
 0x6e2   : > { %3272 = vperm.xlu1 %8279, %v9517_v37  }
 0x6e6   : > { %8282 = vset.pattern.permute.xlu1 %v11077_v57 }
 0x6e7   : > { %2759 = vperm.xlu1 %8282, %v9197_v31  }
 0x6eb   : > { %8293 = vset.pattern.permute.xlu1 %v11085_v40 }
 0x74a   : > { %v3192_v27 = vpop.permute.xlu1 %3191 }
 0x74f   : > { %v3233_v3 = vpop.permute.xlu1 %3232 }
 0x776   : > { %v2666_v0 = vpop.f32.mrf.mxu0 }
 0x777   : > { %v2667_v61 = vadd.f32 %v9329_v26, %v2666_v0  ;;  %v3197_v0 = vpop.permute.xlu0 %3196 }
 0x778   : > { %v8083_v6 = vpop.f32.mrf.mxu0 }
 0x779   : > { %v2701_v39 = vsel %vm2695_vm12, -1e+09, %v2667_v61  ;;  %v3237_v61 = vpop.permute.xlu1 %3236  ;;  %vm11086_vm12 = vcmask 1041409  }
 0x77a   : > { %v2703_v32 = vsel %vm1774_vm1, %v2701_v39, -inf  ;;  %v2669_v50 = vpop.f32.mrf.mxu0 }
 0x77b   : > { %v2704_v53 = vrot.slane %v2703_v32, 4  ;;  %v2670_v55 = vadd.f32 %v9329_v26, %v2669_v50 }
 0x77c   : > { %v8084_v9 = vpop.f32.mrf.mxu0 }
 0x77d   : > { %v2705_v4 = vmax.f32 %v2703_v32, %v2704_v53  ;;  %v2702_v13 = vsel %vm2696_vm9, -1e+09, %v2670_v55 }
 0x77e   : > { %v2710_v44 = vsel %vm1774_vm1, %v2702_v13, -inf  ;;  %v9547_v47 = vpop.f32.mrf.mxu0 }
 0x77f   : > { %v2706_v46 = vrot.slane %v2705_v4, 2  ;;  %v2711_v14 = vrot.slane %v2710_v44, 4 }
 0x780   : > { %v3138_v48 = vpop.f32.mrf.mxu0 }
 0x781   : > { %v2707_v43 = vmax.f32 %v2705_v4, %v2706_v46  ;;  %v2712_v20 = vmax.f32 %v2710_v44, %v2711_v14  ;;  %v3173_v17 = vrot.slane %v3138_v48, %v8816_v11 }
 0x782   : > { %v3140_v60 = vpop.f32.mrf.mxu0 }
 0x783   : > { %v2708_v59 = vrot.slane %v2707_v43, 1  ;;  %v2713_v23 = vrot.slane %v2712_v20, 2  ;;  %v3174_v26 = vcombine.high %v3173_v17, %v3173_v17  ;;  %v3181_v58 = vrot.slane %v3173_v17, %v8816_v11 }
 0x784   : > { %v3141_v56 = vpop.f32.mrf.mxu0 }
 0x785   : > { %v2709_v6 = vmax.f32 %v2707_v43, %v2708_v59  ;;  %v2714_v32 = vmax.f32 %v2712_v20, %v2713_v23  ;;  %v3188_v50 = vrot.slane %v3174_v26, %v8816_v11  ;;  %v9553_v53 = vrot.slane %v3181_v58, %v8794_v7  ;;  %v3253_v43 = vpop.permute.xlu0 %3252  ;;  %v3257_v20 = vpop.permute.xlu1 %3256 }
 0x787   : > { %v2717_v55 = vsub.f32 %v2701_v39, %v2709_v6  ;;  %v2715_v9 = vrot.slane %v2714_v32, 1  ;;  %v9556_v4 = vrot.slane %v3188_v50, %v8794_v7  ;;  %v3209_v44 = vmul.f32 %v9553_v53, %v3192_v27 }
 0x788   : > { %v3239_v46 = vmul.f32 %v3233_v3, %v9553_v53  ;;  %v3259_v39 = vmul.f32 %v3253_v43, %v9553_v53 }
 0x789   : > { %v2719_v14 = vmul.f32 1.442695, %v2717_v55  ;;  %v2716_v48 = vmax.f32 %v2714_v32, %v2715_v9  ;;  %3223 = vrot.lane.b32.xlu1 %v3209_v44, %s11074_s27  ;;  %v3260_v60 = vmul.f32 %v3257_v20, %v9556_v4  ;;  %v3210_v27 = vmul.f32 %v9556_v4, %v3197_v0 }
 0x78a   : > { %3243 = vrot.lane.b32.xlu0 %v3239_v46, %s11075_s21  ;;  %v3240_v3 = vmul.f32 %v3237_v61, %v9556_v4 }
 0x78b   : > { %8472 = vpow2.f32 %v2719_v14  ;;  %v2718_v17 = vsub.f32 %v2702_v13, %v2716_v48 }
 0x78d   : > { %v2721_v59 = vmul.f32 1.442695, %v2718_v17  ;;  %3263 = vrot.lane.b32.xlu1 %v3259_v39, %s11076_s0 }
 0x78e   : > { %3265 = vrot.lane.b32.xlu0 %v3260_v60, %s11076_s0 }
 0x78f   : > { %8474 = vpow2.f32 %v2721_v59 }
 0x791   : > { %3225 = vrot.lane.b32.xlu1 %v3210_v27, %s11074_s27  ;;  %v3273_v27 = vpop.permute.xlu1 %3272 }
 0x795   : > { %3245 = vrot.lane.b32.xlu1 %v3240_v3, %s11075_s21  ;;  %v3150_v3 = vrot.slane %v9547_v47, %v8816_v11 }
 0x798   : > { %v8473_v23 = vpop.eup %8472 }
 0x799   : > { %v2723_v13 = vsel %vm1774_vm1, %v8473_v23, 0.0 }
 0x79a   : > { %v2724_v26 = vrot.slane %v2723_v13, 4 }
 0x79c   : > { %v8475_v58 = vpop.eup %8474  ;;  %v2725_v56 = vadd.f32 %v2724_v26, %v2723_v13  ;;  %v2757_v13 = vpop.permute.xlu0 %2756 }
 0x79d   : > { %v2730_v6 = vsel %vm1774_vm1, %v8475_v58, 0.0  ;;  %v2760_v26 = vpop.permute.xlu1 %2759  ;;  %vm2761_vm10 = vcmp.eq.s32.totalorder %v2757_v13, 1 }
 0x79e   : > { %v2726_v32 = vrot.slane %v2725_v56, 2  ;;  %v2731_v50 = vrot.slane %v2730_v6, 4  ;;  %vm2762_vm11 = vcmp.eq.s32.totalorder %v2760_v26, 1 }
 0x7a0   : > { %v2727_v55 = vadd.f32 %v2726_v32, %v2725_v56  ;;  %v2732_v9 = vadd.f32 %v2731_v50, %v2730_v6  ;;  %v3158_v56 = vrot.slane %v3150_v3, %v8816_v11  ;;  %v3277_v6 = vpop.permute.xlu0 %3276  ;;  %v3151_v50 = vcombine.high %v3150_v3, %v3150_v3 }
 0x7a2   : > { %v2728_v44 = vrot.slane %v2727_v55, 1  ;;  %v2733_v0 = vrot.slane %v2732_v9, 2 }
 0x7a4   : > { %v2729_v46 = vadd.f32 %v2728_v44, %v2727_v55  ;;  %v2734_v14 = vadd.f32 %v2733_v0, %v2732_v9  ;;  %v3165_v44 = vrot.slane %v3151_v50, %v8816_v11 }
 0x7a6   : > { %v2735_v48 = vrot.slane %v2734_v14, 1  ;;  %8476 = vrcp.f32 %v2729_v46  ;;  %v9585_v47 = vrot.slane %v3165_v44, %v8794_v7 }
 0x7a8   : > { %v2736_v61 = vadd.f32 %v2735_v48, %v2734_v14  ;;  %v3279_v48 = vmul.f32 %v3273_v27, %v9553_v53 }
 0x7aa   : > { %8478 = vrcp.f32 %v2736_v61 }
 0x7b3   : > { %v8477_v43 = vpop.eup %8476 }
 0x7b4   : > { %v2739_v20 = vmul.f32 %v8477_v43, %v8473_v23  ;;  %v9580_v23 = vrot.slane %v3158_v56, %v8794_v7 }
 0x7b6   : > { %v2741_v17 = vmul.f32 %v2739_v20, %v9350_v2 }
 0x7b7   : > { %v8479_v39 = vpop.eup %8478 }
 0x7b8   : > { %2745 = vrot.lane.b32.xlu1 %v2741_v17, %s11075_s21  ;;  %v2740_v60 = vmul.f32 %v8479_v39, %v8475_v58 }
 0x7ba   : > { %v2742_v59 = vmul.f32 %v2740_v60, %v9353_v18  ;;  %v3280_v60 = vmul.f32 %v3277_v6, %v9556_v4 }
 0x7bc   : > { %2747 = vrot.lane.b32.xlu0 %v2742_v59, %s11075_s21 }
 0x7fb   : > { %v3224_v32 = vpop.permute.xlu1 %3223 }
 0x7fc   : > { %v3229_v58 = vadd.f32 %v3224_v32, %v9580_v23  ;;  %v3244_v55 = vpop.permute.xlu0 %3243 }
 0x7fe   : > { %v3249_v0 = vadd.f32 %v3244_v55, %v3229_v58 }
 0x7ff   : > { %v3264_v9 = vpop.permute.xlu1 %3263 }
 0x800   : > { %v3269_v14 = vadd.f32 %v3264_v9, %v3249_v0  ;;  %v3266_v39 = vpop.permute.xlu0 %3265 }
 0x802   : > { %v3281_v20 = vadd.f32 %v3279_v48, %v3269_v14 }
 0x803   : > { %v3226_v46 = vpop.permute.xlu1 %3225 }
 0x804   : > { %v3230_v61 = vadd.f32 %v3226_v46, %v9585_v47  ;;  %v3285_v3 = vmul.f32 0.01, %v3281_v20  ;;  %vm3283_vm6 = vcmp.ge.f32.partialorder %v3281_v20, 0.0 }
 0x806   : > { %v3287_v50 = vsel %vm3283_vm6, %v3281_v20, %v3285_v3  ;;  %v9646_v3 = vld [vmem:[%s10997_s4 + $0x8] sm:$0xff]  }
 0x807   : > { %v3246_v43 = vpop.permute.xlu1 %3245 }
 0x808   : > { %v3250_v17 = vadd.f32 %v3246_v43, %v3230_v61 }
 0x80a   : > { %v3270_v59 = vadd.f32 %v3266_v39, %v3250_v17  ;;  %v9630_v17 = vld [vmem:[%s10997_s4 + $0x18] sm:$0xff]   ;;  %v9639_v39 = vld [vmem:[%s10997_s4 + $0x10] sm:$0xff]  }
 0x80c   : > { %v3282_v56 = vadd.f32 %v3280_v60, %v3270_v59 }
 0x80e   : > { %vm3284_vm9 = vcmp.ge.f32.partialorder %v3282_v56, 0.0  ;;  %v3286_v32 = vmul.f32 0.01, %v3282_v56 }
 0x810   : > { %v3288_v58 = vsel %vm3284_vm9, %v3282_v56, %v3286_v32 }
 0x811   : > { %v8288_v55 = vpack.i.bf16 %v3288_v58, %v3287_v50  ;;  %v9653_v50 = vld [vmem:[%s10997_s4] sm:$0xff]  }
 0x813   : > { %8289 = vrot.lane.b32.xlu0 %v8288_v55, %s11075_s21 }
 0x817   : > { %3574 = vperm.xlu0 %8281, %v8916_v16  }
 0x81b   : > { %3653 = vperm.xlu0 %8281, %v8945_v52  }
 0x81f   : > { %3694 = vperm.xlu0 %8281, %v8968_v24  }
 0x823   : > { %3551 = vperm.xlu0 %8281, %v8972_v25  }
 0x827   : > { %3352 = vrot.lane.b32.xlu0 %v9580_v23, %s11074_s27 }
 0x828   : > { %8294 = vset.pattern.permute.xlu0 %v11084_v38 }
 0x82a   : > { %v2746_v53 = vpop.permute.xlu1 %2745 }
 0x82b   : > { %v2751_v4 = vsub.f32 %v9370_v15, %v2746_v53 }
 0x82d   : > { %v2753_v27 = vmax.f32 %v2751_v4, 0.0 }
 0x82e   : > { %v2748_v6 = vpop.permute.xlu0 %2747 }
 0x82f   : > { %v2752_v9 = vsub.f32 %v9375_v62, %v2748_v6  ;;  %v2763_v44 = vsel %vm2761_vm10, %v2753_v27, %v9370_v15  ;;  %vm3503_vm10 = vcmp.eq.s32.totalorder %v8789_v5, 3 }
 0x830   : > { %v9605_v14 = vsel %vm2778_vm0, %v9350_v2, %v2763_v44  ;;  %vm11087_vm0 = vmmov %vm11086_vm12 }
 0x831   : > { %v2754_v0 = vmax.f32 %v2752_v9, 0.0  ;;  %vm11089_vm6 = vmmov %vm11087_vm0 }
 0x833   : > { %v2764_v46 = vsel %vm2762_vm11, %v2754_v0, %v9375_v62  ;;  %vm3506_vm11 = vmand %vm2008_vm5, %vm3503_vm10 }
 0x834   : > { %v9610_v48 = vsel %vm2779_vm15, %v9353_v18, %v2764_v46  ;;  %vm11088_vm15 = vmmov %vm11087_vm0 }
 0x835   : > { %v8283_v61 = vpack.i.bf16 %v9610_v48, %v9605_v14 }
 0x837   : > { %8284 = vrot.lane.b32.xlu1 %v8283_v61, %s11075_s21 }
 0x83b   : > { %3571 = vperm.xlu1 %8293, %v8876_v34  }
 0x83f   : > { %3612 = vperm.xlu1 %8293, %v8872_v29  }
 0x843   : > { %3615 = vperm.xlu1 %8293, %v8892_v45  }
 0x847   : > { %3656 = vperm.xlu1 %8293, %v8932_v41  }
 0x84b   : > { %3697 = vperm.xlu1 %8293, %v8960_v12  }
 0x84f   : > { %3558 = vperm.xlu1 %8293, %v8966_v19  }
 0x853   : > { %3354 = vrot.lane.b32.xlu1 %v9585_v47, %s11074_s27 }
 0x854   : > { %8295 = vset.pattern.permute.xlu1 %v11084_v38 }
 0x885   : > { %v8290_v2 = vpop.permute.xlu0 %8289 }
 0x886   : > { %v8292_v15 = vunpack.i.h.bf16 %v8290_v2  ;;  %v8291_v62 = vunpack.i.l.bf16 %v8290_v2 }
 0x892   : > { %v3575_v20 = vpop.permute.xlu0 %3574 }
 0x893   : > { %v3583_v27 = vrot.slane %v3575_v20, %v8977_v22 }
 0x896   : > { %v3654_v60 = vpop.permute.xlu0 %3653 }
 0x897   : > { %v3661_v46 = vrot.slane %v3654_v60, %v8977_v22 }
 0x89a   : > { %v3695_v32 = vpop.permute.xlu0 %3694 }
 0x89e   : > { %v3552_v6 = vpop.permute.xlu0 %3551 }
 0x89f   : > { %v3556_v2 = vrot.slane %v3552_v6, %v8794_v7 }
 0x8a1   : > { %vm3564_vm4 = vcmp.eq.s32.totalorder %v3556_v2, %v9003_v63 }
 0x8a2   : > { %v9681_v6 = vsel %vm3564_vm4, 1.0, %v11078_v36  ;;  %vm11090_vm4 = vcmask 97280  }
 0x8a9   : > { %v8285_v18 = vpop.permute.xlu1 %8284 }
 0x8aa   : > { %v8287_v21 = vunpack.i.h.bf16 %v8285_v18  ;;  %v8286_v54 = vunpack.i.l.bf16 %v8285_v18 }
 0x8ac   : > { %v3306_v13 = vsel %vm1774_vm1, %v8287_v21, %v8292_v15  ;;  %v3305_v26 = vsel %vm1774_vm1, %v8286_v54, %v8291_v62 }
 0x8ad   : > { %v3307_v43 = vpack.c.bf16 %v3306_v13, %v3305_v26  ;;  %v3702_v13 = vrot.slane %v3695_v32, %v8977_v22 }
 0x8af   : > { %8094 = vmatmul.mubr.msk.bf16.vlgmr.msra.gmra.mxu1 %vm1802_vm2, %v3307_v43 }
 0x8b0   : > { %8106 = vmatpush3.bf16.msra.mxu1 %v9630_v17  ;;  %8113 = vmatprep.mubr.msk.bf16.mxu1 %vm8648_vm13, %v11078_v36 }
 0x8b1   : > { %8107 = vmatprep.subr.bf16.mxu1 %v11078_v36 }
 0x8b4   : > { %8108 = vmatpush3.bf16.msra.mxu1 %v9639_v39 }
 0x8b5   : > { %8109 = vmatprep.subr.bf16.mxu1 %v11078_v36 }
 0x8b6   : > { %v3572_v59 = vpop.permute.xlu1 %3571 }
 0x8b7   : > { %v3579_v58 = vrot.slane %v3572_v59, %v8977_v22 }
 0x8b8   : > { %8110 = vmatpush3.bf16.msra.mxu1 %v9646_v3 }
 0x8b9   : > { %8111 = vmatprep.subr.bf16.mxu1 %v11078_v36  ;;  %v3584_v9 = vsel %vm11086_vm12, %v3583_v27, %v3579_v58  ;;  %vm3507_vm12 = vmand %vm2009_vm7, %vm3503_vm10  ;;  %vm11093_vm10 = vcmask 244736  }
 0x8ba   : > { %v3613_v56 = vpop.permute.xlu1 %3612  ;;  %v3591_v18 = vrot.slane %v3584_v9, %v8816_v11 }
 0x8bb   : > { %v3620_v55 = vrot.slane %v3613_v56, %v8977_v22 }
 0x8bc   : > { %8112 = vmatpush3.bf16.msra.mxu1 %v9653_v50  ;;  %v3592_v20 = vcombine.high %v3591_v18, %v3591_v18  ;;  %v3599_v60 = vrot.slane %v3591_v18, %v8816_v11 }
 0x8bd   : > { %8125 = vmatprep.subr.bf16.mxu1 %v11078_v36 }
 0x8be   : > { %v3616_v53 = vpop.permute.xlu1 %3615 }
 0x8bf   : > { %v3624_v4 = vrot.slane %v3616_v53, %v8977_v22 }
 0x8c1   : > { %v3625_v44 = vsel %vm11087_vm0, %v3624_v4, %v3620_v55 }
 0x8c2   : > { %v3657_v0 = vpop.permute.xlu1 %3656  ;;  %v3632_v15 = vrot.slane %v3625_v44, %v8816_v11 }
 0x8c3   : > { %v3665_v61 = vrot.slane %v3657_v0, %v8977_v22  ;;  %v3606_v0 = vrot.slane %v3592_v20, %v8816_v11 }
 0x8c4   : > { %v3633_v26 = vcombine.high %v3632_v15, %v3632_v15  ;;  %v3640_v58 = vrot.slane %v3632_v15, %v8816_v11 }
 0x8c5   : > { %v3666_v62 = vsel %vm11088_vm15, %v3665_v61, %v3661_v46  ;;  %v3609_v46 = vmul.f32 %v9681_v6, %v3599_v60 }
 0x8c6   : > { %v3673_v21 = vrot.slane %v3666_v62, %v8816_v11  ;;  %v3698_v54 = vpop.permute.xlu1 %3697  ;;  %v3647_v32 = vrot.slane %v3633_v26, %v8816_v11  ;;  %v3650_v2 = vmul.f32 %v9681_v6, %v3640_v58 }
 0x8c7   : > { %v3706_v43 = vrot.slane %v3698_v54, %v8977_v22 }
 0x8c8   : > { %v3674_v59 = vcombine.high %v3673_v21, %v3673_v21  ;;  %v3681_v55 = vrot.slane %v3673_v21, %v8816_v11 }
 0x8c9   : > { %v3707_v56 = vsel %vm11089_vm6, %v3706_v43, %v3702_v13  ;;  %vm11091_vm6 = vcmask 146432  }
 0x8ca   : > { %v3714_v53 = vrot.slane %v3707_v56, %v8816_v11  ;;  %v3559_v4 = vpop.permute.xlu1 %3558  ;;  %v3688_v61 = vrot.slane %v3674_v59, %v8816_v11  ;;  %v3691_v18 = vmul.f32 %v9681_v6, %v3681_v55 }
 0x8cb   : > { %v3563_v27 = vrot.slane %v3559_v4, %v8794_v7 }
 0x8cc   : > { %v3715_v9 = vcombine.high %v3714_v53, %v3714_v53  ;;  %v3722_v44 = vrot.slane %v3714_v53, %v8816_v11 }
 0x8cd   : > { %vm3565_vm9 = vcmp.eq.s32.totalorder %v3563_v27, %v8993_v51 }
 0x8ce   : > { %v3729_v15 = vrot.slane %v3715_v9, %v8816_v11  ;;  %v7807_v62 = vsel %vm3565_vm9, 1.0, %v11078_v36  ;;  %v3732_v43 = vmul.f32 %v9681_v6, %v3722_v44  ;;  %vm11092_vm9 = vcmask 195584  }
 0x8cf   : > { %v3610_v21 = vmul.f32 %v7807_v62, %v3606_v0  ;;  %v3651_v54 = vmul.f32 %v7807_v62, %v3647_v32  ;;  %v3692_v13 = vmul.f32 %v7807_v62, %v3688_v61  ;;  %v3736_v26 = vcombine.low %v9681_v6, %v7807_v62  ;;  %v9707_v0 = vld [vmem:[%s8813_s22] sm:$0xf] }
 0x8d0   : > { %v3733_v20 = vmul.f32 %v7807_v62, %v3729_v15  ;;  %v3413_v61 = vand.u32 2147483647, %v9605_v14  ;;  %v3424_v62 = vand.u32 2147483647, %v9523_v42 }
 0x8d1   : > { %v3774_v60 = vcombine.low %v3650_v2, %v3651_v54  ;;  %v3754_v59 = vcombine.low %v3609_v46, %v3610_v21  ;;  %v3794_v56 = vcombine.low %v3691_v18, %v3692_v13  ;;  %v3423_v46 = vand.u32 2147483647, %v9517_v37  ;;  %v9724_v13 = vld [vmem:[%s8813_s22 + $0x4] sm:$0xf] }
 0x8d2   : > { %v3814_v53 = vcombine.low %v3732_v43, %v3733_v20  ;;  %v3414_v18 = vand.u32 2147483647, %v9610_v48  ;;  %v3415_v15 = vsel %vm2675_vm14, %v3413_v61, -inf  ;;  %v3428_v54 = vsel %vm2686_vm3, %v3424_v62, -inf }
 0x8d3   : > { %v3781_v58 = vrot.slane %v3774_v60, %v8816_v11  ;;  %v3761_v55 = vrot.slane %v3754_v59, %v8816_v11  ;;  %v3801_v9 = vrot.slane %v3794_v56, %v8816_v11  ;;  %v3425_v2 = vsel %vm2686_vm3, %v3423_v46, -inf  ;;  %v3353_v60 = vpop.permute.xlu0 %3352 }
 0x8d4   : > { %v3821_v32 = vrot.slane %v3814_v53, %v8816_v11  ;;  %v3418_v21 = vsel %vm2675_vm14, %v3414_v18, -inf  ;;  %v3508_v43 = vsel %vm3506_vm11, 1, %v11083_v35  ;;  %v3509_v20 = vsel %vm3507_vm12, 1, %v11083_v35 }
 0x8d5   : > { %v3788_v4 = vrot.slane %v3781_v58, %v8816_v11  ;;  %v3768_v27 = vrot.slane %v3761_v55, %v8816_v11  ;;  %v3808_v44 = vrot.slane %v3801_v9, %v8816_v11  ;;  %v9734_v58 = vld [vmem:[%s10998_s5] ss:$0 sm:$0xff]  ;;  %vm11095_vm11 = vcmask 1046528  }
 0x8d6   : > { %v3828_v6 = vrot.slane %v3821_v32, %v8816_v11 }
 0x8d7   : > { %3789 = vrot.lane.b32.xlu1 %v3788_v4, %s11071_s29  ;;  %3769 = vrot.lane.b32.xlu0 %v3768_v27, %s11070_s30  ;;  %v3355_v4 = vpop.permute.xlu1 %3354  ;;  %v3743_v27 = vrot.slane %v3736_v26, %v8816_v11 }
 0x8db   : > { %3829 = vrot.lane.b32.xlu1 %v3828_v6, %s11073_s28  ;;  %3809 = vrot.lane.b32.xlu0 %v3808_v44, %s11072_s19 }
 0x8df   : > { %3521 = vperm.xlu0 %8294, %v9707_v0  }
 0x8fe   : > { %3426 = vmax.xlane.f32.xlu0 %v3425_v2  ;;  %v3750_v2 = vrot.slane %v3743_v27, %v8816_v11  ;;  %v9763_v27 = vld [vmem:[%s10999_s6] sm:$0xff]  }
 0x8ff   : > { %3416 = vmax.xlane.f32.xlu1 %v3415_v15  ;;  %11094 = vst [vmem:[#allocation10_spill] sm:$0xff] %v9763_v27 }
 0x902   : > { %3419 = vmax.xlane.f32.xlu0 %v3418_v21 }
 0x903   : > { %3429 = vmax.xlane.f32.xlu1 %v3428_v54 }
 0x914   : > { %3524 = vperm.xlu1 %8295, %v9724_v13  }
 0x918   : > { %3511 = vperm.xlu0 %8294, %v3508_v43   ;;  %3514 = vperm.xlu1 %8295, %v3509_v20  }
 0x91c   : > { %8296 = vset.pattern.permute.xlu1 %v11083_v35  ;;  %8297 = vset.pattern.permute.xlu0 %v11083_v35 }
 0x949   : > { %v3770_v9 = vpop.permute.xlu0 %3769  ;;  %v3790_v18 = vpop.permute.xlu1 %3789 }
 0x94a   : > { %v3832_v62 = vsel %vm1585_vm8, %v3750_v2, %v3770_v9 }
 0x94b   : > { %v3833_v26 = vsel %vm11090_vm4, %v3832_v62, %v3790_v18 }
 0x94d   : > { %v3810_v21 = vpop.permute.xlu0 %3809 }
 0x96f   : > { %v3345_v59 = vpop.f32.mrf.mxu1 }
 0x970   : > { %v3358_v56 = vadd.f32 %v3353_v60, %v3345_v59  ;;  %v3834_v60 = vsel %vm11091_vm6, %v3833_v26, %v3810_v21  ;;  %v3830_v59 = vpop.permute.xlu1 %3829 }
 0x971   : > { %v8095_v53 = vpop.f32.mrf.mxu1 }
 0x972   : > { %v3360_v55 = vadd.f32 %v9734_v58, %v3358_v56  ;;  %v3835_v56 = vsel %vm11092_vm9, %v3834_v60, %v3830_v59 }
 0x973   : > { %v3348_v32 = vpop.f32.mrf.mxu1  ;;  %v3836_v53 = vpack.c.bf16 %v3835_v56, %v3835_v56 }
 0x974   : > { %v3359_v6 = vadd.f32 %v3355_v4, %v3348_v32  ;;  %v3364_v46 = vmul.f32 0.01, %v3360_v55  ;;  %vm3362_vm0 = vcmp.ge.f32.partialorder %v3360_v55, 0.0  ;;  %v9754_v4 = vld [vmem:[%s10999_s6 + $0x8] sm:$0xff]  }
 0x975   : > { %v8096_v44 = vpop.f32.mrf.mxu1 }
 0x976   : > { %v3361_v61 = vadd.f32 %v9734_v58, %v3359_v6  ;;  %v3366_v54 = vsel %vm3362_vm0, %v3360_v55, %v3364_v46  ;;  %v3522_v55 = vpop.permute.xlu0 %3521 }
 0x977   : > { %v3529_v44 = vrot.slane %v3522_v55, %v8977_v22 }
 0x978   : > { %vm3363_vm15 = vcmp.ge.f32.partialorder %v3361_v61, 0.0  ;;  %v3365_v15 = vmul.f32 0.01, %v3361_v61 }
 0x97a   : > { %v3367_v43 = vsel %vm3363_vm15, %v3361_v61, %v3365_v15 }
 0x97b   : > { %v3368_v20 = vpack.c.bf16 %v3367_v43, %v3366_v54 }
 0x97d   : > { %8102 = vmatmul.mubr.msk.bf16.vlgmr.msra.gmra.mxu0 %vm1774_vm1, %v3368_v20 }
 0x97e   : > { %3853 = vmatpush1.bf16.msra.mxu0 %v9024_v33  ;;  %3872 = vmatprep.mubr.bf16.mxu0 %v11083_v35 }
 0x97f   : > { %3854 = vmatprep.subr.bf16.mxu0 %v9483_v1 }
 0x982   : > { %3855 = vmatpush1.bf16.msra.mxu0 %v9490_v49 }
 0x983   : > { %8117 = vmatprep.subr.bf16.mxu0 %v11078_v36 }
 0x985   : > { %7809 = vmatmul.mubr.msk.bf16.vlgmr.msra.gmra.mxu0 %vm11093_vm10, %v3836_v53 }
 0x986   : > { %8118 = vmatpush3.bf16.msra.mxu0 %v9754_v4  ;;  %8121 = vmatprep.mubr.msk.bf16.mxu0 %vm8648_vm13, %v11078_v36 }
 0x987   : > { %8119 = vmatprep.subr.bf16.mxu0 %v11078_v36  ;;  %v3427_v49 = vpop.xlane.xlu0 %3426 }
 0x988   : > { %v3417_v1 = vpop.xlane.xlu1 %3416  ;;  %vm3431_vm15 = vcmp.eq.f32.partialorder %v3427_v49, 0.0 }
 0x989   : > { %vm3421_vm4 = vcmp.eq.f32.partialorder %v3417_v1, 0.0 }
 0x98a   : > { %8120 = vmatpush3.bf16.msra.mxu0 %v9763_v27  ;;  %vm3433_vm6 = vmand %vm3421_vm4, %vm3431_vm15 }
 0x98b   : > { %7814 = vmatprep.subr.msk.bf16.mxu0 %vm11095_vm11, %v9503_v28  ;;  %v3420_v9 = vpop.xlane.xlu0 %3419 }
 0x98c   : > { %v3430_v32 = vpop.xlane.xlu1 %3429  ;;  %vm3422_vm9 = vcmp.eq.f32.partialorder %v3420_v9, 0.0 }
 0x98d   : > { %vm3432_vm10 = vcmp.eq.f32.partialorder %v3430_v32, 0.0 }
 0x98e   : > { %vm3434_vm11 = vmand %vm3422_vm9, %vm3432_vm10 }
 0x990   : > { %v3525_v6 = vpop.permute.xlu1 %3524 }
 0x991   : > { %v3533_v46 = vrot.slane %v3525_v6, %v8977_v22 }
 0x993   : > { %v9770_v61 = vpop.permute.xlu0 %3511 }
 0x994   : > { %vm3516_vm12 = vcmp.eq.s32.totalorder %v9770_v61, 1  ;;  %v9773_v2 = vpop.permute.xlu1 %3514 }
 0x995   : > { %v9778_v18 = vsel %vm3516_vm12, %v3529_v44, %v9517_v37  ;;  %vm3517_vm0 = vcmp.eq.s32.totalorder %v9773_v2, 1 }
 0x996   : > { %v9784_v28 = vsel %vm3517_vm0, %v3533_v46, %v9523_v42  ;;  %3929 = vperm.xlu1 %8296, %v9778_v18   ;;  %v9806_v42 = vld [vmem:[%s11000_s7] ss:$0 sm:$0xff] }
 0x997   : > { %3934 = vperm.xlu0 %8297, %v9784_v28   ;;  %11096 = vst [vmem:[#allocation11_spill] sm:$0xff] %v9806_v42 }
 0x99a   : > { %8298 = vset.pattern.permute.xlu1 %v11077_v57 }
 0x99b   : > { %3970 = vperm.xlu1 %8298, %v9778_v18   ;;  %8299 = vset.pattern.permute.xlu0 %v11084_v38 }
 0x99c   : > { %3990 = vperm.xlu0 %8299, %v9778_v18  }
 0x99f   : > { %3974 = vperm.xlu1 %8298, %v9784_v28  }
 0x9a0   : > { %8302 = vset.pattern.permute.xlu0 %v11085_v40 }
 0x9a1   : > { %4014 = vperm.xlu0 %8302, %v9784_v28  }
 0x9a3   : > { %8300 = vset.pattern.permute.xlu1 %v11084_v38 }
 0x9a4   : > { %3994 = vperm.xlu1 %8300, %v9784_v28  }
 0x9a5   : > { %8303 = vset.pattern.permute.xlu0 %v11084_v38 }
 0x9a6   : > { %3494 = vperm.xlu0 %8303, %v9192_v30  }
 0x9a8   : > { %8301 = vset.pattern.permute.xlu1 %v11085_v40 }
 0x9a9   : > { %4010 = vperm.xlu1 %8301, %v9778_v18  }
 0x9ad   : > { %8304 = vset.pattern.permute.xlu1 %v11084_v38 }
 0x9ae   : > { %3497 = vperm.xlu1 %8304, %v9197_v31  }
 0xa11   : > { %v3930_v21 = vpop.permute.xlu1 %3929 }
 0xa16   : > { %v3971_v49 = vpop.permute.xlu1 %3970 }
 0xa3d   : > { %v3406_v37 = vpop.f32.mrf.mxu0 }
 0xa3e   : > { %v3407_v15 = vadd.f32 %v9806_v42, %v3406_v37 }
 0xa3f   : > { %v8103_v62 = vpop.f32.mrf.mxu0 }
 0xa40   : > { %v3439_v54 = vsel %vm3433_vm6, -1e+09, %v3407_v15 }
 0xa41   : > { %v3441_v43 = vsel %vm1774_vm1, %v3439_v54, -inf  ;;  %v3409_v20 = vpop.f32.mrf.mxu0 }
 0xa42   : > { %v3442_v26 = vrot.slane %v3441_v43, 4  ;;  %v3410_v60 = vadd.f32 %v9806_v42, %v3409_v20 }
 0xa43   : > { %v8104_v59 = vpop.f32.mrf.mxu0 }
 0xa44   : > { %v3443_v56 = vmax.f32 %v3441_v43, %v3442_v26  ;;  %v3440_v53 = vsel %vm3434_vm11, -1e+09, %v3410_v60  ;;  %v3935_v26 = vpop.permute.xlu0 %3934  ;;  %v3975_v60 = vpop.permute.xlu1 %3974 }
 0xa45   : > { %v3448_v55 = vsel %vm1774_vm1, %v3440_v53, -inf  ;;  %v9812_v1 = vpop.f32.mrf.mxu0 }
 0xa46   : > { %v3444_v6 = vrot.slane %v3443_v56, 2  ;;  %v3449_v9 = vrot.slane %v3448_v55, 4 }
 0xa47   : > { %v3876_v32 = vpop.f32.mrf.mxu0 }
 0xa48   : > { %v3445_v44 = vmax.f32 %v3443_v56, %v3444_v6  ;;  %v3450_v46 = vmax.f32 %v3448_v55, %v3449_v9  ;;  %v3911_v37 = vrot.slane %v3876_v32, %v8816_v11 }
 0xa49   : > { %v3878_v15 = vpop.f32.mrf.mxu0 }
 0xa4a   : > { %v3446_v62 = vrot.slane %v3445_v44, 1  ;;  %v3451_v10 = vrot.slane %v3450_v46, 2  ;;  %v3912_v20 = vcombine.high %v3911_v37, %v3911_v37  ;;  %v3919_v59 = vrot.slane %v3911_v37, %v8816_v11 }
 0xa4b   : > { %v3879_v43 = vpop.f32.mrf.mxu0 }
 0xa4c   : > { %v3447_v8 = vmax.f32 %v3445_v44, %v3446_v62  ;;  %v3452_v42 = vmax.f32 %v3450_v46, %v3451_v10  ;;  %v3926_v38 = vrot.slane %v3912_v20, %v8816_v11  ;;  %v9818_v57 = vrot.slane %v3919_v59, %v8794_v7  ;;  %v3991_v10 = vpop.permute.xlu0 %3990  ;;  %v3995_v44 = vpop.permute.xlu1 %3994 }
 0xa4e   : > { %v3455_v56 = vsub.f32 %v3439_v54, %v3447_v8  ;;  %v3453_v55 = vrot.slane %v3452_v42, 1  ;;  %v9821_v6 = vrot.slane %v3926_v38, %v8794_v7  ;;  %v3947_v9 = vmul.f32 %v9818_v57, %v3930_v21 }
 0xa4f   : > { %v3977_v32 = vmul.f32 %v3971_v49, %v9818_v57  ;;  %v3997_v8 = vmul.f32 %v3991_v10, %v9818_v57  ;;  %v11045_v49 = vmov 4  }
 0xa50   : > { %v3457_v37 = vmul.f32 1.442695, %v3455_v56  ;;  %v3454_v15 = vmax.f32 %v3452_v42, %v3453_v55  ;;  %3961 = vrot.lane.b32.xlu1 %v3947_v9, %s11074_s27  ;;  %v3998_v54 = vmul.f32 %v3995_v44, %v9821_v6  ;;  %v3948_v42 = vmul.f32 %v9821_v6, %v3935_v26  ;;  %8316 = vset.pattern.permute.xlu0 %v11045_v49 }
 0xa51   : > { %3981 = vrot.lane.b32.xlu0 %v3977_v32, %s11075_s21  ;;  %v3978_v21 = vmul.f32 %v3975_v60, %v9821_v6  ;;  %8315 = vset.pattern.permute.xlu1 %v11045_v49 }
 0xa52   : > { %8480 = vpow2.f32 %v3457_v37  ;;  %v3456_v46 = vsub.f32 %v3440_v53, %v3454_v15 }
 0xa54   : > { %v3459_v38 = vmul.f32 1.442695, %v3456_v46  ;;  %4001 = vrot.lane.b32.xlu1 %v3997_v8, %s11076_s0 }
 0xa55   : > { %4003 = vrot.lane.b32.xlu0 %v3998_v54, %s11076_s0 }
 0xa56   : > { %8482 = vpow2.f32 %v3459_v38 }
 0xa58   : > { %3963 = vrot.lane.b32.xlu1 %v3948_v42, %s11074_s27 }
 0xa5c   : > { %3983 = vrot.lane.b32.xlu1 %v3978_v21, %s11075_s21 }
 0xa5f   : > { %v8481_v53 = vpop.eup %8480 }
 0xa60   : > { %v3461_v62 = vsel %vm1774_vm1, %v8481_v53, 0.0 }
 0xa61   : > { %v3462_v20 = vrot.slane %v3461_v62, 4 }
 0xa63   : > { %v8483_v59 = vpop.eup %8482  ;;  %v3463_v43 = vadd.f32 %v3462_v20, %v3461_v62  ;;  %v4011_v20 = vpop.permute.xlu1 %4010 }
 0xa64   : > { %v3468_v56 = vsel %vm1774_vm1, %v8483_v59, 0.0 }
 0xa65   : > { %v3464_v26 = vrot.slane %v3463_v43, 2  ;;  %v3469_v55 = vrot.slane %v3468_v56, 4 }
 0xa67   : > { %v3465_v9 = vadd.f32 %v3464_v26, %v3463_v43  ;;  %v3470_v32 = vadd.f32 %v3469_v55, %v3468_v56  ;;  %v3888_v43 = vrot.slane %v9812_v1, %v8816_v11  ;;  %v4015_v56 = vpop.permute.xlu0 %4014  ;;  %v3498_v26 = vpop.permute.xlu1 %3497 }
 0xa68   : > { %vm3500_vm9 = vcmp.eq.s32.totalorder %v3498_v26, 1 }
 0xa69   : > { %v3466_v60 = vrot.slane %v3465_v9, 1  ;;  %v3471_v37 = vrot.slane %v3470_v32, 2  ;;  %v3896_v55 = vrot.slane %v3888_v43, %v8816_v11 }
 0xa6b   : > { %v3467_v15 = vadd.f32 %v3466_v60, %v3465_v9  ;;  %v3472_v10 = vadd.f32 %v3471_v37, %v3470_v32  ;;  %v3495_v9 = vpop.permute.xlu0 %3494  ;;  %v3889_v60 = vcombine.high %v3888_v43, %v3888_v43 }
 0xa6c   : > { %vm3499_vm6 = vcmp.eq.s32.totalorder %v3495_v9, 1 }
 0xa6d   : > { %v3473_v44 = vrot.slane %v3472_v10, 1  ;;  %8484 = vrcp.f32 %v3467_v15 }
 0xa6f   : > { %v3474_v46 = vadd.f32 %v3473_v44, %v3472_v10  ;;  %v3903_v10 = vrot.slane %v3889_v60, %v8816_v11 }
 0xa71   : > { %8486 = vrcp.f32 %v3474_v46  ;;  %v9852_v1 = vrot.slane %v3903_v10, %v8794_v7 }
 0xa7a   : > { %v8485_v8 = vpop.eup %8484 }
 0xa7b   : > { %v3477_v54 = vmul.f32 %v8485_v8, %v8481_v53  ;;  %v9847_v53 = vrot.slane %v3896_v55, %v8794_v7  ;;  %v4018_v55 = vmul.f32 %v4015_v56, %v9821_v6 }
 0xa7d   : > { %v3479_v38 = vmul.f32 %v3477_v54, %v9580_v23  ;;  %v4017_v54 = vmul.f32 %v4011_v20, %v9818_v57 }
 0xa7e   : > { %v8487_v42 = vpop.eup %8486 }
 0xa7f   : > { %3483 = vrot.lane.b32.xlu1 %v3479_v38, %s11075_s21  ;;  %v3478_v21 = vmul.f32 %v8487_v42, %v8483_v59 }
 0xa81   : > { %v3480_v62 = vmul.f32 %v3478_v21, %v9585_v47 }
 0xa83   : > { %3485 = vrot.lane.b32.xlu0 %v3480_v62, %s11075_s21 }
 0xac2   : > { %v3962_v32 = vpop.permute.xlu1 %3961 }
 0xac3   : > { %v3967_v59 = vadd.f32 %v3962_v32, %v9847_v53  ;;  %v3982_v37 = vpop.permute.xlu0 %3981 }
 0xac5   : > { %v3987_v44 = vadd.f32 %v3982_v37, %v3967_v59 }
 0xac6   : > { %v4002_v15 = vpop.permute.xlu1 %4001 }
 0xac7   : > { %v4007_v8 = vadd.f32 %v4002_v15, %v3987_v44  ;;  %v4004_v43 = vpop.permute.xlu0 %4003 }
 0xac9   : > { %v4019_v21 = vadd.f32 %v4017_v54, %v4007_v8 }
 0xaca   : > { %v3964_v46 = vpop.permute.xlu1 %3963 }
 0xacb   : > { %v3968_v38 = vadd.f32 %v3964_v46, %v9852_v1  ;;  %v4023_v49 = vmul.f32 0.01, %v4019_v21  ;;  %vm4021_vm15 = vcmp.ge.f32.partialorder %v4019_v21, 0.0 }
 0xacd   : > { %v4025_v59 = vsel %vm4021_vm15, %v4019_v21, %v4023_v49 }
 0xace   : > { %v3984_v42 = vpop.permute.xlu1 %3983 }
 0xacf   : > { %v3988_v62 = vadd.f32 %v3984_v42, %v3968_v38 }
 0xad1   : > { %v4008_v32 = vadd.f32 %v4004_v43, %v3988_v62 }
 0xad3   : > { %v4020_v27 = vadd.f32 %v4018_v55, %v4008_v32 }
 0xad5   : > { %vm4022_vm4 = vcmp.ge.f32.partialorder %v4020_v27, 0.0  ;;  %v4024_v60 = vmul.f32 0.01, %v4020_v27 }
 0xad7   : > { %v4026_v37 = vsel %vm4022_vm4, %v4020_v27, %v4024_v60 }
 0xad8   : > { %v8310_v10 = vpack.i.bf16 %v4026_v37, %v4025_v59 }
 0xada   : > { %8311 = vrot.lane.b32.xlu0 %v8310_v10, %s11075_s21 }
 0xade   : > { %4312 = vperm.xlu0 %8316, %v8916_v16  }
 0xae2   : > { %4391 = vperm.xlu0 %8316, %v8945_v52  }
 0xae6   : > { %4432 = vperm.xlu0 %8316, %v8968_v24  }
 0xaea   : > { %4289 = vperm.xlu0 %8316, %v8972_v25  }
 0xaee   : > { %4090 = vrot.lane.b32.xlu0 %v9847_v53, %s11074_s27 }
 0xaef   : > { %8317 = vset.pattern.permute.xlu0 %v11085_v40 }
 0xaf1   : > { %v3484_v57 = vpop.permute.xlu1 %3483 }
 0xaf2   : > { %v3489_v6 = vsub.f32 %v9605_v14, %v3484_v57 }
 0xaf4   : > { %v3491_v27 = vmax.f32 %v3489_v6, 0.0 }
 0xaf5   : > { %v3486_v49 = vpop.permute.xlu0 %3485 }
 0xaf6   : > { %v3490_v20 = vsub.f32 %v9610_v48, %v3486_v49  ;;  %v3501_v56 = vsel %vm3499_vm6, %v3491_v27, %v9605_v14  ;;  %vm4241_vm6 = vcmp.eq.s32.totalorder %v8789_v5, 4 }
 0xaf7   : > { %v9872_v46 = vsel %vm3516_vm12, %v9580_v23, %v3501_v56  ;;  %vm11097_vm12 = vcmask 1041409  }
 0xaf8   : > { %v3492_v15 = vmax.f32 %v3490_v20, 0.0 }
 0xafa   : > { %v3502_v44 = vsel %vm3500_vm9, %v3492_v15, %v9610_v48  ;;  %vm4244_vm9 = vmand %vm2008_vm5, %vm4241_vm6 }
 0xafb   : > { %v9877_v8 = vsel %vm3517_vm0, %v9585_v47, %v3502_v44  ;;  %vm11098_vm0 = vmmov %vm11097_vm12 }
 0xafc   : > { %v8305_v54 = vpack.i.bf16 %v9877_v8, %v9872_v46  ;;  %vm11099_vm10 = vmmov %vm11098_vm0 }
 0xafd   : > { %vm11100_vm15 = vmmov %vm11098_vm0 }
 0xafe   : > { %8306 = vrot.lane.b32.xlu1 %v8305_v54, %s11075_s21 }
 0xb02   : > { %4309 = vperm.xlu1 %8315, %v8876_v34  }
 0xb06   : > { %4350 = vperm.xlu1 %8315, %v8872_v29  }
 0xb0a   : > { %4353 = vperm.xlu1 %8315, %v8892_v45  }
 0xb0e   : > { %4394 = vperm.xlu1 %8315, %v8932_v41  }
 0xb12   : > { %4435 = vperm.xlu1 %8315, %v8960_v12  }
 0xb16   : > { %4296 = vperm.xlu1 %8315, %v8966_v19  }
 0xb1a   : > { %4092 = vrot.lane.b32.xlu1 %v9852_v1, %s11074_s27 }
 0xb1b   : > { %8318 = vset.pattern.permute.xlu1 %v11085_v40 }
 0xb4c   : > { %v8312_v23 = vpop.permute.xlu0 %8311 }
 0xb4d   : > { %v8314_v14 = vunpack.i.h.bf16 %v8312_v23  ;;  %v8313_v48 = vunpack.i.l.bf16 %v8312_v23 }
 0xb59   : > { %v4313_v42 = vpop.permute.xlu0 %4312 }
 0xb5a   : > { %v4321_v55 = vrot.slane %v4313_v42, %v8977_v22 }
 0xb5d   : > { %v4392_v21 = vpop.permute.xlu0 %4391 }
 0xb61   : > { %v4433_v32 = vpop.permute.xlu0 %4432 }
 0xb62   : > { %v4440_v56 = vrot.slane %v4433_v32, %v8977_v22 }
 0xb65   : > { %v4290_v57 = vpop.permute.xlu0 %4289 }
 0xb66   : > { %v4294_v27 = vrot.slane %v4290_v57, %v8794_v7 }
 0xb68   : > { %vm4302_vm11 = vcmp.eq.s32.totalorder %v4294_v27, %v9003_v63 }
 0xb70   : > { %v8307_v47 = vpop.permute.xlu1 %8306 }
 0xb71   : > { %v8309_v61 = vunpack.i.h.bf16 %v8307_v47  ;;  %v8308_v2 = vunpack.i.l.bf16 %v8307_v47 }
 0xb73   : > { %v4044_v26 = vsel %vm1774_vm1, %v8309_v61, %v8314_v14  ;;  %v4043_v9 = vsel %vm1774_vm1, %v8308_v2, %v8313_v48 }
 0xb74   : > { %v4045_v38 = vpack.c.bf16 %v4044_v26, %v4043_v9 }
 0xb76   : > { %8114 = vmatmul.mubr.msk.bf16.vlgmr.msra.gmra.mxu1 %vm1802_vm2, %v4045_v38  ;;  %v9925_v38 = vsel %vm4302_vm11, 1.0, %v11078_v36  ;;  %vm11101_vm11 = vcmask 97280  }
 0xb77   : > { %8126 = vmatpush3.bf16.msra.mxu1 %v9630_v17  ;;  %8133 = vmatprep.mubr.msk.bf16.mxu1 %vm8648_vm13, %v11078_v36 }
 0xb78   : > { %8127 = vmatprep.subr.bf16.mxu1 %v11078_v36 }
 0xb7b   : > { %8128 = vmatpush3.bf16.msra.mxu1 %v9639_v39 }
 0xb7c   : > { %8129 = vmatprep.subr.bf16.mxu1 %v11078_v36 }
 0xb7d   : > { %v4310_v62 = vpop.permute.xlu1 %4309 }
 0xb7e   : > { %v4317_v17 = vrot.slane %v4310_v62, %v8977_v22 }
 0xb7f   : > { %8130 = vmatpush3.bf16.msra.mxu1 %v9646_v3  ;;  %v4399_v3 = vrot.slane %v4392_v21, %v8977_v22 }
 0xb80   : > { %8131 = vmatprep.subr.bf16.mxu1 %v11078_v36  ;;  %v4322_v37 = vsel %vm11097_vm12, %v4321_v55, %v4317_v17  ;;  %vm4245_vm12 = vmand %vm2009_vm7, %vm4241_vm6  ;;  %vm11104_vm6 = vcmask 244736  }
 0xb81   : > { %v4351_v43 = vpop.permute.xlu1 %4350  ;;  %v4329_v49 = vrot.slane %v4322_v37, %v8816_v11 }
 0xb82   : > { %v4358_v60 = vrot.slane %v4351_v43, %v8977_v22 }
 0xb83   : > { %8132 = vmatpush3.bf16.msra.mxu1 %v9653_v50  ;;  %v4330_v23 = vcombine.high %v4329_v49, %v4329_v49  ;;  %v4337_v61 = vrot.slane %v4329_v49, %v8816_v11 }
 0xb84   : > { %8145 = vmatprep.subr.bf16.mxu1 %v11078_v36 }
 0xb85   : > { %v4354_v39 = vpop.permute.xlu1 %4353  ;;  %v4344_v62 = vrot.slane %v4330_v23, %v8816_v11 }
 0xb86   : > { %v4362_v59 = vrot.slane %v4354_v39, %v8977_v22  ;;  %v4347_v39 = vmul.f32 %v9925_v38, %v4337_v61 }
 0xb88   : > { %v4363_v10 = vsel %vm11098_vm0, %v4362_v59, %v4358_v60 }
 0xb89   : > { %v4395_v6 = vpop.permute.xlu1 %4394  ;;  %v4370_v50 = vrot.slane %v4363_v10, %v8816_v11 }
 0xb8a   : > { %v4403_v20 = vrot.slane %v4395_v6, %v8977_v22 }
 0xb8b   : > { %v4371_v47 = vcombine.high %v4370_v50, %v4370_v50  ;;  %v4378_v2 = vrot.slane %v4370_v50, %v8816_v11 }
 0xb8c   : > { %v4404_v15 = vsel %vm11099_vm10, %v4403_v20, %v4399_v3 }
 0xb8d   : > { %v4411_v44 = vrot.slane %v4404_v15, %v8816_v11  ;;  %v4436_v54 = vpop.permute.xlu1 %4435  ;;  %v4385_v43 = vrot.slane %v4371_v47, %v8816_v11  ;;  %v4388_v59 = vmul.f32 %v9925_v38, %v4378_v2 }
 0xb8e   : > { %v4444_v14 = vrot.slane %v4436_v54, %v8977_v22 }
 0xb8f   : > { %v4412_v48 = vcombine.high %v4411_v44, %v4411_v44  ;;  %v4419_v26 = vrot.slane %v4411_v44, %v8816_v11 }
 0xb90   : > { %v4445_v9 = vsel %vm11100_vm15, %v4444_v14, %v4440_v56  ;;  %vm11102_vm15 = vcmask 146432  }
 0xb91   : > { %v4452_v42 = vrot.slane %v4445_v9, %v8816_v11  ;;  %v4297_v21 = vpop.permute.xlu1 %4296  ;;  %v4426_v55 = vrot.slane %v4412_v48, %v8816_v11  ;;  %v4429_v37 = vmul.f32 %v9925_v38, %v4419_v26 }
 0xb92   : > { %v4301_v32 = vrot.slane %v4297_v21, %v8794_v7 }
 0xb93   : > { %v4453_v17 = vcombine.high %v4452_v42, %v4452_v42  ;;  %v4460_v60 = vrot.slane %v4452_v42, %v8816_v11  ;;  %v4151_v42 = vand.u32 2147483647, %v9872_v46 }
 0xb94   : > { %vm4303_vm4 = vcmp.eq.s32.totalorder %v4301_v32, %v8993_v51 }
 0xb95   : > { %v4467_v3 = vrot.slane %v4453_v17, %v8816_v11  ;;  %v4470_v10 = vmul.f32 %v9925_v38, %v4460_v60  ;;  %v7813_v57 = vsel %vm4303_vm4, 1.0, %v11078_v36  ;;  %v4247_v60 = vsel %vm4245_vm12, 1, %v11083_v35 }
 0xb96   : > { %v4348_v6 = vmul.f32 %v7813_v57, %v4344_v62  ;;  %v4389_v27 = vmul.f32 %v7813_v57, %v4385_v43  ;;  %v4430_v49 = vmul.f32 %v7813_v57, %v4426_v55  ;;  %v4474_v50 = vcombine.low %v9925_v38, %v7813_v57 }
 0xb97   : > { %v4471_v20 = vmul.f32 %v7813_v57, %v4467_v3  ;;  %v4161_v38 = vand.u32 2147483647, %v9778_v18  ;;  %v4152_v62 = vand.u32 2147483647, %v9877_v8  ;;  %v4153_v43 = vsel %vm2675_vm14, %v4151_v42, -inf  ;;  %v4093_v57 = vpop.permute.xlu1 %4092 }
 0xb98   : > { %v4512_v56 = vcombine.low %v4388_v59, %v4389_v27  ;;  %v4492_v15 = vcombine.low %v4347_v39, %v4348_v6  ;;  %v4532_v44 = vcombine.low %v4429_v37, %v4430_v49  ;;  %v4162_v55 = vand.u32 2147483647, %v9784_v28  ;;  %v4091_v39 = vpop.permute.xlu0 %4090  ;;  %v9992_v42 = vld [vmem:[%s10996_s3] ss:$8 sps:$4 sm:$0xff]  }
 0xb99   : > { %v4552_v54 = vcombine.low %v4470_v10, %v4471_v20  ;;  %v4163_v21 = vsel %vm2686_vm3, %v4161_v38, -inf  ;;  %v4156_v32 = vsel %vm2675_vm14, %v4152_v62, -inf  ;;  %v4481_v6 = vrot.slane %v4474_v50, %v8816_v11 }
 0xb9a   : > { %v4519_v23 = vrot.slane %v4512_v56, %v8816_v11  ;;  %v4499_v47 = vrot.slane %v4492_v15, %v8816_v11  ;;  %v4539_v14 = vrot.slane %v4532_v44, %v8816_v11  ;;  %v4166_v17 = vsel %vm2686_vm3, %v4162_v55, -inf }
 0xb9b   : > { %v4559_v48 = vrot.slane %v4552_v54, %v8816_v11  ;;  %v4488_v44 = vrot.slane %v4481_v6, %v8816_v11  ;;  %vm11103_vm4 = vcmask 195584   ;;  %v11107_v6 = vmov 1  }
 0xb9c   : > { %v4526_v61 = vrot.slane %v4519_v23, %v8816_v11  ;;  %v4506_v2 = vrot.slane %v4499_v47, %v8816_v11  ;;  %v4546_v9 = vrot.slane %v4539_v14, %v8816_v11 }
 0xb9d   : > { %v4566_v26 = vrot.slane %v4559_v48, %v8816_v11 }
 0xb9e   : > { %4527 = vrot.lane.b32.xlu1 %v4526_v61, %s11071_s29  ;;  %4507 = vrot.lane.b32.xlu0 %v4506_v2, %s11070_s30 }
 0xba2   : > { %4567 = vrot.lane.b32.xlu1 %v4566_v26, %s11073_s28  ;;  %4547 = vrot.lane.b32.xlu0 %v4546_v9, %s11072_s19 }
 0xba6   : > { %4259 = vperm.xlu0 %8317, %v9707_v0   ;;  %v4246_v0 = vsel %vm4244_vm9, 1, %v11083_v35  ;;  %vm11106_vm9 = vcmask 1046528  }
 0xbc5   : > { %4164 = vmax.xlane.f32.xlu0 %v4163_v21 }
 0xbc6   : > { %4154 = vmax.xlane.f32.xlu1 %v4153_v43 }
 0xbc9   : > { %4157 = vmax.xlane.f32.xlu0 %v4156_v32  ;;  %v11105_v32 = vld [vmem:[#allocation10_spill] sm:$0xff] }
 0xbca   : > { %4167 = vmax.xlane.f32.xlu1 %v4166_v17  ;;  %v10005_v17 = vld [vmem:[%s10996_s3 + $0x14] ss:$8 sps:$4 sm:$0x7f]  }
 0xbdb   : > { %4262 = vperm.xlu1 %8318, %v9724_v13  }
 0xbdf   : > { %4249 = vperm.xlu0 %8317, %v4246_v0   ;;  %4252 = vperm.xlu1 %8318, %v4247_v60  }
 0xbe3   : > { %8319 = vset.pattern.permute.xlu1 %v11083_v35  ;;  %8320 = vset.pattern.permute.xlu0 %v11083_v35 }
 0xc10   : > { %v4508_v27 = vpop.permute.xlu0 %4507  ;;  %v4528_v54 = vpop.permute.xlu1 %4527 }
 0xc11   : > { %v4570_v47 = vsel %vm1585_vm8, %v4488_v44, %v4508_v27 }
 0xc12   : > { %v4571_v50 = vsel %vm11101_vm11, %v4570_v47, %v4528_v54 }
 0xc14   : > { %v4548_v14 = vpop.permute.xlu0 %4547  ;;  %v4568_v9 = vpop.permute.xlu1 %4567 }
 0xc15   : > { %v4572_v26 = vsel %vm11102_vm15, %v4571_v50, %v4548_v14 }
 0xc16   : > { %v4573_v38 = vsel %vm11103_vm4, %v4572_v26, %v4568_v9 }
 0xc17   : > { %v4574_v21 = vpack.c.bf16 %v4573_v38, %v4573_v38 }
 0xc21   : > { %v4260_v62 = vpop.permute.xlu0 %4259 }
 0xc36   : > { %v4083_v59 = vpop.f32.mrf.mxu1 }
 0xc37   : > { %v4096_v37 = vadd.f32 %v4091_v39, %v4083_v59  ;;  %v4267_v39 = vrot.slane %v4260_v62, %v8977_v22 }
 0xc38   : > { %v8115_v3 = vpop.f32.mrf.mxu1 }
 0xc39   : > { %v4098_v10 = vadd.f32 %v9734_v58, %v4096_v37 }
 0xc3a   : > { %v4086_v13 = vpop.f32.mrf.mxu1 }
 0xc3b   : > { %v4097_v49 = vadd.f32 %v4093_v57, %v4086_v13  ;;  %v4102_v56 = vmul.f32 0.01, %v4098_v10  ;;  %vm4100_vm0 = vcmp.ge.f32.partialorder %v4098_v10, 0.0  ;;  %v11108_v13 = vmov 2  }
 0xc3c   : > { %v8116_v20 = vpop.f32.mrf.mxu1 }
 0xc3d   : > { %v4099_v15 = vadd.f32 %v9734_v58, %v4097_v49  ;;  %v4104_v48 = vsel %vm4100_vm0, %v4098_v10, %v4102_v56  ;;  %v9985_v58 = vld [vmem:[%s10996_s3 + $0x4] ss:$8 sps:$4 sm:$0xff]  }
 0xc3f   : > { %vm4101_vm10 = vcmp.ge.f32.partialorder %v4099_v15, 0.0  ;;  %v4103_v23 = vmul.f32 0.01, %v4099_v15 }
 0xc41   : > { %v4105_v61 = vsel %vm4101_vm10, %v4099_v15, %v4103_v23 }
 0xc42   : > { %v4106_v2 = vpack.c.bf16 %v4105_v61, %v4104_v48 }
 0xc44   : > { %8122 = vmatmul.mubr.msk.bf16.vlgmr.msra.gmra.mxu0 %vm1774_vm1, %v4106_v2 }
 0xc45   : > { %4591 = vmatpush1.bf16.msra.mxu0 %v9024_v33  ;;  %4610 = vmatprep.mubr.bf16.mxu0 %v11083_v35 }
 0xc46   : > { %4592 = vmatprep.subr.bf16.mxu0 %v9985_v58 }
 0xc49   : > { %4593 = vmatpush1.bf16.msra.mxu0 %v9992_v42 }
 0xc4a   : > { %8137 = vmatprep.subr.bf16.mxu0 %v11078_v36 }
 0xc4c   : > { %7815 = vmatmul.mubr.msk.bf16.vlgmr.msra.gmra.mxu0 %vm11104_vm6, %v4574_v21 }
 0xc4d   : > { %8138 = vmatpush3.bf16.msra.mxu0 %v9754_v4  ;;  %8141 = vmatprep.mubr.msk.bf16.mxu0 %vm8648_vm13, %v11078_v36 }
 0xc4e   : > { %8139 = vmatprep.subr.bf16.mxu0 %v11078_v36  ;;  %v4165_v55 = vpop.xlane.xlu0 %4164 }
 0xc4f   : > { %v4155_v43 = vpop.xlane.xlu1 %4154  ;;  %vm4169_vm10 = vcmp.eq.f32.partialorder %v4165_v55, 0.0 }
 0xc50   : > { %vm4159_vm11 = vcmp.eq.f32.partialorder %v4155_v43, 0.0 }
 0xc51   : > { %8140 = vmatpush3.bf16.msra.mxu0 %v11105_v32  ;;  %vm4171_vm15 = vmand %vm4159_vm11, %vm4169_vm10 }
 0xc52   : > { %7820 = vmatprep.subr.msk.bf16.mxu0 %vm11106_vm9, %v10005_v17  ;;  %v4158_v60 = vpop.xlane.xlu0 %4157 }
 0xc53   : > { %v4168_v0 = vpop.xlane.xlu1 %4167  ;;  %vm4160_vm4 = vcmp.eq.f32.partialorder %v4158_v60, 0.0 }
 0xc54   : > { %vm4170_vm6 = vcmp.eq.f32.partialorder %v4168_v0, 0.0 }
 0xc55   : > { %vm4172_vm9 = vmand %vm4160_vm4, %vm4170_vm6 }
 0xc57   : > { %v4263_v4 = vpop.permute.xlu1 %4262 }
 0xc58   : > { %v4271_v59 = vrot.slane %v4263_v4, %v8977_v22 }
 0xc5a   : > { %v10011_v37 = vpop.permute.xlu0 %4249 }
 0xc5b   : > { %vm4254_vm12 = vcmp.eq.s32.totalorder %v10011_v37, 1  ;;  %v10014_v3 = vpop.permute.xlu1 %4252 }
 0xc5c   : > { %v10019_v10 = vsel %vm4254_vm12, %v4267_v39, %v9778_v18  ;;  %vm4255_vm0 = vcmp.eq.s32.totalorder %v10014_v3, 1 }
 0xc5d   : > { %v10025_v57 = vsel %vm4255_vm0, %v4271_v59, %v9784_v28  ;;  %4667 = vperm.xlu1 %8319, %v10019_v10   ;;  %v11109_v28 = vld [vmem:[#allocation11_spill] sm:$0xff] }
 0xc5e   : > { %4672 = vperm.xlu0 %8320, %v10025_v57  }
 0xc61   : > { %8321 = vset.pattern.permute.xlu1 %v11107_v6 }
 0xc62   : > { %4708 = vperm.xlu1 %8321, %v10019_v10   ;;  %8322 = vset.pattern.permute.xlu0 %v11108_v13 }
 0xc63   : > { %4728 = vperm.xlu0 %8322, %v10019_v10  }
 0xc66   : > { %4712 = vperm.xlu1 %8321, %v10025_v57  }
 0xc67   : > { %8325 = vset.pattern.permute.xlu0 %v11085_v40 }
 0xc68   : > { %4752 = vperm.xlu0 %8325, %v10025_v57  }
 0xc6a   : > { %8323 = vset.pattern.permute.xlu1 %v11108_v13 }
 0xc6b   : > { %4732 = vperm.xlu1 %8323, %v10025_v57  }
 0xc6c   : > { %4232 = vperm.xlu0 %8325, %v9192_v30  }
 0xc6f   : > { %8324 = vset.pattern.permute.xlu1 %v11085_v40 }
 0xc70   : > { %4748 = vperm.xlu1 %8324, %v10019_v10  }
 0xc74   : > { %4235 = vperm.xlu1 %8324, %v9197_v31  }
 0xcd8   : > { %v4668_v9 = vpop.permute.xlu1 %4667 }
 0xcd9   : > { %v4673_v39 = vpop.permute.xlu0 %4672 }
 0xd04   : > { %v4144_v18 = vpop.f32.mrf.mxu0 }
 0xd05   : > { %v4145_v27 = vadd.f32 %v11109_v28, %v4144_v18 }
 0xd06   : > { %v8123_v49 = vpop.f32.mrf.mxu0 }
 0xd07   : > { %v4177_v20 = vsel %vm4171_vm15, -1e+09, %v4145_v27  ;;  %v4709_v49 = vpop.permute.xlu1 %4708 }
 0xd08   : > { %v4179_v56 = vsel %vm1774_vm1, %v4177_v20, -inf  ;;  %v4147_v15 = vpop.f32.mrf.mxu0 }
 0xd09   : > { %v4180_v44 = vrot.slane %v4179_v56, 4  ;;  %v4148_v54 = vadd.f32 %v11109_v28, %v4147_v15 }
 0xd0a   : > { %v8124_v23 = vpop.f32.mrf.mxu0 }
 0xd0b   : > { %v4181_v47 = vmax.f32 %v4179_v56, %v4180_v44  ;;  %v4178_v14 = vsel %vm4172_vm9, -1e+09, %v4148_v54 }
 0xd0c   : > { %v4186_v48 = vsel %vm1774_vm1, %v4178_v14, -inf  ;;  %v10046_v61 = vpop.f32.mrf.mxu0 }
 0xd0d   : > { %v4182_v2 = vrot.slane %v4181_v47, 2  ;;  %v4187_v50 = vrot.slane %v4186_v48, 4 }
 0xd0e   : > { %v4614_v26 = vpop.f32.mrf.mxu0 }
 0xd0f   : > { %v4183_v38 = vmax.f32 %v4181_v47, %v4182_v2  ;;  %v4188_v21 = vmax.f32 %v4186_v48, %v4187_v50  ;;  %v4649_v62 = vrot.slane %v4614_v26, %v8816_v11  ;;  %v4729_v2 = vpop.permute.xlu0 %4728 }
 0xd10   : > { %v4616_v43 = vpop.f32.mrf.mxu0 }
 0xd11   : > { %v4184_v55 = vrot.slane %v4183_v38, 1  ;;  %v4189_v32 = vrot.slane %v4188_v21, 2  ;;  %v4650_v0 = vcombine.high %v4649_v62, %v4649_v62  ;;  %v4657_v60 = vrot.slane %v4649_v62, %v8816_v11 }
 0xd12   : > { %v4617_v4 = vpop.f32.mrf.mxu0  ;;  %v11048_v43 = vmov 5  }
 0xd13   : > { %v4185_v59 = vmax.f32 %v4183_v38, %v4184_v55  ;;  %v4190_v18 = vmax.f32 %v4188_v21, %v4189_v32  ;;  %v4664_v28 = vrot.slane %v4650_v0, %v8816_v11  ;;  %v10052_v27 = vrot.slane %v4657_v60, %v8794_v7  ;;  %v4713_v38 = vpop.permute.xlu1 %4712  ;;  %8337 = vset.pattern.permute.xlu1 %v11048_v43 }
 0xd14   : > { %8336 = vset.pattern.permute.xlu0 %v11048_v43 }
 0xd15   : > { %v4193_v56 = vsub.f32 %v4177_v20, %v4185_v59  ;;  %v4191_v15 = vrot.slane %v4190_v18, 1  ;;  %v10055_v44 = vrot.slane %v4664_v28, %v8794_v7  ;;  %v4685_v54 = vmul.f32 %v10052_v27, %v4668_v9 }
 0xd16   : > { %v4715_v23 = vmul.f32 %v4709_v49, %v10052_v27  ;;  %v4735_v20 = vmul.f32 %v4729_v2, %v10052_v27 }
 0xd17   : > { %v4195_v47 = vmul.f32 1.442695, %v4193_v56  ;;  %v4192_v48 = vmax.f32 %v4190_v18, %v4191_v15  ;;  %4699 = vrot.lane.b32.xlu1 %v4685_v54, %s11074_s27  ;;  %v4686_v26 = vmul.f32 %v10055_v44, %v4673_v39  ;;  %v4716_v9 = vmul.f32 %v4713_v38, %v10055_v44  ;;  %v4733_v62 = vpop.permute.xlu1 %4732 }
 0xd18   : > { %4719 = vrot.lane.b32.xlu0 %v4715_v23, %s11075_s21 }
 0xd19   : > { %8488 = vpow2.f32 %v4195_v47  ;;  %v4194_v50 = vsub.f32 %v4178_v14, %v4192_v48  ;;  %v4736_v14 = vmul.f32 %v4733_v62, %v10055_v44 }
 0xd1b   : > { %v4197_v21 = vmul.f32 1.442695, %v4194_v50  ;;  %4701 = vrot.lane.b32.xlu1 %v4686_v26, %s11074_s27  ;;  %v4749_v62 = vpop.permute.xlu1 %4748 }
 0xd1c   : > { %4739 = vrot.lane.b32.xlu0 %v4735_v20, %s11076_s0 }
 0xd1d   : > { %8490 = vpow2.f32 %v4197_v21 }
 0xd1f   : > { %4721 = vrot.lane.b32.xlu1 %v4716_v9, %s11075_s21  ;;  %v4753_v9 = vpop.permute.xlu0 %4752 }
 0xd23   : > { %4741 = vrot.lane.b32.xlu1 %v4736_v14, %s11076_s0  ;;  %v4626_v14 = vrot.slane %v10046_v61, %v8816_v11 }
 0xd26   : > { %v8489_v55 = vpop.eup %8488 }
 0xd27   : > { %v4199_v32 = vsel %vm1774_vm1, %v8489_v55, 0.0 }
 0xd28   : > { %v4200_v0 = vrot.slane %v4199_v32, 4 }
 0xd2a   : > { %v8491_v60 = vpop.eup %8490  ;;  %v4201_v4 = vadd.f32 %v4200_v0, %v4199_v32  ;;  %v4233_v32 = vpop.permute.xlu0 %4232 }
 0xd2b   : > { %v4206_v39 = vsel %vm1774_vm1, %v8491_v60, 0.0  ;;  %v4236_v0 = vpop.permute.xlu1 %4235  ;;  %vm4237_vm15 = vcmp.eq.s32.totalorder %v4233_v32, 1 }
 0xd2c   : > { %v4202_v59 = vrot.slane %v4201_v4, 2  ;;  %v4207_v18 = vrot.slane %v4206_v39, 4  ;;  %vm4238_vm4 = vcmp.eq.s32.totalorder %v4236_v0, 1 }
 0xd2e   : > { %v4203_v28 = vadd.f32 %v4202_v59, %v4201_v4  ;;  %v4208_v49 = vadd.f32 %v4207_v18, %v4206_v39  ;;  %v4634_v4 = vrot.slane %v4626_v14, %v8816_v11 }
 0xd30   : > { %v4204_v56 = vrot.slane %v4203_v28, 1  ;;  %v4209_v15 = vrot.slane %v4208_v49, 2  ;;  %v10081_v39 = vrot.slane %v4634_v4, %v8794_v7 }
 0xd32   : > { %v4205_v54 = vadd.f32 %v4204_v56, %v4203_v28  ;;  %v4210_v23 = vadd.f32 %v4209_v15, %v4208_v49 }
 0xd34   : > { %v4211_v47 = vrot.slane %v4210_v23, 1  ;;  %8492 = vrcp.f32 %v4205_v54 }
 0xd36   : > { %v4212_v48 = vadd.f32 %v4211_v47, %v4210_v23  ;;  %v4755_v47 = vmul.f32 %v4749_v62, %v10052_v27 }
 0xd38   : > { %8494 = vrcp.f32 %v4212_v48 }
 0xd41   : > { %v8493_v2 = vpop.eup %8492 }
 0xd42   : > { %v4215_v50 = vmul.f32 %v8493_v2, %v8489_v55  ;;  %v4627_v55 = vcombine.high %v4626_v14, %v4626_v14 }
 0xd44   : > { %v4217_v26 = vmul.f32 %v4215_v50, %v9847_v53  ;;  %v4641_v28 = vrot.slane %v4627_v55, %v8816_v11 }
 0xd45   : > { %v8495_v20 = vpop.eup %8494 }
 0xd46   : > { %4221 = vrot.lane.b32.xlu0 %v4217_v26, %s11075_s21  ;;  %v4216_v38 = vmul.f32 %v8495_v20, %v8491_v60  ;;  %v10086_v54 = vrot.slane %v4641_v28, %v8794_v7  ;;  %v4756_v20 = vmul.f32 %v4753_v9, %v10055_v44  ;;  %v11110_v9 = vmov 4  }
 0xd48   : > { %v4218_v21 = vmul.f32 %v4216_v38, %v9852_v1 }
 0xd4a   : > { %4223 = vrot.lane.b32.xlu1 %v4218_v21, %s11075_s21 }
 0xd89   : > { %v4700_v18 = vpop.permute.xlu1 %4699 }
 0xd8a   : > { %v4720_v59 = vpop.permute.xlu0 %4719  ;;  %v4705_v60 = vadd.f32 %v4700_v18, %v10081_v39 }
 0xd8c   : > { %v4725_v49 = vadd.f32 %v4720_v59, %v4705_v60 }
 0xd8d   : > { %v4702_v15 = vpop.permute.xlu1 %4701 }
 0xd8e   : > { %v4740_v56 = vpop.permute.xlu0 %4739  ;;  %v4706_v48 = vadd.f32 %v4702_v15, %v10086_v54 }
 0xd8f   : > { %v4745_v61 = vadd.f32 %v4740_v56, %v4725_v49 }
 0xd91   : > { %v4722_v23 = vpop.permute.xlu1 %4721  ;;  %v4757_v2 = vadd.f32 %v4755_v47, %v4745_v61 }
 0xd92   : > { %v4726_v50 = vadd.f32 %v4722_v23, %v4706_v48 }
 0xd93   : > { %v4761_v21 = vmul.f32 0.01, %v4757_v2  ;;  %vm4759_vm10 = vcmp.ge.f32.partialorder %v4757_v2, 0.0 }
 0xd95   : > { %v4742_v26 = vpop.permute.xlu1 %4741  ;;  %v4763_v55 = vsel %vm4759_vm10, %v4757_v2, %v4761_v21 }
 0xd96   : > { %v4746_v38 = vadd.f32 %v4742_v26, %v4726_v50  ;;  %v10131_v26 = vld [vmem:[%s10997_s4 + $0x18] sm:$0xff]  }
 0xd98   : > { %v4758_v14 = vadd.f32 %v4756_v20, %v4746_v38  ;;  %v10140_v38 = vld [vmem:[%s10997_s4 + $0x10] sm:$0xff]  }
 0xd9a   : > { %vm4760_vm11 = vcmp.ge.f32.partialorder %v4758_v14, 0.0  ;;  %v4762_v4 = vmul.f32 0.01, %v4758_v14 }
 0xd9c   : > { %v4764_v59 = vsel %vm4760_vm11, %v4758_v14, %v4762_v4 }
 0xd9d   : > { %v8331_v18 = vpack.i.bf16 %v4764_v59, %v4763_v55  ;;  %v10149_v59 = vld [vmem:[%s10997_s4 + $0x8] sm:$0xff]  }
 0xd9f   : > { %8332 = vrot.lane.b32.xlu1 %v8331_v18, %s11075_s21 }
 0xda3   : > { %5050 = vperm.xlu1 %8337, %v8916_v16  }
 0xda7   : > { %5088 = vperm.xlu1 %8337, %v8872_v29  }
 0xdab   : > { %5129 = vperm.xlu1 %8337, %v8945_v52  }
 0xdaf   : > { %5170 = vperm.xlu1 %8337, %v8968_v24  }
 0xdb3   : > { %5027 = vperm.xlu1 %8337, %v8972_v25  }
 0xdb7   : > { %4828 = vrot.lane.b32.xlu1 %v10081_v39, %s11074_s27 }
 0xdb8   : > { %v4222_v27 = vpop.permute.xlu0 %4221  ;;  %8339 = vset.pattern.permute.xlu1 %v11110_v9 }
 0xdb9   : > { %v4227_v44 = vsub.f32 %v9872_v46, %v4222_v27 }
 0xdbb   : > { %v4229_v62 = vmax.f32 %v4227_v44, 0.0 }
 0xdbc   : > { %v4224_v60 = vpop.permute.xlu1 %4223 }
 0xdbd   : > { %v4228_v28 = vsub.f32 %v9877_v8, %v4224_v60  ;;  %v4239_v49 = vsel %vm4237_vm15, %v4229_v62, %v9872_v46  ;;  %v10159_v60 = vld [vmem:[%s10997_s4] sm:$0xff]   ;;  %vm4979_vm15 = vcmp.eq.s32.totalorder %v8789_v5, 5 }
 0xdbe   : > { %v10107_v61 = vsel %vm4254_vm12, %v9847_v53, %v4239_v49  ;;  %vm11111_vm12 = vcmask 1041409  }
 0xdbf   : > { %v4230_v56 = vmax.f32 %v4228_v28, 0.0 }
 0xdc1   : > { %v4240_v15 = vsel %vm4238_vm4, %v4230_v56, %v9877_v8  ;;  %vm4983_vm4 = vmand %vm2009_vm7, %vm4979_vm15 }
 0xdc2   : > { %v10112_v23 = vsel %vm4255_vm0, %v9852_v1, %v4240_v15  ;;  %vm11112_vm0 = vmmov %vm11111_vm12 }
 0xdc3   : > { %v8326_v47 = vpack.i.bf16 %v10112_v23, %v10107_v61  ;;  %vm11113_vm6 = vmmov %vm11112_vm0 }
 0xdc4   : > { %vm11114_vm10 = vmmov %vm11112_vm0 }
 0xdc5   : > { %8327 = vrot.lane.b32.xlu0 %v8326_v47, %s11075_s21 }
 0xdc9   : > { %5047 = vperm.xlu0 %8336, %v8876_v34  }
 0xdcd   : > { %5091 = vperm.xlu0 %8336, %v8892_v45  }
 0xdd1   : > { %5132 = vperm.xlu0 %8336, %v8932_v41  }
 0xdd5   : > { %5173 = vperm.xlu0 %8336, %v8960_v12  }
 0xdd9   : > { %5034 = vperm.xlu0 %8336, %v8966_v19  }
 0xddd   : > { %4830 = vrot.lane.b32.xlu0 %v10086_v54, %s11074_s27 }
 0xdde   : > { %8338 = vset.pattern.permute.xlu0 %v11110_v9 }
 0xe11   : > { %v8333_v53 = vpop.permute.xlu1 %8332 }
 0xe12   : > { %v8335_v8 = vunpack.i.h.bf16 %v8333_v53  ;;  %v8334_v37 = vunpack.i.l.bf16 %v8333_v53 }
 0xe1e   : > { %v5051_v1 = vpop.permute.xlu1 %5050 }
 0xe1f   : > { %v5059_v14 = vrot.slane %v5051_v1, %v8977_v22 }
 0xe22   : > { %v5089_v0 = vpop.permute.xlu1 %5088 }
 0xe23   : > { %v5096_v18 = vrot.slane %v5089_v0, %v8977_v22 }
 0xe26   : > { %v5130_v20 = vpop.permute.xlu1 %5129 }
 0xe27   : > { %v5137_v28 = vrot.slane %v5130_v20, %v8977_v22 }
 0xe2a   : > { %v5171_v4 = vpop.permute.xlu1 %5170 }
 0xe2e   : > { %v5028_v56 = vpop.permute.xlu1 %5027 }
 0xe2f   : > { %v5032_v47 = vrot.slane %v5028_v56, %v8794_v7 }
 0xe31   : > { %vm5040_vm9 = vcmp.eq.s32.totalorder %v5032_v47, %v9003_v63 }
 0xe37   : > { %v8328_v46 = vpop.permute.xlu0 %8327 }
 0xe38   : > { %v8330_v3 = vunpack.i.h.bf16 %v8328_v46  ;;  %v8329_v32 = vunpack.i.l.bf16 %v8328_v46 }
 0xe3a   : > { %v4781_v48 = vsel %vm1774_vm1, %v8329_v32, %v8334_v37  ;;  %v4782_v2 = vsel %vm1774_vm1, %v8330_v3, %v8335_v8  ;;  %v5178_v8 = vrot.slane %v5171_v4, %v8977_v22 }
 0xe3b   : > { %v4783_v50 = vpack.c.bf16 %v4782_v2, %v4781_v48 }
 0xe3d   : > { %8134 = vmatmul.mubr.msk.bf16.vlgmr.msra.gmra.mxu1 %vm1802_vm2, %v4783_v50 }
 0xe3e   : > { %8146 = vmatpush3.bf16.msra.mxu1 %v10131_v26  ;;  %8153 = vmatprep.mubr.msk.bf16.mxu1 %vm8648_vm13, %v11078_v36 }
 0xe3f   : > { %8147 = vmatprep.subr.bf16.mxu1 %v11078_v36 }
 0xe42   : > { %8148 = vmatpush3.bf16.msra.mxu1 %v10140_v38 }
 0xe43   : > { %8149 = vmatprep.subr.bf16.mxu1 %v11078_v36 }
 0xe44   : > { %v5048_v21 = vpop.permute.xlu0 %5047 }
 0xe45   : > { %v5055_v55 = vrot.slane %v5048_v21, %v8977_v22 }
 0xe46   : > { %8150 = vmatpush3.bf16.msra.mxu1 %v10149_v59 }
 0xe47   : > { %8151 = vmatprep.subr.bf16.mxu1 %v11078_v36  ;;  %v5060_v62 = vsel %vm11111_vm12, %v5059_v14, %v5055_v55  ;;  %v10179_v55 = vsel %vm5040_vm9, 1.0, %v11078_v36  ;;  %vm4982_vm12 = vmand %vm2008_vm5, %vm4979_vm15  ;;  %vm11115_vm9 = vcmask 97280   ;;  %vm11118_vm15 = vcmask 244736  }
 0xe48   : > { %v5092_v27 = vpop.permute.xlu0 %5091  ;;  %v5067_v53 = vrot.slane %v5060_v62, %v8816_v11 }
 0xe49   : > { %v5100_v44 = vrot.slane %v5092_v27, %v8977_v22 }
 0xe4a   : > { %8152 = vmatpush3.bf16.msra.mxu1 %v10159_v60  ;;  %v5068_v0 = vcombine.high %v5067_v53, %v5067_v53  ;;  %v5075_v20 = vrot.slane %v5067_v53, %v8816_v11 }
 0xe4b   : > { %v5101_v49 = vsel %vm11112_vm0, %v5100_v44, %v5096_v18  ;;  %8165 = vmatprep.subr.bf16.mxu1 %v11078_v36 }
 0xe4c   : > { %v5133_v15 = vpop.permute.xlu0 %5132  ;;  %v5108_v1 = vrot.slane %v5101_v49, %v8816_v11  ;;  %v5082_v44 = vrot.slane %v5068_v0, %v8816_v11  ;;  %v5085_v47 = vmul.f32 %v10179_v55, %v5075_v20 }
 0xe4d   : > { %v5141_v46 = vrot.slane %v5133_v15, %v8977_v22 }
 0xe4e   : > { %v5109_v48 = vcombine.high %v5108_v1, %v5108_v1  ;;  %v5116_v21 = vrot.slane %v5108_v1, %v8816_v11 }
 0xe4f   : > { %v5142_v37 = vsel %vm11113_vm6, %v5141_v46, %v5137_v28 }
 0xe50   : > { %v5149_v3 = vrot.slane %v5142_v37, %v8816_v11  ;;  %v5174_v32 = vpop.permute.xlu0 %5173  ;;  %v5123_v62 = vrot.slane %v5109_v48, %v8816_v11  ;;  %v5126_v53 = vmul.f32 %v10179_v55, %v5116_v21 }
 0xe51   : > { %v5182_v2 = vrot.slane %v5174_v32, %v8977_v22 }
 0xe52   : > { %v5150_v50 = vcombine.high %v5149_v3, %v5149_v3  ;;  %v5157_v14 = vrot.slane %v5149_v3, %v8816_v11 }
 0xe53   : > { %v5183_v4 = vsel %vm11114_vm10, %v5182_v2, %v5178_v8  ;;  %vm11116_vm10 = vcmask 146432  }
 0xe54   : > { %v5190_v18 = vrot.slane %v5183_v4, %v8816_v11  ;;  %v5035_v27 = vpop.permute.xlu0 %5034  ;;  %v5164_v28 = vrot.slane %v5150_v50, %v8816_v11  ;;  %v5167_v1 = vmul.f32 %v10179_v55, %v5157_v14 }
 0xe55   : > { %v5039_v49 = vrot.slane %v5035_v27, %v8794_v7 }
 0xe56   : > { %v5191_v56 = vcombine.high %v5190_v18, %v5190_v18  ;;  %v5198_v15 = vrot.slane %v5190_v18, %v8816_v11 }
 0xe57   : > { %vm5041_vm11 = vcmp.eq.s32.totalorder %v5039_v49, %v8993_v51 }
 0xe58   : > { %v5205_v46 = vrot.slane %v5191_v56, %v8816_v11  ;;  %v5208_v8 = vmul.f32 %v10179_v55, %v5198_v15  ;;  %v7819_v37 = vsel %vm5041_vm11, 1.0, %v11078_v36  ;;  %v10208_v56 = vld [vmem:[%s8813_s22 + $0x4] sm:$0xf]  ;;  %v4900_v15 = vand.u32 2147483647, %v10025_v57 }
 0xe59   : > { %v5086_v3 = vmul.f32 %v7819_v37, %v5082_v44  ;;  %v5127_v32 = vmul.f32 %v7819_v37, %v5123_v62  ;;  %v5168_v0 = vmul.f32 %v7819_v37, %v5164_v28  ;;  %v5212_v48 = vcombine.low %v10179_v55, %v7819_v37 }
 0xe5a   : > { %v5209_v2 = vmul.f32 %v7819_v37, %v5205_v46  ;;  %vm11117_vm11 = vcmask 195584  }
 0xe5b   : > { %v5250_v50 = vcombine.low %v5126_v53, %v5127_v32  ;;  %v5230_v20 = vcombine.low %v5085_v47, %v5086_v3  ;;  %v5270_v21 = vcombine.low %v5167_v1, %v5168_v0  ;;  %v4889_v47 = vand.u32 2147483647, %v10107_v61  ;;  %v10225_v32 = vld [vmem:[%s8813_s22] sm:$0xf] }
 0xe5c   : > { %v5290_v4 = vcombine.low %v5208_v8, %v5209_v2  ;;  %v4904_v53 = vsel %vm2686_vm3, %v4900_v15, -inf  ;;  %v4890_v1 = vand.u32 2147483647, %v10112_v23  ;;  %v4899_v8 = vand.u32 2147483647, %v10019_v10 }
 0xe5d   : > { %v5257_v14 = vrot.slane %v5250_v50, %v8816_v11  ;;  %v5237_v18 = vrot.slane %v5230_v20, %v8816_v11  ;;  %v5277_v27 = vrot.slane %v5270_v21, %v8816_v11  ;;  %v4891_v46 = vsel %vm2675_vm14, %v4889_v47, -inf  ;;  %v4829_v50 = vpop.permute.xlu1 %4828  ;;  %v4831_v20 = vpop.permute.xlu0 %4830 }
 0xe5e   : > { %v5297_v49 = vrot.slane %v5290_v4, %v8816_v11  ;;  %v4894_v37 = vsel %vm2675_vm14, %v4890_v1, -inf  ;;  %v4901_v3 = vsel %vm2686_vm3, %v4899_v8, -inf  ;;  %v4985_v0 = vsel %vm4983_vm4, 1, %v11083_v35 }
 0xe5f   : > { %v5264_v44 = vrot.slane %v5257_v14, %v8816_v11  ;;  %v5244_v62 = vrot.slane %v5237_v18, %v8816_v11  ;;  %v5284_v28 = vrot.slane %v5277_v27, %v8816_v11  ;;  %v4984_v2 = vsel %vm4982_vm12, 1, %v11083_v35  ;;  %v10235_v18 = vld [vmem:[%s10998_s5] ss:$0 sm:$0xff] }
 0xe60   : > { %v5304_v55 = vrot.slane %v5297_v49, %v8816_v11  ;;  %v5219_v49 = vrot.slane %v5212_v48, %v8816_v11 }
 0xe61   : > { %5265 = vrot.lane.b32.xlu0 %v5264_v44, %s11071_s29  ;;  %5245 = vrot.lane.b32.xlu1 %v5244_v62, %s11070_s30 }
 0xe62   : > { %v5226_v1 = vrot.slane %v5219_v49, %v8816_v11 }
 0xe65   : > { %5305 = vrot.lane.b32.xlu0 %v5304_v55, %s11073_s28  ;;  %5285 = vrot.lane.b32.xlu1 %v5284_v28, %s11072_s19 }
 0xe69   : > { %5000 = vperm.xlu0 %8338, %v10208_v56  }
 0xe88   : > { %4905 = vmax.xlane.f32.xlu0 %v4904_v53 }
 0xe89   : > { %4892 = vmax.xlane.f32.xlu1 %v4891_v46 }
 0xe8c   : > { %4895 = vmax.xlane.f32.xlu0 %v4894_v37 }
 0xe8d   : > { %4902 = vmax.xlane.f32.xlu1 %v4901_v3 }
 0xe9e   : > { %4997 = vperm.xlu1 %8339, %v10225_v32  }
 0xea2   : > { %4990 = vperm.xlu0 %8338, %v4985_v0   ;;  %4987 = vperm.xlu1 %8339, %v4984_v2  }
 0xea6   : > { %8341 = vset.pattern.permute.xlu0 %v11107_v6  ;;  %8340 = vset.pattern.permute.xlu1 %v11083_v35 }
 0xed3   : > { %v5266_v44 = vpop.permute.xlu0 %5265  ;;  %v5246_v55 = vpop.permute.xlu1 %5245 }
 0xed4   : > { %v5308_v8 = vsel %vm1585_vm8, %v5226_v1, %v5246_v55  ;;  %v10268_v55 = vld [vmem:[%s10999_s6] sm:$0xff]  }
 0xed5   : > { %11121 = vst [vmem:[#allocation10_spill] sm:$0xff] %v10268_v55 }
 0xed7   : > { %v5306_v37 = vpop.permute.xlu0 %5305  ;;  %v5286_v3 = vpop.permute.xlu1 %5285 }
 0xefd   : > { %v4821_v21 = vpop.f32.mrf.mxu1 }
 0xefe   : > { %v4834_v4 = vadd.f32 %v4829_v50, %v4821_v21  ;;  %v5309_v50 = vsel %vm11115_vm9, %v5308_v8, %v5266_v44  ;;  %v5001_v21 = vpop.permute.xlu0 %5000  ;;  %v10255_v44 = vld [vmem:[%s10999_s6 + $0x8] sm:$0xff]   ;;  %v10310_v8 = vld [vmem:[%s11000_s7] ss:$0 sm:$0xff] }
 0xeff   : > { %v8135_v14 = vpop.f32.mrf.mxu1  ;;  %v5009_v1 = vrot.slane %v5001_v21, %v8977_v22  ;;  %11123 = vst [vmem:[#allocation11_spill] sm:$0xff] %v10310_v8 }
 0xf00   : > { %v4836_v27 = vadd.f32 %v10235_v18, %v4834_v4 }
 0xf01   : > { %v4824_v62 = vpop.f32.mrf.mxu1 }
 0xf02   : > { %v4835_v28 = vadd.f32 %v4831_v20, %v4824_v62  ;;  %v4840_v47 = vmul.f32 0.01, %v4836_v27  ;;  %vm4838_vm0 = vcmp.ge.f32.partialorder %v4836_v27, 0.0  ;;  %v5310_v20 = vsel %vm11116_vm10, %v5309_v50, %v5286_v3 }
 0xf03   : > { %v8136_v15 = vpop.f32.mrf.mxu1  ;;  %v5311_v4 = vsel %vm11117_vm11, %v5310_v20, %v5306_v37 }
 0xf04   : > { %v4837_v53 = vadd.f32 %v10235_v18, %v4835_v28  ;;  %v4842_v0 = vsel %vm4838_vm0, %v4836_v27, %v4840_v47  ;;  %v5312_v14 = vpack.c.bf16 %v5311_v4, %v5311_v4 }
 0xf06   : > { %vm4839_vm6 = vcmp.ge.f32.partialorder %v4837_v53, 0.0  ;;  %v4841_v46 = vmul.f32 0.01, %v4837_v53 }
 0xf08   : > { %v4843_v2 = vsel %vm4839_vm6, %v4837_v53, %v4841_v46  ;;  %vm11122_vm6 = vcmask 1046528  }
 0xf09   : > { %v4844_v48 = vpack.c.bf16 %v4843_v2, %v4842_v0 }
 0xf0b   : > { %8142 = vmatmul.mubr.msk.bf16.vlgmr.msra.gmra.mxu0 %vm1774_vm1, %v4844_v48 }
 0xf0c   : > { %5329 = vmatpush1.bf16.msra.mxu0 %v9024_v33  ;;  %5348 = vmatprep.mubr.bf16.mxu0 %v11083_v35 }
 0xf0d   : > { %5330 = vmatprep.subr.bf16.mxu0 %v9985_v58 }
 0xf10   : > { %5331 = vmatpush1.bf16.msra.mxu0 %v9992_v42 }
 0xf11   : > { %v4906_v27 = vpop.xlane.xlu0 %4905  ;;  %8157 = vmatprep.subr.bf16.mxu0 %v11078_v36 }
 0xf12   : > { %v4893_v49 = vpop.xlane.xlu1 %4892  ;;  %vm4908_vm4 = vcmp.eq.f32.partialorder %v4906_v27, 0.0 }
 0xf13   : > { %7821 = vmatmul.mubr.msk.bf16.vlgmr.msra.gmra.mxu0 %vm11118_vm15, %v5312_v14  ;;  %vm4897_vm15 = vcmp.eq.f32.partialorder %v4893_v49, 0.0 }
 0xf14   : > { %8158 = vmatpush3.bf16.msra.mxu0 %v10255_v44  ;;  %8161 = vmatprep.mubr.msk.bf16.mxu0 %vm8648_vm13, %v11078_v36 }
 0xf15   : > { %v4896_v58 = vpop.xlane.xlu0 %4895  ;;  %8159 = vmatprep.subr.bf16.mxu0 %v11078_v36 }
 0xf16   : > { %vm4898_vm12 = vcmp.eq.f32.partialorder %v4896_v58, 0.0  ;;  %v4903_v42 = vpop.xlane.xlu1 %4902 }
 0xf17   : > { %vm10261_vm0 = vmand %vm4898_vm12, %vm4908_vm4  ;;  %vm4907_vm11 = vcmp.eq.f32.partialorder %v4903_v42, 0.0 }
 0xf18   : > { %8160 = vmatpush3.bf16.msra.mxu0 %v10268_v55  ;;  %vm4909_vm4 = vmand %vm4897_vm15, %vm4907_vm11 }
 0xf19   : > { %7826 = vmatprep.subr.msk.bf16.mxu0 %vm11122_vm6, %v10005_v17 }
 0xf1a   : > { %v4998_v28 = vpop.permute.xlu1 %4997 }
 0xf1b   : > { %v5005_v15 = vrot.slane %v4998_v28, %v8977_v22 }
 0xf1d   : > { %v10274_v47 = vpop.permute.xlu0 %4990 }
 0xf1e   : > { %v10276_v53 = vpop.permute.xlu1 %4987  ;;  %vm4993_vm10 = vcmp.eq.s32.totalorder %v10274_v47, 1 }
 0xf1f   : > { %vm4992_vm9 = vcmp.eq.s32.totalorder %v10276_v53, 1  ;;  %v10291_v17 = vsel %vm4993_vm10, %v5009_v1, %v10025_v57 }
 0xf20   : > { %v10283_v46 = vsel %vm4992_vm9, %v5005_v15, %v10019_v10 }
 0xf21   : > { %5446 = vperm.xlu0 %8341, %v10283_v46   ;;  %5405 = vperm.xlu1 %8340, %v10283_v46  }
 0xf25   : > { %8344 = vset.pattern.permute.xlu0 %v11108_v13  ;;  %5410 = vperm.xlu1 %8340, %v10291_v17  }
 0xf26   : > { %5470 = vperm.xlu0 %8344, %v10291_v17  }
 0xf29   : > { %8342 = vset.pattern.permute.xlu1 %v11107_v6 }
 0xf2a   : > { %5450 = vperm.xlu1 %8342, %v10291_v17   ;;  %8346 = vset.pattern.permute.xlu0 %v11110_v9 }
 0xf2b   : > { %4970 = vperm.xlu0 %8346, %v9192_v30  }
 0xf2e   : > { %8343 = vset.pattern.permute.xlu1 %v11108_v13 }
 0xf2f   : > { %5466 = vperm.xlu1 %8343, %v10283_v46  }
 0xf33   : > { %8345 = vset.pattern.permute.xlu1 %v11085_v40 }
 0xf34   : > { %5486 = vperm.xlu1 %8345, %v10283_v46  }
 0xf38   : > { %5490 = vperm.xlu1 %8345, %v10291_v17  }
 0xf3c   : > { %8347 = vset.pattern.permute.xlu1 %v11110_v9 }
 0xf3d   : > { %4973 = vperm.xlu1 %8347, %v9197_v31  }
 0xf9c   : > { %v5406_v10 = vpop.permute.xlu1 %5405 }
 0xfa0   : > { %v5411_v9 = vpop.permute.xlu1 %5410 }
 0xfa5   : > { %v5451_v15 = vpop.permute.xlu1 %5450 }
 0xfaa   : > { %v5467_v13 = vpop.permute.xlu1 %5466 }
 0xfcb   : > { %v4882_v57 = vpop.f32.mrf.mxu0 }
 0xfcc   : > { %v4883_v37 = vadd.f32 %v10310_v8, %v4882_v57 }
 0xfcd   : > { %v8143_v3 = vpop.f32.mrf.mxu0 }
 0xfce   : > { %v4915_v0 = vsel %vm4909_vm4, -1e+09, %v4883_v37 }
 0xfcf   : > { %v4917_v2 = vsel %vm1774_vm1, %v4915_v0, -inf  ;;  %v4885_v48 = vpop.f32.mrf.mxu0 }
 0xfd0   : > { %v4918_v50 = vrot.slane %v4917_v2, 4  ;;  %v4886_v20 = vadd.f32 %v10310_v8, %v4885_v48 }
 0xfd1   : > { %v8144_v21 = vpop.f32.mrf.mxu0 }
 0xfd2   : > { %v4919_v4 = vmax.f32 %v4917_v2, %v4918_v50  ;;  %v4916_v14 = vsel %vm10261_vm0, -1e+09, %v4886_v20 }
 0xfd3   : > { %v4924_v27 = vsel %vm1774_vm1, %v4916_v14, -inf  ;;  %v10318_v49 = vpop.f32.mrf.mxu0 }
 0xfd4   : > { %v4920_v58 = vrot.slane %v4919_v4, 2  ;;  %v4925_v42 = vrot.slane %v4924_v27, 4 }
 0xfd5   : > { %v5352_v28 = vpop.f32.mrf.mxu0 }
 0xfd6   : > { %v4921_v1 = vmax.f32 %v4919_v4, %v4920_v58  ;;  %v4926_v57 = vmax.f32 %v4924_v27, %v4925_v42  ;;  %v5387_v37 = vrot.slane %v5352_v28, %v8816_v11  ;;  %v5447_v28 = vpop.permute.xlu0 %5446 }
 0xfd7   : > { %v5354_v3 = vpop.f32.mrf.mxu0 }
 0xfd8   : > { %v4922_v43 = vrot.slane %v4921_v1, 1  ;;  %v4927_v48 = vrot.slane %v4926_v57, 2  ;;  %v5388_v21 = vcombine.high %v5387_v37, %v5387_v37  ;;  %v5395_v2 = vrot.slane %v5387_v37, %v8816_v11 }
 0xfd9   : > { %v5355_v62 = vpop.f32.mrf.mxu0 }
 0xfda   : > { %v4923_v50 = vmax.f32 %v4921_v1, %v4922_v43  ;;  %v4928_v20 = vmax.f32 %v4926_v57, %v4927_v48  ;;  %v5402_v8 = vrot.slane %v5388_v21, %v8816_v11  ;;  %v10324_v40 = vrot.slane %v5395_v2, %v8794_v7 }
 0xfdc   : > { %v4931_v6 = vsub.f32 %v4915_v0, %v4923_v50  ;;  %v4929_v4 = vrot.slane %v4928_v20, 1  ;;  %v10327_v27 = vrot.slane %v5402_v8, %v8794_v7  ;;  %v5473_v58 = vmul.f32 %v5467_v13, %v10324_v40  ;;  %v5471_v13 = vpop.permute.xlu0 %5470 }
 0xfdd   : > { %v5423_v42 = vmul.f32 %v10324_v40, %v5406_v10  ;;  %v5453_v1 = vmul.f32 %v5447_v28, %v10324_v40  ;;  %v11055_v8 = vmov 6  }
 0xfde   : > { %v4933_v37 = vmul.f32 1.442695, %v4931_v6  ;;  %v4930_v3 = vmax.f32 %v4928_v20, %v4929_v4  ;;  %5477 = vrot.lane.b32.xlu1 %v5473_v58, %s11076_s0  ;;  %v5424_v0 = vmul.f32 %v10327_v27, %v5411_v9  ;;  %v5474_v6 = vmul.f32 %v5471_v13, %v10327_v27  ;;  %8359 = vset.pattern.permute.xlu0 %v11055_v8 }
 0xfdf   : > { %5437 = vrot.lane.b32.xlu0 %v5423_v42, %s11074_s27  ;;  %v5454_v10 = vmul.f32 %v5451_v15, %v10327_v27  ;;  %8358 = vset.pattern.permute.xlu1 %v11055_v8 }
 0xfe0   : > { %8496 = vpow2.f32 %v4933_v37  ;;  %v4932_v43 = vsub.f32 %v4916_v14, %v4930_v3 }
 0xfe2   : > { %v4935_v57 = vmul.f32 1.442695, %v4932_v43  ;;  %5439 = vrot.lane.b32.xlu1 %v5424_v0, %s11074_s27 }
 0xfe3   : > { %5457 = vrot.lane.b32.xlu0 %v5453_v1, %s11075_s21 }
 0xfe4   : > { %8498 = vpow2.f32 %v4935_v57 }
 0xfe6   : > { %5459 = vrot.lane.b32.xlu1 %v5454_v10, %s11075_s21 }
 0xfe7   : > { %5479 = vrot.lane.b32.xlu0 %v5474_v6, %s11076_s0 }
 0xfed   : > { %v8497_v9 = vpop.eup %8496 }
 0xfee   : > { %v4937_v14 = vsel %vm1774_vm1, %v8497_v9, 0.0 }
 0xfef   : > { %v4938_v48 = vrot.slane %v4937_v14, 4 }
 0xff1   : > { %v8499_v21 = vpop.eup %8498  ;;  %v4939_v2 = vadd.f32 %v4938_v48, %v4937_v14  ;;  %v5487_v14 = vpop.permute.xlu1 %5486 }
 0xff2   : > { %v4944_v62 = vsel %vm1774_vm1, %v8499_v21, 0.0 }
 0xff3   : > { %v4940_v50 = vrot.slane %v4939_v2, 2  ;;  %v4945_v20 = vrot.slane %v4944_v62, 4 }
 0xff5   : > { %v4941_v15 = vadd.f32 %v4940_v50, %v4939_v2  ;;  %v4946_v4 = vadd.f32 %v4945_v20, %v4944_v62  ;;  %v5491_v48 = vpop.permute.xlu1 %5490  ;;  %v5364_v2 = vrot.slane %v10318_v49, %v8816_v11  ;;  %v4971_v62 = vpop.permute.xlu0 %4970 }
 0xff6   : > { %vm4975_vm6 = vcmp.eq.s32.totalorder %v4971_v62, 1 }
 0xff7   : > { %v4942_v58 = vrot.slane %v4941_v15, 1  ;;  %v4947_v42 = vrot.slane %v4946_v4, 2  ;;  %v5365_v20 = vcombine.high %v5364_v2, %v5364_v2 }
 0xff9   : > { %v4943_v28 = vadd.f32 %v4942_v58, %v4941_v15  ;;  %v4948_v37 = vadd.f32 %v4947_v42, %v4946_v4  ;;  %v4974_v50 = vpop.permute.xlu1 %4973  ;;  %v5379_v58 = vrot.slane %v5365_v20, %v8816_v11 }
 0xffa   : > { %vm4976_vm11 = vcmp.eq.s32.totalorder %v4974_v50, 1 }
 0xffb   : > { %v4949_v3 = vrot.slane %v4948_v37, 1  ;;  %8500 = vrcp.f32 %v4943_v28 }
 0xffd   : > { %v4950_v43 = vadd.f32 %v4949_v3, %v4948_v37  ;;  %v10358_v3 = vrot.slane %v5379_v58, %v8794_v7 }
 0xfff   : > { %8502 = vrcp.f32 %v4950_v43  ;;  %v5493_v43 = vmul.f32 %v5487_v14, %v10324_v40  ;;  %v11124_v40 = vmov 5  }
0x1008   : > { %v8501_v1 = vpop.eup %8500 }
0x1009   : > { %v4953_v0 = vmul.f32 %v8501_v1, %v8497_v9  ;;  %v5372_v9 = vrot.slane %v5364_v2, %v8816_v11  ;;  %v5494_v2 = vmul.f32 %v5491_v48, %v10327_v27 }
0x100b   : > { %v4955_v57 = vmul.f32 %v4953_v0, %v10081_v39 }
0x100c   : > { %v8503_v13 = vpop.eup %8502 }
0x100d   : > { %4959 = vrot.lane.b32.xlu1 %v4955_v57, %s11075_s21  ;;  %v4954_v6 = vmul.f32 %v8503_v13, %v8499_v21  ;;  %v10354_v21 = vrot.slane %v5372_v9, %v8794_v7 }
0x100f   : > { %v4956_v10 = vmul.f32 %v4954_v6, %v10086_v54 }
0x1011   : > { %4961 = vrot.lane.b32.xlu0 %v4956_v10, %s11075_s21 }
0x1050   : > { %v5478_v15 = vpop.permute.xlu1 %5477 }
0x1051   : > { %v5438_v4 = vpop.permute.xlu0 %5437 }
0x1052   : > { %v5443_v42 = vadd.f32 %v5438_v4, %v10354_v21 }
0x1054   : > { %v5440_v37 = vpop.permute.xlu1 %5439 }
0x1055   : > { %v5458_v28 = vpop.permute.xlu0 %5457  ;;  %v5444_v0 = vadd.f32 %v5440_v37, %v10358_v3 }
0x1056   : > { %v5463_v49 = vadd.f32 %v5458_v28, %v5443_v42 }
0x1058   : > { %v5483_v1 = vadd.f32 %v5478_v15, %v5463_v49  ;;  %v5460_v57 = vpop.permute.xlu1 %5459 }
0x1059   : > { %v5464_v6 = vadd.f32 %v5460_v57, %v5444_v0  ;;  %v5480_v10 = vpop.permute.xlu0 %5479 }
0x105a   : > { %v5495_v13 = vadd.f32 %v5493_v43, %v5483_v1 }
0x105b   : > { %v5484_v20 = vadd.f32 %v5480_v10, %v5464_v6 }
0x105c   : > { %v5499_v9 = vmul.f32 0.01, %v5495_v13  ;;  %vm5497_vm12 = vcmp.ge.f32.partialorder %v5495_v13, 0.0 }
0x105d   : > { %v5496_v4 = vadd.f32 %v5494_v2, %v5484_v20 }
0x105e   : > { %v5501_v58 = vsel %vm5497_vm12, %v5495_v13, %v5499_v9 }
0x105f   : > { %vm5498_vm0 = vcmp.ge.f32.partialorder %v5496_v4, 0.0  ;;  %v5500_v8 = vmul.f32 0.01, %v5496_v4 }
0x1061   : > { %v5502_v55 = vsel %vm5498_vm0, %v5496_v4, %v5500_v8 }
0x1062   : > { %v8353_v42 = vpack.i.bf16 %v5502_v55, %v5501_v58 }
0x1064   : > { %8354 = vrot.lane.b32.xlu0 %v8353_v42, %s11075_s21 }
0x1068   : > { %5788 = vperm.xlu0 %8359, %v8916_v16  }
0x106c   : > { %5867 = vperm.xlu0 %8359, %v8945_v52  }
0x1070   : > { %5908 = vperm.xlu0 %8359, %v8968_v24  }
0x1074   : > { %5765 = vperm.xlu0 %8359, %v8972_v25  }
0x1078   : > { %5566 = vrot.lane.b32.xlu0 %v10354_v21, %s11074_s27 }
0x1079   : > { %8360 = vset.pattern.permute.xlu0 %v11124_v40 }
0x107f   : > { %v4960_v27 = vpop.permute.xlu1 %4959 }
0x1080   : > { %v4965_v14 = vsub.f32 %v10107_v61, %v4960_v27 }
0x1082   : > { %v4967_v8 = vmax.f32 %v4965_v14, 0.0 }
0x1083   : > { %v4962_v55 = vpop.permute.xlu0 %4961 }
0x1084   : > { %v4966_v48 = vsub.f32 %v10112_v23, %v4962_v55  ;;  %v4977_v16 = vsel %vm4975_vm6, %v4967_v8, %v10107_v61  ;;  %vm5717_vm6 = vcmp.eq.s32.totalorder %v8789_v5, 6 }
0x1085   : > { %v10378_v25 = vsel %vm4992_vm9, %v10081_v39, %v4977_v16  ;;  %vm11125_vm9 = vcmask 1041409  }
0x1086   : > { %v4968_v52 = vmax.f32 %v4966_v48, 0.0  ;;  %vm11127_vm15 = vmmov %vm11125_vm9 }
0x1087   : > { %vm11128_vm12 = vmmov %vm11125_vm9 }
0x1088   : > { %v4978_v24 = vsel %vm4976_vm11, %v4968_v52, %v10112_v23  ;;  %vm5720_vm11 = vmand %vm2008_vm5, %vm5717_vm6 }
0x1089   : > { %v10383_v15 = vsel %vm4993_vm10, %v10086_v54, %v4978_v24  ;;  %vm11126_vm10 = vmmov %vm11125_vm9 }
0x108a   : > { %v8348_v28 = vpack.i.bf16 %v10383_v15, %v10378_v25 }
0x108c   : > { %8349 = vrot.lane.b32.xlu1 %v8348_v28, %s11075_s21 }
0x1090   : > { %5785 = vperm.xlu1 %8358, %v8876_v34  }
0x1094   : > { %5826 = vperm.xlu1 %8358, %v8872_v29  }
0x1098   : > { %5829 = vperm.xlu1 %8358, %v8892_v45  }
0x109c   : > { %5870 = vperm.xlu1 %8358, %v8932_v41  }
0x10a0   : > { %5911 = vperm.xlu1 %8358, %v8960_v12  }
0x10a4   : > { %5772 = vperm.xlu1 %8358, %v8966_v19  }
0x10a8   : > { %5568 = vrot.lane.b32.xlu1 %v10358_v3, %s11074_s27 }
0x10a9   : > { %8361 = vset.pattern.permute.xlu1 %v11124_v40 }
0x10d6   : > { %v8355_v39 = vpop.permute.xlu0 %8354 }
0x10d7   : > { %v8357_v61 = vunpack.i.h.bf16 %v8355_v39  ;;  %v8356_v23 = vunpack.i.l.bf16 %v8355_v39 }
0x10e3   : > { %v5789_v12 = vpop.permute.xlu0 %5788 }
0x10e4   : > { %v5797_v50 = vrot.slane %v5789_v12, %v8977_v22 }
0x10e7   : > { %v5868_v19 = vpop.permute.xlu0 %5867 }
0x10e8   : > { %v5875_v0 = vrot.slane %v5868_v19, %v8977_v22 }
0x10eb   : > { %v5909_v37 = vpop.permute.xlu0 %5908 }
0x10ec   : > { %v5916_v20 = vrot.slane %v5909_v37, %v8977_v22 }
0x10ef   : > { %v5766_v57 = vpop.permute.xlu0 %5765 }
0x10f0   : > { %v5770_v6 = vrot.slane %v5766_v57, %v8794_v7 }
0x10f2   : > { %vm5778_vm4 = vcmp.eq.s32.totalorder %v5770_v6, %v9003_v63 }
0x10f3   : > { %v10430_v24 = vsel %vm5778_vm4, 1.0, %v11078_v36  ;;  %vm11129_vm4 = vcmask 97280  }
0x10fe   : > { %v8350_v54 = vpop.permute.xlu1 %8349 }
0x10ff   : > { %v8352_v34 = vunpack.i.h.bf16 %v8350_v54  ;;  %v8351_v47 = vunpack.i.l.bf16 %v8350_v54 }
0x1101   : > { %v5520_v29 = vsel %vm1774_vm1, %v8352_v34, %v8357_v61  ;;  %v5519_v45 = vsel %vm1774_vm1, %v8351_v47, %v8356_v23 }
0x1102   : > { %v5521_v41 = vpack.c.bf16 %v5520_v29, %v5519_v45 }
0x1104   : > { %8154 = vmatmul.mubr.msk.bf16.vlgmr.msra.gmra.mxu1 %vm1802_vm2, %v5521_v41 }
0x1105   : > { %8166 = vmatpush3.bf16.msra.mxu1 %v10131_v26  ;;  %8173 = vmatprep.mubr.msk.bf16.mxu1 %vm8648_vm13, %v11078_v36 }
0x1106   : > { %8167 = vmatprep.subr.bf16.mxu1 %v11078_v36 }
0x1109   : > { %8168 = vmatpush3.bf16.msra.mxu1 %v10140_v38 }
0x110a   : > { %8169 = vmatprep.subr.bf16.mxu1 %v11078_v36 }
0x110b   : > { %v5786_v53 = vpop.permute.xlu1 %5785 }
0x110c   : > { %v5793_v26 = vrot.slane %v5786_v53, %v8977_v22 }
0x110d   : > { %8170 = vmatpush3.bf16.msra.mxu1 %v10149_v59 }
0x110e   : > { %8171 = vmatprep.subr.bf16.mxu1 %v11078_v36  ;;  %v5798_v1 = vsel %vm11125_vm9, %v5797_v50, %v5793_v26  ;;  %vm5721_vm9 = vmand %vm2009_vm7, %vm5717_vm6  ;;  %vm11132_vm6 = vcmask 244736  }
0x110f   : > { %v5827_v62 = vpop.permute.xlu1 %5826  ;;  %v5805_v10 = vrot.slane %v5798_v1, %v8816_v11 }
0x1110   : > { %v5834_v49 = vrot.slane %v5827_v62, %v8977_v22 }
0x1111   : > { %8172 = vmatpush3.bf16.msra.mxu1 %v10159_v60  ;;  %v5806_v42 = vcombine.high %v5805_v10, %v5805_v10  ;;  %v5813_v55 = vrot.slane %v5805_v10, %v8816_v11 }
0x1113   : > { %v5830_v43 = vpop.permute.xlu1 %5829  ;;  %v5820_v63 = vrot.slane %v5806_v42, %v8816_v11  ;;  %v5823_v29 = vmul.f32 %v10430_v24, %v5813_v55  ;;  %v5723_v55 = vsel %vm5721_vm9, 1, %v11083_v35 }
0x1114   : > { %v5838_v38 = vrot.slane %v5830_v43, %v8977_v22 }
0x1116   : > { %v5839_v59 = vsel %vm11126_vm10, %v5838_v38, %v5834_v49 }
0x1117   : > { %v5871_v13 = vpop.permute.xlu1 %5870  ;;  %v5846_v2 = vrot.slane %v5839_v59, %v8816_v11 }
0x1118   : > { %v5879_v60 = vrot.slane %v5871_v13, %v8977_v22 }
0x1119   : > { %v5847_v27 = vcombine.high %v5846_v2, %v5846_v2  ;;  %v5854_v48 = vrot.slane %v5846_v2, %v8816_v11 }
0x111a   : > { %v5880_v9 = vsel %vm11127_vm15, %v5879_v60, %v5875_v0 }
0x111b   : > { %v5887_v4 = vrot.slane %v5880_v9, %v8816_v11  ;;  %v5912_v58 = vpop.permute.xlu1 %5911  ;;  %v5861_v54 = vrot.slane %v5847_v27, %v8816_v11  ;;  %v5864_v45 = vmul.f32 %v10430_v24, %v5854_v48  ;;  %v5627_v9 = vand.u32 2147483647, %v10378_v25  ;;  %v5567_v48 = vpop.permute.xlu0 %5566 }
0x111c   : > { %v5920_v14 = vrot.slane %v5912_v58, %v8977_v22  ;;  %v5628_v58 = vand.u32 2147483647, %v10383_v15  ;;  %v5638_v27 = vand.u32 2147483647, %v10291_v17 }
0x111d   : > { %v5888_v8 = vcombine.high %v5887_v4, %v5887_v4  ;;  %v5895_v16 = vrot.slane %v5887_v4, %v8816_v11  ;;  %v5629_v42 = vsel %vm2675_vm14, %v5627_v9, -inf }
0x111e   : > { %v5921_v52 = vsel %vm11128_vm12, %v5920_v14, %v5916_v20  ;;  %v5637_v20 = vand.u32 2147483647, %v10283_v46  ;;  %v5632_v14 = vsel %vm2675_vm14, %v5628_v58, -inf  ;;  %vm11130_vm12 = vcmask 146432  }
0x111f   : > { %v5928_v28 = vrot.slane %v5921_v52, %v8816_v11  ;;  %v5773_v39 = vpop.permute.xlu1 %5772  ;;  %v5902_v61 = vrot.slane %v5888_v8, %v8816_v11  ;;  %v5905_v41 = vmul.f32 %v10430_v24, %v5895_v16  ;;  %v5642_v8 = vsel %vm2686_vm3, %v5638_v27, -inf }
0x1120   : > { %v5777_v23 = vrot.slane %v5773_v39, %v8794_v7  ;;  %v5639_v4 = vsel %vm2686_vm3, %v5637_v20, -inf  ;;  %v11138_v58 = vmov 1  }
0x1121   : > { %v5929_v34 = vcombine.high %v5928_v28, %v5928_v28  ;;  %v5936_v47 = vrot.slane %v5928_v28, %v8816_v11 }
0x1122   : > { %vm5779_vm0 = vcmp.eq.s32.totalorder %v5777_v23, %v8993_v51 }
0x1123   : > { %v5943_v12 = vrot.slane %v5929_v34, %v8816_v11  ;;  %v5946_v19 = vmul.f32 %v10430_v24, %v5936_v47  ;;  %v7825_v53 = vsel %vm5779_vm0, 1.0, %v11078_v36  ;;  %v5569_v39 = vpop.permute.xlu1 %5568  ;;  %vm11131_vm0 = vcmask 195584  }
0x1124   : > { %v5824_v62 = vmul.f32 %v7825_v53, %v5820_v63  ;;  %v5865_v50 = vmul.f32 %v7825_v53, %v5861_v54  ;;  %v5906_v37 = vmul.f32 %v7825_v53, %v5902_v61  ;;  %v5950_v26 = vcombine.low %v10430_v24, %v7825_v53 }
0x1125   : > { %v5947_v49 = vmul.f32 %v7825_v53, %v5943_v12 }
0x1126   : > { %v5988_v43 = vcombine.low %v5864_v45, %v5865_v50  ;;  %v5968_v38 = vcombine.low %v5823_v29, %v5824_v62  ;;  %v6008_v1 = vcombine.low %v5905_v41, %v5906_v37  ;;  %v5957_v63 = vrot.slane %v5950_v26, %v8816_v11 }
0x1127   : > { %v6028_v0 = vcombine.low %v5946_v19, %v5947_v49 }
0x1128   : > { %v5995_v59 = vrot.slane %v5988_v43, %v8816_v11  ;;  %v5975_v51 = vrot.slane %v5968_v38, %v8816_v11  ;;  %v6015_v57 = vrot.slane %v6008_v1, %v8816_v11  ;;  %v5964_v29 = vrot.slane %v5957_v63, %v8816_v11  ;;  %v8570_v1 = vld [vmem:[%s10996_s3] ss:$8 sps:$4 sm:$0xff]  }
0x1129   : > { %v6035_v13 = vrot.slane %v6028_v0, %v8816_v11 }
0x112a   : > { %v6002_v6 = vrot.slane %v5995_v59, %v8816_v11  ;;  %v5982_v10 = vrot.slane %v5975_v51, %v8816_v11  ;;  %v6022_v60 = vrot.slane %v6015_v57, %v8816_v11  ;;  %v11135_v57 = vld [vmem:[#allocation10_spill] sm:$0xff] }
0x112b   : > { %v6042_v2 = vrot.slane %v6035_v13, %v8816_v11 }
0x112c   : > { %6003 = vrot.lane.b32.xlu1 %v6002_v6, %s11071_s29  ;;  %5983 = vrot.lane.b32.xlu0 %v5982_v10, %s11070_s30 }
0x1130   : > { %6043 = vrot.lane.b32.xlu1 %v6042_v2, %s11073_s28  ;;  %6023 = vrot.lane.b32.xlu0 %v6022_v60, %s11072_s19 }
0x1134   : > { %5735 = vperm.xlu0 %8360, %v10225_v32   ;;  %v5722_v32 = vsel %vm5720_vm11, 1, %v11083_v35 }
0x1153   : > { %5640 = vmax.xlane.f32.xlu0 %v5639_v4 }
0x1154   : > { %5630 = vmax.xlane.f32.xlu1 %v5629_v42  ;;  %v11139_v42 = vmov 2  }
0x1157   : > { %5633 = vmax.xlane.f32.xlu0 %v5632_v14  ;;  %v11142_v14 = vld [vmem:[#allocation11_spill] sm:$0xff] }
0x1158   : > { %5643 = vmax.xlane.f32.xlu1 %v5642_v8 }
0x1169   : > { %5738 = vperm.xlu1 %8361, %v10208_v56  }
0x116d   : > { %5725 = vperm.xlu0 %8360, %v5722_v32   ;;  %5728 = vperm.xlu1 %8361, %v5723_v55  }
0x1171   : > { %8362 = vset.pattern.permute.xlu1 %v11083_v35  ;;  %8363 = vset.pattern.permute.xlu0 %v11083_v35 }
0x119e   : > { %v5984_v54 = vpop.permute.xlu0 %5983  ;;  %v6004_v45 = vpop.permute.xlu1 %6003 }
0x119f   : > { %v6046_v12 = vsel %vm1585_vm8, %v5964_v29, %v5984_v54 }
0x11a0   : > { %v6047_v37 = vsel %vm11129_vm4, %v6046_v12, %v6004_v45 }
0x11a2   : > { %v6024_v19 = vpop.permute.xlu0 %6023  ;;  %v6044_v49 = vpop.permute.xlu1 %6043 }
0x11a3   : > { %v6048_v26 = vsel %vm11130_vm12, %v6047_v37, %v6024_v19 }
0x11a4   : > { %v6049_v43 = vsel %vm11131_vm0, %v6048_v26, %v6044_v49 }
0x11a5   : > { %v6050_v0 = vpack.c.bf16 %v6049_v43, %v6049_v43 }
0x11af   : > { %v5736_v38 = vpop.permute.xlu0 %5735 }
0x11c4   : > { %v5559_v16 = vpop.f32.mrf.mxu1 }
0x11c5   : > { %v5572_v52 = vadd.f32 %v5567_v48, %v5559_v16 }
0x11c6   : > { %v8155_v24 = vpop.f32.mrf.mxu1 }
0x11c7   : > { %v5574_v28 = vadd.f32 %v10235_v18, %v5572_v52 }
0x11c8   : > { %v5562_v56 = vpop.f32.mrf.mxu1 }
0x11c9   : > { %v5573_v61 = vadd.f32 %v5569_v39, %v5562_v56  ;;  %v5578_v34 = vmul.f32 0.01, %v5574_v28  ;;  %vm5576_vm10 = vcmp.ge.f32.partialorder %v5574_v28, 0.0 }
0x11ca   : > { %v8156_v23 = vpop.f32.mrf.mxu1 }
0x11cb   : > { %v5575_v47 = vadd.f32 %v10235_v18, %v5573_v61  ;;  %v5580_v53 = vsel %vm5576_vm10, %v5574_v28, %v5578_v34  ;;  %v8569_v18 = vld [vmem:[%s10996_s3 + $0x4] ss:$8 sps:$4 sm:$0xff]  }
0x11cd   : > { %vm5577_vm15 = vcmp.ge.f32.partialorder %v5575_v47, 0.0  ;;  %v5579_v41 = vmul.f32 0.01, %v5575_v47 }
0x11cf   : > { %v5581_v62 = vsel %vm5577_vm15, %v5575_v47, %v5579_v41 }
0x11d0   : > { %v5582_v50 = vpack.c.bf16 %v5581_v62, %v5580_v53 }
0x11d2   : > { %8162 = vmatmul.mubr.msk.bf16.vlgmr.msra.gmra.mxu0 %vm1774_vm1, %v5582_v50 }
0x11d3   : > { %6067 = vmatpush1.bf16.msra.mxu0 %v9024_v33  ;;  %6086 = vmatprep.mubr.bf16.mxu0 %v11083_v35 }
0x11d4   : > { %6068 = vmatprep.subr.bf16.mxu0 %v8569_v18 }
0x11d7   : > { %6069 = vmatpush1.bf16.msra.mxu0 %v8570_v1 }
0x11d8   : > { %8177 = vmatprep.subr.bf16.mxu0 %v11078_v36 }
0x11da   : > { %7827 = vmatmul.mubr.msk.bf16.vlgmr.msra.gmra.mxu0 %vm11132_vm6, %v6050_v0 }
0x11db   : > { %8178 = vmatpush3.bf16.msra.mxu0 %v10255_v44  ;;  %8181 = vmatprep.mubr.msk.bf16.mxu0 %vm8648_vm13, %v11078_v36 }
0x11dc   : > { %v5641_v33 = vpop.xlane.xlu0 %5640  ;;  %8179 = vmatprep.subr.bf16.mxu0 %v11078_v36  ;;  %v5743_v36 = vrot.slane %v5736_v38, %v8977_v22 }
0x11dd   : > { %vm5645_vm11 = vcmp.eq.f32.partialorder %v5641_v33, 0.0  ;;  %v5631_v59 = vpop.xlane.xlu1 %5630 }
0x11de   : > { %vm5635_vm9 = vcmp.eq.f32.partialorder %v5631_v59, 0.0 }
0x11df   : > { %vm10500_vm10 = vmand %vm5635_vm9, %vm5645_vm11  ;;  %8180 = vmatpush3.bf16.msra.mxu0 %v11135_v57 }
0x11e0   : > { %v5634_v13 = vpop.xlane.xlu0 %5633 }
0x11e1   : > { %vm5636_vm15 = vcmp.eq.f32.partialorder %v5634_v13, 0.0  ;;  %v5644_v6 = vpop.xlane.xlu1 %5643 }
0x11e2   : > { %vm5646_vm4 = vcmp.eq.f32.partialorder %v5644_v6, 0.0 }
0x11e3   : > { %vm10505_vm12 = vmand %vm5636_vm15, %vm5646_vm4 }
0x11e5   : > { %v5739_v10 = vpop.permute.xlu1 %5738 }
0x11e6   : > { %v5747_v2 = vrot.slane %v5739_v10, %v8977_v22 }
0x11e8   : > { %v10511_v60 = vpop.permute.xlu0 %5725 }
0x11e9   : > { %vm5730_vm13 = vcmp.eq.s32.totalorder %v10511_v60, 1  ;;  %v10514_v20 = vpop.permute.xlu1 %5728 }
0x11ea   : > { %v10519_v9 = vsel %vm5730_vm13, %v5743_v36, %v10283_v46  ;;  %vm5731_vm0 = vcmp.eq.s32.totalorder %v10514_v20, 1  ;;  %v11140_v46 = vmov 3  }
0x11eb   : > { %v10525_v4 = vsel %vm5731_vm0, %v5747_v2, %v10291_v17  ;;  %6143 = vperm.xlu1 %8362, %v10519_v9   ;;  %v11141_v17 = vmov 6  }
0x11ec   : > { %6148 = vperm.xlu0 %8363, %v10525_v4   ;;  %v6376_v20 = vand.u32 2147483647, %v10525_v4 }
0x11ef   : > { %8364 = vset.pattern.permute.xlu1 %v11138_v58 }
0x11f0   : > { %6184 = vperm.xlu1 %8364, %v10519_v9   ;;  %8365 = vset.pattern.permute.xlu0 %v11139_v42 }
0x11f1   : > { %6204 = vperm.xlu0 %8365, %v10519_v9  }
0x11f4   : > { %6188 = vperm.xlu1 %8364, %v10525_v4  }
0x11f5   : > { %8368 = vset.pattern.permute.xlu0 %v11140_v46 }
0x11f6   : > { %6228 = vperm.xlu0 %8368, %v10525_v4  }
0x11f8   : > { %8366 = vset.pattern.permute.xlu1 %v11139_v42 }
0x11f9   : > { %6208 = vperm.xlu1 %8366, %v10525_v4  }
0x11fa   : > { %8369 = vset.pattern.permute.xlu0 %v11124_v40 }
0x11fb   : > { %5708 = vperm.xlu0 %8369, %v9192_v30  }
0x11fd   : > { %8367 = vset.pattern.permute.xlu1 %v11140_v46 }
0x11fe   : > { %6224 = vperm.xlu1 %8367, %v10519_v9  }
0x11ff   : > { %8381 = vset.pattern.permute.xlu0 %v11141_v17 }
0x1202   : > { %8370 = vset.pattern.permute.xlu1 %v11124_v40 }
0x1203   : > { %5711 = vperm.xlu1 %8370, %v9197_v31  }
0x1207   : > { %8382 = vset.pattern.permute.xlu1 %v11141_v17 }
0x1266   : > { %v6144_v55 = vpop.permute.xlu1 %6143 }
0x1267   : > { %v6149_v26 = vpop.permute.xlu0 %6148 }
0x126b   : > { %v6185_v61 = vpop.permute.xlu1 %6184 }
0x126c   : > { %v6205_v44 = vpop.permute.xlu0 %6204 }
0x126f   : > { %v6189_v49 = vpop.permute.xlu1 %6188 }
0x1274   : > { %v6209_v10 = vpop.permute.xlu1 %6208 }
0x1292   : > { %v5620_v27 = vpop.f32.mrf.mxu0 }
0x1293   : > { %v5621_v8 = vadd.f32 %v11142_v14, %v5620_v27 }
0x1294   : > { %v8163_v32 = vpop.f32.mrf.mxu0 }
0x1295   : > { %v5653_v48 = vsel %vm10500_vm10, -1e+09, %v5621_v8 }
0x1296   : > { %v5655_v16 = vsel %vm1774_vm1, %v5653_v48, -inf  ;;  %v5623_v52 = vpop.f32.mrf.mxu0 }
0x1297   : > { %v5656_v24 = vrot.slane %v5655_v16, 4  ;;  %v5624_v28 = vadd.f32 %v11142_v14, %v5623_v52 }
0x1298   : > { %v8164_v39 = vpop.f32.mrf.mxu0 }
0x1299   : > { %v5657_v40 = vmax.f32 %v5655_v16, %v5656_v24  ;;  %v5654_v63 = vsel %vm10505_vm12, -1e+09, %v5624_v28 }
0x129a   : > { %v5662_v56 = vsel %vm1774_vm1, %v5654_v63, -inf  ;;  %v10554_v54 = vpop.f32.mrf.mxu0 }
0x129b   : > { %v5658_v23 = vrot.slane %v5657_v40, 2  ;;  %v5663_v34 = vrot.slane %v5662_v56, 4 }
0x129c   : > { %v6090_v47 = vpop.f32.mrf.mxu0 }
0x129d   : > { %v5659_v29 = vmax.f32 %v5657_v40, %v5658_v23  ;;  %v5664_v45 = vmax.f32 %v5662_v56, %v5663_v34  ;;  %v6125_v41 = vrot.slane %v6090_v47, %v8816_v11 }
0x129e   : > { %v6092_v12 = vpop.f32.mrf.mxu0 }
0x129f   : > { %v5660_v19 = vrot.slane %v5659_v29, 1  ;;  %v5665_v53 = vrot.slane %v5664_v45, 2  ;;  %v6126_v62 = vcombine.high %v6125_v41, %v6125_v41  ;;  %v6133_v50 = vrot.slane %v6125_v41, %v8816_v11 }
0x12a0   : > { %v6093_v37 = vpop.f32.mrf.mxu0 }
0x12a1   : > { %v5661_v18 = vmax.f32 %v5659_v29, %v5660_v19  ;;  %v5666_v43 = vmax.f32 %v5664_v45, %v5665_v53  ;;  %v6140_v38 = vrot.slane %v6126_v62, %v8816_v11  ;;  %v10560_v1 = vrot.slane %v6133_v50, %v8794_v7  ;;  %v6225_v19 = vpop.permute.xlu1 %6224  ;;  %v6229_v62 = vpop.permute.xlu0 %6228 }
0x12a2   : > { %v6102_v53 = vrot.slane %v10554_v54, %v8816_v11 }
0x12a3   : > { %v5669_v0 = vsub.f32 %v5653_v48, %v5661_v18  ;;  %v5667_v33 = vrot.slane %v5666_v43, 1  ;;  %v10563_v59 = vrot.slane %v6140_v38, %v8794_v7  ;;  %v6191_v51 = vmul.f32 %v6185_v61, %v10560_v1 }
0x12a4   : > { %v6161_v57 = vmul.f32 %v10560_v1, %v6144_v55  ;;  %v6211_v2 = vmul.f32 %v6205_v44, %v10560_v1  ;;  %v6110_v37 = vrot.slane %v6102_v53, %v8816_v11  ;;  %v6231_v44 = vmul.f32 %v6225_v19, %v10560_v1 }
0x12a5   : > { %v5671_v13 = vmul.f32 1.442695, %v5669_v0  ;;  %v5668_v6 = vmax.f32 %v5666_v43, %v5667_v33  ;;  %6195 = vrot.lane.b32.xlu0 %v6191_v51, %s11075_s21  ;;  %v6212_v58 = vmul.f32 %v6209_v10, %v10563_v59  ;;  %v6162_v46 = vmul.f32 %v10563_v59, %v6149_v26  ;;  %v5712_v50 = vpop.permute.xlu1 %5711  ;;  %v5709_v26 = vpop.permute.xlu0 %5708 }
0x12a6   : > { %6175 = vrot.lane.b32.xlu1 %v6161_v57, %s11074_s27  ;;  %v6192_v17 = vmul.f32 %v6189_v49, %v10563_v59  ;;  %v10587_v49 = vrot.slane %v6110_v37, %v8794_v7  ;;  %v6103_v43 = vcombine.high %v6102_v53, %v6102_v53  ;;  %vm5713_vm9 = vcmp.eq.s32.totalorder %v5709_v26, 1 }
0x12a7   : > { %8504 = vpow2.f32 %v5671_v13  ;;  %v5670_v36 = vsub.f32 %v5654_v63, %v5668_v6  ;;  %vm5714_vm10 = vcmp.eq.s32.totalorder %v5712_v50, 1 }
0x12a8   : > { %v6117_v51 = vrot.slane %v6103_v43, %v8816_v11  ;;  %v8571_v43 = vld [vmem:[%s10998_s5] ss:$0 sm:$0xff] }
0x12a9   : > { %v5673_v42 = vmul.f32 1.442695, %v5670_v36  ;;  %6217 = vrot.lane.b32.xlu0 %v6212_v58, %s11076_s0 }
0x12aa   : > { %6215 = vrot.lane.b32.xlu1 %v6211_v2, %s11076_s0  ;;  %v10592_v54 = vrot.slane %v6117_v51, %v8794_v7 }
0x12ab   : > { %8506 = vpow2.f32 %v5673_v42 }
0x12ae   : > { %6177 = vrot.lane.b32.xlu1 %v6162_v46, %s11074_s27  ;;  %v6232_v46 = vmul.f32 %v6229_v62, %v10563_v59 }
0x12b2   : > { %6197 = vrot.lane.b32.xlu1 %v6192_v17, %s11075_s21 }
0x12b4   : > { %v8505_v27 = vpop.eup %8504 }
0x12b5   : > { %v5675_v14 = vsel %vm1774_vm1, %v8505_v27, 0.0 }
0x12b6   : > { %v5676_v8 = vrot.slane %v5675_v14, 4 }
0x12b8   : > { %v8507_v32 = vpop.eup %8506  ;;  %v5677_v55 = vadd.f32 %v5676_v8, %v5675_v14 }
0x12b9   : > { %v5682_v48 = vsel %vm1774_vm1, %v8507_v32, 0.0 }
0x12ba   : > { %v5678_v16 = vrot.slane %v5677_v55, 2  ;;  %v5683_v52 = vrot.slane %v5682_v48, 4 }
0x12bc   : > { %v5679_v24 = vadd.f32 %v5678_v16, %v5677_v55  ;;  %v5684_v28 = vadd.f32 %v5683_v52, %v5682_v48 }
0x12be   : > { %v5680_v39 = vrot.slane %v5679_v24, 1  ;;  %v5685_v40 = vrot.slane %v5684_v28, 2 }
0x12c0   : > { %v5681_v63 = vadd.f32 %v5680_v39, %v5679_v24  ;;  %v5686_v56 = vadd.f32 %v5685_v40, %v5684_v28 }
0x12c2   : > { %v5687_v61 = vrot.slane %v5686_v56, 1  ;;  %8508 = vrcp.f32 %v5681_v63 }
0x12c4   : > { %v5688_v23 = vadd.f32 %v5687_v61, %v5686_v56 }
0x12c6   : > { %8510 = vrcp.f32 %v5688_v23  ;;  %v6380_v23 = vsel %vm2686_vm3, %v6376_v20, -inf }
0x12cf   : > { %v8509_v34 = vpop.eup %8508 }
0x12d0   : > { %v5691_v47 = vmul.f32 %v8509_v34, %v8505_v27 }
0x12d2   : > { %v5693_v29 = vmul.f32 %v5691_v47, %v10354_v21 }
0x12d3   : > { %v8511_v45 = vpop.eup %8510 }
0x12d4   : > { %5697 = vrot.lane.b32.xlu1 %v5693_v29, %s11075_s21  ;;  %v5692_v41 = vmul.f32 %v8511_v45, %v8507_v32 }
0x12d6   : > { %v5694_v12 = vmul.f32 %v5692_v41, %v10358_v3 }
0x12d8   : > { %5699 = vrot.lane.b32.xlu0 %v5694_v12, %s11075_s21 }
0x1317   : > { %v6196_v0 = vpop.permute.xlu0 %6195 }
0x1318   : > { %v6176_v18 = vpop.permute.xlu1 %6175 }
0x1319   : > { %v6181_v38 = vadd.f32 %v6176_v18, %v10587_v49 }
0x131b   : > { %v6201_v57 = vadd.f32 %v6196_v0, %v6181_v38  ;;  %v6218_v42 = vpop.permute.xlu0 %6217 }
0x131c   : > { %v6216_v33 = vpop.permute.xlu1 %6215 }
0x131d   : > { %v6221_v6 = vadd.f32 %v6216_v33, %v6201_v57 }
0x131f   : > { %v6233_v2 = vadd.f32 %v6231_v44, %v6221_v6 }
0x1320   : > { %v6178_v13 = vpop.permute.xlu1 %6177 }
0x1321   : > { %v6182_v10 = vadd.f32 %v6178_v13, %v10592_v54  ;;  %v6237_v27 = vmul.f32 0.01, %v6233_v2  ;;  %vm6235_vm6 = vcmp.ge.f32.partialorder %v6233_v2, 0.0 }
0x1323   : > { %v6239_v8 = vsel %vm6235_vm6, %v6233_v2, %v6237_v27 }
0x1324   : > { %v6198_v36 = vpop.permute.xlu1 %6197 }
0x1325   : > { %v6202_v58 = vadd.f32 %v6198_v36, %v6182_v10 }
0x1327   : > { %v6222_v17 = vadd.f32 %v6218_v42, %v6202_v58 }
0x1329   : > { %v6234_v14 = vadd.f32 %v6232_v46, %v6222_v17 }
0x132b   : > { %vm6236_vm11 = vcmp.ge.f32.partialorder %v6234_v14, 0.0  ;;  %v6238_v11 = vmul.f32 0.01, %v6234_v14 }
0x132d   : > { %v6240_v32 = vsel %vm6236_vm11, %v6234_v14, %v6238_v11 }
0x132e   : > { %v8376_v55 = vpack.i.bf16 %v6240_v32, %v6239_v8 }
0x1330   : > { %8377 = vrot.lane.b32.xlu0 %v8376_v55, %s11075_s21 }
0x1334   : > { %6306 = vrot.lane.b32.xlu0 %v10592_v54, %s11074_s27 }
0x1346   : > { %v5698_v1 = vpop.permute.xlu1 %5697 }
0x1347   : > { %v5703_v48 = vsub.f32 %v10378_v25, %v5698_v1 }
0x1349   : > { %v5705_v16 = vmax.f32 %v5703_v48, 0.0 }
0x134a   : > { %v5700_v52 = vpop.permute.xlu0 %5699 }
0x134b   : > { %v5704_v59 = vsub.f32 %v10383_v15, %v5700_v52  ;;  %v5715_v24 = vsel %vm5713_vm9, %v5705_v16, %v10378_v25 }
0x134c   : > { %v10607_v40 = vsel %vm5730_vm13, %v10354_v21, %v5715_v24 }
0x134d   : > { %v5706_v28 = vmax.f32 %v5704_v59, 0.0 }
0x134f   : > { %v5716_v39 = vsel %vm5714_vm10, %v5706_v28, %v10383_v15  ;;  %v6375_v15 = vand.u32 2147483647, %v10519_v9  ;;  %vm6669_vm10 = vcmask 1041408  }
0x1350   : > { %v10612_v63 = vsel %vm5731_vm0, %v10358_v3, %v5716_v39  ;;  %v6365_v3 = vand.u32 2147483647, %v10607_v40 }
0x1351   : > { %v8371_v56 = vpack.i.bf16 %v10612_v63, %v10607_v40  ;;  %v6366_v61 = vand.u32 2147483647, %v10612_v63  ;;  %v6377_v21 = vsel %vm2686_vm3, %v6375_v15, -inf }
0x1352   : > { %v6367_v60 = vsel %vm2675_vm14, %v6365_v3, -inf }
0x1353   : > { %8372 = vrot.lane.b32.xlu1 %v8371_v56, %s11075_s21  ;;  %v6370_v25 = vsel %vm2675_vm14, %v6366_v61, -inf }
0x1354   : > { %6371 = vmax.xlane.f32.xlu0 %v6370_v25 }
0x1357   : > { %6304 = vrot.lane.b32.xlu1 %v10587_v49, %s11074_s27  ;;  %s475_s27 = sand.u32 1, %s8627_s16  }
0x1358   : > { %6378 = vmax.xlane.f32.xlu0 %v6377_v21  ;;  %s10953_s29 = scalar_lea.sflag [#allocation4], %s475_s27 }
0x136e   : > { %6446 = vperm.xlu0 %8381, %v9192_v30   ;;  %v8572_v30 = vld [vmem:[%s11000_s7] ss:$0 sm:$0xff] }
0x1372   : > { %8384 = vset.pattern.permute.xlu0 %v11083_v35 }
0x137b   : > { %6368 = vmax.xlane.f32.xlu1 %v6367_v60 }
0x137f   : > { %6381 = vmax.xlane.f32.xlu1 %v6380_v23 }
0x1390   : > { %6449 = vperm.xlu1 %8382, %v9197_v31  }
0x13a2   : > { %v8378_v34 = vpop.permute.xlu0 %8377 }
0x13a3   : > { %v8380_v29 = vunpack.i.h.bf16 %v8378_v34  ;;  %v8379_v45 = vunpack.i.l.bf16 %v8378_v34 }
0x13a6   : > { %v6307_v0 = vpop.permute.xlu0 %6306 }
0x13c5   : > { %v8373_v47 = vpop.permute.xlu1 %8372 }
0x13c6   : > { %v8375_v41 = vunpack.i.h.bf16 %v8373_v47  ;;  %v8374_v12 = vunpack.i.l.bf16 %v8373_v47 }
0x13c8   : > { %v6258_v19 = vsel %vm1774_vm1, %v8375_v41, %v8380_v29  ;;  %v6257_v53 = vsel %vm1774_vm1, %v8374_v12, %v8379_v45 }
0x13c9   : > { %v6259_v62 = vpack.c.bf16 %v6258_v19, %v6257_v53  ;;  %v6305_v50 = vpop.permute.xlu1 %6304 }
0x13cb   : > { %8174 = vmatmul.mubr.msk.bf16.vlgmr.msra.gmra.mxu1 %vm1802_vm2, %v6259_v62  ;;  %vm6455_vm2 = vcmp.eq.s32.totalorder %v8789_v5, 7 }
0x13cc   : > { %6763 = vmatprep.mubr.bf16.mxu1 %v11083_v35  ;;  %vm6458_vm12 = vmand %vm2008_vm5, %vm6455_vm2 }
0x13cd   : > { %v6460_v58 = vsel %vm6458_vm12, 1, %v11083_v35  ;;  %vm6459_vm13 = vmand %vm2009_vm7, %vm6455_vm2 }
0x13ce   : > { %6463 = vperm.xlu1 %8382, %v6460_v58   ;;  %v6461_v42 = vsel %vm6459_vm13, 1, %v11083_v35  ;;  %v8654_v58 = vmov 1983009808  }
0x13d2   : > { %6466 = vperm.xlu1 %8382, %v6461_v42   ;;  %v6643_v42 = vunpack.c.l.s4 %v8654_v58 }
0x13dd   : > { %v6372_v46 = vpop.xlane.xlu0 %6371 }
0x13de   : > { %vm6374_vm7 = vcmp.eq.f32.partialorder %v6372_v46, 0.0 }
0x13e1   : > { %v6379_v27 = vpop.xlane.xlu0 %6378 }
0x13e2   : > { %vm6383_vm6 = vcmp.eq.f32.partialorder %v6379_v27, 0.0  ;;  %v6514_v27 = vld [vmem:[%s11002_s9] sm:$0xff] }
0x1404   : > { %v6369_v17 = vpop.xlane.xlu1 %6368 }
0x1405   : > { %vm6373_vm0 = vcmp.eq.f32.partialorder %v6369_v17, 0.0  ;;  %v6644_v17 = vunpack.c.0.s8 %v6643_v42  ;;  %v8420_v42 = vld [vmem:[%s11004_s11 + $0x70] sm:$0xff]  }
0x1406   : > { %vm6385_vm5 = vmand %vm6373_vm0, %vm6383_vm6 }
0x1408   : > { %v6382_v14 = vpop.xlane.xlu1 %6381 }
0x1409   : > { %vm6384_vm11 = vcmp.eq.f32.partialorder %v6382_v14, 0.0  ;;  %v6647_v14 = vsub.s32 %v6644_v17, %v8789_v5  ;;  %v8418_v17 = vld [vmem:[%s11004_s11 + $0xf8] sm:$0xff]  }
0x140a   : > { %vm6386_vm9 = vmand %vm6374_vm7, %vm6384_vm11 }
0x148b   : > { %v6297_v37 = vpop.f32.mrf.mxu1 }
0x148c   : > { %v6310_v26 = vadd.f32 %v6305_v50, %v6297_v37 }
0x148d   : > { %v8175_v18 = vpop.f32.mrf.mxu1 }
0x148e   : > { %v6312_v38 = vadd.f32 %v8571_v43, %v6310_v26 }
0x148f   : > { %v6300_v33 = vpop.f32.mrf.mxu1 }
0x1490   : > { %v6311_v51 = vadd.f32 %v6307_v0, %v6300_v33  ;;  %v6316_v13 = vmul.f32 0.01, %v6312_v38  ;;  %vm6314_vm15 = vcmp.ge.f32.partialorder %v6312_v38, 0.0 }
0x1491   : > { %v8176_v57 = vpop.f32.mrf.mxu1 }
0x1492   : > { %v6313_v6 = vadd.f32 %v8571_v43, %v6311_v51  ;;  %v6318_v10 = vsel %vm6314_vm15, %v6312_v38, %v6316_v13 }
0x1494   : > { %vm6315_vm4 = vcmp.ge.f32.partialorder %v6313_v6, 0.0  ;;  %v6317_v44 = vmul.f32 0.01, %v6313_v6 }
0x1496   : > { %v6319_v36 = vsel %vm6315_vm4, %v6313_v6, %v6317_v44 }
0x1497   : > { %v6320_v2 = vpack.c.bf16 %v6319_v36, %v6318_v10 }
0x1499   : > { %8182 = vmatmul.mubr.msk.bf16.vlgmr.msra.gmra.mxu0 %vm1774_vm1, %v6320_v2 }
0x149a   : > { %6720 = vmatprep.mubr.bf16.mxu0 %v11083_v35 }
0x1559   : > { %v6358_v11 = vpop.f32.mrf.mxu0 }
0x155a   : > { %v6359_v8 = vadd.f32 %v8572_v30, %v6358_v11  ;;  %v6641_v11 = vcombine.high %v6514_v27, %v6514_v27 }
0x155b   : > { %v8183_v32 = vpop.f32.mrf.mxu0 }
0x155c   : > { %v6391_v31 = vsel %vm6385_vm5, -1e+09, %v6359_v8  ;;  %v6655_v8 = vrot.slane %v6641_v11, %v6647_v14  ;;  %v8573_v32 = vld [vmem:[%s8813_s22] sm:$0xf]  ;;  %v8422_v11 = vld [vmem:[%s11004_s11 + $0xf0] sm:$0xff]  }
0x155d   : > { %v6393_v55 = vsel %vm1774_vm1, %v6391_v31, -inf  ;;  %v6361_v1 = vpop.f32.mrf.mxu0 }
0x155e   : > { %v6394_v48 = vrot.slane %v6393_v55, 4  ;;  %v6362_v16 = vadd.f32 %v8572_v30, %v6361_v1  ;;  %v6648_v30 = vrot.slane %v6514_v27, %v6647_v14  ;;  %v8421_v27 = vld [vmem:[%s11004_s11 + $0x30] sm:$0xff]   ;;  %v8424_v14 = vld [vmem:[%s11004_s11 + $0x68] sm:$0xff]  }
0x155f   : > { %v8184_v52 = vpop.f32.mrf.mxu0 }
0x1560   : > { %v6395_v59 = vmax.f32 %v6393_v55, %v6394_v48  ;;  %v6392_v24 = vsel %vm6386_vm9, -1e+09, %v6362_v16  ;;  %v6657_v55 = vcombine.high %v6655_v8, %v6655_v8  ;;  %v6671_v1 = vsel %vm6669_vm10, %v6648_v30, 0  ;;  %v8574_v16 = vld [vmem:[%s8813_s22 + $0x4] sm:$0xf]  ;;  %s7761_s22 = sshll.u32 %s475_s27, 1 }
0x1561   : > { %v6400_v28 = vsel %vm1774_vm1, %v6392_v24, -inf  ;;  %v6677_v48 = vsel %vm6669_vm10, %v6655_v8, 0  ;;  %v7830_v52 = vld.sshfl [vmem:[%s11002_s9 + $0x8] sm:$0x33 pattern:$0x76325410] }
0x1562   : > { %v6396_v39 = vrot.slane %v6395_v59, 2  ;;  %v6401_v56 = vrot.slane %v6400_v28, 4  ;;  %7833 = vmatprep.subr.msk.bf16.mxu1 %vm6669_vm10, %v6657_v55  ;;  %v8428_v8 = vld [vmem:[%s11004_s11 + $0x60] sm:$0xff]   ;;  %s477_s0 = scalar_lea.vmem [#allocation3], %s7761_s22 }
0x1563   : > { %6746 = vmatpush1.bf16.msra.mxu1 %v6677_v48  ;;  %v8429_v55 = vld [vmem:[%s11004_s11 + $0x20] sm:$0xff]  }
0x1564   : > { %v6397_v61 = vmax.f32 %v6395_v59, %v6396_v39  ;;  %v6402_v25 = vmax.f32 %v6400_v28, %v6401_v56  ;;  %v6665_v59 = vcombine.high %v7830_v52, %v7830_v52  ;;  %v8400_v28 = vld [vmem:[%s11001_s8 + $0x34] ss:$24 sps:$4 sm:$0xff]   ;;  %v6450_v39 = vpop.permute.xlu1 %6449  ;;  %v8430_v48 = vld [vmem:[%s11004_s11 + $0xe0] sm:$0xff]  }
0x1565   : > { %6895 = vmatprep.subr.bf16.mxu1 %v8400_v28  ;;  %vm6452_vm2 = vcmp.eq.s32.totalorder %v6450_v39, 1  ;;  %v8435_v28 = vld [vmem:[%s11004_s11 + $0x98] sm:$0xff]   ;;  %v8436_v39 = vld [vmem:[%s11004_s11 + $0x50] sm:$0xff]  }
0x1566   : > { %v6398_v15 = vrot.slane %v6397_v61, 1  ;;  %v6403_v21 = vrot.slane %v6402_v25, 2 }
0x1568   : > { %v6399_v3 = vmax.f32 %v6397_v61, %v6398_v15  ;;  %v6404_v60 = vmax.f32 %v6402_v25, %v6403_v21  ;;  %v6464_v56 = vpop.permute.xlu1 %6463  ;;  %v6447_v25 = vpop.permute.xlu0 %6446 }
0x1569   : > { %vm6451_vm15 = vcmp.eq.s32.totalorder %v6447_v25, 1  ;;  %vm6468_vm4 = vcmp.eq.s32.totalorder %v6464_v56, 1  ;;  %v8437_v56 = vld [vmem:[%s11004_s11 + $0x10] sm:$0xff]  }
0x156a   : > { %v6407_v20 = vsub.f32 %v6391_v31, %v6399_v3  ;;  %v6405_v23 = vrot.slane %v6404_v60, 1  ;;  %v6656_v31 = vcombine.high %v6648_v30, %v6648_v30  ;;  %v8425_v30 = vld [vmem:[%s11004_s11 + $0x28] sm:$0xff]   ;;  %v8439_v25 = vld [vmem:[%s11004_s11 + $0x90] sm:$0xff]  }
0x156c   : > { %v6409_v34 = vmul.f32 1.442695, %v6407_v20  ;;  %v6406_v47 = vmax.f32 %v6404_v60, %v6405_v23  ;;  %7831 = vmatprep.subr.msk.bf16.mxu0 %vm6669_vm10, %v6656_v31  ;;  %v6467_v61 = vpop.permute.xlu1 %6466  ;;  %v8426_v31 = vld [vmem:[%s11004_s11 + $0xe8] sm:$0xff]  }
0x156d   : > { %6703 = vmatpush1.bf16.msra.mxu0 %v6671_v1  ;;  %vm6469_vm12 = vcmp.eq.s32.totalorder %v6467_v61, 1  ;;  %v8427_v1 = vld [vmem:[%s11004_s11 + $0xa8] sm:$0xff]   ;;  %v8438_v61 = vld [vmem:[%s11004_s11 + $0xd0] sm:$0xff]  }
0x156e   : > { %8512 = vpow2.f32 %v6409_v34  ;;  %v6408_v29 = vsub.f32 %v6392_v24, %v6406_v47  ;;  %v6683_v24 = vsel %vm6669_vm10, %v7830_v52, 0  ;;  %7835 = vmatprep.subr.msk.bf16.mxu0 %vm6669_vm10, %v6665_v59  ;;  %v8432_v52 = vld [vmem:[%s11004_s11 + $0x58] sm:$0xff]  }
0x156f   : > { %v8433_v59 = vld [vmem:[%s11004_s11 + $0x18] sm:$0xff]  }
0x1570   : > { %v6411_v45 = vmul.f32 1.442695, %v6408_v29 }
0x1572   : > { %8514 = vpow2.f32 %v6411_v45 }
0x157b   : > { %v8513_v41 = vpop.eup %8512 }
0x157c   : > { %v6413_v12 = vsel %vm1774_vm1, %v8513_v41, 0.0 }
0x157d   : > { %v6414_v19 = vrot.slane %v6413_v12, 4 }
0x157f   : > { %v8515_v53 = vpop.eup %8514  ;;  %v6415_v62 = vadd.f32 %v6414_v19, %v6413_v12 }
0x1580   : > { %v6420_v50 = vsel %vm1774_vm1, %v8515_v53, 0.0 }
0x1581   : > { %v6416_v37 = vrot.slane %v6415_v62, 2  ;;  %v6421_v26 = vrot.slane %v6420_v50, 4 }
0x1583   : > { %v6417_v18 = vadd.f32 %v6416_v37, %v6415_v62  ;;  %v6422_v43 = vadd.f32 %v6421_v26, %v6420_v50 }
0x1585   : > { %v6418_v38 = vrot.slane %v6417_v18, 1  ;;  %v6423_v0 = vrot.slane %v6422_v43, 2 }
0x1587   : > { %v6419_v33 = vadd.f32 %v6418_v38, %v6417_v18  ;;  %v6424_v51 = vadd.f32 %v6423_v0, %v6422_v43  ;;  %v8398_v43 = vld [vmem:[%s11001_s8 + $0x30] ss:$24 sps:$4 sm:$0xff]   ;;  %v8403_v38 = vld [vmem:[%s11001_s8 + $0x3c] ss:$24 sps:$4 sm:$0xff]  }
0x1588   : > { %v8412_v0 = vld [vmem:[%s11001_s8 + $0x44] ss:$24 sps:$4 sm:$0xff]  }
0x1589   : > { %v6425_v57 = vrot.slane %v6424_v51, 1  ;;  %8516 = vrcp.f32 %v6419_v33  ;;  %v8401_v33 = vld [vmem:[%s11001_s8 + $0x38] ss:$24 sps:$4 sm:$0xff]  }
0x158b   : > { %v6426_v13 = vadd.f32 %v6425_v57, %v6424_v51  ;;  %v8409_v51 = vld [vmem:[%s11001_s8 + $0xc] ss:$24 sps:$4 sm:$0xff]   ;;  %v8407_v57 = vld [vmem:[%s11001_s8 + $0x8] ss:$24 sps:$4 sm:$0xff]  }
0x158d   : > { %8518 = vrcp.f32 %v6426_v13 }
0x1596   : > { %v8517_v6 = vpop.eup %8516 }
0x1597   : > { %v6429_v44 = vmul.f32 %v8517_v6, %v8513_v41 }
0x1599   : > { %v6431_v10 = vmul.f32 %v6429_v44, %v10587_v49  ;;  %v8416_v44 = vld [vmem:[%s11004_s11 + $0x78] sm:$0xff]  }
0x159a   : > { %v8519_v36 = vpop.eup %8518 }
0x159b   : > { %6435 = vrot.lane.b32.xlu1 %v6431_v10, %s11075_s21  ;;  %v6430_v2 = vmul.f32 %v8519_v36, %v8515_v53  ;;  %v8410_v10 = vld [vmem:[%s11001_s8 + $0x40] ss:$24 sps:$4 sm:$0xff]   ;;  %v8415_v36 = vld [vmem:[%s11001_s8 + $0x14] ss:$24 sps:$4 sm:$0xff]  }
0x159d   : > { %v6432_v46 = vmul.f32 %v6430_v2, %v10592_v54  ;;  %v8417_v2 = vld [vmem:[%s11004_s11 + $0x38] sm:$0xff]  }
0x159f   : > { %6437 = vrot.lane.b32.xlu1 %v6432_v46, %s11075_s21  ;;  %v8413_v46 = vld [vmem:[%s11001_s8 + $0x10] ss:$24 sps:$4 sm:$0xff]  }
0x15a3   : > { %6473 = vperm.xlu1 %8382, %v8573_v32   ;;  %v8423_v32 = vld [vmem:[%s11004_s11 + $0xb0] sm:$0xff]  }
0x15a7   : > { %6476 = vperm.xlu1 %8382, %v8574_v16   ;;  %v8431_v16 = vld [vmem:[%s11004_s11 + $0xa0] sm:$0xff]  }
0x15ab   : > { %8383 = vset.pattern.permute.xlu1 %v11083_v35 }
0x160d   : > { %v6436_v15 = vpop.permute.xlu1 %6435 }
0x160e   : > { %v6441_v21 = vsub.f32 %v10607_v40, %v6436_v15  ;;  %v8440_v15 = vld [vmem:[%s11004_s11 + $0x48] sm:$0xff]  }
0x1610   : > { %v6443_v3 = vmax.f32 %v6441_v21, 0.0  ;;  %v8441_v21 = vld [vmem:[%s11004_s11 + $0x8] sm:$0xff]  }
0x1611   : > { %v6438_v60 = vpop.permute.xlu1 %6437 }
0x1612   : > { %v6453_v20 = vsel %vm6451_vm15, %v6443_v3, %v10607_v40  ;;  %v6442_v23 = vsub.f32 %v10612_v63, %v6438_v60  ;;  %v8442_v3 = vld [vmem:[%s11004_s11 + $0xc8] sm:$0xff]  }
0x1613   : > { %v6470_v34 = vsel %vm6468_vm4, %v10587_v49, %v6453_v20  ;;  %v8443_v60 = vld [vmem:[%s11004_s11 + $0x88] sm:$0xff]   ;;  %v8444_v20 = vld [vmem:[%s11004_s11 + $0x40] sm:$0xff]  }
0x1614   : > { %v6444_v47 = vmax.f32 %v6442_v23, 0.0  ;;  %v6615_v29 = vand.u32 2147483647, %v6470_v34  ;;  %v8445_v23 = vld [vmem:[%s11004_s11] sm:$0xff]  }
0x1616   : > { %v6454_v45 = vsel %vm6452_vm2, %v6444_v47, %v10612_v63  ;;  %v6617_v41 = vsel %vm2675_vm14, %v6615_v29, -inf  ;;  %v8447_v47 = vld [vmem:[%s11004_s11 + $0x80] sm:$0xff]   ;;  %v8448_v29 = vld [vmem:[%s11004_s11 + $0x178] sm:$0xff]  }
0x1617   : > { %6618 = vmax.xlane.f32.xlu0 %v6617_v41  ;;  %v6471_v12 = vsel %vm6469_vm12, %v10592_v54, %v6454_v45  ;;  %v7916_v45 = vld [vmem:[%s11006_s13] ss:$0 sm:$0xff] }
0x1618   : > { %v6637_v19 = vpack.c.bf16 %v6471_v12, %v6470_v34  ;;  %v6616_v13 = vand.u32 2147483647, %v6471_v12  ;;  %v8446_v34 = vld [vmem:[%s11004_s11 + $0xc0] sm:$0xff]  }
0x1619   : > { %v7915_v41 = vld [vmem:[#allocation2] ss:$0 sm:$0xff] }
0x161a   : > { %6818 = vrot.lane.b32.xlu1 %v6637_v19, %s11075_s21  ;;  %v6620_v6 = vsel %vm2675_vm14, %v6616_v13, -inf  ;;  %s7686_s21 = sshll.u32 %s477_s0, 4  ;;  %s10951_s21 = int_to_ptr.vmem [resolvable:$true] %s7686_s21 }
0x161b   : > { %s8575_s19 = scalar_lea.vmem %s10951_s21, 32 }
0x161c   : > { %p8576_p11 = scmp.ne.s32.totalorder %s10951_s21, %s8575_s19 }
0x161e   : > { %v6474_v40 = vpop.permute.xlu1 %6473  ;;  %p8577_p12 = pnand %p8576_p11, %p8775_p5 }
0x161f   : > { %v6481_v53 = vrot.slane %v6474_v40, %v8977_v22 }
0x1620   : > { %p8578_p13 = pneg %p8577_p12 }
0x1621   : > { %v6500_v49 = vsel %vm6468_vm4, %v6481_v53, %v10519_v9  ;;  %v8406_v9 = vld [vmem:[%s11001_s8 + $0x4] ss:$24 sps:$4 sm:$0xff]  }
0x1622   : > { %v6477_v62 = vpop.permute.xlu1 %6476  ;;  %v6625_v50 = vand.u32 2147483647, %v6500_v49 }
0x1623   : > { %v6485_v37 = vrot.slane %v6477_v62, %v8977_v22 }
0x1624   : > { %v6627_v63 = vsel %vm2686_vm3, %v6625_v50, -inf }
0x1625   : > { %v6501_v26 = vsel %vm6469_vm12, %v6485_v37, %v10525_v4  ;;  %6628 = vmax.xlane.f32.xlu0 %v6627_v63  ;;  %v8404_v4 = vld [vmem:[%s11001_s8] ss:$24 sps:$4 sm:$0xff]  }
0x1626   : > { %v6638_v18 = vpack.c.bf16 %v6501_v26, %v6500_v49  ;;  %v6626_v54 = vand.u32 2147483647, %v6501_v26 }
0x1628   : > { %7832 = vmatmul.mubr.msk.bf16.vlgmr.msra.gmra.mxu0 %vm2686_vm3, %v6638_v18  ;;  %7834 = vmatmul.mubr.msk.bf16.vlgmr.msra.gmra.mxu1 %vm2686_vm3, %v6638_v18  ;;  %v6630_v22 = vsel %vm2686_vm3, %v6626_v54, -inf }
0x1629   : > { %6631 = vmax.xlane.f32.xlu0 %v6630_v22  ;;  %6789 = vmatpush1.bf16.msra.mxu0 %v6683_v24  ;;  %v8434_v24 = vld [vmem:[%s11004_s11 + $0xd8] sm:$0xff]  }
0x162a   : > { %6806 = vmatprep.mubr.bf16.mxu0 %v11083_v35  ;;  %6896 = vmatpush1.bf16.msra.mxu1 %v8398_v43 }
0x162b   : > { %6938 = vmatprep.subr.bf16.mxu0 %v8403_v38  ;;  %6897 = vmatprep.subr.bf16.mxu1 %v8406_v9  ;;  %v10842_v9 = vld [vmem:[%s11003_s10] sm:$0x3f] }
0x162c   : > { %6915 = vmatprep.mubr.bf16.mxu1 %v11083_v35 }
0x162e   : > { %6898 = vmatpush1.bf16.msra.mxu1 %v8404_v4 }
0x162f   : > { %6981 = vmatprep.subr.bf16.mxu1 %v8412_v0 }
0x1630   : > { %7836 = vmatmul.mubr.msk.bf16.vlgmr.msra.gmra.mxu0 %vm2686_vm3, %v6638_v18 }
0x1631   : > { %6939 = vmatpush1.bf16.msra.mxu0 %v8401_v33  ;;  %6958 = vmatprep.mubr.bf16.mxu0 %v11083_v35  ;;  %v7016_v33 = vrot.slane %v10842_v9, %v8794_v7  ;;  %v7035_v7 = vsub.s32 5, %v8789_v5 }
0x1632   : > { %6940 = vmatprep.subr.bf16.mxu0 %v8409_v51 }
0x1635   : > { %6941 = vmatpush1.bf16.msra.mxu0 %v8407_v57  ;;  %v11143_v57 = vld [vmem:[#allocation7_spill] sm:$0xff] }
0x1636   : > { %7979 = vmatprep.subr.bf16.mxu0 %v8416_v44  ;;  %v7020_v13 = vrot.slane %v10842_v9, %v11143_v57  ;;  %v8450_v57 = vld [vmem:[%s11004_s11 + $0x170] sm:$0xff]  }
0x163e   : > { %6621 = vmax.xlane.f32.xlu1 %v6620_v6 }
0x163f   : > { %7603 = vrot.lane.b32.xlu0 %v7916_v45, %s11070_s30  ;;  %s7922_s30 = sshll.u32 %s8758_s12, 5  ;;  %s8656_s12 = smov [#allocation3]  }
0x1640   : > { %s10949_s26 = scalar_lea.hbm %s11007_s14, %s7922_s30  ;;  %s8579_s28 = sshll.u32 %s8656_s12, 4  ;;  %s8580_s28 = int_to_ptr.vmem [resolvable:$false] %s8579_s28 }
0x1641   : > { %p8582_p0 = scmp.lt.s32.totalorder %s10951_s21, %s8580_s28 }
0x164f   : > { %7579 = vperm.xlu1 %8383, %v7915_v41  }
0x168c   : > { %v6819_v58 = vpop.permute.xlu1 %6818 }
0x168d   : > { %7849 = vmatmul.mubr.msk.bf16.vlgmr.msra.gmra.mxu1 %vm1774_vm1, %v6819_v58  ;;  %7850 = vmatmul.mubr.msk.bf16.vlgmr.msra.gmra.mxu0 %vm1774_vm1, %v6819_v58 }
0x168e   : > { %6982 = vmatpush1.bf16.msra.mxu1 %v8410_v10  ;;  %7001 = vmatprep.mubr.bf16.mxu1 %v11083_v35  ;;  %v8419_v35 = vld [vmem:[%s11004_s11 + $0xb8] sm:$0xff]  }
0x168f   : > { %6983 = vmatprep.subr.bf16.mxu1 %v8415_v36  ;;  %7980 = vmatpush3.bf16.msra.mxu0 %v8417_v2  ;;  %v11144_v36 = vld [vmem:[#allocation9_spill] sm:$0xff] }
0x1690   : > { %7981 = vmatprep.subr.bf16.mxu0 %v8420_v42  ;;  %v7028_v2 = vrot.slane %v10842_v9, %v11144_v36  ;;  %v8451_v36 = vld [vmem:[%s11004_s11 + $0x130] sm:$0xff]  }
0x1692   : > { %6984 = vmatpush1.bf16.msra.mxu1 %v8413_v46 }
0x1693   : > { %8001 = vmatprep.subr.bf16.mxu1 %v8418_v17  ;;  %7982 = vmatpush3.bf16.msra.mxu0 %v8421_v27 }
0x1694   : > { %7983 = vmatprep.subr.bf16.mxu0 %v8424_v14  ;;  %v11145_v14 = vld [vmem:[#allocation8_spill] sm:$0xff] }
0x1695   : > { %7851 = vmatmul.mubr.msk.bf16.vlgmr.msra.gmra.mxu1 %vm1774_vm1, %v6819_v58 }
0x1696   : > { %8002 = vmatpush3.bf16.msra.mxu1 %v8419_v35  ;;  %v7024_v35 = vrot.slane %v10842_v9, %v11145_v14  ;;  %v8455_v14 = vld [vmem:[%s11004_s11 + $0x120] sm:$0xff]  }
0x1697   : > { %8003 = vmatprep.subr.bf16.mxu1 %v8422_v11  ;;  %7984 = vmatpush3.bf16.msra.mxu0 %v8425_v30 }
0x1698   : > { %7985 = vmatprep.subr.bf16.mxu0 %v8428_v8 }
0x169a   : > { %8004 = vmatpush3.bf16.msra.mxu1 %v8423_v32 }
0x169b   : > { %8005 = vmatprep.subr.bf16.mxu1 %v8426_v31  ;;  %7986 = vmatpush3.bf16.msra.mxu0 %v8429_v55 }
0x169c   : > { %7987 = vmatprep.subr.bf16.mxu0 %v8432_v52 }
0x169e   : > { %8006 = vmatpush3.bf16.msra.mxu1 %v8427_v1 }
0x169f   : > { %8007 = vmatprep.subr.bf16.mxu1 %v8430_v48  ;;  %7988 = vmatpush3.bf16.msra.mxu0 %v8433_v59 }
0x16a0   : > { %7989 = vmatprep.subr.bf16.mxu0 %v8436_v39  ;;  %v6619_v18 = vpop.xlane.xlu0 %6618 }
0x16a1   : > { %vm6623_vm1 = vcmp.eq.f32.partialorder %v6619_v18, 0.0 }
0x16a2   : > { %8008 = vmatpush3.bf16.msra.mxu1 %v8431_v16 }
0x16a3   : > { %8009 = vmatprep.subr.bf16.mxu1 %v8434_v24  ;;  %7990 = vmatpush3.bf16.msra.mxu0 %v8437_v56 }
0x16a4   : > { %7991 = vmatprep.subr.bf16.mxu0 %v8440_v15 }
0x16a6   : > { %8010 = vmatpush3.bf16.msra.mxu1 %v8435_v28 }
0x16a7   : > { %8011 = vmatprep.subr.bf16.mxu1 %v8438_v61  ;;  %7992 = vmatpush3.bf16.msra.mxu0 %v8441_v21  ;;  %v7036_v21 = vrot.slane %v10842_v9, %v7035_v7  ;;  %v7031_v7 = vsub.s32 4, %v8789_v5  ;;  %v8459_v5 = vld [vmem:[%s11004_s11 + $0x110] sm:$0xff]  }
0x16a8   : > { %7993 = vmatprep.subr.bf16.mxu0 %v8444_v20 }
0x16aa   : > { %8012 = vmatpush3.bf16.msra.mxu1 %v8439_v25 }
0x16ab   : > { %8013 = vmatprep.subr.bf16.mxu1 %v8442_v3  ;;  %7994 = vmatpush3.bf16.msra.mxu0 %v8445_v23 }
0x16ac   : > { %8023 = vmatprep.subr.bf16.mxu0 %v8448_v29 }
0x16ae   : > { %8014 = vmatpush3.bf16.msra.mxu1 %v8443_v60  ;;  %v6629_v38 = vpop.xlane.xlu0 %6628 }
0x16af   : > { %8015 = vmatprep.subr.bf16.mxu1 %v8446_v34  ;;  %vm6633_vm3 = vcmp.eq.f32.partialorder %v6629_v38, 0.0 }
0x16b0   : > { %vm10862_vm9 = vmand %vm6623_vm1, %vm6633_vm3 }
0x16b1   : > { %vm7901_vm1 = vmneg %vm10862_vm9 }
0x16b2   : > { %8016 = vmatpush3.bf16.msra.mxu1 %v8447_v47  ;;  %v6632_v46 = vpop.xlane.xlu0 %6631 }
0x16b3   : > { %vm6634_vm14 = vcmp.eq.f32.partialorder %v6632_v46, 0.0 }
0x16c7   : > { %v6622_v17 = vpop.xlane.xlu1 %6621 }
0x16c8   : > { %vm6624_vm13 = vcmp.eq.f32.partialorder %v6622_v17, 0.0  ;;  %v8453_v17 = vld [vmem:[%s11004_s11 + $0x128] sm:$0xff]  }
0x16c9   : > { %vm10856_vm0 = vmand %vm6624_vm13, %vm6634_vm14 }
0x16ca   : > { %vm7900_vm4 = vmneg %vm10856_vm0 }
0x16cb   : > { %vm10881_vm3 = vmpackc.low %vm7900_vm4, %vm7901_vm1 }
0x16e8   : > { %v6722_v12 = vpop.f32.mrf.mxu0  ;;  %v6765_v49 = vpop.f32.mrf.mxu1 }
0x16ea   : > { %v6724_v19 = vpop.f32.mrf.mxu0  ;;  %v6767_v50 = vpop.f32.mrf.mxu1 }
0x16ec   : > { %v6726_v40 = vpop.f32.mrf.mxu0  ;;  %v6769_v63 = vpop.f32.mrf.mxu1 }
0x16ee   : > { %v6728_v53 = vpop.f32.mrf.mxu0  ;;  %v6771_v54 = vpop.f32.mrf.mxu1 }
0x16f0   : > { %v10833_v62 = vpop.f32.mrf.mxu0 }
0x16f2   : > { %v6810_v37 = vpop.f32.mrf.mxu0 }
0x16f4   : > { %v10835_v26 = vpop.f32.mrf.mxu0 }
0x16f6   : > { %v10837_v43 = vpop.f32.mrf.mxu0 }
0x174d   : > { %v6917_v22 = vpop.f32.mrf.mxu1  ;;  %v6960_v4 = vpop.f32.mrf.mxu0 }
0x174e   : > { %v6918_v0 = vadd.f32 %v6917_v22, %v6722_v12  ;;  %v6961_v27 = vadd.f32 %v6960_v4, %v6765_v49  ;;  %v8449_v22 = vld [vmem:[%s11004_s11 + $0x138] sm:$0xff]  }
0x174f   : > { %v6919_v51 = vpop.f32.mrf.mxu1  ;;  %v6962_v6 = vpop.f32.mrf.mxu0 }
0x1750   : > { %v6920_v44 = vadd.f32 %v6919_v51, %v6724_v19  ;;  %v6963_v10 = vadd.f32 %v6962_v6, %v6767_v50  ;;  %v7043_v11 = vadd.f32 %v7016_v33, %v6918_v0  ;;  %v7045_v61 = vadd.f32 %v7024_v35, %v6961_v27  ;;  %v8454_v27 = vld [vmem:[%s11004_s11 + $0x160] sm:$0xff]  }
0x1751   : > { %v6921_v58 = vpop.f32.mrf.mxu1  ;;  %v6964_v42 = vpop.f32.mrf.mxu0 }
0x1752   : > { %v7044_v30 = vadd.f32 %v7020_v13, %v6920_v44  ;;  %v6922_v8 = vadd.f32 %v6921_v58, %v6726_v40  ;;  %v6965_v32 = vadd.f32 %v6964_v42, %v6769_v63  ;;  %v7046_v16 = vadd.f32 %v7028_v2, %v6963_v10 }
0x1753   : > { %v6923_v31 = vpop.f32.mrf.mxu1  ;;  %v6966_v55 = vpop.f32.mrf.mxu0  ;;  %v7067_v56 = vmul.f32 0.01, %v7043_v11  ;;  %vm7055_vm6 = vcmp.ge.f32.partialorder %v7043_v11, 0.0  ;;  %v7069_v12 = vmul.f32 0.01, %v7045_v61  ;;  %vm7057_vm12 = vcmp.ge.f32.partialorder %v7045_v61, 0.0 }
0x1754   : > { %v6924_v1 = vadd.f32 %v6923_v31, %v6728_v53  ;;  %v6967_v48 = vadd.f32 %v6966_v55, %v6771_v54  ;;  %v7049_v59 = vadd.f32 %v7016_v33, %v6922_v8  ;;  %v7051_v24 = vadd.f32 %v7024_v35, %v6965_v32  ;;  %v8456_v35 = vld [vmem:[%s11004_s11 + $0x158] sm:$0xff]   ;;  %v8460_v55 = vld [vmem:[%s11004_s11 + $0x148] sm:$0xff]  }
0x1755   : > { %v10853_v52 = vpop.f32.mrf.mxu1  ;;  %v7068_v25 = vmul.f32 0.01, %v7044_v30  ;;  %vm7056_vm11 = vcmp.ge.f32.partialorder %v7044_v30, 0.0  ;;  %v7070_v45 = vmul.f32 0.01, %v7046_v16  ;;  %vm7058_vm2 = vcmp.ge.f32.partialorder %v7046_v16, 0.0 }
0x1756   : > { %v7050_v28 = vadd.f32 %v7020_v13, %v6924_v1  ;;  %v7052_v39 = vadd.f32 %v7028_v2, %v6967_v48  ;;  %vm7061_vm5 = vcmp.ge.f32.partialorder %v7049_v59, 0.0  ;;  %v7073_v60 = vmul.f32 0.01, %v7049_v59  ;;  %v8452_v2 = vld [vmem:[%s11004_s11 + $0x168] sm:$0xff]  }
0x1757   : > { %v7005_v15 = vpop.f32.mrf.mxu1  ;;  %v7075_v20 = vmul.f32 0.01, %v7051_v24  ;;  %vm7063_vm10 = vcmp.ge.f32.partialorder %v7051_v24, 0.0  ;;  %v7080_v49 = vsel %vm7056_vm11, %v7044_v30, %v7068_v25  ;;  %v7082_v51 = vsel %vm7058_vm2, %v7046_v16, %v7070_v45  ;;  %v8458_v30 = vld [vmem:[%s11004_s11 + $0x150] sm:$0xff]  }
0x1758   : > { %vm7062_vm7 = vcmp.ge.f32.partialorder %v7050_v28, 0.0  ;;  %v7074_v23 = vmul.f32 0.01, %v7050_v28  ;;  %v7076_v34 = vmul.f32 0.01, %v7052_v39  ;;  %vm7064_vm15 = vcmp.ge.f32.partialorder %v7052_v39, 0.0 }
0x1759   : > { %v7007_v47 = vpop.f32.mrf.mxu1  ;;  %v7006_v41 = vadd.f32 %v7005_v15, %v6810_v37  ;;  %v7085_v19 = vsel %vm7061_vm5, %v7049_v59, %v7073_v60  ;;  %v7079_v37 = vsel %vm7055_vm6, %v7043_v11, %v7067_v56  ;;  %v7087_v18 = vsel %vm7063_vm10, %v7051_v24, %v7075_v20  ;;  %v8457_v11 = vld [vmem:[%s11004_s11 + $0x118] sm:$0xff]  }
0x175a   : > { %v7086_v40 = vsel %vm7062_vm7, %v7050_v28, %v7074_v23  ;;  %v7088_v38 = vsel %vm7064_vm15, %v7052_v39, %v7076_v34  ;;  %v7081_v13 = vsel %vm7057_vm12, %v7045_v61, %v7069_v12  ;;  %v7008_v8 = vadd.f32 %v7007_v47, %v10835_v26  ;;  %v8461_v26 = vld [vmem:[%s11004_s11 + $0x108] sm:$0xff]  }
0x175b   : > { %v7009_v53 = vpop.f32.mrf.mxu1  ;;  %v7048_v50 = vadd.f32 %v7036_v21, %v7006_v41  ;;  %v7903_v54 = vpack.c.bf16 %v7086_v40, %v7080_v49  ;;  %v7145_v6 = vpack.c.bf16 %v7088_v38, %v7082_v51  ;;  %v7913_v44 = vpack.c.bf16 %v7087_v18, %v7081_v13  ;;  %v7604_v40 = vpop.permute.xlu0 %7603 }
0x175c   : > { %v7010_v63 = vadd.f32 %v7009_v53, %v10837_v43  ;;  %v7908_v43 = vpack.c.bf16 %v7085_v19, %v7079_v37  ;;  %v7004_v32 = vadd.f32 %v10853_v52, %v10833_v62  ;;  %v7032_v31 = vrot.slane %v10842_v9, %v7031_v7  ;;  %v8462_v62 = vld [vmem:[%s11004_s11 + $0x140] sm:$0xff]  }
0x175d   : > { %v7072_v0 = vmul.f32 0.01, %v7048_v50  ;;  %vm7060_vm14 = vcmp.ge.f32.partialorder %v7048_v50, 0.0  ;;  %7904 = vmatprep.mubr.msk.bf16.mxu0 %vm10881_vm3, %v7903_v54  ;;  %7509 = vmatprep.mubr.bf16.mxu1 %v7145_v6  ;;  %v8463_v52 = vld [vmem:[%s11004_s11 + $0x100] sm:$0xff]   ;;  %vm7636_vm5 = vcmask 97328  }
0x175e   : > { %v7054_v33 = vadd.f32 %v7036_v21, %v7010_v63  ;;  %7909 = vmatmul.mubr.msk.bf16.vlgmr.msra.gmra.mxu0 %vm10881_vm3, %v7908_v43  ;;  %7914 = vmatmul.mubr.msk.bf16.vlgmr.msra.gmra.mxu1 %vm10881_vm3, %v7913_v44  ;;  %v7053_v1 = vadd.f32 %v7032_v31, %v7008_v8  ;;  %v7047_v48 = vadd.f32 %v7032_v31, %v7004_v32 }
0x175f   : > { %8024 = vmatpush3.bf16.msra.mxu0 %v8449_v22  ;;  %v7084_v58 = vsel %vm7060_vm14, %v7048_v50, %v7072_v0 }
0x1760   : > { %vm7066_vm13 = vcmp.ge.f32.partialorder %v7054_v33, 0.0  ;;  %v7078_v10 = vmul.f32 0.01, %v7054_v33  ;;  %8025 = vmatprep.subr.bf16.mxu0 %v8450_v57  ;;  %v7077_v9 = vmul.f32 0.01, %v7053_v1  ;;  %vm7065_vm0 = vcmp.ge.f32.partialorder %v7053_v1, 0.0 }
0x1761   : > { %v7071_v16 = vmul.f32 0.01, %v7047_v48  ;;  %vm7059_vm6 = vcmp.ge.f32.partialorder %v7047_v48, 0.0 }
0x1762   : > { %v7090_v42 = vsel %vm7066_vm13, %v7054_v33, %v7078_v10  ;;  %v7089_v59 = vsel %vm7065_vm0, %v7053_v1, %v7077_v9 }
0x1763   : > { %v7147_v46 = vpack.c.bf16 %v7090_v42, %v7084_v58  ;;  %8026 = vmatpush3.bf16.msra.mxu0 %v8451_v36  ;;  %v7083_v24 = vsel %vm7059_vm6, %v7047_v48, %v7071_v16 }
0x1764   : > { %8027 = vmatprep.subr.bf16.mxu0 %v8452_v2  ;;  %v7146_v28 = vpack.c.bf16 %v7089_v59, %v7083_v24 }
0x1765   : > { %7550 = vmatprep.mubr.bf16.mxu0 %v7147_v46 }
0x1767   : > { %8028 = vmatpush3.bf16.msra.mxu0 %v8453_v17 }
0x1768   : > { %8029 = vmatprep.subr.bf16.mxu0 %v8454_v27 }
0x176b   : > { %8030 = vmatpush3.bf16.msra.mxu0 %v8455_v14 }
0x176c   : > { %8031 = vmatprep.subr.bf16.mxu0 %v8456_v35 }
0x176f   : > { %8032 = vmatpush3.bf16.msra.mxu0 %v8457_v11 }
0x1770   : > { %8033 = vmatprep.subr.bf16.mxu0 %v8458_v30 }
0x1773   : > { %8034 = vmatpush3.bf16.msra.mxu0 %v8459_v5 }
0x1774   : > { %8035 = vmatprep.subr.bf16.mxu0 %v8460_v55 }
0x1777   : > { %8036 = vmatpush3.bf16.msra.mxu0 %v8461_v26 }
0x1778   : > { %8037 = vmatprep.subr.bf16.mxu0 %v8462_v62 }
0x177b   : > { %8038 = vmatpush3.bf16.msra.mxu0 %v8463_v52 }
0x177e   : > { %7551 = vmatmul.mubr.bf16.vlgmr.msra.gmra.mxu0 %v7146_v28 }
0x181e   : > { %v7995_v39 = vpop.f32.mrf.mxu0  ;;  %v8017_v56 = vpop.f32.mrf.mxu1 }
0x1820   : > { %v7996_v61 = vpop.f32.mrf.mxu0  ;;  %v8018_v25 = vpop.f32.mrf.mxu1 }
0x1821   : > { %v7997_v60 = vadd.f32 %v7996_v61, %v7995_v39  ;;  %v8019_v20 = vadd.f32 %v8018_v25, %v8017_v56 }
0x1822   : > { %v7998_v15 = vpop.f32.mrf.mxu0  ;;  %v8020_v21 = vpop.f32.mrf.mxu1 }
0x1823   : > { %v7512_v29 = vadd.f32 %v8019_v20, %v7997_v60 }
0x1824   : > { %v7999_v3 = vpop.f32.mrf.mxu0  ;;  %v8021_v23 = vpop.f32.mrf.mxu1 }
0x1825   : > { %v8000_v45 = vadd.f32 %v7999_v3, %v7998_v15  ;;  %v8022_v41 = vadd.f32 %v8021_v23, %v8020_v21 }
0x1827   : > { %v7515_v50 = vadd.f32 %v8022_v41, %v8000_v45 }
0x183e   : > { %v8039_v34 = vpop.f32.mrf.mxu0 }
0x1840   : > { %v8040_v47 = vpop.f32.mrf.mxu0 }
0x1841   : > { %v8041_v12 = vadd.f32 %v8040_v47, %v8039_v34 }
0x1842   : > { %v8042_v19 = vpop.f32.mrf.mxu0 }
0x1843   : > { %v7553_v53 = vadd.f32 %v8041_v12, %v7512_v29  ;;  %v7580_v29 = vpop.permute.xlu1 %7579 }
0x1844   : > { %v8043_v49 = vpop.f32.mrf.mxu0 }
0x1845   : > { %v7606_v63 = vadd.f32 %v7604_v40, %v7553_v53  ;;  %v8044_v37 = vadd.f32 %v8043_v49, %v8042_v19  ;;  %v7559_v28 = vsel %vm1585_vm8, %v7553_v53, 0.0 }
0x1846   : > { %v7560_v39 = vrot.slane %v7559_v28, 4 }
0x1847   : > { %v7610_v18 = vmin.f32 %v7606_v63, 20.0  ;;  %v7556_v54 = vadd.f32 %v8044_v37, %v7515_v50  ;;  %vm7608_vm7 = vcmp.gt.f32.partialorder %v7606_v63, 20.0 }
0x1848   : > { %v7561_v61 = vadd.f32 %v7560_v39, %v7559_v28 }
0x1849   : > { %v7612_v38 = vmul.f32 1.442695, %v7610_v18  ;;  %v7607_v22 = vadd.f32 %v7604_v40, %v7556_v54  ;;  %v7566_v56 = vsel %vm1585_vm8, %v7556_v54, 0.0  ;;  %vm7669_vm8 = vcmask 40960  }
0x184a   : > { %v7567_v25 = vrot.slane %v7566_v56, 4  ;;  %v7562_v15 = vrot.slane %v7561_v61, 2 }
0x184b   : > { %8520 = vpow2.f32 %v7612_v38  ;;  %v7611_v4 = vmin.f32 %v7607_v22, 20.0  ;;  %vm7609_vm10 = vcmp.gt.f32.partialorder %v7607_v22, 20.0 }
0x184c   : > { %v7568_v21 = vadd.f32 %v7567_v25, %v7566_v56  ;;  %v7563_v60 = vadd.f32 %v7562_v15, %v7561_v61 }
0x184d   : > { %v7614_v43 = vmul.f32 1.442695, %v7611_v4 }
0x184e   : > { %v7569_v3 = vrot.slane %v7568_v21, 2  ;;  %v7564_v20 = vrot.slane %v7563_v60, 1 }
0x184f   : > { %8522 = vpow2.f32 %v7614_v43 }
0x1850   : > { %v7570_v23 = vadd.f32 %v7569_v3, %v7568_v21  ;;  %v7565_v34 = vadd.f32 %v7564_v20, %v7563_v60 }
0x1852   : > { %v7571_v47 = vrot.slane %v7570_v23, 1  ;;  %v7582_v41 = vadd.f32 %v7580_v29, %v7565_v34 }
0x1854   : > { %v7572_v45 = vadd.f32 %v7571_v47, %v7570_v23  ;;  %v7584_v19 = vsub.f32 0.0, %v7582_v41 }
0x1856   : > { %v7583_v12 = vadd.f32 %v7580_v29, %v7572_v45  ;;  %v7586_v53 = vmul.f32 1.442695, %v7584_v19 }
0x1858   : > { %v8521_v0 = vpop.eup %8520  ;;  %v7585_v40 = vsub.f32 0.0, %v7583_v12 }
0x1859   : > { %v7616_v33 = vadd.f32 1.0, %v8521_v0  ;;  %v7619_v13 = vmul.f32 -0.5, %v8521_v0  ;;  %v7622_v10 = vand.u32 2147483647, %v8521_v0 }
0x185a   : > { %v7588_v49 = vmul.f32 1.442695, %v7585_v40 }
0x185b   : > { %8524 = vlog2.f32 %v7616_v33  ;;  %v7620_v6 = vadd.f32 1.0, %v7619_v13  ;;  %vm7623_vm11 = vcmp.lt.f32.partialorder %v7622_v10, 0.0004427343 }
0x185c   : > { %v8523_v51 = vpop.eup %8522 }
0x185d   : > { %v7625_v57 = vadd.f32 1.0, %v8523_v51  ;;  %v7628_v44 = vmul.f32 -0.5, %v8523_v51  ;;  %v7621_v58 = vmul.f32 %v8521_v0, %v7620_v6  ;;  %v7631_v46 = vand.u32 2147483647, %v8523_v51 }
0x185f   : > { %8526 = vlog2.f32 %v7625_v57  ;;  %v7629_v42 = vadd.f32 1.0, %v7628_v44  ;;  %vm7632_vm9 = vcmp.lt.f32.partialorder %v7631_v46, 0.0004427343 }
0x1860   : > { %8528 = vpow2.f32 %v7586_v53 }
0x1861   : > { %v7630_v11 = vmul.f32 %v8523_v51, %v7629_v42  ;;  %8530 = vpow2.f32 %v7588_v49 }
0x1868   : > { %v8525_v36 = vpop.eup %8524 }
0x1869   : > { %v7618_v2 = vmul.f32 0.6931472, %v8525_v36 }
0x186b   : > { %v7624_v17 = vsel %vm7623_vm11, %v7621_v58, %v7618_v2 }
0x186c   : > { %v8527_v27 = vpop.eup %8526  ;;  %v7634_v14 = vsel %vm7608_vm7, %v7606_v63, %v7624_v17 }
0x186d   : > { %v7637_v35 = vsel %vm7636_vm5, %v7634_v14, -inf  ;;  %v7627_v7 = vmul.f32 0.6931472, %v8527_v27  ;;  %v8529_v50 = vpop.eup %8528 }
0x186e   : > { %v7638_v30 = vrot.slane %v7637_v35, 4  ;;  %v7590_v63 = vadd.f32 1.0, %v8529_v50  ;;  %v8531_v37 = vpop.eup %8530 }
0x186f   : > { %v7633_v8 = vsel %vm7632_vm9, %v7630_v11, %v7627_v7  ;;  %v7591_v18 = vadd.f32 1.0, %v8531_v37 }
0x1870   : > { %v7639_v32 = vmax.f32 %v7637_v35, %v7638_v30  ;;  %v7635_v31 = vsel %vm7609_vm10, %v7607_v22, %v7633_v8  ;;  %8532 = vrcp.f32 %v7590_v63 }
0x1871   : > { %v7644_v5 = vsel %vm7636_vm5, %v7635_v31, -inf  ;;  %8534 = vrcp.f32 %v7591_v18 }
0x1872   : > { %v7640_v55 = vrot.slane %v7639_v32, 2  ;;  %v7645_v1 = vrot.slane %v7644_v5, 4 }
0x1874   : > { %v7641_v48 = vmax.f32 %v7639_v32, %v7640_v55  ;;  %v7646_v26 = vmax.f32 %v7644_v5, %v7645_v1 }
0x1876   : > { %v7642_v62 = vrot.slane %v7641_v48, 1  ;;  %v7647_v9 = vrot.slane %v7646_v26, 2 }
0x1878   : > { %v7643_v16 = vmax.f32 %v7641_v48, %v7642_v62  ;;  %v7648_v52 = vmax.f32 %v7646_v26, %v7647_v9 }
0x187a   : > { %7653 = vrot.lane.b32.xlu1 %v7643_v16, %s8655_s2  ;;  %v7649_v59 = vrot.slane %v7648_v52, 1 }
0x187c   : > { %v7650_v24 = vmax.f32 %v7648_v52, %v7649_v59 }
0x187d   : > { %v8533_v54 = vpop.eup %8532 }
0x187e   : > { %7655 = vrot.lane.b32.xlu1 %v7650_v24, %s8655_s2  ;;  %v7596_v38 = vmax.f32 %v8533_v54, 1e-05  ;;  %v8535_v22 = vpop.eup %8534  ;;  %s8581_s2 = scalar_lea.vmem %s8580_s28, 64 }
0x187f   : > { %v7597_v43 = vmax.f32 %v8535_v22, 1e-05  ;;  %p8583_p1 = scmp.lt.s32.totalorder %s8581_s2, %s8575_s19 }
0x1880   : > { %v7661_v4 = vmul.f32 1.442695, %v7596_v38 }
0x1881   : > { %v7663_v0 = vmul.f32 1.442695, %v7597_v43  ;;  %p8584_p2 = por %p8583_p1, %p8582_p0 }
0x1882   : > { %8536 = vpow2.f32 %v7661_v4 }
0x1883   : > { %8538 = vpow2.f32 %v7663_v0  ;;  %p8585_p3 = pnand %p8584_p2, %p8578_p13 }
0x188f   : > { %v8537_v33 = vpop.eup %8536 }
0x1890   : > { %v7665_v13 = vmul.f32 0.1, %v8537_v33  ;;  %v8539_v6 = vpop.eup %8538 }
0x1891   : > { %v7666_v36 = vmul.f32 0.1, %v8539_v6 }
0x18ec   : > { %v7654_v51 = vpop.permute.xlu1 %7653 }
0x18ed   : > { %v7659_v57 = vmul.f32 %v7654_v51, %v7596_v38 }
0x18ef   : > { %v7667_v44 = vsub.f32 %v7659_v57, %v7665_v13 }
0x18f0   : > { %v7656_v10 = vpop.permute.xlu1 %7655 }
0x18f1   : > { %7670 = vst.msk [vmem:[%s477_s0] sm:$0x1] %vm7669_vm8, %v7667_v44  ;;  %v7660_v2 = vmul.f32 %v7656_v10, %v7597_v43 }
0x18f3   : > { %v7668_v58 = vsub.f32 %v7660_v2, %v7666_v36 }
0x18f5   : > { %7671 = vst.msk [vmem:[%s477_s0 + $0x1] sm:$0x1] %vm7669_vm8, %v7668_v58 }
0x18f6   : > { %8588 = shalt.err (!%p8585_p3)
}
0x18f7   : > { %s8589_s27 = scalar_lea.hbm %s10949_s26, 32  ;;  %s8593_s30 = scalar_lea.hbm %s11007_s14, 64 }
0x18f8   : > { %p8590_p4 = scmp.ne.s32.totalorder %s10949_s26, %s8589_s27  ;;  %p8594_p9 = scmp.lt.s32.totalorder %s10949_s26, %s11007_s14 }
0x18f9   : > { %p8595_p10 = scmp.lt.s32.totalorder %s8593_s30, %s8589_s27 }
0x18fa   : > { %p8591_p7 = pnand %p8590_p4, %p8775_p5 }
0x18fb   : > { %p8596_p11 = por %p8595_p10, %p8594_p9 }
0x18fc   : > { %p8592_p8 = pneg %p8591_p7 }
0x18fe   : > { %p8597_p12 = pnand %p8596_p11, %p8592_p8 }
0x1900   : > { %8600 = shalt.err (!%p8597_p12)
}
0x1901   : > { %s8657_s19 = smov 16   ;;  %s8658_s12 = smov 1  }
0x1902   : > { %8185 = dma.vmem_to_hbm [thread:$0]  (%p8775_p5), %s10951_s21, 32, %s10949_s26, %s10953_s29, %s8657_s19, %s8657_s19, %s8658_s12  }
0x1903 PF: > { %p8191_p13 = scmp.ge.s32.totalorder %s8635_s18, 2  ;;  %s7701_s28 = sand.u32 1, %s8623_s15  }
0x1904   : > { %s7702_s2 = scalar_lea.sflag [#allocation4], %s7701_s28 }
0x1905   : > { %p8188_p0 = pnand %p8191_p13, %p8779_p6 }
0x1907   : > { %p8189_p1 = pneg %p8188_p0 }
0x1909   : > { %8618 = dma.done.wait (%p8189_p1), %s7702_s2, 32  }
0x190a   : > { %8620 = vsyncadd (%p8189_p1), %s7702_s2, 4294967264  ;;  %s11152_s27 = sld [smem:[#allocation6_spill]]  ;;  %p26_p2 = scmp.ge.s32.totalorder %s8762_s20, 4  }
0x190b   : > { %s11153_s15 = smov %s8627_s16  ;;  %s11154_s16 = smov %s8631_s17 }
0x190c   : > { %s11156_s18 = smov %s8762_s20  ;;  %28 = sbr.rel (!%p26_p2) target bundleno = 7 (0x7), region = 114 }
0x1910   : > { %s11155_s17 = smov %s11152_s27 }
0x1911   :  { %7707 = vsyncpa [#allocation4], 1 }
0x1912   :  { %7709 = vsyncpa [#allocation4 + $0x1], 1 }

</bundles_post_ra>
